<compile_context>
chip_gen: v5e
topology: v5e:2x2
jax: 0.10.0
libtpu: 0.0.40
codegen_flags: <defaults>
</compile_context>

<pallas_src>
import functools

import jax
import jax.numpy as jnp
import numpy as np
from jax import lax
from jax.experimental import pallas as pl
from jax.experimental.pallas import tpu as pltpu

IMAGE_SIZE = 16   # small stand-in for the module's 150
EPS = 1e-5        # PyTorch BatchNorm eps


# ---------------------------------------------------------------------------
# Static model configuration
# ---------------------------------------------------------------------------
_CHANS = [(3, 32), (32, 32), (32, 64), (64, 64), (64, 128), (128, 128)]
_POOL_FLAGS = [False, True, False, True, False, True]  # 2nd conv of each block pools


def _layer_cfg(image_size):
    """Per conv layer: (H, W, Cin, Cout, pool) with H, W the layer INPUT size."""
    cfg = []
    h = w = image_size
    for (ci, co), p in zip(_CHANS, _POOL_FLAGS):
        cfg.append((h, w, ci, co, p))
        if p:
            h //= 2
            w //= 2
    return tuple(cfg), h, w


# ---------------------------------------------------------------------------
# Fused Pallas kernel
# ---------------------------------------------------------------------------
def _fused_forward_kernel(*refs, layers, guard, hf, wf):
    n_conv = len(layers)
    n_mask = sum(1 for l in layers if not l[4])

    i = 0
    x_ref = refs[i]; i += 1                       # (hw0_pad, 27) im2col input
    w0_ref = refs[i]; i += 1                      # (27, 32)
    w_refs = refs[i:i + n_conv - 1]; i += n_conv - 1   # (9, Cin, Cout) per layer 1..5
    b_refs = refs[i:i + n_conv]; i += n_conv      # (1, Cout) folded BN biases
    m_refs = refs[i:i + n_mask]; i += n_mask      # (hw_pad, 1) pad-column masks
    w1_ref, b1_ref, w2_ref, b2_ref = refs[i:i + 4]; i += 4
    o_ref = refs[i]; i += 1
    buf_a, buf_b = refs[i:i + 2]

    lanes = buf_a.shape[1]
    zg = jnp.zeros((guard, lanes), jnp.float32)

    # Top guard rows (read by dy=-1 taps) must be zero; stores never touch them.
    buf_a[pl.ds(0, guard), :] = zg
    buf_b[pl.ds(0, guard), :] = zg

    # ---- layer 0: host-packed im2col (K=27) -> one MXU matmul ----
    H, W, _, C0, _ = layers[0]
    wp = W + 1
    hwp = H * wp
    y = jnp.dot(x_ref[...], w0_ref[...], preferred_element_type=jnp.float32)
    y = jnp.maximum(y + b_refs[0][...], 0.0) * m_refs[0][...]   # zero the pad column
    cur = buf_a
    cur[pl.ds(guard, hwp), 0:C0] = y
    cur[pl.ds(guard + hwp, guard), :] = zg                      # bottom/shrink band

    mask_i = 1
    for li in range(1, n_conv):
        H, W, Cin, Cout, pool = layers[li]
        wp = W + 1
        hwp = H * wp
        other = buf_b if cur is buf_a else buf_a

        # 3x3 conv = 9 shifted-row matmuls; pad-column layout -> no column masks.
        acc = None
        for t in range(9):
            dy, dx = t // 3 - 1, t % 3 - 1
            xt = cur[pl.ds(guard + dy * wp + dx, hwp), 0:Cin]
            d = jnp.dot(xt, w_refs[li - 1][t], preferred_element_type=jnp.float32)
            acc = d if acc is None else acc + d
        y = jnp.maximum(acc + b_refs[li][...], 0.0)   # BN scale folded into weights

        if not pool:
            y = y * m_refs[mask_i][...]               # keep pad column zero
            mask_i += 1
            other[pl.ds(guard, hwp), 0:Cout] = y
            other[pl.ds(guard + hwp, guard), :] = zg  # shrink band below output
            cur = other
        else:
            # MaxPool2d(2,2): store conv output, then per pooled row take the max
            # of 4 stride-2 row views (pure VPU/loads, no selection matmuls).
            # Conv-out pad columns are garbage but never selected (only even,
            # in-bounds positions are read), so no masking is needed here.
            other[pl.ds(guard, hwp), 0:Cout] = y
            hq, wq = H // 2, W // 2
            wqp = wq + 1
            zrow = jnp.zeros((1, lanes), jnp.float32)
            for r in range(hq):
                base = guard + 2 * r * wp
                t00 = other[pl.ds(base, wq, stride=2), :]
                t01 = other[pl.ds(base + 1, wq, stride=2), :]
                t10 = other[pl.ds(base + wp, wq, stride=2), :]
                t11 = other[pl.ds(base + wp + 1, wq, stride=2), :]
                prow = jnp.maximum(jnp.maximum(t00, t01), jnp.maximum(t10, t11))
                ob = guard + r * wqp
                cur[pl.ds(ob, wq), :] = prow          # pooled rows (back into cur)
                cur[pl.ds(ob + wq, 1), :] = zrow      # pad column stays zero
            cur[pl.ds(guard + hq * wqp, guard), :] = zg   # shrink band
            # pooled result lives in `cur`; `other` holds the dead conv output

    # ---- FC head (flatten-free): per spatial row one K=c_final matmul into acc,
    #      then folded BatchNorm1d bias + ReLU, 512->1 as a lane reduction, sigmoid.
    c_final = layers[-1][3]
    wqp_f = wf + 1
    hacc = None
    for s in range(hf * wf):
        ii, jj = divmod(s, wf)
        row = guard + ii * wqp_f + jj
        a_row = cur[pl.ds(row, 1), 0:c_final]                       # (1, c_final)
        d = jnp.dot(a_row, w1_ref[pl.ds(s * c_final, c_final), :],
                    preferred_element_type=jnp.float32)             # (1, nh)
        hacc = d if hacc is None else hacc + d
    hfc = jnp.maximum(hacc + b1_ref[...], 0.0)
    z = jnp.sum(hfc * w2_ref[...], axis=-1, keepdims=True) + b2_ref[...]
    sig = 1.0 / (1.0 + jnp.exp(-z))
    o_ref[0] = jnp.broadcast_to(sig, (1, o_ref.shape[2]))


# ---------------------------------------------------------------------------
# Host-side helpers
# ---------------------------------------------------------------------------
def _full_spec(shape):
    nd = len(shape)
    return pl.BlockSpec(shape, lambda b, _nd=nd: (0,) * _nd)


def _pad_mask(h, w):
    """(h*(w+1), 1) mask: 1 on valid columns, 0 on the per-row pad column."""
    m = np.zeros((h, w + 1, 1), np.float32)
    m[:, :w, :] = 1.0
    return jnp.asarray(m.reshape(h * (w + 1), 1))


def _im2col_padcols(x_nchw):
    """Layer-0 im2col in the pad-column flat layout: (B*H*(W+1), 27)."""
    B, C, H, W = x_nchw.shape
    wp = W + 1
    xp = jnp.pad(x_nchw, ((0, 0), (0, 0), (1, 1), (1, 1)))
    taps = [xp[:, :, dy:dy + H, dx:dx + W] for dy in range(3) for dx in range(3)]
    cols = jnp.stack(taps, axis=-1)                  # (B, C, H, W, 9)
    cols = jnp.transpose(cols, (0, 2, 3, 4, 1))      # (B, H, W, 9, C) tap-major, cin-minor
    cols = cols.reshape(B, H, W, 9 * C)
    full = jnp.zeros((B, H, wp, 9 * C), x_nchw.dtype).at[:, :, :W, :].set(cols)
    return full.reshape(B * H * wp, 9 * C)


def meningioma_forward(x_nchw, params):
    """Fused Pallas implementation of MeningiomaModel.forward (eval mode). x: NCHW."""
    B, C, H, W = x_nchw.shape
    assert H == W and C == 3 and H % 8 == 0
    layers, hf, wf = _layer_cfg(H)
    c_final = layers[-1][3]
    hw_final = hf * wf

    max_wp = layers[0][1] + 1
    guard = ((max_wp + 1 + 7) // 8) * 8              # >= W+2 zero rows, multiple of 8
    hw_max = max(l[0] * (l[1] + 1) for l in layers)  # pad-column row count, layer 0
    seg = guard + hw_max + guard

    x_cols = _im2col_padcols(x_nchw)                 # (B*hw0_pad, 27)
    hwp0 = H * (W + 1)

    # Fold BatchNorm scale into conv weights (exact for inference).
    convs = params["convs"]
    folded = [p["w_hwio"] * p["scale"][None, None, None, :] for p in convs]
    w0 = folded[0].reshape(27, _CHANS[0][1])
    w_taps = [folded[i].reshape(9, _CHANS[i][0], _CHANS[i][1]) for i in range(1, 6)]
    biases = [p["bias"].reshape(1, -1) for p in convs]
    masks = [_pad_mask(l[0], l[1]) for l in layers if not l[4]]

    fc = params["fc"]
    nh = fc["w1"].shape[1]
    # Permute w1 rows: torch flatten order is (c, h, w); kernel order is (s, c).
    # Also fold the BatchNorm1d scale into w1.
    w1p = (fc["w1"].reshape(c_final, hw_final, nh)
           .transpose(1, 0, 2).reshape(c_final * hw_final, nh)) * fc["scale1"][None, :]
    b1 = fc["bias1"].reshape(1, nh)
    w2t = fc["w2"].reshape(nh, 1).T
    b2 = fc["b2"].reshape(1, 1)

    inputs = [x_cols, w0, *w_taps, *biases, *masks, w1p, b1, w2t, b2]
    in_specs = ([pl.BlockSpec((hwp0, 9 * C), lambda b: (b, 0))]
                + [_full_spec(tuple(a.shape)) for a in inputs[1:]])

    # Rough cost hint for the XLA scheduler.
    flops = 2 * hwp0 * 27 * _CHANS[0][1]
    for (lh, lw, ci, co, _) in layers[1:]:
        flops += 2 * lh * (lw + 1) * 9 * ci * co
    flops += 2 * hw_final * c_final * nh + 2 * nh
    flops *= B
    bytes_accessed = sum(int(np.prod(a.shape)) * a.dtype.itemsize for a in inputs) + B * 128 * 4

    kernel = functools.partial(_fused_forward_kernel, layers=layers, guard=guard,
                               hf=hf, wf=wf)

    out = pl.pallas_call(
        kernel,
        out_shape=jax.ShapeDtypeStruct((B, 1, 128), jnp.float32),
        grid=(B,),
        in_specs=in_specs,
        out_specs=pl.BlockSpec((1, 1, 128), lambda b: (b, 0, 0)),
        scratch_shapes=[pltpu.VMEM((seg, 128), jnp.float32),   # ping
                        pltpu.VMEM((seg, 128), jnp.float32)],  # pong
        compiler_params=pltpu.CompilerParams(dimension_semantics=("parallel",)),
        cost_estimate=pl.CostEstimate(flops=int(flops), transcendentals=int(B),
                                      bytes_accessed=int(bytes_accessed)),
    )(*inputs)
    return out[:, 0, 0:1]


# ---------------------------------------------------------------------------
# Parameters + pure-JAX reference (same folded-BN inference semantics)
# ---------------------------------------------------------------------------
def _fold_bn(conv_bias, gamma, beta, mean, var):
    s = gamma / jnp.sqrt(var + EPS)
    return s, (conv_bias - mean) * s + beta


def init_params(key):
    keys = iter(jax.random.split(key, 64))

    def conv_params(cin, cout):
        w = 0.05 * jax.random.normal(next(keys), (3, 3, cin, cout), jnp.float32)  # HWIO
        b = 0.05 * jax.random.normal(next(keys), (cout,), jnp.float32)
        gamma = 1.0 + 0.1 * jax.random.normal(next(keys), (cout,), jnp.float32)
        beta = 0.1 * jax.random.normal(next(keys), (cout,), jnp.float32)
        mean = 0.1 * jax.random.normal(next(keys), (cout,), jnp.float32)
        var = 1.0 + 0.1 * jnp.abs(jax.random.normal(next(keys), (cout,), jnp.float32))
        s, bb = _fold_bn(b, gamma, beta, mean, var)
        return {"w_hwio": w, "scale": s, "bias": bb}

    convs = [conv_params(ci, co) for ci, co in _CHANS]

    feat_dim = 128 * (IMAGE_SIZE // 8) ** 2
    w1 = 0.05 * jax.random.normal(next(keys), (feat_dim, 512), jnp.float32)
    b1 = 0.05 * jax.random.normal(next(keys), (512,), jnp.float32)
    gamma = 1.0 + 0.1 * jax.random.normal(next(keys), (512,), jnp.float32)
    beta = 0.1 * jax.random.normal(next(keys), (512,), jnp.float32)
    mean = 0.1 * jax.random.normal(next(keys), (512,), jnp.float32)
    var = 1.0 + 0.1 * jnp.abs(jax.random.normal(next(keys), (512,), jnp.float32))
    s1, bb1 = _fold_bn(b1, gamma, beta, mean, var)
    w2 = 0.05 * jax.random.normal(next(keys), (512, 1), jnp.float32)
    b2 = 0.05 * jax.random.normal(next(keys), (1,), jnp.float32)
    return {"convs": convs,
            "fc": {"w1": w1, "scale1": s1, "bias1": bb1, "w2": w2, "b2": b2}}


def reference_forward(x_nchw, params):
    x = jnp.transpose(x_nchw, (0, 2, 3, 1))
    for p, do_pool in zip(params["convs"], _POOL_FLAGS):
        y = lax.conv_general_dilated(x, p["w_hwio"], window_strides=(1, 1),
                                     padding="SAME",
                                     dimension_numbers=("NHWC", "HWIO", "NHWC"),
                                     precision=lax.Precision.HIGHEST)
        y = jnp.maximum(y * p["scale"] + p["bias"], 0.0)
        if do_pool:
            y = lax.reduce_window(y, -jnp.inf, lax.max,
                                  (1, 2, 2, 1), (1, 2, 2, 1), "VALID")
        x = y
    B, Ho, Wo, Cc = x.shape
    feat = jnp.transpose(x, (0, 3, 1, 2)).reshape(B, Cc * Ho * Wo)
    fc = params["fc"]
    h = jnp.maximum(jnp.dot(feat, fc["w1"], precision=lax.Precision.HIGHEST)
                    * fc["scale1"] + fc["bias1"], 0.0)
    z = jnp.dot(h, fc["w2"], precision=lax.Precision.HIGHEST) + fc["b2"]
    return 1.0 / (1.0 + jnp.exp(-z))


if __name__ == "__main__":
    key = jax.random.PRNGKey(0)
    pkey, xkey = jax.random.split(key)
    params = init_params(pkey)
    # NCHW input, like the PyTorch module (small shapes: batch=2, 3x16x16).
    x = jax.random.normal(xkey, (2, 3, IMAGE_SIZE, IMAGE_SIZE), jnp.float32)

    fwd = jax.jit(meningioma_forward)
    out = jax.block_until_ready(fwd(x, params))
    ref = jax.block_until_ready(reference_forward(x, params))

    assert out.shape == (2, 1), out.shape
    np.testing.assert_allclose(np.asarray(out), np.asarray(ref), rtol=5e-3, atol=5e-3)
    print("KERNEL_OK")
</pallas_src>

<mosaic_0001>
module attributes {stable_mosaic.version = 11 : i64} {
  func.func @_fused_forward_kernel(%arg0: i32, %arg1: memref<272x27xf32, #tpu.memory_space<vmem>>, %arg2: memref<27x32xf32, #tpu.memory_space<vmem>>, %arg3: memref<9x32x32xf32, #tpu.memory_space<vmem>>, %arg4: memref<9x32x64xf32, #tpu.memory_space<vmem>>, %arg5: memref<9x64x64xf32, #tpu.memory_space<vmem>>, %arg6: memref<9x64x128xf32, #tpu.memory_space<vmem>>, %arg7: memref<9x128x128xf32, #tpu.memory_space<vmem>>, %arg8: memref<1x32xf32, #tpu.memory_space<vmem>>, %arg9: memref<1x32xf32, #tpu.memory_space<vmem>>, %arg10: memref<1x64xf32, #tpu.memory_space<vmem>>, %arg11: memref<1x64xf32, #tpu.memory_space<vmem>>, %arg12: memref<1x128xf32, #tpu.memory_space<vmem>>, %arg13: memref<1x128xf32, #tpu.memory_space<vmem>>, %arg14: memref<272x1xf32, #tpu.memory_space<vmem>>, %arg15: memref<72x1xf32, #tpu.memory_space<vmem>>, %arg16: memref<20x1xf32, #tpu.memory_space<vmem>>, %arg17: memref<512x512xf32, #tpu.memory_space<vmem>>, %arg18: memref<1x512xf32, #tpu.memory_space<vmem>>, %arg19: memref<1x512xf32, #tpu.memory_space<vmem>>, %arg20: memref<1x1xf32, #tpu.memory_space<vmem>>, %arg21: memref<1x1x128xf32, #tpu.memory_space<vmem>>, %arg22: memref<320x128xf32, #tpu.memory_space<vmem>>, %arg23: memref<320x128xf32, #tpu.memory_space<vmem>>) attributes {dimension_semantics = [#tpu.dimension_semantics<parallel>], iteration_bounds = array<i64: 2>, scalar_prefetch = 0 : i64, scratch_operands = 2 : i64, tpu.core_type = #tpu.core_type<tc>, window_params = [{transform_indices = @transform_0, window_bounds = array<i64: 272, 27>}, {pipeline_mode = #tpu.pipeline_mode<synchronous>, transform_indices = @transform_1, window_bounds = array<i64: 27, 32>}, {pipeline_mode = #tpu.pipeline_mode<synchronous>, transform_indices = @transform_2, window_bounds = array<i64: 9, 32, 32>}, {pipeline_mode = #tpu.pipeline_mode<synchronous>, transform_indices = @transform_3, window_bounds = array<i64: 9, 32, 64>}, {pipeline_mode = #tpu.pipeline_mode<synchronous>, transform_indices = @transform_4, window_bounds = array<i64: 9, 64, 64>}, {pipeline_mode = #tpu.pipeline_mode<synchronous>, transform_indices = @transform_5, window_bounds = array<i64: 9, 64, 128>}, {pipeline_mode = #tpu.pipeline_mode<synchronous>, transform_indices = @transform_6, window_bounds = array<i64: 9, 128, 128>}, {pipeline_mode = #tpu.pipeline_mode<synchronous>, transform_indices = @transform_7, window_bounds = array<i64: 1, 32>}, {pipeline_mode = #tpu.pipeline_mode<synchronous>, transform_indices = @transform_8, window_bounds = array<i64: 1, 32>}, {pipeline_mode = #tpu.pipeline_mode<synchronous>, transform_indices = @transform_9, window_bounds = array<i64: 1, 64>}, {pipeline_mode = #tpu.pipeline_mode<synchronous>, transform_indices = @transform_10, window_bounds = array<i64: 1, 64>}, {pipeline_mode = #tpu.pipeline_mode<synchronous>, transform_indices = @transform_11, window_bounds = array<i64: 1, 128>}, {pipeline_mode = #tpu.pipeline_mode<synchronous>, transform_indices = @transform_12, window_bounds = array<i64: 1, 128>}, {pipeline_mode = #tpu.pipeline_mode<synchronous>, transform_indices = @transform_13, window_bounds = array<i64: 272, 1>}, {pipeline_mode = #tpu.pipeline_mode<synchronous>, transform_indices = @transform_14, window_bounds = array<i64: 72, 1>}, {pipeline_mode = #tpu.pipeline_mode<synchronous>, transform_indices = @transform_15, window_bounds = array<i64: 20, 1>}, {pipeline_mode = #tpu.pipeline_mode<synchronous>, transform_indices = @transform_16, window_bounds = array<i64: 512, 512>}, {pipeline_mode = #tpu.pipeline_mode<synchronous>, transform_indices = @transform_17, window_bounds = array<i64: 1, 512>}, {pipeline_mode = #tpu.pipeline_mode<synchronous>, transform_indices = @transform_18, window_bounds = array<i64: 1, 512>}, {pipeline_mode = #tpu.pipeline_mode<synchronous>, transform_indices = @transform_19, window_bounds = array<i64: 1, 1>}, {transform_indices = @transform_20, window_bounds = array<i64: 1, 1, 128>}]} {
    %cst = arith.constant 0.000000e+00 : f32
    %0 = vector.broadcast %cst : f32 to vector<24x128xf32>
    %c0 = arith.constant 0 : index
    %c0_0 = arith.constant 0 : index
    %1 = vector.load %arg22[%c0, %c0_0] : memref<320x128xf32, #tpu.memory_space<vmem>>, vector<24x128xf32>
    tpu.vector_store %arg22[%c0, %c0_0], %0 {strides = array<i32>} : memref<320x128xf32, #tpu.memory_space<vmem>>, vector<24x128xf32>,
    %c0_1 = arith.constant 0 : index
    %c0_2 = arith.constant 0 : index
    %2 = vector.load %arg23[%c0_1, %c0_2] : memref<320x128xf32, #tpu.memory_space<vmem>>, vector<24x128xf32>
    tpu.vector_store %arg23[%c0_1, %c0_2], %0 {strides = array<i32>} : memref<320x128xf32, #tpu.memory_space<vmem>>, vector<24x128xf32>,
    %c0_3 = arith.constant 0 : index
    %c0_4 = arith.constant 0 : index
    %3 = vector.load %arg1[%c0_3, %c0_4] : memref<272x27xf32, #tpu.memory_space<vmem>>, vector<272x27xf32>
    %c0_5 = arith.constant 0 : index
    %c0_6 = arith.constant 0 : index
    %4 = vector.load %arg2[%c0_5, %c0_6] : memref<27x32xf32, #tpu.memory_space<vmem>>, vector<27x32xf32>
    %cst_7 = arith.constant dense<0.000000e+00> : vector<272x32xf32>
    %5 = tpu.matmul %3, %4, %cst_7 {dimension_numbers = #tpu.dot_dimension_numbers<[1], [0], [0], [1], [0, 0, 1, 1], [], []>} : vector<272x27xf32>, vector<27x32xf32>, vector<272x32xf32> -> vector<272x32xf32>
    %c0_8 = arith.constant 0 : index
    %c0_9 = arith.constant 0 : index
    %6 = vector.load %arg8[%c0_8, %c0_9] : memref<1x32xf32, #tpu.memory_space<vmem>>, vector<1x32xf32>
    %7 = vector.broadcast %6 : vector<1x32xf32> to vector<272x32xf32>
    %8 = arith.addf %5, %7 : vector<272x32xf32>
    %cst_10 = arith.constant 0.000000e+00 : f32
    %9 = vector.broadcast %cst_10 : f32 to vector<272x32xf32>
    %10 = arith.maximumf %8, %9 : vector<272x32xf32>
    %c0_11 = arith.constant 0 : index
    %c0_12 = arith.constant 0 : index
    %11 = vector.load %arg14[%c0_11, %c0_12] : memref<272x1xf32, #tpu.memory_space<vmem>>, vector<272x1xf32>
    %12 = vector.broadcast %11 : vector<272x1xf32> to vector<272x32xf32>
    %13 = arith.mulf %10, %12 : vector<272x32xf32>
    %c24 = arith.constant 24 : index
    %c0_13 = arith.constant 0 : index
    %14 = vector.load %arg22[%c24, %c0_13] : memref<320x128xf32, #tpu.memory_space<vmem>>, vector<272x32xf32>
    tpu.vector_store %arg22[%c24, %c0_13], %13 {strides = array<i32>} : memref<320x128xf32, #tpu.memory_space<vmem>>, vector<272x32xf32>,
    %c296 = arith.constant 296 : index
    %c0_14 = arith.constant 0 : index
    %15 = vector.load %arg22[%c296, %c0_14] : memref<320x128xf32, #tpu.memory_space<vmem>>, vector<24x128xf32>
    tpu.vector_store %arg22[%c296, %c0_14], %0 {strides = array<i32>} : memref<320x128xf32, #tpu.memory_space<vmem>>, vector<24x128xf32>,
    %c6 = arith.constant 6 : index
    %c0_15 = arith.constant 0 : index
    %16 = vector.load %arg22[%c6, %c0_15] : memref<320x128xf32, #tpu.memory_space<vmem>>, vector<272x32xf32>
    %c0_16 = arith.constant 0 : index
    %c0_17 = arith.constant 0 : index
    %c0_18 = arith.constant 0 : index
    %17 = vector.load %arg3[%c0_16, %c0_17, %c0_18] : memref<9x32x32xf32, #tpu.memory_space<vmem>>, vector<1x32x32xf32>
    %18 = vector.shape_cast %17 : vector<1x32x32xf32> to vector<32x32xf32>
    %cst_19 = arith.constant dense<0.000000e+00> : vector<272x32xf32>
    %19 = tpu.matmul %16, %18, %cst_19 {dimension_numbers = #tpu.dot_dimension_numbers<[1], [0], [0], [1], [0, 0, 1, 1], [], []>} : vector<272x32xf32>, vector<32x32xf32>, vector<272x32xf32> -> vector<272x32xf32>
    %c7 = arith.constant 7 : index
    %c0_20 = arith.constant 0 : index
    %20 = vector.load %arg22[%c7, %c0_20] : memref<320x128xf32, #tpu.memory_space<vmem>>, vector<272x32xf32>
    %c1 = arith.constant 1 : index
    %c0_21 = arith.constant 0 : index
    %c0_22 = arith.constant 0 : index
    %21 = vector.load %arg3[%c1, %c0_21, %c0_22] : memref<9x32x32xf32, #tpu.memory_space<vmem>>, vector<1x32x32xf32>
    %22 = vector.shape_cast %21 : vector<1x32x32xf32> to vector<32x32xf32>
    %cst_23 = arith.constant dense<0.000000e+00> : vector<272x32xf32>
    %23 = tpu.matmul %20, %22, %cst_23 {dimension_numbers = #tpu.dot_dimension_numbers<[1], [0], [0], [1], [0, 0, 1, 1], [], []>} : vector<272x32xf32>, vector<32x32xf32>, vector<272x32xf32> -> vector<272x32xf32>
    %24 = arith.addf %19, %23 : vector<272x32xf32>
    %c8 = arith.constant 8 : index
    %c0_24 = arith.constant 0 : index
    %25 = vector.load %arg22[%c8, %c0_24] : memref<320x128xf32, #tpu.memory_space<vmem>>, vector<272x32xf32>
    %c2 = arith.constant 2 : index
    %c0_25 = arith.constant 0 : index
    %c0_26 = arith.constant 0 : index
    %26 = vector.load %arg3[%c2, %c0_25, %c0_26] : memref<9x32x32xf32, #tpu.memory_space<vmem>>, vector<1x32x32xf32>
    %27 = vector.shape_cast %26 : vector<1x32x32xf32> to vector<32x32xf32>
    %cst_27 = arith.constant dense<0.000000e+00> : vector<272x32xf32>
    %28 = tpu.matmul %25, %27, %cst_27 {dimension_numbers = #tpu.dot_dimension_numbers<[1], [0], [0], [1], [0, 0, 1, 1], [], []>} : vector<272x32xf32>, vector<32x32xf32>, vector<272x32xf32> -> vector<272x32xf32>
    %29 = arith.addf %24, %28 : vector<272x32xf32>
    %c23 = arith.constant 23 : index
    %c0_28 = arith.constant 0 : index
    %30 = vector.load %arg22[%c23, %c0_28] : memref<320x128xf32, #tpu.memory_space<vmem>>, vector<272x32xf32>
    %c3 = arith.constant 3 : index
    %c0_29 = arith.constant 0 : index
    %c0_30 = arith.constant 0 : index
    %31 = vector.load %arg3[%c3, %c0_29, %c0_30] : memref<9x32x32xf32, #tpu.memory_space<vmem>>, vector<1x32x32xf32>
    %32 = vector.shape_cast %31 : vector<1x32x32xf32> to vector<32x32xf32>
    %cst_31 = arith.constant dense<0.000000e+00> : vector<272x32xf32>
    %33 = tpu.matmul %30, %32, %cst_31 {dimension_numbers = #tpu.dot_dimension_numbers<[1], [0], [0], [1], [0, 0, 1, 1], [], []>} : vector<272x32xf32>, vector<32x32xf32>, vector<272x32xf32> -> vector<272x32xf32>
    %34 = arith.addf %29, %33 : vector<272x32xf32>
    %c24_32 = arith.constant 24 : index
    %c0_33 = arith.constant 0 : index
    %35 = vector.load %arg22[%c24_32, %c0_33] : memref<320x128xf32, #tpu.memory_space<vmem>>, vector<272x32xf32>
    %c4 = arith.constant 4 : index
    %c0_34 = arith.constant 0 : index
    %c0_35 = arith.constant 0 : index
    %36 = vector.load %arg3[%c4, %c0_34, %c0_35] : memref<9x32x32xf32, #tpu.memory_space<vmem>>, vector<1x32x32xf32>
    %37 = vector.shape_cast %36 : vector<1x32x32xf32> to vector<32x32xf32>
    %cst_36 = arith.constant dense<0.000000e+00> : vector<272x32xf32>
    %38 = tpu.matmul %35, %37, %cst_36 {dimension_numbers = #tpu.dot_dimension_numbers<[1], [0], [0], [1], [0, 0, 1, 1], [], []>} : vector<272x32xf32>, vector<32x32xf32>, vector<272x32xf32> -> vector<272x32xf32>
    %39 = arith.addf %34, %38 : vector<272x32xf32>
    %c25 = arith.constant 25 : index
    %c0_37 = arith.constant 0 : index
    %40 = vector.load %arg22[%c25, %c0_37] : memref<320x128xf32, #tpu.memory_space<vmem>>, vector<272x32xf32>
    %c5 = arith.constant 5 : index
    %c0_38 = arith.constant 0 : index
    %c0_39 = arith.constant 0 : index
    %41 = vector.load %arg3[%c5, %c0_38, %c0_39] : memref<9x32x32xf32, #tpu.memory_space<vmem>>, vector<1x32x32xf32>
    %42 = vector.shape_cast %41 : vector<1x32x32xf32> to vector<32x32xf32>
    %cst_40 = arith.constant dense<0.000000e+00> : vector<272x32xf32>
    %43 = tpu.matmul %40, %42, %cst_40 {dimension_numbers = #tpu.dot_dimension_numbers<[1], [0], [0], [1], [0, 0, 1, 1], [], []>} : vector<272x32xf32>, vector<32x32xf32>, vector<272x32xf32> -> vector<272x32xf32>
    %44 = arith.addf %39, %43 : vector<272x32xf32>
    %c40 = arith.constant 40 : index
    %c0_41 = arith.constant 0 : index
    %45 = vector.load %arg22[%c40, %c0_41] : memref<320x128xf32, #tpu.memory_space<vmem>>, vector<272x32xf32>
    %c6_42 = arith.constant 6 : index
    %c0_43 = arith.constant 0 : index
    %c0_44 = arith.constant 0 : index
    %46 = vector.load %arg3[%c6_42, %c0_43, %c0_44] : memref<9x32x32xf32, #tpu.memory_space<vmem>>, vector<1x32x32xf32>
    %47 = vector.shape_cast %46 : vector<1x32x32xf32> to vector<32x32xf32>
    %cst_45 = arith.constant dense<0.000000e+00> : vector<272x32xf32>
    %48 = tpu.matmul %45, %47, %cst_45 {dimension_numbers = #tpu.dot_dimension_numbers<[1], [0], [0], [1], [0, 0, 1, 1], [], []>} : vector<272x32xf32>, vector<32x32xf32>, vector<272x32xf32> -> vector<272x32xf32>
    %49 = arith.addf %44, %48 : vector<272x32xf32>
    %c41 = arith.constant 41 : index
    %c0_46 = arith.constant 0 : index
    %50 = vector.load %arg22[%c41, %c0_46] : memref<320x128xf32, #tpu.memory_space<vmem>>, vector<272x32xf32>
    %c7_47 = arith.constant 7 : index
    %c0_48 = arith.constant 0 : index
    %c0_49 = arith.constant 0 : index
    %51 = vector.load %arg3[%c7_47, %c0_48, %c0_49] : memref<9x32x32xf32, #tpu.memory_space<vmem>>, vector<1x32x32xf32>
    %52 = vector.shape_cast %51 : vector<1x32x32xf32> to vector<32x32xf32>
    %cst_50 = arith.constant dense<0.000000e+00> : vector<272x32xf32>
    %53 = tpu.matmul %50, %52, %cst_50 {dimension_numbers = #tpu.dot_dimension_numbers<[1], [0], [0], [1], [0, 0, 1, 1], [], []>} : vector<272x32xf32>, vector<32x32xf32>, vector<272x32xf32> -> vector<272x32xf32>
    %54 = arith.addf %49, %53 : vector<272x32xf32>
    %c42 = arith.constant 42 : index
    %c0_51 = arith.constant 0 : index
    %55 = vector.load %arg22[%c42, %c0_51] : memref<320x128xf32, #tpu.memory_space<vmem>>, vector<272x32xf32>
    %c8_52 = arith.constant 8 : index
    %c0_53 = arith.constant 0 : index
    %c0_54 = arith.constant 0 : index
    %56 = vector.load %arg3[%c8_52, %c0_53, %c0_54] : memref<9x32x32xf32, #tpu.memory_space<vmem>>, vector<1x32x32xf32>
    %57 = vector.shape_cast %56 : vector<1x32x32xf32> to vector<32x32xf32>
    %cst_55 = arith.constant dense<0.000000e+00> : vector<272x32xf32>
    %58 = tpu.matmul %55, %57, %cst_55 {dimension_numbers = #tpu.dot_dimension_numbers<[1], [0], [0], [1], [0, 0, 1, 1], [], []>} : vector<272x32xf32>, vector<32x32xf32>, vector<272x32xf32> -> vector<272x32xf32>
    %59 = arith.addf %54, %58 : vector<272x32xf32>
    %c0_56 = arith.constant 0 : index
    %c0_57 = arith.constant 0 : index
    %60 = vector.load %arg9[%c0_56, %c0_57] : memref<1x32xf32, #tpu.memory_space<vmem>>, vector<1x32xf32>
    %61 = vector.broadcast %60 : vector<1x32xf32> to vector<272x32xf32>
    %62 = arith.addf %59, %61 : vector<272x32xf32>
    %cst_58 = arith.constant 0.000000e+00 : f32
    %63 = vector.broadcast %cst_58 : f32 to vector<272x32xf32>
    %64 = arith.maximumf %62, %63 : vector<272x32xf32>
    %c24_59 = arith.constant 24 : index
    %c0_60 = arith.constant 0 : index
    %65 = vector.load %arg23[%c24_59, %c0_60] : memref<320x128xf32, #tpu.memory_space<vmem>>, vector<272x32xf32>
    tpu.vector_store %arg23[%c24_59, %c0_60], %64 {strides = array<i32>} : memref<320x128xf32, #tpu.memory_space<vmem>>, vector<272x32xf32>,
    %cst_61 = arith.constant 0.000000e+00 : f32
    %66 = vector.broadcast %cst_61 : f32 to vector<1x128xf32>
    %c24_62 = arith.constant 24 : index
    %c0_63 = arith.constant 0 : index
    %67 = tpu.strided_load %arg23[%c24_62, %c0_63] {strides = array<i32: 2, 1>} : memref<320x128xf32, #tpu.memory_space<vmem>>, vector<8x128xf32>
    %c25_64 = arith.constant 25 : index
    %c0_65 = arith.constant 0 : index
    %68 = tpu.strided_load %arg23[%c25_64, %c0_65] {strides = array<i32: 2, 1>} : memref<320x128xf32, #tpu.memory_space<vmem>>, vector<8x128xf32>
    %c41_66 = arith.constant 41 : index
    %c0_67 = arith.constant 0 : index
    %69 = tpu.strided_load %arg23[%c41_66, %c0_67] {strides = array<i32: 2, 1>} : memref<320x128xf32, #tpu.memory_space<vmem>>, vector<8x128xf32>
    %c42_68 = arith.constant 42 : index
    %c0_69 = arith.constant 0 : index
    %70 = tpu.strided_load %arg23[%c42_68, %c0_69] {strides = array<i32: 2, 1>} : memref<320x128xf32, #tpu.memory_space<vmem>>, vector<8x128xf32>
    %71 = arith.maximumf %67, %68 : vector<8x128xf32>
    %72 = arith.maximumf %69, %70 : vector<8x128xf32>
    %73 = arith.maximumf %71, %72 : vector<8x128xf32>
    %c24_70 = arith.constant 24 : index
    %c0_71 = arith.constant 0 : index
    %74 = vector.load %arg22[%c24_70, %c0_71] : memref<320x128xf32, #tpu.memory_space<vmem>>, vector<8x128xf32>
    tpu.vector_store %arg22[%c24_70, %c0_71], %73 {strides = array<i32>} : memref<320x128xf32, #tpu.memory_space<vmem>>, vector<8x128xf32>,
    %c32 = arith.constant 32 : index
    %c0_72 = arith.constant 0 : index
    %75 = vector.load %arg22[%c32, %c0_72] : memref<320x128xf32, #tpu.memory_space<vmem>>, vector<1x128xf32>
    tpu.vector_store %arg22[%c32, %c0_72], %66 {strides = array<i32>} : memref<320x128xf32, #tpu.memory_space<vmem>>, vector<1x128xf32>,
    %c58 = arith.constant 58 : index
    %c0_73 = arith.constant 0 : index
    %76 = tpu.strided_load %arg23[%c58, %c0_73] {strides = array<i32: 2, 1>} : memref<320x128xf32, #tpu.memory_space<vmem>>, vector<8x128xf32>
    %c59 = arith.constant 59 : index
    %c0_74 = arith.constant 0 : index
    %77 = tpu.strided_load %arg23[%c59, %c0_74] {strides = array<i32: 2, 1>} : memref<320x128xf32, #tpu.memory_space<vmem>>, vector<8x128xf32>
    %c75 = arith.constant 75 : index
    %c0_75 = arith.constant 0 : index
    %78 = tpu.strided_load %arg23[%c75, %c0_75] {strides = array<i32: 2, 1>} : memref<320x128xf32, #tpu.memory_space<vmem>>, vector<8x128xf32>
    %c76 = arith.constant 76 : index
    %c0_76 = arith.constant 0 : index
    %79 = tpu.strided_load %arg23[%c76, %c0_76] {strides = array<i32: 2, 1>} : memref<320x128xf32, #tpu.memory_space<vmem>>, vector<8x128xf32>
    %80 = arith.maximumf %76, %77 : vector<8x128xf32>
    %81 = arith.maximumf %78, %79 : vector<8x128xf32>
    %82 = arith.maximumf %80, %81 : vector<8x128xf32>
    %c33 = arith.constant 33 : index
    %c0_77 = arith.constant 0 : index
    %83 = vector.load %arg22[%c33, %c0_77] : memref<320x128xf32, #tpu.memory_space<vmem>>, vector<8x128xf32>
    tpu.vector_store %arg22[%c33, %c0_77], %82 {strides = array<i32>} : memref<320x128xf32, #tpu.memory_space<vmem>>, vector<8x128xf32>,
    %c41_78 = arith.constant 41 : index
    %c0_79 = arith.constant 0 : index
    %84 = vector.load %arg22[%c41_78, %c0_79] : memref<320x128xf32, #tpu.memory_space<vmem>>, vector<1x128xf32>
    tpu.vector_store %arg22[%c41_78, %c0_79], %66 {strides = array<i32>} : memref<320x128xf32, #tpu.memory_space<vmem>>, vector<1x128xf32>,
    %c92 = arith.constant 92 : index
    %c0_80 = arith.constant 0 : index
    %85 = tpu.strided_load %arg23[%c92, %c0_80] {strides = array<i32: 2, 1>} : memref<320x128xf32, #tpu.memory_space<vmem>>, vector<8x128xf32>
    %c93 = arith.constant 93 : index
    %c0_81 = arith.constant 0 : index
    %86 = tpu.strided_load %arg23[%c93, %c0_81] {strides = array<i32: 2, 1>} : memref<320x128xf32, #tpu.memory_space<vmem>>, vector<8x128xf32>
    %c109 = arith.constant 109 : index
    %c0_82 = arith.constant 0 : index
    %87 = tpu.strided_load %arg23[%c109, %c0_82] {strides = array<i32: 2, 1>} : memref<320x128xf32, #tpu.memory_space<vmem>>, vector<8x128xf32>
    %c110 = arith.constant 110 : index
    %c0_83 = arith.constant 0 : index
    %88 = tpu.strided_load %arg23[%c110, %c0_83] {strides = array<i32: 2, 1>} : memref<320x128xf32, #tpu.memory_space<vmem>>, vector<8x128xf32>
    %89 = arith.maximumf %85, %86 : vector<8x128xf32>
    %90 = arith.maximumf %87, %88 : vector<8x128xf32>
    %91 = arith.maximumf %89, %90 : vector<8x128xf32>
    %c42_84 = arith.constant 42 : index
    %c0_85 = arith.constant 0 : index
    %92 = vector.load %arg22[%c42_84, %c0_85] : memref<320x128xf32, #tpu.memory_space<vmem>>, vector<8x128xf32>
    tpu.vector_store %arg22[%c42_84, %c0_85], %91 {strides = array<i32>} : memref<320x128xf32, #tpu.memory_space<vmem>>, vector<8x128xf32>,
    %c50 = arith.constant 50 : index
    %c0_86 = arith.constant 0 : index
    %93 = vector.load %arg22[%c50, %c0_86] : memref<320x128xf32, #tpu.memory_space<vmem>>, vector<1x128xf32>
    tpu.vector_store %arg22[%c50, %c0_86], %66 {strides = array<i32>} : memref<320x128xf32, #tpu.memory_space<vmem>>, vector<1x128xf32>,
    %c126 = arith.constant 126 : index
    %c0_87 = arith.constant 0 : index
    %94 = tpu.strided_load %arg23[%c126, %c0_87] {strides = array<i32: 2, 1>} : memref<320x128xf32, #tpu.memory_space<vmem>>, vector<8x128xf32>
    %c127 = arith.constant 127 : index
    %c0_88 = arith.constant 0 : index
    %95 = tpu.strided_load %arg23[%c127, %c0_88] {strides = array<i32: 2, 1>} : memref<320x128xf32, #tpu.memory_space<vmem>>, vector<8x128xf32>
    %c143 = arith.constant 143 : index
    %c0_89 = arith.constant 0 : index
    %96 = tpu.strided_load %arg23[%c143, %c0_89] {strides = array<i32: 2, 1>} : memref<320x128xf32, #tpu.memory_space<vmem>>, vector<8x128xf32>
    %c144 = arith.constant 144 : index
    %c0_90 = arith.constant 0 : index
    %97 = tpu.strided_load %arg23[%c144, %c0_90] {strides = array<i32: 2, 1>} : memref<320x128xf32, #tpu.memory_space<vmem>>, vector<8x128xf32>
    %98 = arith.maximumf %94, %95 : vector<8x128xf32>
    %99 = arith.maximumf %96, %97 : vector<8x128xf32>
    %100 = arith.maximumf %98, %99 : vector<8x128xf32>
    %c51 = arith.constant 51 : index
    %c0_91 = arith.constant 0 : index
    %101 = vector.load %arg22[%c51, %c0_91] : memref<320x128xf32, #tpu.memory_space<vmem>>, vector<8x128xf32>
    tpu.vector_store %arg22[%c51, %c0_91], %100 {strides = array<i32>} : memref<320x128xf32, #tpu.memory_space<vmem>>, vector<8x128xf32>,
    %c59_92 = arith.constant 59 : index
    %c0_93 = arith.constant 0 : index
    %102 = vector.load %arg22[%c59_92, %c0_93] : memref<320x128xf32, #tpu.memory_space<vmem>>, vector<1x128xf32>
    tpu.vector_store %arg22[%c59_92, %c0_93], %66 {strides = array<i32>} : memref<320x128xf32, #tpu.memory_space<vmem>>, vector<1x128xf32>,
    %c160 = arith.constant 160 : index
    %c0_94 = arith.constant 0 : index
    %103 = tpu.strided_load %arg23[%c160, %c0_94] {strides = array<i32: 2, 1>} : memref<320x128xf32, #tpu.memory_space<vmem>>, vector<8x128xf32>
    %c161 = arith.constant 161 : index
    %c0_95 = arith.constant 0 : index
    %104 = tpu.strided_load %arg23[%c161, %c0_95] {strides = array<i32: 2, 1>} : memref<320x128xf32, #tpu.memory_space<vmem>>, vector<8x128xf32>
    %c177 = arith.constant 177 : index
    %c0_96 = arith.constant 0 : index
    %105 = tpu.strided_load %arg23[%c177, %c0_96] {strides = array<i32: 2, 1>} : memref<320x128xf32, #tpu.memory_space<vmem>>, vector<8x128xf32>
    %c178 = arith.constant 178 : index
    %c0_97 = arith.constant 0 : index
    %106 = tpu.strided_load %arg23[%c178, %c0_97] {strides = array<i32: 2, 1>} : memref<320x128xf32, #tpu.memory_space<vmem>>, vector<8x128xf32>
    %107 = arith.maximumf %103, %104 : vector<8x128xf32>
    %108 = arith.maximumf %105, %106 : vector<8x128xf32>
    %109 = arith.maximumf %107, %108 : vector<8x128xf32>
    %c60 = arith.constant 60 : index
    %c0_98 = arith.constant 0 : index
    %110 = vector.load %arg22[%c60, %c0_98] : memref<320x128xf32, #tpu.memory_space<vmem>>, vector<8x128xf32>
    tpu.vector_store %arg22[%c60, %c0_98], %109 {strides = array<i32>} : memref<320x128xf32, #tpu.memory_space<vmem>>, vector<8x128xf32>,
    %c68 = arith.constant 68 : index
    %c0_99 = arith.constant 0 : index
    %111 = vector.load %arg22[%c68, %c0_99] : memref<320x128xf32, #tpu.memory_space<vmem>>, vector<1x128xf32>
    tpu.vector_store %arg22[%c68, %c0_99], %66 {strides = array<i32>} : memref<320x128xf32, #tpu.memory_space<vmem>>, vector<1x128xf32>,
    %c194 = arith.constant 194 : index
    %c0_100 = arith.constant 0 : index
    %112 = tpu.strided_load %arg23[%c194, %c0_100] {strides = array<i32: 2, 1>} : memref<320x128xf32, #tpu.memory_space<vmem>>, vector<8x128xf32>
    %c195 = arith.constant 195 : index
    %c0_101 = arith.constant 0 : index
    %113 = tpu.strided_load %arg23[%c195, %c0_101] {strides = array<i32: 2, 1>} : memref<320x128xf32, #tpu.memory_space<vmem>>, vector<8x128xf32>
    %c211 = arith.constant 211 : index
    %c0_102 = arith.constant 0 : index
    %114 = tpu.strided_load %arg23[%c211, %c0_102] {strides = array<i32: 2, 1>} : memref<320x128xf32, #tpu.memory_space<vmem>>, vector<8x128xf32>
    %c212 = arith.constant 212 : index
    %c0_103 = arith.constant 0 : index
    %115 = tpu.strided_load %arg23[%c212, %c0_103] {strides = array<i32: 2, 1>} : memref<320x128xf32, #tpu.memory_space<vmem>>, vector<8x128xf32>
    %116 = arith.maximumf %112, %113 : vector<8x128xf32>
    %117 = arith.maximumf %114, %115 : vector<8x128xf32>
    %118 = arith.maximumf %116, %117 : vector<8x128xf32>
    %c69 = arith.constant 69 : index
    %c0_104 = arith.constant 0 : index
    %119 = vector.load %arg22[%c69, %c0_104] : memref<320x128xf32, #tpu.memory_space<vmem>>, vector<8x128xf32>
    tpu.vector_store %arg22[%c69, %c0_104], %118 {strides = array<i32>} : memref<320x128xf32, #tpu.memory_space<vmem>>, vector<8x128xf32>,
    %c77 = arith.constant 77 : index
    %c0_105 = arith.constant 0 : index
    %120 = vector.load %arg22[%c77, %c0_105] : memref<320x128xf32, #tpu.memory_space<vmem>>, vector<1x128xf32>
    tpu.vector_store %arg22[%c77, %c0_105], %66 {strides = array<i32>} : memref<320x128xf32, #tpu.memory_space<vmem>>, vector<1x128xf32>,
    %c228 = arith.constant 228 : index
    %c0_106 = arith.constant 0 : index
    %121 = tpu.strided_load %arg23[%c228, %c0_106] {strides = array<i32: 2, 1>} : memref<320x128xf32, #tpu.memory_space<vmem>>, vector<8x128xf32>
    %c229 = arith.constant 229 : index
    %c0_107 = arith.constant 0 : index
    %122 = tpu.strided_load %arg23[%c229, %c0_107] {strides = array<i32: 2, 1>} : memref<320x128xf32, #tpu.memory_space<vmem>>, vector<8x128xf32>
    %c245 = arith.constant 245 : index
    %c0_108 = arith.constant 0 : index
    %123 = tpu.strided_load %arg23[%c245, %c0_108] {strides = array<i32: 2, 1>} : memref<320x128xf32, #tpu.memory_space<vmem>>, vector<8x128xf32>
    %c246 = arith.constant 246 : index
    %c0_109 = arith.constant 0 : index
    %124 = tpu.strided_load %arg23[%c246, %c0_109] {strides = array<i32: 2, 1>} : memref<320x128xf32, #tpu.memory_space<vmem>>, vector<8x128xf32>
    %125 = arith.maximumf %121, %122 : vector<8x128xf32>
    %126 = arith.maximumf %123, %124 : vector<8x128xf32>
    %127 = arith.maximumf %125, %126 : vector<8x128xf32>
    %c78 = arith.constant 78 : index
    %c0_110 = arith.constant 0 : index
    %128 = vector.load %arg22[%c78, %c0_110] : memref<320x128xf32, #tpu.memory_space<vmem>>, vector<8x128xf32>
    tpu.vector_store %arg22[%c78, %c0_110], %127 {strides = array<i32>} : memref<320x128xf32, #tpu.memory_space<vmem>>, vector<8x128xf32>,
    %c86 = arith.constant 86 : index
    %c0_111 = arith.constant 0 : index
    %129 = vector.load %arg22[%c86, %c0_111] : memref<320x128xf32, #tpu.memory_space<vmem>>, vector<1x128xf32>
    tpu.vector_store %arg22[%c86, %c0_111], %66 {strides = array<i32>} : memref<320x128xf32, #tpu.memory_space<vmem>>, vector<1x128xf32>,
    %c262 = arith.constant 262 : index
    %c0_112 = arith.constant 0 : index
    %130 = tpu.strided_load %arg23[%c262, %c0_112] {strides = array<i32: 2, 1>} : memref<320x128xf32, #tpu.memory_space<vmem>>, vector<8x128xf32>
    %c263 = arith.constant 263 : index
    %c0_113 = arith.constant 0 : index
    %131 = tpu.strided_load %arg23[%c263, %c0_113] {strides = array<i32: 2, 1>} : memref<320x128xf32, #tpu.memory_space<vmem>>, vector<8x128xf32>
    %c279 = arith.constant 279 : index
    %c0_114 = arith.constant 0 : index
    %132 = tpu.strided_load %arg23[%c279, %c0_114] {strides = array<i32: 2, 1>} : memref<320x128xf32, #tpu.memory_space<vmem>>, vector<8x128xf32>
    %c280 = arith.constant 280 : index
    %c0_115 = arith.constant 0 : index
    %133 = tpu.strided_load %arg23[%c280, %c0_115] {strides = array<i32: 2, 1>} : memref<320x128xf32, #tpu.memory_space<vmem>>, vector<8x128xf32>
    %134 = arith.maximumf %130, %131 : vector<8x128xf32>
    %135 = arith.maximumf %132, %133 : vector<8x128xf32>
    %136 = arith.maximumf %134, %135 : vector<8x128xf32>
    %c87 = arith.constant 87 : index
    %c0_116 = arith.constant 0 : index
    %137 = vector.load %arg22[%c87, %c0_116] : memref<320x128xf32, #tpu.memory_space<vmem>>, vector<8x128xf32>
    tpu.vector_store %arg22[%c87, %c0_116], %136 {strides = array<i32>} : memref<320x128xf32, #tpu.memory_space<vmem>>, vector<8x128xf32>,
    %c95 = arith.constant 95 : index
    %c0_117 = arith.constant 0 : index
    %138 = vector.load %arg22[%c95, %c0_117] : memref<320x128xf32, #tpu.memory_space<vmem>>, vector<1x128xf32>
    tpu.vector_store %arg22[%c95, %c0_117], %66 {strides = array<i32>} : memref<320x128xf32, #tpu.memory_space<vmem>>, vector<1x128xf32>,
    %c96 = arith.constant 96 : index
    %c0_118 = arith.constant 0 : index
    %139 = vector.load %arg22[%c96, %c0_118] : memref<320x128xf32, #tpu.memory_space<vmem>>, vector<24x128xf32>
    tpu.vector_store %arg22[%c96, %c0_118], %0 {strides = array<i32>} : memref<320x128xf32, #tpu.memory_space<vmem>>, vector<24x128xf32>,
    %c14 = arith.constant 14 : index
    %c0_119 = arith.constant 0 : index
    %140 = vector.load %arg22[%c14, %c0_119] : memref<320x128xf32, #tpu.memory_space<vmem>>, vector<72x32xf32>
    %c0_120 = arith.constant 0 : index
    %c0_121 = arith.constant 0 : index
    %c0_122 = arith.constant 0 : index
    %141 = vector.load %arg4[%c0_120, %c0_121, %c0_122] : memref<9x32x64xf32, #tpu.memory_space<vmem>>, vector<1x32x64xf32>
    %142 = vector.shape_cast %141 : vector<1x32x64xf32> to vector<32x64xf32>
    %cst_123 = arith.constant dense<0.000000e+00> : vector<72x64xf32>
    %143 = tpu.matmul %140, %142, %cst_123 {dimension_numbers = #tpu.dot_dimension_numbers<[1], [0], [0], [1], [0, 0, 1, 1], [], []>} : vector<72x32xf32>, vector<32x64xf32>, vector<72x64xf32> -> vector<72x64xf32>
    %c15 = arith.constant 15 : index
    %c0_124 = arith.constant 0 : index
    %144 = vector.load %arg22[%c15, %c0_124] : memref<320x128xf32, #tpu.memory_space<vmem>>, vector<72x32xf32>
    %c1_125 = arith.constant 1 : index
    %c0_126 = arith.constant 0 : index
    %c0_127 = arith.constant 0 : index
    %145 = vector.load %arg4[%c1_125, %c0_126, %c0_127] : memref<9x32x64xf32, #tpu.memory_space<vmem>>, vector<1x32x64xf32>
    %146 = vector.shape_cast %145 : vector<1x32x64xf32> to vector<32x64xf32>
    %cst_128 = arith.constant dense<0.000000e+00> : vector<72x64xf32>
    %147 = tpu.matmul %144, %146, %cst_128 {dimension_numbers = #tpu.dot_dimension_numbers<[1], [0], [0], [1], [0, 0, 1, 1], [], []>} : vector<72x32xf32>, vector<32x64xf32>, vector<72x64xf32> -> vector<72x64xf32>
    %148 = arith.addf %143, %147 : vector<72x64xf32>
    %c16 = arith.constant 16 : index
    %c0_129 = arith.constant 0 : index
    %149 = vector.load %arg22[%c16, %c0_129] : memref<320x128xf32, #tpu.memory_space<vmem>>, vector<72x32xf32>
    %c2_130 = arith.constant 2 : index
    %c0_131 = arith.constant 0 : index
    %c0_132 = arith.constant 0 : index
    %150 = vector.load %arg4[%c2_130, %c0_131, %c0_132] : memref<9x32x64xf32, #tpu.memory_space<vmem>>, vector<1x32x64xf32>
    %151 = vector.shape_cast %150 : vector<1x32x64xf32> to vector<32x64xf32>
    %cst_133 = arith.constant dense<0.000000e+00> : vector<72x64xf32>
    %152 = tpu.matmul %149, %151, %cst_133 {dimension_numbers = #tpu.dot_dimension_numbers<[1], [0], [0], [1], [0, 0, 1, 1], [], []>} : vector<72x32xf32>, vector<32x64xf32>, vector<72x64xf32> -> vector<72x64xf32>
    %153 = arith.addf %148, %152 : vector<72x64xf32>
    %c23_134 = arith.constant 23 : index
    %c0_135 = arith.constant 0 : index
    %154 = vector.load %arg22[%c23_134, %c0_135] : memref<320x128xf32, #tpu.memory_space<vmem>>, vector<72x32xf32>
    %c3_136 = arith.constant 3 : index
    %c0_137 = arith.constant 0 : index
    %c0_138 = arith.constant 0 : index
    %155 = vector.load %arg4[%c3_136, %c0_137, %c0_138] : memref<9x32x64xf32, #tpu.memory_space<vmem>>, vector<1x32x64xf32>
    %156 = vector.shape_cast %155 : vector<1x32x64xf32> to vector<32x64xf32>
    %cst_139 = arith.constant dense<0.000000e+00> : vector<72x64xf32>
    %157 = tpu.matmul %154, %156, %cst_139 {dimension_numbers = #tpu.dot_dimension_numbers<[1], [0], [0], [1], [0, 0, 1, 1], [], []>} : vector<72x32xf32>, vector<32x64xf32>, vector<72x64xf32> -> vector<72x64xf32>
    %158 = arith.addf %153, %157 : vector<72x64xf32>
    %c24_140 = arith.constant 24 : index
    %c0_141 = arith.constant 0 : index
    %159 = vector.load %arg22[%c24_140, %c0_141] : memref<320x128xf32, #tpu.memory_space<vmem>>, vector<72x32xf32>
    %c4_142 = arith.constant 4 : index
    %c0_143 = arith.constant 0 : index
    %c0_144 = arith.constant 0 : index
    %160 = vector.load %arg4[%c4_142, %c0_143, %c0_144] : memref<9x32x64xf32, #tpu.memory_space<vmem>>, vector<1x32x64xf32>
    %161 = vector.shape_cast %160 : vector<1x32x64xf32> to vector<32x64xf32>
    %cst_145 = arith.constant dense<0.000000e+00> : vector<72x64xf32>
    %162 = tpu.matmul %159, %161, %cst_145 {dimension_numbers = #tpu.dot_dimension_numbers<[1], [0], [0], [1], [0, 0, 1, 1], [], []>} : vector<72x32xf32>, vector<32x64xf32>, vector<72x64xf32> -> vector<72x64xf32>
    %163 = arith.addf %158, %162 : vector<72x64xf32>
    %c25_146 = arith.constant 25 : index
    %c0_147 = arith.constant 0 : index
    %164 = vector.load %arg22[%c25_146, %c0_147] : memref<320x128xf32, #tpu.memory_space<vmem>>, vector<72x32xf32>
    %c5_148 = arith.constant 5 : index
    %c0_149 = arith.constant 0 : index
    %c0_150 = arith.constant 0 : index
    %165 = vector.load %arg4[%c5_148, %c0_149, %c0_150] : memref<9x32x64xf32, #tpu.memory_space<vmem>>, vector<1x32x64xf32>
    %166 = vector.shape_cast %165 : vector<1x32x64xf32> to vector<32x64xf32>
    %cst_151 = arith.constant dense<0.000000e+00> : vector<72x64xf32>
    %167 = tpu.matmul %164, %166, %cst_151 {dimension_numbers = #tpu.dot_dimension_numbers<[1], [0], [0], [1], [0, 0, 1, 1], [], []>} : vector<72x32xf32>, vector<32x64xf32>, vector<72x64xf32> -> vector<72x64xf32>
    %168 = arith.addf %163, %167 : vector<72x64xf32>
    %c32_152 = arith.constant 32 : index
    %c0_153 = arith.constant 0 : index
    %169 = vector.load %arg22[%c32_152, %c0_153] : memref<320x128xf32, #tpu.memory_space<vmem>>, vector<72x32xf32>
    %c6_154 = arith.constant 6 : index
    %c0_155 = arith.constant 0 : index
    %c0_156 = arith.constant 0 : index
    %170 = vector.load %arg4[%c6_154, %c0_155, %c0_156] : memref<9x32x64xf32, #tpu.memory_space<vmem>>, vector<1x32x64xf32>
    %171 = vector.shape_cast %170 : vector<1x32x64xf32> to vector<32x64xf32>
    %cst_157 = arith.constant dense<0.000000e+00> : vector<72x64xf32>
    %172 = tpu.matmul %169, %171, %cst_157 {dimension_numbers = #tpu.dot_dimension_numbers<[1], [0], [0], [1], [0, 0, 1, 1], [], []>} : vector<72x32xf32>, vector<32x64xf32>, vector<72x64xf32> -> vector<72x64xf32>
    %173 = arith.addf %168, %172 : vector<72x64xf32>
    %c33_158 = arith.constant 33 : index
    %c0_159 = arith.constant 0 : index
    %174 = vector.load %arg22[%c33_158, %c0_159] : memref<320x128xf32, #tpu.memory_space<vmem>>, vector<72x32xf32>
    %c7_160 = arith.constant 7 : index
    %c0_161 = arith.constant 0 : index
    %c0_162 = arith.constant 0 : index
    %175 = vector.load %arg4[%c7_160, %c0_161, %c0_162] : memref<9x32x64xf32, #tpu.memory_space<vmem>>, vector<1x32x64xf32>
    %176 = vector.shape_cast %175 : vector<1x32x64xf32> to vector<32x64xf32>
    %cst_163 = arith.constant dense<0.000000e+00> : vector<72x64xf32>
    %177 = tpu.matmul %174, %176, %cst_163 {dimension_numbers = #tpu.dot_dimension_numbers<[1], [0], [0], [1], [0, 0, 1, 1], [], []>} : vector<72x32xf32>, vector<32x64xf32>, vector<72x64xf32> -> vector<72x64xf32>
    %178 = arith.addf %173, %177 : vector<72x64xf32>
    %c34 = arith.constant 34 : index
    %c0_164 = arith.constant 0 : index
    %179 = vector.load %arg22[%c34, %c0_164] : memref<320x128xf32, #tpu.memory_space<vmem>>, vector<72x32xf32>
    %c8_165 = arith.constant 8 : index
    %c0_166 = arith.constant 0 : index
    %c0_167 = arith.constant 0 : index
    %180 = vector.load %arg4[%c8_165, %c0_166, %c0_167] : memref<9x32x64xf32, #tpu.memory_space<vmem>>, vector<1x32x64xf32>
    %181 = vector.shape_cast %180 : vector<1x32x64xf32> to vector<32x64xf32>
    %cst_168 = arith.constant dense<0.000000e+00> : vector<72x64xf32>
    %182 = tpu.matmul %179, %181, %cst_168 {dimension_numbers = #tpu.dot_dimension_numbers<[1], [0], [0], [1], [0, 0, 1, 1], [], []>} : vector<72x32xf32>, vector<32x64xf32>, vector<72x64xf32> -> vector<72x64xf32>
    %183 = arith.addf %178, %182 : vector<72x64xf32>
    %c0_169 = arith.constant 0 : index
    %c0_170 = arith.constant 0 : index
    %184 = vector.load %arg10[%c0_169, %c0_170] : memref<1x64xf32, #tpu.memory_space<vmem>>, vector<1x64xf32>
    %185 = vector.broadcast %184 : vector<1x64xf32> to vector<72x64xf32>
    %186 = arith.addf %183, %185 : vector<72x64xf32>
    %cst_171 = arith.constant 0.000000e+00 : f32
    %187 = vector.broadcast %cst_171 : f32 to vector<72x64xf32>
    %188 = arith.maximumf %186, %187 : vector<72x64xf32>
    %c0_172 = arith.constant 0 : index
    %c0_173 = arith.constant 0 : index
    %189 = vector.load %arg15[%c0_172, %c0_173] : memref<72x1xf32, #tpu.memory_space<vmem>>, vector<72x1xf32>
    %190 = vector.broadcast %189 : vector<72x1xf32> to vector<72x64xf32>
    %191 = arith.mulf %188, %190 : vector<72x64xf32>
    %c24_174 = arith.constant 24 : index
    %c0_175 = arith.constant 0 : index
    %192 = vector.load %arg23[%c24_174, %c0_175] : memref<320x128xf32, #tpu.memory_space<vmem>>, vector<72x64xf32>
    tpu.vector_store %arg23[%c24_174, %c0_175], %191 {strides = array<i32>} : memref<320x128xf32, #tpu.memory_space<vmem>>, vector<72x64xf32>,
    %c96_176 = arith.constant 96 : index
    %c0_177 = arith.constant 0 : index
    %193 = vector.load %arg23[%c96_176, %c0_177] : memref<320x128xf32, #tpu.memory_space<vmem>>, vector<24x128xf32>
    tpu.vector_store %arg23[%c96_176, %c0_177], %0 {strides = array<i32>} : memref<320x128xf32, #tpu.memory_space<vmem>>, vector<24x128xf32>,
    %c14_178 = arith.constant 14 : index
    %c0_179 = arith.constant 0 : index
    %194 = vector.load %arg23[%c14_178, %c0_179] : memref<320x128xf32, #tpu.memory_space<vmem>>, vector<72x64xf32>
    %c0_180 = arith.constant 0 : index
    %c0_181 = arith.constant 0 : index
    %c0_182 = arith.constant 0 : index
    %195 = vector.load %arg5[%c0_180, %c0_181, %c0_182] : memref<9x64x64xf32, #tpu.memory_space<vmem>>, vector<1x64x64xf32>
    %196 = vector.shape_cast %195 : vector<1x64x64xf32> to vector<64x64xf32>
    %cst_183 = arith.constant dense<0.000000e+00> : vector<72x64xf32>
    %197 = tpu.matmul %194, %196, %cst_183 {dimension_numbers = #tpu.dot_dimension_numbers<[1], [0], [0], [1], [0, 0, 1, 1], [], []>} : vector<72x64xf32>, vector<64x64xf32>, vector<72x64xf32> -> vector<72x64xf32>
    %c15_184 = arith.constant 15 : index
    %c0_185 = arith.constant 0 : index
    %198 = vector.load %arg23[%c15_184, %c0_185] : memref<320x128xf32, #tpu.memory_space<vmem>>, vector<72x64xf32>
    %c1_186 = arith.constant 1 : index
    %c0_187 = arith.constant 0 : index
    %c0_188 = arith.constant 0 : index
    %199 = vector.load %arg5[%c1_186, %c0_187, %c0_188] : memref<9x64x64xf32, #tpu.memory_space<vmem>>, vector<1x64x64xf32>
    %200 = vector.shape_cast %199 : vector<1x64x64xf32> to vector<64x64xf32>
    %cst_189 = arith.constant dense<0.000000e+00> : vector<72x64xf32>
    %201 = tpu.matmul %198, %200, %cst_189 {dimension_numbers = #tpu.dot_dimension_numbers<[1], [0], [0], [1], [0, 0, 1, 1], [], []>} : vector<72x64xf32>, vector<64x64xf32>, vector<72x64xf32> -> vector<72x64xf32>
    %202 = arith.addf %197, %201 : vector<72x64xf32>
    %c16_190 = arith.constant 16 : index
    %c0_191 = arith.constant 0 : index
    %203 = vector.load %arg23[%c16_190, %c0_191] : memref<320x128xf32, #tpu.memory_space<vmem>>, vector<72x64xf32>
    %c2_192 = arith.constant 2 : index
    %c0_193 = arith.constant 0 : index
    %c0_194 = arith.constant 0 : index
    %204 = vector.load %arg5[%c2_192, %c0_193, %c0_194] : memref<9x64x64xf32, #tpu.memory_space<vmem>>, vector<1x64x64xf32>
    %205 = vector.shape_cast %204 : vector<1x64x64xf32> to vector<64x64xf32>
    %cst_195 = arith.constant dense<0.000000e+00> : vector<72x64xf32>
    %206 = tpu.matmul %203, %205, %cst_195 {dimension_numbers = #tpu.dot_dimension_numbers<[1], [0], [0], [1], [0, 0, 1, 1], [], []>} : vector<72x64xf32>, vector<64x64xf32>, vector<72x64xf32> -> vector<72x64xf32>
    %207 = arith.addf %202, %206 : vector<72x64xf32>
    %c23_196 = arith.constant 23 : index
    %c0_197 = arith.constant 0 : index
    %208 = vector.load %arg23[%c23_196, %c0_197] : memref<320x128xf32, #tpu.memory_space<vmem>>, vector<72x64xf32>
    %c3_198 = arith.constant 3 : index
    %c0_199 = arith.constant 0 : index
    %c0_200 = arith.constant 0 : index
    %209 = vector.load %arg5[%c3_198, %c0_199, %c0_200] : memref<9x64x64xf32, #tpu.memory_space<vmem>>, vector<1x64x64xf32>
    %210 = vector.shape_cast %209 : vector<1x64x64xf32> to vector<64x64xf32>
    %cst_201 = arith.constant dense<0.000000e+00> : vector<72x64xf32>
    %211 = tpu.matmul %208, %210, %cst_201 {dimension_numbers = #tpu.dot_dimension_numbers<[1], [0], [0], [1], [0, 0, 1, 1], [], []>} : vector<72x64xf32>, vector<64x64xf32>, vector<72x64xf32> -> vector<72x64xf32>
    %212 = arith.addf %207, %211 : vector<72x64xf32>
    %c24_202 = arith.constant 24 : index
    %c0_203 = arith.constant 0 : index
    %213 = vector.load %arg23[%c24_202, %c0_203] : memref<320x128xf32, #tpu.memory_space<vmem>>, vector<72x64xf32>
    %c4_204 = arith.constant 4 : index
    %c0_205 = arith.constant 0 : index
    %c0_206 = arith.constant 0 : index
    %214 = vector.load %arg5[%c4_204, %c0_205, %c0_206] : memref<9x64x64xf32, #tpu.memory_space<vmem>>, vector<1x64x64xf32>
    %215 = vector.shape_cast %214 : vector<1x64x64xf32> to vector<64x64xf32>
    %cst_207 = arith.constant dense<0.000000e+00> : vector<72x64xf32>
    %216 = tpu.matmul %213, %215, %cst_207 {dimension_numbers = #tpu.dot_dimension_numbers<[1], [0], [0], [1], [0, 0, 1, 1], [], []>} : vector<72x64xf32>, vector<64x64xf32>, vector<72x64xf32> -> vector<72x64xf32>
    %217 = arith.addf %212, %216 : vector<72x64xf32>
    %c25_208 = arith.constant 25 : index
    %c0_209 = arith.constant 0 : index
    %218 = vector.load %arg23[%c25_208, %c0_209] : memref<320x128xf32, #tpu.memory_space<vmem>>, vector<72x64xf32>
    %c5_210 = arith.constant 5 : index
    %c0_211 = arith.constant 0 : index
    %c0_212 = arith.constant 0 : index
    %219 = vector.load %arg5[%c5_210, %c0_211, %c0_212] : memref<9x64x64xf32, #tpu.memory_space<vmem>>, vector<1x64x64xf32>
    %220 = vector.shape_cast %219 : vector<1x64x64xf32> to vector<64x64xf32>
    %cst_213 = arith.constant dense<0.000000e+00> : vector<72x64xf32>
    %221 = tpu.matmul %218, %220, %cst_213 {dimension_numbers = #tpu.dot_dimension_numbers<[1], [0], [0], [1], [0, 0, 1, 1], [], []>} : vector<72x64xf32>, vector<64x64xf32>, vector<72x64xf32> -> vector<72x64xf32>
    %222 = arith.addf %217, %221 : vector<72x64xf32>
    %c32_214 = arith.constant 32 : index
    %c0_215 = arith.constant 0 : index
    %223 = vector.load %arg23[%c32_214, %c0_215] : memref<320x128xf32, #tpu.memory_space<vmem>>, vector<72x64xf32>
    %c6_216 = arith.constant 6 : index
    %c0_217 = arith.constant 0 : index
    %c0_218 = arith.constant 0 : index
    %224 = vector.load %arg5[%c6_216, %c0_217, %c0_218] : memref<9x64x64xf32, #tpu.memory_space<vmem>>, vector<1x64x64xf32>
    %225 = vector.shape_cast %224 : vector<1x64x64xf32> to vector<64x64xf32>
    %cst_219 = arith.constant dense<0.000000e+00> : vector<72x64xf32>
    %226 = tpu.matmul %223, %225, %cst_219 {dimension_numbers = #tpu.dot_dimension_numbers<[1], [0], [0], [1], [0, 0, 1, 1], [], []>} : vector<72x64xf32>, vector<64x64xf32>, vector<72x64xf32> -> vector<72x64xf32>
    %227 = arith.addf %222, %226 : vector<72x64xf32>
    %c33_220 = arith.constant 33 : index
    %c0_221 = arith.constant 0 : index
    %228 = vector.load %arg23[%c33_220, %c0_221] : memref<320x128xf32, #tpu.memory_space<vmem>>, vector<72x64xf32>
    %c7_222 = arith.constant 7 : index
    %c0_223 = arith.constant 0 : index
    %c0_224 = arith.constant 0 : index
    %229 = vector.load %arg5[%c7_222, %c0_223, %c0_224] : memref<9x64x64xf32, #tpu.memory_space<vmem>>, vector<1x64x64xf32>
    %230 = vector.shape_cast %229 : vector<1x64x64xf32> to vector<64x64xf32>
    %cst_225 = arith.constant dense<0.000000e+00> : vector<72x64xf32>
    %231 = tpu.matmul %228, %230, %cst_225 {dimension_numbers = #tpu.dot_dimension_numbers<[1], [0], [0], [1], [0, 0, 1, 1], [], []>} : vector<72x64xf32>, vector<64x64xf32>, vector<72x64xf32> -> vector<72x64xf32>
    %232 = arith.addf %227, %231 : vector<72x64xf32>
    %c34_226 = arith.constant 34 : index
    %c0_227 = arith.constant 0 : index
    %233 = vector.load %arg23[%c34_226, %c0_227] : memref<320x128xf32, #tpu.memory_space<vmem>>, vector<72x64xf32>
    %c8_228 = arith.constant 8 : index
    %c0_229 = arith.constant 0 : index
    %c0_230 = arith.constant 0 : index
    %234 = vector.load %arg5[%c8_228, %c0_229, %c0_230] : memref<9x64x64xf32, #tpu.memory_space<vmem>>, vector<1x64x64xf32>
    %235 = vector.shape_cast %234 : vector<1x64x64xf32> to vector<64x64xf32>
    %cst_231 = arith.constant dense<0.000000e+00> : vector<72x64xf32>
    %236 = tpu.matmul %233, %235, %cst_231 {dimension_numbers = #tpu.dot_dimension_numbers<[1], [0], [0], [1], [0, 0, 1, 1], [], []>} : vector<72x64xf32>, vector<64x64xf32>, vector<72x64xf32> -> vector<72x64xf32>
    %237 = arith.addf %232, %236 : vector<72x64xf32>
    %c0_232 = arith.constant 0 : index
    %c0_233 = arith.constant 0 : index
    %238 = vector.load %arg11[%c0_232, %c0_233] : memref<1x64xf32, #tpu.memory_space<vmem>>, vector<1x64xf32>
    %239 = vector.broadcast %238 : vector<1x64xf32> to vector<72x64xf32>
    %240 = arith.addf %237, %239 : vector<72x64xf32>
    %cst_234 = arith.constant 0.000000e+00 : f32
    %241 = vector.broadcast %cst_234 : f32 to vector<72x64xf32>
    %242 = arith.maximumf %240, %241 : vector<72x64xf32>
    %c24_235 = arith.constant 24 : index
    %c0_236 = arith.constant 0 : index
    %243 = vector.load %arg22[%c24_235, %c0_236] : memref<320x128xf32, #tpu.memory_space<vmem>>, vector<72x64xf32>
    tpu.vector_store %arg22[%c24_235, %c0_236], %242 {strides = array<i32>} : memref<320x128xf32, #tpu.memory_space<vmem>>, vector<72x64xf32>,
    %cst_237 = arith.constant 0.000000e+00 : f32
    %244 = vector.broadcast %cst_237 : f32 to vector<1x128xf32>
    %c24_238 = arith.constant 24 : index
    %c0_239 = arith.constant 0 : index
    %245 = tpu.strided_load %arg22[%c24_238, %c0_239] {strides = array<i32: 2, 1>} : memref<320x128xf32, #tpu.memory_space<vmem>>, vector<4x128xf32>
    %c25_240 = arith.constant 25 : index
    %c0_241 = arith.constant 0 : index
    %246 = tpu.strided_load %arg22[%c25_240, %c0_241] {strides = array<i32: 2, 1>} : memref<320x128xf32, #tpu.memory_space<vmem>>, vector<4x128xf32>
    %c33_242 = arith.constant 33 : index
    %c0_243 = arith.constant 0 : index
    %247 = tpu.strided_load %arg22[%c33_242, %c0_243] {strides = array<i32: 2, 1>} : memref<320x128xf32, #tpu.memory_space<vmem>>, vector<4x128xf32>
    %c34_244 = arith.constant 34 : index
    %c0_245 = arith.constant 0 : index
    %248 = tpu.strided_load %arg22[%c34_244, %c0_245] {strides = array<i32: 2, 1>} : memref<320x128xf32, #tpu.memory_space<vmem>>, vector<4x128xf32>
    %249 = arith.maximumf %245, %246 : vector<4x128xf32>
    %250 = arith.maximumf %247, %248 : vector<4x128xf32>
    %251 = arith.maximumf %249, %250 : vector<4x128xf32>
    %c24_246 = arith.constant 24 : index
    %c0_247 = arith.constant 0 : index
    %252 = vector.load %arg23[%c24_246, %c0_247] : memref<320x128xf32, #tpu.memory_space<vmem>>, vector<4x128xf32>
    tpu.vector_store %arg23[%c24_246, %c0_247], %251 {strides = array<i32>} : memref<320x128xf32, #tpu.memory_space<vmem>>, vector<4x128xf32>,
    %c28 = arith.constant 28 : index
    %c0_248 = arith.constant 0 : index
    %253 = vector.load %arg23[%c28, %c0_248] : memref<320x128xf32, #tpu.memory_space<vmem>>, vector<1x128xf32>
    tpu.vector_store %arg23[%c28, %c0_248], %244 {strides = array<i32>} : memref<320x128xf32, #tpu.memory_space<vmem>>, vector<1x128xf32>,
    %c42_249 = arith.constant 42 : index
    %c0_250 = arith.constant 0 : index
    %254 = tpu.strided_load %arg22[%c42_249, %c0_250] {strides = array<i32: 2, 1>} : memref<320x128xf32, #tpu.memory_space<vmem>>, vector<4x128xf32>
    %c43 = arith.constant 43 : index
    %c0_251 = arith.constant 0 : index
    %255 = tpu.strided_load %arg22[%c43, %c0_251] {strides = array<i32: 2, 1>} : memref<320x128xf32, #tpu.memory_space<vmem>>, vector<4x128xf32>
    %c51_252 = arith.constant 51 : index
    %c0_253 = arith.constant 0 : index
    %256 = tpu.strided_load %arg22[%c51_252, %c0_253] {strides = array<i32: 2, 1>} : memref<320x128xf32, #tpu.memory_space<vmem>>, vector<4x128xf32>
    %c52 = arith.constant 52 : index
    %c0_254 = arith.constant 0 : index
    %257 = tpu.strided_load %arg22[%c52, %c0_254] {strides = array<i32: 2, 1>} : memref<320x128xf32, #tpu.memory_space<vmem>>, vector<4x128xf32>
    %258 = arith.maximumf %254, %255 : vector<4x128xf32>
    %259 = arith.maximumf %256, %257 : vector<4x128xf32>
    %260 = arith.maximumf %258, %259 : vector<4x128xf32>
    %c29 = arith.constant 29 : index
    %c0_255 = arith.constant 0 : index
    %261 = vector.load %arg23[%c29, %c0_255] : memref<320x128xf32, #tpu.memory_space<vmem>>, vector<4x128xf32>
    tpu.vector_store %arg23[%c29, %c0_255], %260 {strides = array<i32>} : memref<320x128xf32, #tpu.memory_space<vmem>>, vector<4x128xf32>,
    %c33_256 = arith.constant 33 : index
    %c0_257 = arith.constant 0 : index
    %262 = vector.load %arg23[%c33_256, %c0_257] : memref<320x128xf32, #tpu.memory_space<vmem>>, vector<1x128xf32>
    tpu.vector_store %arg23[%c33_256, %c0_257], %244 {strides = array<i32>} : memref<320x128xf32, #tpu.memory_space<vmem>>, vector<1x128xf32>,
    %c60_258 = arith.constant 60 : index
    %c0_259 = arith.constant 0 : index
    %263 = tpu.strided_load %arg22[%c60_258, %c0_259] {strides = array<i32: 2, 1>} : memref<320x128xf32, #tpu.memory_space<vmem>>, vector<4x128xf32>
    %c61 = arith.constant 61 : index
    %c0_260 = arith.constant 0 : index
    %264 = tpu.strided_load %arg22[%c61, %c0_260] {strides = array<i32: 2, 1>} : memref<320x128xf32, #tpu.memory_space<vmem>>, vector<4x128xf32>
    %c69_261 = arith.constant 69 : index
    %c0_262 = arith.constant 0 : index
    %265 = tpu.strided_load %arg22[%c69_261, %c0_262] {strides = array<i32: 2, 1>} : memref<320x128xf32, #tpu.memory_space<vmem>>, vector<4x128xf32>
    %c70 = arith.constant 70 : index
    %c0_263 = arith.constant 0 : index
    %266 = tpu.strided_load %arg22[%c70, %c0_263] {strides = array<i32: 2, 1>} : memref<320x128xf32, #tpu.memory_space<vmem>>, vector<4x128xf32>
    %267 = arith.maximumf %263, %264 : vector<4x128xf32>
    %268 = arith.maximumf %265, %266 : vector<4x128xf32>
    %269 = arith.maximumf %267, %268 : vector<4x128xf32>
    %c34_264 = arith.constant 34 : index
    %c0_265 = arith.constant 0 : index
    %270 = vector.load %arg23[%c34_264, %c0_265] : memref<320x128xf32, #tpu.memory_space<vmem>>, vector<4x128xf32>
    tpu.vector_store %arg23[%c34_264, %c0_265], %269 {strides = array<i32>} : memref<320x128xf32, #tpu.memory_space<vmem>>, vector<4x128xf32>,
    %c38 = arith.constant 38 : index
    %c0_266 = arith.constant 0 : index
    %271 = vector.load %arg23[%c38, %c0_266] : memref<320x128xf32, #tpu.memory_space<vmem>>, vector<1x128xf32>
    tpu.vector_store %arg23[%c38, %c0_266], %244 {strides = array<i32>} : memref<320x128xf32, #tpu.memory_space<vmem>>, vector<1x128xf32>,
    %c78_267 = arith.constant 78 : index
    %c0_268 = arith.constant 0 : index
    %272 = tpu.strided_load %arg22[%c78_267, %c0_268] {strides = array<i32: 2, 1>} : memref<320x128xf32, #tpu.memory_space<vmem>>, vector<4x128xf32>
    %c79 = arith.constant 79 : index
    %c0_269 = arith.constant 0 : index
    %273 = tpu.strided_load %arg22[%c79, %c0_269] {strides = array<i32: 2, 1>} : memref<320x128xf32, #tpu.memory_space<vmem>>, vector<4x128xf32>
    %c87_270 = arith.constant 87 : index
    %c0_271 = arith.constant 0 : index
    %274 = tpu.strided_load %arg22[%c87_270, %c0_271] {strides = array<i32: 2, 1>} : memref<320x128xf32, #tpu.memory_space<vmem>>, vector<4x128xf32>
    %c88 = arith.constant 88 : index
    %c0_272 = arith.constant 0 : index
    %275 = tpu.strided_load %arg22[%c88, %c0_272] {strides = array<i32: 2, 1>} : memref<320x128xf32, #tpu.memory_space<vmem>>, vector<4x128xf32>
    %276 = arith.maximumf %272, %273 : vector<4x128xf32>
    %277 = arith.maximumf %274, %275 : vector<4x128xf32>
    %278 = arith.maximumf %276, %277 : vector<4x128xf32>
    %c39 = arith.constant 39 : index
    %c0_273 = arith.constant 0 : index
    %279 = vector.load %arg23[%c39, %c0_273] : memref<320x128xf32, #tpu.memory_space<vmem>>, vector<4x128xf32>
    tpu.vector_store %arg23[%c39, %c0_273], %278 {strides = array<i32>} : memref<320x128xf32, #tpu.memory_space<vmem>>, vector<4x128xf32>,
    %c43_274 = arith.constant 43 : index
    %c0_275 = arith.constant 0 : index
    %280 = vector.load %arg23[%c43_274, %c0_275] : memref<320x128xf32, #tpu.memory_space<vmem>>, vector<1x128xf32>
    tpu.vector_store %arg23[%c43_274, %c0_275], %244 {strides = array<i32>} : memref<320x128xf32, #tpu.memory_space<vmem>>, vector<1x128xf32>,
    %c44 = arith.constant 44 : index
    %c0_276 = arith.constant 0 : index
    %281 = vector.load %arg23[%c44, %c0_276] : memref<320x128xf32, #tpu.memory_space<vmem>>, vector<24x128xf32>
    tpu.vector_store %arg23[%c44, %c0_276], %0 {strides = array<i32>} : memref<320x128xf32, #tpu.memory_space<vmem>>, vector<24x128xf32>,
    %c18 = arith.constant 18 : index
    %c0_277 = arith.constant 0 : index
    %282 = vector.load %arg23[%c18, %c0_277] : memref<320x128xf32, #tpu.memory_space<vmem>>, vector<20x64xf32>
    %c0_278 = arith.constant 0 : index
    %c0_279 = arith.constant 0 : index
    %c0_280 = arith.constant 0 : index
    %283 = vector.load %arg6[%c0_278, %c0_279, %c0_280] : memref<9x64x128xf32, #tpu.memory_space<vmem>>, vector<1x64x128xf32>
    %284 = vector.shape_cast %283 : vector<1x64x128xf32> to vector<64x128xf32>
    %cst_281 = arith.constant dense<0.000000e+00> : vector<20x128xf32>
    %285 = tpu.matmul %282, %284, %cst_281 {dimension_numbers = #tpu.dot_dimension_numbers<[1], [0], [0], [1], [0, 0, 1, 1], [], []>} : vector<20x64xf32>, vector<64x128xf32>, vector<20x128xf32> -> vector<20x128xf32>
    %c19 = arith.constant 19 : index
    %c0_282 = arith.constant 0 : index
    %286 = vector.load %arg23[%c19, %c0_282] : memref<320x128xf32, #tpu.memory_space<vmem>>, vector<20x64xf32>
    %c1_283 = arith.constant 1 : index
    %c0_284 = arith.constant 0 : index
    %c0_285 = arith.constant 0 : index
    %287 = vector.load %arg6[%c1_283, %c0_284, %c0_285] : memref<9x64x128xf32, #tpu.memory_space<vmem>>, vector<1x64x128xf32>
    %288 = vector.shape_cast %287 : vector<1x64x128xf32> to vector<64x128xf32>
    %cst_286 = arith.constant dense<0.000000e+00> : vector<20x128xf32>
    %289 = tpu.matmul %286, %288, %cst_286 {dimension_numbers = #tpu.dot_dimension_numbers<[1], [0], [0], [1], [0, 0, 1, 1], [], []>} : vector<20x64xf32>, vector<64x128xf32>, vector<20x128xf32> -> vector<20x128xf32>
    %290 = arith.addf %285, %289 : vector<20x128xf32>
    %c20 = arith.constant 20 : index
    %c0_287 = arith.constant 0 : index
    %291 = vector.load %arg23[%c20, %c0_287] : memref<320x128xf32, #tpu.memory_space<vmem>>, vector<20x64xf32>
    %c2_288 = arith.constant 2 : index
    %c0_289 = arith.constant 0 : index
    %c0_290 = arith.constant 0 : index
    %292 = vector.load %arg6[%c2_288, %c0_289, %c0_290] : memref<9x64x128xf32, #tpu.memory_space<vmem>>, vector<1x64x128xf32>
    %293 = vector.shape_cast %292 : vector<1x64x128xf32> to vector<64x128xf32>
    %cst_291 = arith.constant dense<0.000000e+00> : vector<20x128xf32>
    %294 = tpu.matmul %291, %293, %cst_291 {dimension_numbers = #tpu.dot_dimension_numbers<[1], [0], [0], [1], [0, 0, 1, 1], [], []>} : vector<20x64xf32>, vector<64x128xf32>, vector<20x128xf32> -> vector<20x128xf32>
    %295 = arith.addf %290, %294 : vector<20x128xf32>
    %c23_292 = arith.constant 23 : index
    %c0_293 = arith.constant 0 : index
    %296 = vector.load %arg23[%c23_292, %c0_293] : memref<320x128xf32, #tpu.memory_space<vmem>>, vector<20x64xf32>
    %c3_294 = arith.constant 3 : index
    %c0_295 = arith.constant 0 : index
    %c0_296 = arith.constant 0 : index
    %297 = vector.load %arg6[%c3_294, %c0_295, %c0_296] : memref<9x64x128xf32, #tpu.memory_space<vmem>>, vector<1x64x128xf32>
    %298 = vector.shape_cast %297 : vector<1x64x128xf32> to vector<64x128xf32>
    %cst_297 = arith.constant dense<0.000000e+00> : vector<20x128xf32>
    %299 = tpu.matmul %296, %298, %cst_297 {dimension_numbers = #tpu.dot_dimension_numbers<[1], [0], [0], [1], [0, 0, 1, 1], [], []>} : vector<20x64xf32>, vector<64x128xf32>, vector<20x128xf32> -> vector<20x128xf32>
    %300 = arith.addf %295, %299 : vector<20x128xf32>
    %c24_298 = arith.constant 24 : index
    %c0_299 = arith.constant 0 : index
    %301 = vector.load %arg23[%c24_298, %c0_299] : memref<320x128xf32, #tpu.memory_space<vmem>>, vector<20x64xf32>
    %c4_300 = arith.constant 4 : index
    %c0_301 = arith.constant 0 : index
    %c0_302 = arith.constant 0 : index
    %302 = vector.load %arg6[%c4_300, %c0_301, %c0_302] : memref<9x64x128xf32, #tpu.memory_space<vmem>>, vector<1x64x128xf32>
    %303 = vector.shape_cast %302 : vector<1x64x128xf32> to vector<64x128xf32>
    %cst_303 = arith.constant dense<0.000000e+00> : vector<20x128xf32>
    %304 = tpu.matmul %301, %303, %cst_303 {dimension_numbers = #tpu.dot_dimension_numbers<[1], [0], [0], [1], [0, 0, 1, 1], [], []>} : vector<20x64xf32>, vector<64x128xf32>, vector<20x128xf32> -> vector<20x128xf32>
    %305 = arith.addf %300, %304 : vector<20x128xf32>
    %c25_304 = arith.constant 25 : index
    %c0_305 = arith.constant 0 : index
    %306 = vector.load %arg23[%c25_304, %c0_305] : memref<320x128xf32, #tpu.memory_space<vmem>>, vector<20x64xf32>
    %c5_306 = arith.constant 5 : index
    %c0_307 = arith.constant 0 : index
    %c0_308 = arith.constant 0 : index
    %307 = vector.load %arg6[%c5_306, %c0_307, %c0_308] : memref<9x64x128xf32, #tpu.memory_space<vmem>>, vector<1x64x128xf32>
    %308 = vector.shape_cast %307 : vector<1x64x128xf32> to vector<64x128xf32>
    %cst_309 = arith.constant dense<0.000000e+00> : vector<20x128xf32>
    %309 = tpu.matmul %306, %308, %cst_309 {dimension_numbers = #tpu.dot_dimension_numbers<[1], [0], [0], [1], [0, 0, 1, 1], [], []>} : vector<20x64xf32>, vector<64x128xf32>, vector<20x128xf32> -> vector<20x128xf32>
    %310 = arith.addf %305, %309 : vector<20x128xf32>
    %c28_310 = arith.constant 28 : index
    %c0_311 = arith.constant 0 : index
    %311 = vector.load %arg23[%c28_310, %c0_311] : memref<320x128xf32, #tpu.memory_space<vmem>>, vector<20x64xf32>
    %c6_312 = arith.constant 6 : index
    %c0_313 = arith.constant 0 : index
    %c0_314 = arith.constant 0 : index
    %312 = vector.load %arg6[%c6_312, %c0_313, %c0_314] : memref<9x64x128xf32, #tpu.memory_space<vmem>>, vector<1x64x128xf32>
    %313 = vector.shape_cast %312 : vector<1x64x128xf32> to vector<64x128xf32>
    %cst_315 = arith.constant dense<0.000000e+00> : vector<20x128xf32>
    %314 = tpu.matmul %311, %313, %cst_315 {dimension_numbers = #tpu.dot_dimension_numbers<[1], [0], [0], [1], [0, 0, 1, 1], [], []>} : vector<20x64xf32>, vector<64x128xf32>, vector<20x128xf32> -> vector<20x128xf32>
    %315 = arith.addf %310, %314 : vector<20x128xf32>
    %c29_316 = arith.constant 29 : index
    %c0_317 = arith.constant 0 : index
    %316 = vector.load %arg23[%c29_316, %c0_317] : memref<320x128xf32, #tpu.memory_space<vmem>>, vector<20x64xf32>
    %c7_318 = arith.constant 7 : index
    %c0_319 = arith.constant 0 : index
    %c0_320 = arith.constant 0 : index
    %317 = vector.load %arg6[%c7_318, %c0_319, %c0_320] : memref<9x64x128xf32, #tpu.memory_space<vmem>>, vector<1x64x128xf32>
    %318 = vector.shape_cast %317 : vector<1x64x128xf32> to vector<64x128xf32>
    %cst_321 = arith.constant dense<0.000000e+00> : vector<20x128xf32>
    %319 = tpu.matmul %316, %318, %cst_321 {dimension_numbers = #tpu.dot_dimension_numbers<[1], [0], [0], [1], [0, 0, 1, 1], [], []>} : vector<20x64xf32>, vector<64x128xf32>, vector<20x128xf32> -> vector<20x128xf32>
    %320 = arith.addf %315, %319 : vector<20x128xf32>
    %c30 = arith.constant 30 : index
    %c0_322 = arith.constant 0 : index
    %321 = vector.load %arg23[%c30, %c0_322] : memref<320x128xf32, #tpu.memory_space<vmem>>, vector<20x64xf32>
    %c8_323 = arith.constant 8 : index
    %c0_324 = arith.constant 0 : index
    %c0_325 = arith.constant 0 : index
    %322 = vector.load %arg6[%c8_323, %c0_324, %c0_325] : memref<9x64x128xf32, #tpu.memory_space<vmem>>, vector<1x64x128xf32>
    %323 = vector.shape_cast %322 : vector<1x64x128xf32> to vector<64x128xf32>
    %cst_326 = arith.constant dense<0.000000e+00> : vector<20x128xf32>
    %324 = tpu.matmul %321, %323, %cst_326 {dimension_numbers = #tpu.dot_dimension_numbers<[1], [0], [0], [1], [0, 0, 1, 1], [], []>} : vector<20x64xf32>, vector<64x128xf32>, vector<20x128xf32> -> vector<20x128xf32>
    %325 = arith.addf %320, %324 : vector<20x128xf32>
    %c0_327 = arith.constant 0 : index
    %c0_328 = arith.constant 0 : index
    %326 = vector.load %arg12[%c0_327, %c0_328] : memref<1x128xf32, #tpu.memory_space<vmem>>, vector<1x128xf32>
    %327 = vector.broadcast %326 : vector<1x128xf32> to vector<20x128xf32>
    %328 = arith.addf %325, %327 : vector<20x128xf32>
    %cst_329 = arith.constant 0.000000e+00 : f32
    %329 = vector.broadcast %cst_329 : f32 to vector<20x128xf32>
    %330 = arith.maximumf %328, %329 : vector<20x128xf32>
    %c0_330 = arith.constant 0 : index
    %c0_331 = arith.constant 0 : index
    %331 = vector.load %arg16[%c0_330, %c0_331] : memref<20x1xf32, #tpu.memory_space<vmem>>, vector<20x1xf32>
    %332 = vector.broadcast %331 : vector<20x1xf32> to vector<20x128xf32>
    %333 = arith.mulf %330, %332 : vector<20x128xf32>
    %c24_332 = arith.constant 24 : index
    %c0_333 = arith.constant 0 : index
    %334 = vector.load %arg22[%c24_332, %c0_333] : memref<320x128xf32, #tpu.memory_space<vmem>>, vector<20x128xf32>
    tpu.vector_store %arg22[%c24_332, %c0_333], %333 {strides = array<i32>} : memref<320x128xf32, #tpu.memory_space<vmem>>, vector<20x128xf32>,
    %c44_334 = arith.constant 44 : index
    %c0_335 = arith.constant 0 : index
    %335 = vector.load %arg22[%c44_334, %c0_335] : memref<320x128xf32, #tpu.memory_space<vmem>>, vector<24x128xf32>
    tpu.vector_store %arg22[%c44_334, %c0_335], %0 {strides = array<i32>} : memref<320x128xf32, #tpu.memory_space<vmem>>, vector<24x128xf32>,
    %c18_336 = arith.constant 18 : index
    %c0_337 = arith.constant 0 : index
    %336 = vector.load %arg22[%c18_336, %c0_337] : memref<320x128xf32, #tpu.memory_space<vmem>>, vector<20x128xf32>
    %c0_338 = arith.constant 0 : index
    %c0_339 = arith.constant 0 : index
    %c0_340 = arith.constant 0 : index
    %337 = vector.load %arg7[%c0_338, %c0_339, %c0_340] : memref<9x128x128xf32, #tpu.memory_space<vmem>>, vector<1x128x128xf32>
    %338 = vector.shape_cast %337 : vector<1x128x128xf32> to vector<128x128xf32>
    %cst_341 = arith.constant dense<0.000000e+00> : vector<20x128xf32>
    %339 = tpu.matmul %336, %338, %cst_341 {dimension_numbers = #tpu.dot_dimension_numbers<[1], [0], [0], [1], [0, 0, 1, 1], [], []>} : vector<20x128xf32>, vector<128x128xf32>, vector<20x128xf32> -> vector<20x128xf32>
    %c19_342 = arith.constant 19 : index
    %c0_343 = arith.constant 0 : index
    %340 = vector.load %arg22[%c19_342, %c0_343] : memref<320x128xf32, #tpu.memory_space<vmem>>, vector<20x128xf32>
    %c1_344 = arith.constant 1 : index
    %c0_345 = arith.constant 0 : index
    %c0_346 = arith.constant 0 : index
    %341 = vector.load %arg7[%c1_344, %c0_345, %c0_346] : memref<9x128x128xf32, #tpu.memory_space<vmem>>, vector<1x128x128xf32>
    %342 = vector.shape_cast %341 : vector<1x128x128xf32> to vector<128x128xf32>
    %cst_347 = arith.constant dense<0.000000e+00> : vector<20x128xf32>
    %343 = tpu.matmul %340, %342, %cst_347 {dimension_numbers = #tpu.dot_dimension_numbers<[1], [0], [0], [1], [0, 0, 1, 1], [], []>} : vector<20x128xf32>, vector<128x128xf32>, vector<20x128xf32> -> vector<20x128xf32>
    %344 = arith.addf %339, %343 : vector<20x128xf32>
    %c20_348 = arith.constant 20 : index
    %c0_349 = arith.constant 0 : index
    %345 = vector.load %arg22[%c20_348, %c0_349] : memref<320x128xf32, #tpu.memory_space<vmem>>, vector<20x128xf32>
    %c2_350 = arith.constant 2 : index
    %c0_351 = arith.constant 0 : index
    %c0_352 = arith.constant 0 : index
    %346 = vector.load %arg7[%c2_350, %c0_351, %c0_352] : memref<9x128x128xf32, #tpu.memory_space<vmem>>, vector<1x128x128xf32>
    %347 = vector.shape_cast %346 : vector<1x128x128xf32> to vector<128x128xf32>
    %cst_353 = arith.constant dense<0.000000e+00> : vector<20x128xf32>
    %348 = tpu.matmul %345, %347, %cst_353 {dimension_numbers = #tpu.dot_dimension_numbers<[1], [0], [0], [1], [0, 0, 1, 1], [], []>} : vector<20x128xf32>, vector<128x128xf32>, vector<20x128xf32> -> vector<20x128xf32>
    %349 = arith.addf %344, %348 : vector<20x128xf32>
    %c23_354 = arith.constant 23 : index
    %c0_355 = arith.constant 0 : index
    %350 = vector.load %arg22[%c23_354, %c0_355] : memref<320x128xf32, #tpu.memory_space<vmem>>, vector<20x128xf32>
    %c3_356 = arith.constant 3 : index
    %c0_357 = arith.constant 0 : index
    %c0_358 = arith.constant 0 : index
    %351 = vector.load %arg7[%c3_356, %c0_357, %c0_358] : memref<9x128x128xf32, #tpu.memory_space<vmem>>, vector<1x128x128xf32>
    %352 = vector.shape_cast %351 : vector<1x128x128xf32> to vector<128x128xf32>
    %cst_359 = arith.constant dense<0.000000e+00> : vector<20x128xf32>
    %353 = tpu.matmul %350, %352, %cst_359 {dimension_numbers = #tpu.dot_dimension_numbers<[1], [0], [0], [1], [0, 0, 1, 1], [], []>} : vector<20x128xf32>, vector<128x128xf32>, vector<20x128xf32> -> vector<20x128xf32>
    %354 = arith.addf %349, %353 : vector<20x128xf32>
    %c24_360 = arith.constant 24 : index
    %c0_361 = arith.constant 0 : index
    %355 = vector.load %arg22[%c24_360, %c0_361] : memref<320x128xf32, #tpu.memory_space<vmem>>, vector<20x128xf32>
    %c4_362 = arith.constant 4 : index
    %c0_363 = arith.constant 0 : index
    %c0_364 = arith.constant 0 : index
    %356 = vector.load %arg7[%c4_362, %c0_363, %c0_364] : memref<9x128x128xf32, #tpu.memory_space<vmem>>, vector<1x128x128xf32>
    %357 = vector.shape_cast %356 : vector<1x128x128xf32> to vector<128x128xf32>
    %cst_365 = arith.constant dense<0.000000e+00> : vector<20x128xf32>
    %358 = tpu.matmul %355, %357, %cst_365 {dimension_numbers = #tpu.dot_dimension_numbers<[1], [0], [0], [1], [0, 0, 1, 1], [], []>} : vector<20x128xf32>, vector<128x128xf32>, vector<20x128xf32> -> vector<20x128xf32>
    %359 = arith.addf %354, %358 : vector<20x128xf32>
    %c25_366 = arith.constant 25 : index
    %c0_367 = arith.constant 0 : index
    %360 = vector.load %arg22[%c25_366, %c0_367] : memref<320x128xf32, #tpu.memory_space<vmem>>, vector<20x128xf32>
    %c5_368 = arith.constant 5 : index
    %c0_369 = arith.constant 0 : index
    %c0_370 = arith.constant 0 : index
    %361 = vector.load %arg7[%c5_368, %c0_369, %c0_370] : memref<9x128x128xf32, #tpu.memory_space<vmem>>, vector<1x128x128xf32>
    %362 = vector.shape_cast %361 : vector<1x128x128xf32> to vector<128x128xf32>
    %cst_371 = arith.constant dense<0.000000e+00> : vector<20x128xf32>
    %363 = tpu.matmul %360, %362, %cst_371 {dimension_numbers = #tpu.dot_dimension_numbers<[1], [0], [0], [1], [0, 0, 1, 1], [], []>} : vector<20x128xf32>, vector<128x128xf32>, vector<20x128xf32> -> vector<20x128xf32>
    %364 = arith.addf %359, %363 : vector<20x128xf32>
    %c28_372 = arith.constant 28 : index
    %c0_373 = arith.constant 0 : index
    %365 = vector.load %arg22[%c28_372, %c0_373] : memref<320x128xf32, #tpu.memory_space<vmem>>, vector<20x128xf32>
    %c6_374 = arith.constant 6 : index
    %c0_375 = arith.constant 0 : index
    %c0_376 = arith.constant 0 : index
    %366 = vector.load %arg7[%c6_374, %c0_375, %c0_376] : memref<9x128x128xf32, #tpu.memory_space<vmem>>, vector<1x128x128xf32>
    %367 = vector.shape_cast %366 : vector<1x128x128xf32> to vector<128x128xf32>
    %cst_377 = arith.constant dense<0.000000e+00> : vector<20x128xf32>
    %368 = tpu.matmul %365, %367, %cst_377 {dimension_numbers = #tpu.dot_dimension_numbers<[1], [0], [0], [1], [0, 0, 1, 1], [], []>} : vector<20x128xf32>, vector<128x128xf32>, vector<20x128xf32> -> vector<20x128xf32>
    %369 = arith.addf %364, %368 : vector<20x128xf32>
    %c29_378 = arith.constant 29 : index
    %c0_379 = arith.constant 0 : index
    %370 = vector.load %arg22[%c29_378, %c0_379] : memref<320x128xf32, #tpu.memory_space<vmem>>, vector<20x128xf32>
    %c7_380 = arith.constant 7 : index
    %c0_381 = arith.constant 0 : index
    %c0_382 = arith.constant 0 : index
    %371 = vector.load %arg7[%c7_380, %c0_381, %c0_382] : memref<9x128x128xf32, #tpu.memory_space<vmem>>, vector<1x128x128xf32>
    %372 = vector.shape_cast %371 : vector<1x128x128xf32> to vector<128x128xf32>
    %cst_383 = arith.constant dense<0.000000e+00> : vector<20x128xf32>
    %373 = tpu.matmul %370, %372, %cst_383 {dimension_numbers = #tpu.dot_dimension_numbers<[1], [0], [0], [1], [0, 0, 1, 1], [], []>} : vector<20x128xf32>, vector<128x128xf32>, vector<20x128xf32> -> vector<20x128xf32>
    %374 = arith.addf %369, %373 : vector<20x128xf32>
    %c30_384 = arith.constant 30 : index
    %c0_385 = arith.constant 0 : index
    %375 = vector.load %arg22[%c30_384, %c0_385] : memref<320x128xf32, #tpu.memory_space<vmem>>, vector<20x128xf32>
    %c8_386 = arith.constant 8 : index
    %c0_387 = arith.constant 0 : index
    %c0_388 = arith.constant 0 : index
    %376 = vector.load %arg7[%c8_386, %c0_387, %c0_388] : memref<9x128x128xf32, #tpu.memory_space<vmem>>, vector<1x128x128xf32>
    %377 = vector.shape_cast %376 : vector<1x128x128xf32> to vector<128x128xf32>
    %cst_389 = arith.constant dense<0.000000e+00> : vector<20x128xf32>
    %378 = tpu.matmul %375, %377, %cst_389 {dimension_numbers = #tpu.dot_dimension_numbers<[1], [0], [0], [1], [0, 0, 1, 1], [], []>} : vector<20x128xf32>, vector<128x128xf32>, vector<20x128xf32> -> vector<20x128xf32>
    %379 = arith.addf %374, %378 : vector<20x128xf32>
    %c0_390 = arith.constant 0 : index
    %c0_391 = arith.constant 0 : index
    %380 = vector.load %arg13[%c0_390, %c0_391] : memref<1x128xf32, #tpu.memory_space<vmem>>, vector<1x128xf32>
    %381 = vector.broadcast %380 : vector<1x128xf32> to vector<20x128xf32>
    %382 = arith.addf %379, %381 : vector<20x128xf32>
    %cst_392 = arith.constant 0.000000e+00 : f32
    %383 = vector.broadcast %cst_392 : f32 to vector<20x128xf32>
    %384 = arith.maximumf %382, %383 : vector<20x128xf32>
    %c24_393 = arith.constant 24 : index
    %c0_394 = arith.constant 0 : index
    %385 = vector.load %arg23[%c24_393, %c0_394] : memref<320x128xf32, #tpu.memory_space<vmem>>, vector<20x128xf32>
    tpu.vector_store %arg23[%c24_393, %c0_394], %384 {strides = array<i32>} : memref<320x128xf32, #tpu.memory_space<vmem>>, vector<20x128xf32>,
    %cst_395 = arith.constant 0.000000e+00 : f32
    %386 = vector.broadcast %cst_395 : f32 to vector<1x128xf32>
    %c24_396 = arith.constant 24 : index
    %c0_397 = arith.constant 0 : index
    %387 = tpu.strided_load %arg23[%c24_396, %c0_397] {strides = array<i32: 2, 1>} : memref<320x128xf32, #tpu.memory_space<vmem>>, vector<2x128xf32>
    %c25_398 = arith.constant 25 : index
    %c0_399 = arith.constant 0 : index
    %388 = tpu.strided_load %arg23[%c25_398, %c0_399] {strides = array<i32: 2, 1>} : memref<320x128xf32, #tpu.memory_space<vmem>>, vector<2x128xf32>
    %c29_400 = arith.constant 29 : index
    %c0_401 = arith.constant 0 : index
    %389 = tpu.strided_load %arg23[%c29_400, %c0_401] {strides = array<i32: 2, 1>} : memref<320x128xf32, #tpu.memory_space<vmem>>, vector<2x128xf32>
    %c30_402 = arith.constant 30 : index
    %c0_403 = arith.constant 0 : index
    %390 = tpu.strided_load %arg23[%c30_402, %c0_403] {strides = array<i32: 2, 1>} : memref<320x128xf32, #tpu.memory_space<vmem>>, vector<2x128xf32>
    %391 = arith.maximumf %387, %388 : vector<2x128xf32>
    %392 = arith.maximumf %389, %390 : vector<2x128xf32>
    %393 = arith.maximumf %391, %392 : vector<2x128xf32>
    %c24_404 = arith.constant 24 : index
    %c0_405 = arith.constant 0 : index
    %394 = vector.load %arg22[%c24_404, %c0_405] : memref<320x128xf32, #tpu.memory_space<vmem>>, vector<2x128xf32>
    tpu.vector_store %arg22[%c24_404, %c0_405], %393 {strides = array<i32>} : memref<320x128xf32, #tpu.memory_space<vmem>>, vector<2x128xf32>,
    %c26 = arith.constant 26 : index
    %c0_406 = arith.constant 0 : index
    %395 = vector.load %arg22[%c26, %c0_406] : memref<320x128xf32, #tpu.memory_space<vmem>>, vector<1x128xf32>
    tpu.vector_store %arg22[%c26, %c0_406], %386 {strides = array<i32>} : memref<320x128xf32, #tpu.memory_space<vmem>>, vector<1x128xf32>,
    %c34_407 = arith.constant 34 : index
    %c0_408 = arith.constant 0 : index
    %396 = tpu.strided_load %arg23[%c34_407, %c0_408] {strides = array<i32: 2, 1>} : memref<320x128xf32, #tpu.memory_space<vmem>>, vector<2x128xf32>
    %c35 = arith.constant 35 : index
    %c0_409 = arith.constant 0 : index
    %397 = tpu.strided_load %arg23[%c35, %c0_409] {strides = array<i32: 2, 1>} : memref<320x128xf32, #tpu.memory_space<vmem>>, vector<2x128xf32>
    %c39_410 = arith.constant 39 : index
    %c0_411 = arith.constant 0 : index
    %398 = tpu.strided_load %arg23[%c39_410, %c0_411] {strides = array<i32: 2, 1>} : memref<320x128xf32, #tpu.memory_space<vmem>>, vector<2x128xf32>
    %c40_412 = arith.constant 40 : index
    %c0_413 = arith.constant 0 : index
    %399 = tpu.strided_load %arg23[%c40_412, %c0_413] {strides = array<i32: 2, 1>} : memref<320x128xf32, #tpu.memory_space<vmem>>, vector<2x128xf32>
    %400 = arith.maximumf %396, %397 : vector<2x128xf32>
    %401 = arith.maximumf %398, %399 : vector<2x128xf32>
    %402 = arith.maximumf %400, %401 : vector<2x128xf32>
    %c27 = arith.constant 27 : index
    %c0_414 = arith.constant 0 : index
    %403 = vector.load %arg22[%c27, %c0_414] : memref<320x128xf32, #tpu.memory_space<vmem>>, vector<2x128xf32>
    tpu.vector_store %arg22[%c27, %c0_414], %402 {strides = array<i32>} : memref<320x128xf32, #tpu.memory_space<vmem>>, vector<2x128xf32>,
    %c29_415 = arith.constant 29 : index
    %c0_416 = arith.constant 0 : index
    %404 = vector.load %arg22[%c29_415, %c0_416] : memref<320x128xf32, #tpu.memory_space<vmem>>, vector<1x128xf32>
    tpu.vector_store %arg22[%c29_415, %c0_416], %386 {strides = array<i32>} : memref<320x128xf32, #tpu.memory_space<vmem>>, vector<1x128xf32>,
    %c30_417 = arith.constant 30 : index
    %c0_418 = arith.constant 0 : index
    %405 = vector.load %arg22[%c30_417, %c0_418] : memref<320x128xf32, #tpu.memory_space<vmem>>, vector<24x128xf32>
    tpu.vector_store %arg22[%c30_417, %c0_418], %0 {strides = array<i32>} : memref<320x128xf32, #tpu.memory_space<vmem>>, vector<24x128xf32>,
    %c24_419 = arith.constant 24 : index
    %c0_420 = arith.constant 0 : index
    %406 = vector.load %arg22[%c24_419, %c0_420] : memref<320x128xf32, #tpu.memory_space<vmem>>, vector<1x128xf32>
    %c0_421 = arith.constant 0 : index
    %c0_422 = arith.constant 0 : index
    %407 = vector.load %arg17[%c0_421, %c0_422] : memref<512x512xf32, #tpu.memory_space<vmem>>, vector<128x512xf32>
    %cst_423 = arith.constant dense<0.000000e+00> : vector<1x512xf32>
    %408 = tpu.matmul %406, %407, %cst_423 {dimension_numbers = #tpu.dot_dimension_numbers<[1], [0], [0], [1], [0, 0, 1, 1], [], []>} : vector<1x128xf32>, vector<128x512xf32>, vector<1x512xf32> -> vector<1x512xf32>
    %c25_424 = arith.constant 25 : index
    %c0_425 = arith.constant 0 : index
    %409 = vector.load %arg22[%c25_424, %c0_425] : memref<320x128xf32, #tpu.memory_space<vmem>>, vector<1x128xf32>
    %c128 = arith.constant 128 : index
    %c0_426 = arith.constant 0 : index
    %410 = vector.load %arg17[%c128, %c0_426] : memref<512x512xf32, #tpu.memory_space<vmem>>, vector<128x512xf32>
    %cst_427 = arith.constant dense<0.000000e+00> : vector<1x512xf32>
    %411 = tpu.matmul %409, %410, %cst_427 {dimension_numbers = #tpu.dot_dimension_numbers<[1], [0], [0], [1], [0, 0, 1, 1], [], []>} : vector<1x128xf32>, vector<128x512xf32>, vector<1x512xf32> -> vector<1x512xf32>
    %412 = arith.addf %408, %411 : vector<1x512xf32>
    %c27_428 = arith.constant 27 : index
    %c0_429 = arith.constant 0 : index
    %413 = vector.load %arg22[%c27_428, %c0_429] : memref<320x128xf32, #tpu.memory_space<vmem>>, vector<1x128xf32>
    %c256 = arith.constant 256 : index
    %c0_430 = arith.constant 0 : index
    %414 = vector.load %arg17[%c256, %c0_430] : memref<512x512xf32, #tpu.memory_space<vmem>>, vector<128x512xf32>
    %cst_431 = arith.constant dense<0.000000e+00> : vector<1x512xf32>
    %415 = tpu.matmul %413, %414, %cst_431 {dimension_numbers = #tpu.dot_dimension_numbers<[1], [0], [0], [1], [0, 0, 1, 1], [], []>} : vector<1x128xf32>, vector<128x512xf32>, vector<1x512xf32> -> vector<1x512xf32>
    %416 = arith.addf %412, %415 : vector<1x512xf32>
    %c28_432 = arith.constant 28 : index
    %c0_433 = arith.constant 0 : index
    %417 = vector.load %arg22[%c28_432, %c0_433] : memref<320x128xf32, #tpu.memory_space<vmem>>, vector<1x128xf32>
    %c384 = arith.constant 384 : index
    %c0_434 = arith.constant 0 : index
    %418 = vector.load %arg17[%c384, %c0_434] : memref<512x512xf32, #tpu.memory_space<vmem>>, vector<128x512xf32>
    %cst_435 = arith.constant dense<0.000000e+00> : vector<1x512xf32>
    %419 = tpu.matmul %417, %418, %cst_435 {dimension_numbers = #tpu.dot_dimension_numbers<[1], [0], [0], [1], [0, 0, 1, 1], [], []>} : vector<1x128xf32>, vector<128x512xf32>, vector<1x512xf32> -> vector<1x512xf32>
    %420 = arith.addf %416, %419 : vector<1x512xf32>
    %c0_436 = arith.constant 0 : index
    %c0_437 = arith.constant 0 : index
    %421 = vector.load %arg18[%c0_436, %c0_437] : memref<1x512xf32, #tpu.memory_space<vmem>>, vector<1x512xf32>
    %422 = arith.addf %420, %421 : vector<1x512xf32>
    %cst_438 = arith.constant 0.000000e+00 : f32
    %423 = vector.broadcast %cst_438 : f32 to vector<1x512xf32>
    %424 = arith.maximumf %422, %423 : vector<1x512xf32>
    %c0_439 = arith.constant 0 : index
    %c0_440 = arith.constant 0 : index
    %425 = vector.load %arg19[%c0_439, %c0_440] : memref<1x512xf32, #tpu.memory_space<vmem>>, vector<1x512xf32>
    %426 = arith.mulf %424, %425 : vector<1x512xf32>
    %cst_441 = arith.constant dense<0.000000e+00> : vector<1xf32>
    %427 = vector.multi_reduction <add>, %426, %cst_441 [1] : vector<1x512xf32> to vector<1xf32>
    %428 = vector.shape_cast %427 : vector<1xf32> to vector<1x1xf32>
    %c0_442 = arith.constant 0 : index
    %c0_443 = arith.constant 0 : index
    %429 = vector.load %arg20[%c0_442, %c0_443] : memref<1x1xf32, #tpu.memory_space<vmem>>, vector<1x1xf32>
    %430 = arith.addf %428, %429 : vector<1x1xf32>
    %cst_444 = arith.constant 0.000000e+00 : f32
    %431 = vector.broadcast %cst_444 : f32 to vector<1x1xf32>
    %432 = arith.subf %431, %430 : vector<1x1xf32>
    %433 = math.exp %432 : vector<1x1xf32>
    %cst_445 = arith.constant 1.000000e+00 : f32
    %434 = vector.broadcast %cst_445 : f32 to vector<1x1xf32>
    %435 = arith.addf %434, %433 : vector<1x1xf32>
    %cst_446 = arith.constant 1.000000e+00 : f32
    %436 = vector.broadcast %cst_446 : f32 to vector<1x1xf32>
    %437 = arith.divf %436, %435 : vector<1x1xf32>
    %438 = vector.shape_cast %437 : vector<1x1xf32> to vector<1x1xf32>
    %439 = vector.broadcast %438 : vector<1x1xf32> to vector<1x128xf32>
    %c0_447 = arith.constant 0 : index
    %c0_448 = arith.constant 0 : index
    %c0_449 = arith.constant 0 : index
    %440 = vector.load %arg21[%c0_447, %c0_448, %c0_449] : memref<1x1x128xf32, #tpu.memory_space<vmem>>, vector<1x1x128xf32>
    %441 = vector.shape_cast %440 : vector<1x1x128xf32> to vector<1x128xf32>
    %442 = vector.shape_cast %439 : vector<1x128xf32> to vector<1x1x128xf32>
    tpu.vector_store %arg21[%c0_447, %c0_448, %c0_449], %442 {strides = array<i32>} : memref<1x1x128xf32, #tpu.memory_space<vmem>>, vector<1x1x128xf32>,
    return
  }
  func.func @transform_0(%arg0: i32) -> (i32, i32) {
    %c0_i32 = arith.constant 0 : i32
    %c0_i32_0 = arith.constant 0 : i32
    return %arg0, %c0_i32 : i32, i32
  }
  func.func @transform_1(%arg0: i32) -> (i32, i32) {
    %c0_i32 = arith.constant 0 : i32
    %c0_i32_0 = arith.constant 0 : i32
    %c0_i32_1 = arith.constant 0 : i32
    return %c0_i32, %c0_i32_0 : i32, i32
  }
  func.func @transform_2(%arg0: i32) -> (i32, i32, i32) {
    %c0_i32 = arith.constant 0 : i32
    %c0_i32_0 = arith.constant 0 : i32
    %c0_i32_1 = arith.constant 0 : i32
    %c0_i32_2 = arith.constant 0 : i32
    return %c0_i32, %c0_i32_0, %c0_i32_1 : i32, i32, i32
  }
  func.func @transform_3(%arg0: i32) -> (i32, i32, i32) {
    %c0_i32 = arith.constant 0 : i32
    %c0_i32_0 = arith.constant 0 : i32
    %c0_i32_1 = arith.constant 0 : i32
    %c0_i32_2 = arith.constant 0 : i32
    return %c0_i32, %c0_i32_0, %c0_i32_1 : i32, i32, i32
  }
  func.func @transform_4(%arg0: i32) -> (i32, i32, i32) {
    %c0_i32 = arith.constant 0 : i32
    %c0_i32_0 = arith.constant 0 : i32
    %c0_i32_1 = arith.constant 0 : i32
    %c0_i32_2 = arith.constant 0 : i32
    return %c0_i32, %c0_i32_0, %c0_i32_1 : i32, i32, i32
  }
  func.func @transform_5(%arg0: i32) -> (i32, i32, i32) {
    %c0_i32 = arith.constant 0 : i32
    %c0_i32_0 = arith.constant 0 : i32
    %c0_i32_1 = arith.constant 0 : i32
    %c0_i32_2 = arith.constant 0 : i32
    return %c0_i32, %c0_i32_0, %c0_i32_1 : i32, i32, i32
  }
  func.func @transform_6(%arg0: i32) -> (i32, i32, i32) {
    %c0_i32 = arith.constant 0 : i32
    %c0_i32_0 = arith.constant 0 : i32
    %c0_i32_1 = arith.constant 0 : i32
    %c0_i32_2 = arith.constant 0 : i32
    return %c0_i32, %c0_i32_0, %c0_i32_1 : i32, i32, i32
  }
  func.func @transform_7(%arg0: i32) -> (i32, i32) {
    %c0_i32 = arith.constant 0 : i32
    %c0_i32_0 = arith.constant 0 : i32
    %c0_i32_1 = arith.constant 0 : i32
    return %c0_i32, %c0_i32_0 : i32, i32
  }
  func.func @transform_8(%arg0: i32) -> (i32, i32) {
    %c0_i32 = arith.constant 0 : i32
    %c0_i32_0 = arith.constant 0 : i32
    %c0_i32_1 = arith.constant 0 : i32
    return %c0_i32, %c0_i32_0 : i32, i32
  }
  func.func @transform_9(%arg0: i32) -> (i32, i32) {
    %c0_i32 = arith.constant 0 : i32
    %c0_i32_0 = arith.constant 0 : i32
    %c0_i32_1 = arith.constant 0 : i32
    return %c0_i32, %c0_i32_0 : i32, i32
  }
  func.func @transform_10(%arg0: i32) -> (i32, i32) {
    %c0_i32 = arith.constant 0 : i32
    %c0_i32_0 = arith.constant 0 : i32
    %c0_i32_1 = arith.constant 0 : i32
    return %c0_i32, %c0_i32_0 : i32, i32
  }
  func.func @transform_11(%arg0: i32) -> (i32, i32) {
    %c0_i32 = arith.constant 0 : i32
    %c0_i32_0 = arith.constant 0 : i32
    %c0_i32_1 = arith.constant 0 : i32
    return %c0_i32, %c0_i32_0 : i32, i32
  }
  func.func @transform_12(%arg0: i32) -> (i32, i32) {
    %c0_i32 = arith.constant 0 : i32
    %c0_i32_0 = arith.constant 0 : i32
    %c0_i32_1 = arith.constant 0 : i32
    return %c0_i32, %c0_i32_0 : i32, i32
  }
  func.func @transform_13(%arg0: i32) -> (i32, i32) {
    %c0_i32 = arith.constant 0 : i32
    %c0_i32_0 = arith.constant 0 : i32
    %c0_i32_1 = arith.constant 0 : i32
    return %c0_i32, %c0_i32_0 : i32, i32
  }
  func.func @transform_14(%arg0: i32) -> (i32, i32) {
    %c0_i32 = arith.constant 0 : i32
    %c0_i32_0 = arith.constant 0 : i32
    %c0_i32_1 = arith.constant 0 : i32
    return %c0_i32, %c0_i32_0 : i32, i32
  }
  func.func @transform_15(%arg0: i32) -> (i32, i32) {
    %c0_i32 = arith.constant 0 : i32
    %c0_i32_0 = arith.constant 0 : i32
    %c0_i32_1 = arith.constant 0 : i32
    return %c0_i32, %c0_i32_0 : i32, i32
  }
  func.func @transform_16(%arg0: i32) -> (i32, i32) {
    %c0_i32 = arith.constant 0 : i32
    %c0_i32_0 = arith.constant 0 : i32
    %c0_i32_1 = arith.constant 0 : i32
    return %c0_i32, %c0_i32_0 : i32, i32
  }
  func.func @transform_17(%arg0: i32) -> (i32, i32) {
    %c0_i32 = arith.constant 0 : i32
    %c0_i32_0 = arith.constant 0 : i32
    %c0_i32_1 = arith.constant 0 : i32
    return %c0_i32, %c0_i32_0 : i32, i32
  }
  func.func @transform_18(%arg0: i32) -> (i32, i32) {
    %c0_i32 = arith.constant 0 : i32
    %c0_i32_0 = arith.constant 0 : i32
    %c0_i32_1 = arith.constant 0 : i32
    return %c0_i32, %c0_i32_0 : i32, i32
  }
  func.func @transform_19(%arg0: i32) -> (i32, i32) {
    %c0_i32 = arith.constant 0 : i32
    %c0_i32_0 = arith.constant 0 : i32
    %c0_i32_1 = arith.constant 0 : i32
    return %c0_i32, %c0_i32_0 : i32, i32
  }
  func.func @transform_20(%arg0: i32) -> (i32, i32, i32) {
    %c0_i32 = arith.constant 0 : i32
    %c0_i32_0 = arith.constant 0 : i32
    %c0_i32_1 = arith.constant 0 : i32
    return %arg0, %c0_i32, %c0_i32_0 : i32, i32, i32
  }
}

</mosaic_0001>

<bundles_post_ra>
// kernel: meningioma_forward.1
= control target key start
LH: loop header
LB: loop body
LE: loop exit
PB: predicated region body
PF: predicated region fallthrough
CT: control target
= control target key end

     0   :  { %s8547_s23 = smov 0   ;;  %s12626_s0 = inlined_call_operand.vmem [shape: f32[544,27], index: 0, kind: input, shape index: {}]   ;;  %s12627_s1 = inlined_call_operand.vmem [shape: f32[27,32], index: 1, kind: input, shape index: {}]   ;;  %s12628_s2 = inlined_call_operand.vmem [shape: f32[9,32,32], index: 2, kind: input, shape index: {}]   ;;  %s12629_s3 = inlined_call_operand.vmem [shape: f32[9,32,64], index: 3, kind: input, shape index: {}]   ;;  %s12630_s4 = inlined_call_operand.vmem [shape: f32[9,64,64], index: 4, kind: input, shape index: {}]   ;;  %s12631_s5 = inlined_call_operand.vmem [shape: f32[9,64,128], index: 5, kind: input, shape index: {}]   ;;  %s12632_s6 = inlined_call_operand.vmem [shape: f32[9,128,128], index: 6, kind: input, shape index: {}]   ;;  %s12633_s7 = inlined_call_operand.vmem [shape: f32[1,32], index: 7, kind: input, shape index: {}]   ;;  %s12634_s8 = inlined_call_operand.vmem [shape: f32[1,32], index: 8, kind: input, shape index: {}]   ;;  %s12635_s9 = inlined_call_operand.vmem [shape: f32[1,64], index: 9, kind: input, shape index: {}]   ;;  %s12636_s10 = inlined_call_operand.vmem [shape: f32[1,64], index: 10, kind: input, shape index: {}]   ;;  %s12637_s11 = inlined_call_operand.vmem [shape: f32[1,128], index: 11, kind: input, shape index: {}]   ;;  %s12638_s12 = inlined_call_operand.vmem [shape: f32[1,128], index: 12, kind: input, shape index: {}]   ;;  %s12639_s13 = inlined_call_operand.vmem [shape: f32[272,1], index: 13, kind: input, shape index: {}]   ;;  %s12640_s14 = inlined_call_operand.vmem [shape: f32[72,1], index: 14, kind: input, shape index: {}]   ;;  %s12641_s15 = inlined_call_operand.vmem [shape: f32[20,1], index: 15, kind: input, shape index: {}]   ;;  %s12642_s16 = inlined_call_operand.vmem [shape: f32[512,512], index: 16, kind: input, shape index: {}]   ;;  %s12643_s17 = inlined_call_operand.vmem [shape: f32[1,512], index: 17, kind: input, shape index: {}]   ;;  %s12644_s18 = inlined_call_operand.vmem [shape: f32[1,512], index: 18, kind: input, shape index: {}]   ;;  %s12645_s19 = inlined_call_operand.<no memory space> [shape: f32[1,1], index: 19, kind: input, shape index: {}]   ;;  %s12646_s20 = inlined_call_operand.vmem [shape: f32[2,1,128], index: 20, kind: output, shape index: {}]  }
   0x1   :  { %12658 = sst [smem:[#allocation47_spill]] %s12626_s0  ;;  %v25_v0 = vstv %s12645_s19 }
   0x2   :  { %12659 = sst [smem:[#allocation48_spill]] %s12627_s1  ;;  %26 = vst [vmem:[#allocation4] sm:$0x1] %v25_v0 }
   0x3   :  { %12660 = sst [smem:[#allocation49_spill]] %s12628_s2 }
   0x4   :  { %12661 = sst [smem:[#allocation50_spill]] %s12629_s3 }
   0x5   :  { %12662 = sst [smem:[#allocation51_spill]] %s12630_s4 }
   0x6 LB: > { %s8553_s24 = sadd.s32 4294967295, %s8435_s23   ;;  %p7540_p0 = scmp.ge.s32.totalorder %s8435_s23, 1  ;;  %s8435_s23 = sphi %s8547_s23, %s32_s23  }
   0x7   : > { %p565_p1 = scmp.lt.s32.totalorder %s8435_s23, 3 }
   0x9   : > { %p566_p2 = pnand %p7540_p0, %p565_p1 }
   0xb   : > { %569 = sbr.rel (%p566_p2) target bundleno = 2612 (0xa34), region = 100 }
  0x10   : > { %v942_v1 = vld [vmem:[%s12639_s13 + $0x20] sm:$0xff]  ;;  %v940_v2 = vld [vmem:[%s12639_s13 + $0x10] sm:$0xff]  ;;  %s621_s28 = smul.u32 34, %s8553_s24  ;;  %v8437_v4 = vmov 0   ;;  %s12663_s30 = sld [smem:[#allocation48_spill]]  ;;  %vm781_vm0 = vcmask 1042432  }
  0x11   : > { %v938_v3 = vld [vmem:[%s12639_s13] sm:$0xff]  ;;  %8410 = vset.pattern.permute.xlu2 %v8437_v4  ;;  %8409 = vset.pattern.permute.xlu1 %v8437_v4  ;;  %v943_v9 = vld [vmem:[%s12639_s13 + $0x28] sm:$0xff]  ;;  %s12664_s29 = sld [smem:[#allocation47_spill]]  ;;  %vm678_vm1 = vcmask 220160   ;;  %v941_v11 = vld [vmem:[%s12639_s13 + $0x18] sm:$0xff]  ;;  %v12651_v54 = vmov 0.0  }
  0x12   : > { %8408 = vset.pattern.permute.xlu0 %v8437_v4  ;;  %994 = vperm.xlu2 %8410, %v942_v1   ;;  %p622_p3 = scmp.lt.s32.totalorder %s621_s28, 67  ;;  %v939_v12 = vld [vmem:[%s12639_s13 + $0x8] sm:$0xff]  ;;  %v946_v13 = vld [vmem:[%s12639_s13 + $0x40] sm:$0xff]  ;;  %v945_v15 = vld [vmem:[%s12639_s13 + $0x38] sm:$0xff]  ;;  %s12665_s21 = sld [smem:[#allocation49_spill]]  ;;  %630 = vst [vmem:[#allocation2] sm:$0xff] %v12651_v54 }
  0x13   : > { %984 = vperm.xlu1 %8409, %v940_v2   ;;  %974 = vperm.xlu0 %8408, %v938_v3   ;;  %v944_v16 = vld [vmem:[%s12639_s13 + $0x30] sm:$0xff]  ;;  %v949_v17 = vld [vmem:[%s12639_s13 + $0x58] sm:$0xff]  ;;  %v947_v20 = vld [vmem:[%s12639_s13 + $0x48] sm:$0xff]  ;;  %631 = vst [vmem:[#allocation2 + $0x8] sm:$0xff] %v12651_v54  ;;  %vm1176_vm2 = vcmask 261120   ;;  %s12787_s25 = sld [smem:[#allocation51_spill]] }
  0x14   : > { %s12790_s28 = smov (!%p622_p3, %s621_s28), 67  ;;  %v948_v19 = vld [vmem:[%s12639_s13 + $0x50] sm:$0xff]  ;;  %v951_v23 = vld [vmem:[%s12639_s13 + $0x68] sm:$0xff]  ;;  %v950_v24 = vld [vmem:[%s12639_s13 + $0x60] sm:$0xff]  ;;  %632 = vst [vmem:[#allocation2 + $0x10] sm:$0xff] %v12651_v54  ;;  %vm4916_vm3 = vcmask 523264  }
  0x15   : > { %s7541_s19 = sshll.u32 %s12790_s28, 3  ;;  %v952_v21 = vld [vmem:[%s12639_s13 + $0x70] sm:$0xff]  ;;  %v955_v25 = vld [vmem:[%s12639_s13 + $0x88] sm:$0xff]  ;;  %v954_v27 = vld [vmem:[%s12639_s13 + $0x80] sm:$0xff]  ;;  %634 = vst [vmem:[#allocation3 + $0x8] sm:$0xff] %v12651_v54  ;;  %vm7452_vm4 = vcmask 1040384  }
  0x16   : > { %v673_v5 = vld [vmem:[%s12663_s30 + $0x18] sm:$0x7]  ;;  %v672_v6 = vld [vmem:[%s12663_s30 + $0x10] sm:$0xff]  ;;  %v671_v7 = vld [vmem:[%s12663_s30 + $0x8] sm:$0xff]  ;;  %635 = vst [vmem:[#allocation3 + $0x10] sm:$0xff] %v12651_v54  ;;  %p627_p4 = scmp.lt.s32.totalorder %s8553_s24, 1 }
  0x17   : > { %7542 = vmatpush.msk.msra.mxu0 %vm781_vm0, %v673_v5  ;;  %v670_v8 = vld [vmem:[%s12663_s30] sm:$0xff]  ;;  %s8585_s0 = scalar_lea.vmem %s12664_s29, %s7541_s19  ;;  %v953_v28 = vld [vmem:[%s12639_s13 + $0x78] sm:$0xff]  ;;  %v956_v32 = vld [vmem:[%s12639_s13 + $0x90] sm:$0xff]  ;;  %1211 = vst [vmem:[#allocation2 + $0x128] sm:$0xff] %v12651_v54  ;;  %s12730_s29 = sld [smem:[#allocation50_spill]] }
  0x18   : > { %v636_v10 = vld [vmem:[%s8585_s0] sm:$0xff]  ;;  %v637_v14 = vld [vmem:[%s8585_s0 + $0x8] sm:$0xff]  ;;  %v638_v18 = vld [vmem:[%s8585_s0 + $0x10] sm:$0xff]  ;;  %1212 = vst [vmem:[#allocation2 + $0x130] sm:$0xff] %v12651_v54  ;;  %s12792_s24 = smov (!%p627_p4, %s8553_s24), 1 }
  0x19   : > { %798 = vmatpush.msra.mxu0 %v672_v6  ;;  %v639_v22 = vld [vmem:[%s8585_s0 + $0x18] sm:$0xff]  ;;  %v640_v26 = vld [vmem:[%s8585_s0 + $0x20] sm:$0xff]  ;;  %v641_v30 = vld [vmem:[%s8585_s0 + $0x28] sm:$0xff]  ;;  %1213 = vst [vmem:[#allocation2 + $0x138] sm:$0xff] %v12651_v54  ;;  %s629_s28 = scalar_lea.vmem %s12646_s20, %s12792_s24 }
  0x1a   : > { %999 = vperm.xlu2 %8410, %v943_v9   ;;  %v958_v29 = vld [vmem:[%s12639_s13 + $0xa0] sm:$0xff]  ;;  %v957_v31 = vld [vmem:[%s12639_s13 + $0x98] sm:$0xff]  ;;  %v642_v34 = vld [vmem:[%s8585_s0 + $0x30] sm:$0xff] }
  0x1b   : > { %799 = vmatpush.msra.mxu0 %v671_v7  ;;  %989 = vperm.xlu1 %8409, %v941_v11   ;;  %v961_v33 = vld [vmem:[%s12639_s13 + $0xb8] sm:$0xff]  ;;  %v960_v35 = vld [vmem:[%s12639_s13 + $0xb0] sm:$0xff]  ;;  %v959_v36 = vld [vmem:[%s12639_s13 + $0xa8] sm:$0xff] }
  0x1c   : > { %979 = vperm.xlu0 %8408, %v939_v12   ;;  %v964_v37 = vld [vmem:[%s12639_s13 + $0xd0] sm:$0xff]  ;;  %v643_v38 = vld [vmem:[%s8585_s0 + $0x38] sm:$0xff]  ;;  %v963_v39 = vld [vmem:[%s12639_s13 + $0xc8] sm:$0xff] }
  0x1d   : > { %800 = vmatpush.msra.mxu0 %v670_v8  ;;  %v962_v40 = vld [vmem:[%s12639_s13 + $0xc0] sm:$0xff]  ;;  %v967_v41 = vld [vmem:[%s12639_s13 + $0xe8] sm:$0xff]  ;;  %v965_v44 = vld [vmem:[%s12639_s13 + $0xd8] sm:$0xff] }
  0x1e   : > { %7543 = vmatmul.msk.f32.vlgmr.msra.gmra.mxu0 %vm678_vm1, %v636_v10  ;;  %v644_v42 = vld [vmem:[%s8585_s0 + $0x40] sm:$0xff]  ;;  %v645_v46 = vld [vmem:[%s8585_s0 + $0x48] sm:$0xff]  ;;  %v969_v47 = vld [vmem:[%s12639_s13 + $0xf8] sm:$0xff] }
  0x1f   : > { %v966_v43 = vld [vmem:[%s12639_s13 + $0xe0] sm:$0xff]  ;;  %v968_v48 = vld [vmem:[%s12639_s13 + $0xf0] sm:$0xff]  ;;  %v1251_v49 = vld [vmem:[%s12665_s21 + $0x18] sm:$0xff] }
  0x20   : > { %v970_v45 = vld [vmem:[%s12639_s13 + $0x100] sm:$0xff]  ;;  %1626 = vmatpush.msra.mxu2 %v1251_v49  ;;  %v4854_v50 = vld [vmem:[%s12640_s14 + $0x8] sm:$0xff]  ;;  %v646_v51 = vld [vmem:[%s8585_s0 + $0x50] sm:$0xff] }
  0x21   : > { %v4853_v52 = vld [vmem:[%s12640_s14] sm:$0xff]  ;;  %v971_v53 = vld [vmem:[%s12639_s13 + $0x108] sm:$0xff]  ;;  %v1250_v55 = vld [vmem:[%s12665_s21 + $0x10] sm:$0xff] }
  0x22   : > { %1014 = vperm.xlu2 %8410, %v946_v13   ;;  %1627 = vmatpush.msra.mxu2 %v1250_v55  ;;  %v1249_v56 = vld [vmem:[%s12665_s21 + $0x8] sm:$0xff]  ;;  %v7580_v57 = vld [vmem:[%s12665_s21 + $0x38] sm:$0xff]  ;;  %v1248_v58 = vld [vmem:[%s12665_s21] sm:$0xff] }
  0x23   : > { %1009 = vperm.xlu1 %8409, %v945_v15   ;;  %v7579_v59 = vld [vmem:[%s12665_s21 + $0x30] sm:$0xff]  ;;  %v4857_v60 = vld [vmem:[%s12640_s14 + $0x20] sm:$0xff]  ;;  %1405 = vmatpush.msra.mxu1 %v7580_v57  ;;  %v647_v61 = vld [vmem:[%s8585_s0 + $0x58] sm:$0xff] }
  0x24   : > { %1004 = vperm.xlu0 %8408, %v944_v16   ;;  %1628 = vmatpush.msra.mxu2 %v1249_v56  ;;  %v4856_v62 = vld [vmem:[%s12640_s14 + $0x18] sm:$0xff]  ;;  %v4855_v63 = vld [vmem:[%s12640_s14 + $0x10] sm:$0xff]  ;;  %v1214_v0 = vld [vmem:[#allocation2 + $0x6] sm:$0xff] }
  0x25   : > { %1406 = vmatpush.msra.mxu1 %v7579_v59  ;;  %v7578_v1 = vld [vmem:[%s12665_s21 + $0x28] sm:$0xff]  ;;  %v7652_v2 = vld [vmem:[%s12665_s21 + $0x58] sm:$0xff]  ;;  %v7577_v3 = vld [vmem:[%s12665_s21 + $0x20] sm:$0xff] }
  0x26   : > { %7544 = vmatmul.msk.f32.gmra.mxu0 %vm678_vm1, %v637_v14  ;;  %1629 = vmatpush.msra.mxu2 %v1248_v58  ;;  %v7651_v4 = vld [vmem:[%s12665_s21 + $0x50] sm:$0xff]  ;;  %v1252_v5 = vld [vmem:[#allocation2 + $0x7] sm:$0xff]  ;;  %v4860_v6 = vld [vmem:[%s12640_s14 + $0x38] sm:$0xff] }
  0x27   : > { %7615 = vmatmul.msk.f32.vlgmr.msra.gmra.mxu2 %vm1176_vm2, %v1214_v0  ;;  %1407 = vmatpush.msra.mxu1 %v7578_v1  ;;  %v7650_v7 = vld [vmem:[%s12665_s21 + $0x48] sm:$0xff]  ;;  %v648_v8 = vld [vmem:[%s8585_s0 + $0x60] sm:$0xff]  ;;  %v4859_v9 = vld [vmem:[%s12640_s14 + $0x30] sm:$0xff] }
  0x28   : > { %8394 = vmatpush.msra.mxu3 %v7652_v2  ;;  %1886 = vmatpush.msrb.mxu0 %v7652_v2  ;;  %v1215_v10 = vld [vmem:[#allocation2 + $0xe] sm:$0xff]  ;;  %v7649_v12 = vld [vmem:[%s12665_s21 + $0x40] sm:$0xff] }
  0x29   : > { %1408 = vmatpush.msra.mxu1 %v7577_v3  ;;  %v4858_v11 = vld [vmem:[%s12640_s14 + $0x28] sm:$0xff]  ;;  %v6331_v16 = vld [vmem:[%s12641_s15] sm:$0xff] }
  0x2a   : > { %1029 = vperm.xlu2 %8410, %v949_v17   ;;  %8395 = vmatpush.msra.mxu3 %v7651_v4  ;;  %v1253_v13 = vld [vmem:[#allocation2 + $0xf] sm:$0xff]  ;;  %v4861_v17 = vld [vmem:[%s12640_s14 + $0x40] sm:$0xff] }
  0x2b   : > { %1024 = vperm.xlu1 %8409, %v948_v19   ;;  %7581 = vmatmul.msk.f32.vlgmr.msra.gmra.mxu1 %vm1176_vm2, %v1252_v5  ;;  %v6332_v14 = vld [vmem:[%s12641_s15 + $0x8] sm:$0xff]  ;;  %v6333_v19 = vld [vmem:[%s12641_s15 + $0x10] sm:$0xf] }
  0x2c   : > { %1019 = vperm.xlu0 %8408, %v947_v20   ;;  %1887 = vmatpush.msrb.mxu0 %v7651_v4  ;;  %v649_v15 = vld [vmem:[%s8585_s0 + $0x68] sm:$0xff]  ;;  %v7728_v20 = vld [vmem:[%s12665_s21 + $0x98] sm:$0xff] }
  0x2d   : > { %8396 = vmatpush.msra.mxu3 %v7650_v7  ;;  %2474 = vmatpush.msrb.mxu1 %v7728_v20 }
  0x2e   : > { %7545 = vmatmul.msk.f32.gmra.mxu0 %vm678_vm1, %v638_v18  ;;  %v650_v18 = vld [vmem:[%s8585_s0 + $0x70] sm:$0xff] }
  0x2f   : > { %7616 = vmatmul.msk.f32.gmra.mxu2 %vm1176_vm2, %v1215_v10  ;;  %8397 = vmatpush.msra.mxu3 %v7649_v12 }
  0x30   : > { %7654 = vmatmul.msk.f32.vlgmr.msra.gmra.mxu3 %vm1176_vm2, %v12651_v54  ;;  %1888 = vmatpush.msrb.mxu0 %v7650_v7  ;;  %v657_v7 = vld [vmem:[%s8585_s0 + $0xa8] sm:$0xff] }
  0x32   : > { %1044 = vperm.xlu2 %8410, %v952_v21   ;;  %1889 = vmatpush.msrb.mxu0 %v7649_v12  ;;  %v651_v21 = vld [vmem:[%s8585_s0 + $0x78] sm:$0xff] }
  0x33   : > { %1039 = vperm.xlu1 %8409, %v951_v23   ;;  %7582 = vmatmul.msk.f32.gmra.mxu1 %vm1176_vm2, %v1253_v13 }
  0x34   : > { %1034 = vperm.xlu0 %8408, %v950_v24   ;;  %v652_v24 = vld [vmem:[%s8585_s0 + $0x80] sm:$0xff] }
  0x36   : > { %7546 = vmatmul.msk.f32.gmra.mxu0 %vm678_vm1, %v639_v22  ;;  %v8801_v22 = vld [vmem:[%s12633_s7] ss:$0 sm:$0xff] }
  0x3a   : > { %1059 = vperm.xlu2 %8410, %v955_v25  }
  0x3b   : > { %1054 = vperm.xlu1 %8409, %v954_v27  }
  0x3c   : > { %1049 = vperm.xlu0 %8408, %v953_v28  }
  0x3e   : > { %7547 = vmatmul.msk.f32.gmra.mxu0 %vm678_vm1, %v640_v26 }
  0x42   : > { %1074 = vperm.xlu2 %8410, %v958_v29  }
  0x43   : > { %1069 = vperm.xlu1 %8409, %v957_v31  }
  0x44   : > { %1064 = vperm.xlu0 %8408, %v956_v32  }
  0x46   : > { %7548 = vmatmul.msk.f32.gmra.mxu0 %vm678_vm1, %v641_v30  ;;  %v653_v30 = vld [vmem:[%s8585_s0 + $0x88] sm:$0xff] }
  0x4a   : > { %1089 = vperm.xlu2 %8410, %v961_v33  }
  0x4b   : > { %1084 = vperm.xlu1 %8409, %v960_v35  }
  0x4c   : > { %1079 = vperm.xlu0 %8408, %v959_v36  }
  0x4e   : > { %7549 = vmatmul.msk.f32.gmra.mxu0 %vm678_vm1, %v642_v34 }
  0x52   : > { %1104 = vperm.xlu2 %8410, %v964_v37  }
  0x53   : > { %1099 = vperm.xlu1 %8409, %v963_v39   ;;  %v654_v39 = vld [vmem:[%s8585_s0 + $0x90] sm:$0xff] }
  0x54   : > { %1094 = vperm.xlu0 %8408, %v962_v40  }
  0x56   : > { %7550 = vmatmul.msk.f32.gmra.mxu0 %vm678_vm1, %v643_v38 }
  0x5a   : > { %1119 = vperm.xlu2 %8410, %v967_v41  }
  0x5b   : > { %1114 = vperm.xlu1 %8409, %v966_v43  }
  0x5c   : > { %1109 = vperm.xlu0 %8408, %v965_v44  }
  0x5e   : > { %7551 = vmatmul.msk.f32.gmra.mxu0 %vm678_vm1, %v644_v42 }
  0x62   : > { %1134 = vperm.xlu2 %8410, %v970_v45  }
  0x63   : > { %1129 = vperm.xlu1 %8409, %v969_v47  }
  0x64   : > { %1124 = vperm.xlu0 %8408, %v968_v48  }
  0x66   : > { %7552 = vmatmul.msk.f32.gmra.mxu0 %vm678_vm1, %v645_v46 }
  0x6a   : > { %4869 = vperm.xlu2 %8410, %v4854_v50   ;;  %v655_v50 = vld [vmem:[%s8585_s0 + $0x98] sm:$0xff] }
  0x6b   : > { %4864 = vperm.xlu1 %8409, %v4853_v52  }
  0x6c   : > { %1139 = vperm.xlu0 %8408, %v971_v53  }
  0x6e   : > { %7553 = vmatmul.msk.f32.gmra.mxu0 %vm678_vm1, %v646_v51 }
  0x72   : > { %4884 = vperm.xlu2 %8410, %v4857_v60   ;;  %v656_v60 = vld [vmem:[%s8585_s0 + $0xa0] sm:$0xff] }
  0x73   : > { %4879 = vperm.xlu1 %8409, %v4856_v62   ;;  %v995_v62 = vpop.permute.xlu2 %994 }
  0x74   : > { %4874 = vperm.xlu0 %8408, %v4855_v63  }
  0x76   : > { %7554 = vmatmul.msk.f32.gmra.mxu0 %vm678_vm1, %v647_v61 }
  0x7a   : > { %4899 = vperm.xlu2 %8410, %v4860_v6  }
  0x7b   : > { %4894 = vperm.xlu1 %8409, %v4859_v9   ;;  %v1000_v10 = vpop.permute.xlu2 %999 }
  0x7c   : > { %4889 = vperm.xlu0 %8408, %v4858_v11  }
  0x7e   : > { %7555 = vmatmul.msk.f32.gmra.mxu0 %vm678_vm1, %v648_v8 }
  0x82   : > { %6341 = vperm.xlu2 %8410, %v6332_v14  }
  0x83   : > { %6336 = vperm.xlu1 %8409, %v6331_v16  }
  0x84   : > { %4904 = vperm.xlu0 %8408, %v4861_v17  }
  0x85   : > { %v975_v26 = vpop.permute.xlu0 %974  ;;  %v985_v41 = vpop.permute.xlu1 %984 }
  0x86   : > { %7556 = vmatmul.msk.f32.gmra.mxu0 %vm678_vm1, %v649_v15 }
  0x8c   : > { %6346 = vperm.xlu0 %8408, %v6333_v19   ;;  %v658_v19 = vld [vmem:[%s8585_s0 + $0xb0] sm:$0xff] }
  0x8d   : > { %v990_v53 = vpop.permute.xlu1 %989 }
  0x8e   : > { %7557 = vmatmul.msk.f32.gmra.mxu0 %vm678_vm1, %v650_v18  ;;  %v980_v33 = vpop.permute.xlu0 %979 }
  0x96   : > { %7558 = vmatmul.msk.f32.gmra.mxu0 %vm678_vm1, %v651_v21 }
  0x9b   : > { %v802_v23 = vpop.f32.mrf.mxu0 }
  0x9c   : > { %v803_v25 = vadd.f32 %v8801_v22, %v802_v23  ;;  %v1005_v23 = vpop.permute.xlu0 %1004 }
  0x9e   : > { %v904_v27 = vmax.f32 %v803_v25, 0.0  ;;  %7559 = vmatmul.msk.f32.gmra.mxu0 %vm678_vm1, %v652_v24 }
  0xa0   : > { %v1142_v28 = vmul.f32 %v975_v26, %v904_v27 }
  0xa2   : > { %1177 = vst.msk [vmem:[#allocation2 + $0x18] sm:$0xff] %vm1176_vm2, %v1142_v28 }
  0xa3   : > { %v805_v29 = vpop.f32.mrf.mxu0 }
  0xa4   : > { %v806_v31 = vadd.f32 %v8801_v22, %v805_v29 }
  0xa6   : > { %v905_v32 = vmax.f32 %v806_v31, 0.0  ;;  %7560 = vmatmul.msk.f32.gmra.mxu0 %vm678_vm1, %v653_v30 }
  0xa8   : > { %v1143_v34 = vmul.f32 %v980_v33, %v905_v32  ;;  %v659_v32 = vld [vmem:[%s8585_s0 + $0xb8] sm:$0xff] }
  0xa9   : > { %v8810_v35 = vld [vmem:[#allocation2 + $0x17] sm:$0xff] }
  0xaa   : > { %v1216_v36 = vld [vmem:[#allocation2 + $0x16] sm:$0xff]  ;;  %1178 = vst.msk [vmem:[#allocation2 + $0x20] sm:$0xff] %vm1176_vm2, %v1143_v34  ;;  %7583 = vmatmul.msk.f32.gmra.mxu1 %vm1176_vm2, %v8810_v35 }
  0xab   : > { %v1735_v37 = vld [vmem:[#allocation2 + $0x18] sm:$0xff]  ;;  %7617 = vmatmul.msk.f32.gmra.mxu2 %vm1176_vm2, %v1216_v36  ;;  %v808_v38 = vpop.f32.mrf.mxu0  ;;  %v1010_v36 = vpop.permute.xlu1 %1009 }
  0xac   : > { %7655 = vmatmul.msk.f32.gmra.mxu3 %vm1176_vm2, %v1735_v37  ;;  %v809_v40 = vadd.f32 %v8801_v22, %v808_v38 }
  0xae   : > { %v906_v42 = vmax.f32 %v809_v40, 0.0  ;;  %7561 = vmatmul.msk.f32.gmra.mxu0 %vm678_vm1, %v654_v39 }
  0xb0   : > { %v1144_v43 = vmul.f32 %v985_v41, %v906_v42  ;;  %v660_v41 = vld [vmem:[%s8585_s0 + $0xc0] sm:$0xff]  ;;  %v7727_v42 = vld [vmem:[%s12665_s21 + $0x90] sm:$0xff] }
  0xb1   : > { %v8820_v44 = vld [vmem:[#allocation2 + $0x1f] sm:$0xff]  ;;  %2475 = vmatpush.msrb.mxu1 %v7727_v42 }
  0xb2   : > { %v1217_v45 = vld [vmem:[#allocation2 + $0x1e] sm:$0xff]  ;;  %1179 = vst.msk [vmem:[#allocation2 + $0x28] sm:$0xff] %vm1176_vm2, %v1144_v43  ;;  %7584 = vmatmul.msk.f32.gmra.mxu1 %vm1176_vm2, %v8820_v44 }
  0xb3   : > { %v1736_v46 = vld [vmem:[#allocation2 + $0x20] sm:$0xff]  ;;  %7618 = vmatmul.msk.f32.gmra.mxu2 %vm1176_vm2, %v1217_v45  ;;  %v811_v49 = vpop.f32.mrf.mxu0 }
  0xb4   : > { %v8826_v47 = vld [vmem:[#allocation2 + $0x19] sm:$0xff]  ;;  %7656 = vmatmul.msk.f32.gmra.mxu3 %vm1176_vm2, %v1736_v46  ;;  %v812_v51 = vadd.f32 %v8801_v22, %v811_v49 }
  0xb5   : > { %v8828_v48 = vld [vmem:[#allocation2 + $0x20] sm:$0xff] }
  0xb6   : > { %3909 = vst [vmem:[#allocation2 + $0x20] sm:$0x1] %v12651_v54  ;;  %v907_v52 = vmax.f32 %v812_v51, 0.0  ;;  %7562 = vmatmul.msk.f32.gmra.mxu0 %vm678_vm1, %v655_v50 }
  0xb8   : > { %v1145_v55 = vmul.f32 %v990_v53, %v907_v52  ;;  %v1015_v52 = vpop.permute.xlu2 %1014 }
  0xb9   : > { %v8835_v56 = vld [vmem:[#allocation2 + $0x27] sm:$0xff] }
  0xba   : > { %v1218_v57 = vld [vmem:[#allocation2 + $0x26] sm:$0xff]  ;;  %1180 = vst.msk [vmem:[#allocation2 + $0x30] sm:$0xff] %vm1176_vm2, %v1145_v55  ;;  %7585 = vmatmul.msk.f32.gmra.mxu1 %vm1176_vm2, %v8835_v56 }
  0xbb   : > { %v1737_v58 = vld [vmem:[#allocation2 + $0x28] sm:$0xff]  ;;  %7619 = vmatmul.msk.f32.gmra.mxu2 %vm1176_vm2, %v1218_v57  ;;  %v814_v59 = vpop.f32.mrf.mxu0 }
  0xbc   : > { %7657 = vmatmul.msk.f32.gmra.mxu3 %vm1176_vm2, %v1737_v58  ;;  %v815_v61 = vadd.f32 %v8801_v22, %v814_v59  ;;  %v8851_v4 = vld [vmem:[#allocation2 + $0x28] sm:$0xff] }
  0xbe   : > { %v908_v63 = vmax.f32 %v815_v61, 0.0  ;;  %7563 = vmatmul.msk.f32.gmra.mxu0 %vm678_vm1, %v656_v60 }
  0xc0   : > { %v1146_v0 = vmul.f32 %v995_v62, %v908_v63  ;;  %v661_v63 = vld [vmem:[%s8585_s0 + $0xc8] sm:$0xff] }
  0xc1   : > { %v8845_v1 = vld [vmem:[#allocation2 + $0x2f] sm:$0xff] }
  0xc2   : > { %v1219_v2 = vld [vmem:[#allocation2 + $0x2e] sm:$0xff]  ;;  %1181 = vst.msk [vmem:[#allocation2 + $0x38] sm:$0xff] %vm1176_vm2, %v1146_v0  ;;  %7586 = vmatmul.msk.f32.gmra.mxu1 %vm1176_vm2, %v8845_v1 }
  0xc3   : > { %v1738_v3 = vld [vmem:[#allocation2 + $0x30] sm:$0xff]  ;;  %7620 = vmatmul.msk.f32.gmra.mxu2 %vm1176_vm2, %v1219_v2  ;;  %v817_v6 = vpop.f32.mrf.mxu0 }
  0xc4   : > { %v8853_v5 = vld [vmem:[#allocation2 + $0x29] sm:$0xff]  ;;  %7658 = vmatmul.msk.f32.gmra.mxu3 %vm1176_vm2, %v1738_v3  ;;  %v818_v8 = vadd.f32 %v8801_v22, %v817_v6  ;;  %v1020_v3 = vpop.permute.xlu0 %1019 }
  0xc5   : > { %3922 = vst [vmem:[#allocation2 + $0x29] sm:$0x1] %v12651_v54  ;;  %v8866_v15 = vld [vmem:[#allocation2 + $0x30] sm:$0xff] }
  0xc6   : > { %v909_v9 = vmax.f32 %v818_v8, 0.0  ;;  %7564 = vmatmul.msk.f32.gmra.mxu0 %vm678_vm1, %v657_v7 }
  0xc8   : > { %v1147_v11 = vmul.f32 %v1000_v10, %v909_v9 }
  0xc9   : > { %v8860_v12 = vld [vmem:[#allocation2 + $0x37] sm:$0xff] }
  0xca   : > { %v1220_v13 = vld [vmem:[#allocation2 + $0x36] sm:$0xff]  ;;  %1182 = vst.msk [vmem:[#allocation2 + $0x40] sm:$0xff] %vm1176_vm2, %v1147_v11  ;;  %7587 = vmatmul.msk.f32.gmra.mxu1 %vm1176_vm2, %v8860_v12 }
  0xcb   : > { %v1739_v14 = vld [vmem:[#allocation2 + $0x38] sm:$0xff]  ;;  %7621 = vmatmul.msk.f32.gmra.mxu2 %vm1176_vm2, %v1220_v13  ;;  %v820_v18 = vpop.f32.mrf.mxu0 }
  0xcc   : > { %v8868_v16 = vld [vmem:[#allocation2 + $0x31] sm:$0xff]  ;;  %7659 = vmatmul.msk.f32.gmra.mxu3 %vm1176_vm2, %v1739_v14  ;;  %v821_v20 = vadd.f32 %v8801_v22, %v820_v18 }
  0xcd   : > { %v8870_v17 = vld [vmem:[#allocation2 + $0x32] sm:$0xff] }
  0xce   : > { %12666 = vst [vmem:[#allocation5_spill] sm:$0xff] %v8870_v17  ;;  %v910_v21 = vmax.f32 %v821_v20, 0.0  ;;  %7565 = vmatmul.msk.f32.gmra.mxu0 %vm678_vm1, %v658_v19  ;;  %v8883_v28 = vld [vmem:[#allocation2 + $0x38] sm:$0xff]  ;;  %v662_v18 = vld [vmem:[%s8585_s0 + $0xd0] sm:$0xff] }
  0xcf   : > { %3935 = vst [vmem:[#allocation2 + $0x32] sm:$0x1] %v12651_v54 }
  0xd0   : > { %v1148_v24 = vmul.f32 %v1005_v23, %v910_v21  ;;  %v1025_v21 = vpop.permute.xlu1 %1024 }
  0xd1   : > { %v8877_v25 = vld [vmem:[#allocation2 + $0x3f] sm:$0xff] }
  0xd2   : > { %v1221_v26 = vld [vmem:[#allocation2 + $0x3e] sm:$0xff]  ;;  %1183 = vst.msk [vmem:[#allocation2 + $0x48] sm:$0xff] %vm1176_vm2, %v1148_v24  ;;  %7588 = vmatmul.msk.f32.gmra.mxu1 %vm1176_vm2, %v8877_v25 }
  0xd3   : > { %v1740_v27 = vld [vmem:[#allocation2 + $0x40] sm:$0xff]  ;;  %7622 = vmatmul.msk.f32.gmra.mxu2 %vm1176_vm2, %v1221_v26  ;;  %v823_v31 = vpop.f32.mrf.mxu0 }
  0xd4   : > { %v8885_v29 = vld [vmem:[#allocation2 + $0x39] sm:$0xff]  ;;  %7660 = vmatmul.msk.f32.gmra.mxu3 %vm1176_vm2, %v1740_v27  ;;  %v824_v33 = vadd.f32 %v8801_v22, %v823_v31 }
  0xd5   : > { %v8887_v30 = vld [vmem:[#allocation2 + $0x3a] sm:$0xff] }
  0xd6   : > { %12667 = vst [vmem:[#allocation6_spill] sm:$0xff] %v8887_v30  ;;  %v911_v34 = vmax.f32 %v824_v33, 0.0  ;;  %7566 = vmatmul.msk.f32.gmra.mxu0 %vm678_vm1, %v659_v32  ;;  %v8905_v45 = vld [vmem:[#allocation2 + $0x40] sm:$0xff] }
  0xd7   : > { %3948 = vst [vmem:[#allocation2 + $0x3b] sm:$0x1] %v12651_v54 }
  0xd8   : > { %v1149_v37 = vmul.f32 %v1010_v36, %v911_v34  ;;  %v663_v36 = vld [vmem:[%s8585_s0 + $0xd8] sm:$0xff] }
  0xd9   : > { %v8894_v38 = vld [vmem:[#allocation2 + $0x47] sm:$0xff] }
  0xda   : > { %v1222_v39 = vld [vmem:[#allocation2 + $0x46] sm:$0xff]  ;;  %1184 = vst.msk [vmem:[#allocation2 + $0x50] sm:$0xff] %vm1176_vm2, %v1149_v37  ;;  %7589 = vmatmul.msk.f32.gmra.mxu1 %vm1176_vm2, %v8894_v38 }
  0xdb   : > { %v1741_v40 = vld [vmem:[#allocation2 + $0x48] sm:$0xff]  ;;  %7623 = vmatmul.msk.f32.gmra.mxu2 %vm1176_vm2, %v1222_v39  ;;  %v826_v43 = vpop.f32.mrf.mxu0 }
  0xdc   : > { %7661 = vmatmul.msk.f32.gmra.mxu3 %vm1176_vm2, %v1741_v40  ;;  %v8907_v46 = vld [vmem:[#allocation2 + $0x41] sm:$0xff]  ;;  %v827_v50 = vadd.f32 %v8801_v22, %v826_v43  ;;  %v1030_v40 = vpop.permute.xlu2 %1029 }
  0xdd   : > { %v8909_v49 = vld [vmem:[#allocation2 + $0x42] sm:$0xff] }
  0xde   : > { %12668 = vst [vmem:[#allocation7_spill] sm:$0xff] %v8909_v49  ;;  %v912_v51 = vmax.f32 %v827_v50, 0.0  ;;  %7567 = vmatmul.msk.f32.gmra.mxu0 %vm678_vm1, %v660_v41  ;;  %v8920_v59 = vld [vmem:[#allocation2 + $0x48] sm:$0xff] }
  0xdf   : > { %3961 = vst [vmem:[#allocation2 + $0x44] sm:$0x1] %v12651_v54 }
  0xe0   : > { %v1150_v53 = vmul.f32 %v1015_v52, %v912_v51 }
  0xe1   : > { %v8914_v55 = vld [vmem:[#allocation2 + $0x4f] sm:$0xff] }
  0xe2   : > { %v1223_v57 = vld [vmem:[#allocation2 + $0x4e] sm:$0xff]  ;;  %1185 = vst.msk [vmem:[#allocation2 + $0x58] sm:$0xff] %vm1176_vm2, %v1150_v53  ;;  %7590 = vmatmul.msk.f32.gmra.mxu1 %vm1176_vm2, %v8914_v55 }
  0xe3   : > { %v1742_v58 = vld [vmem:[#allocation2 + $0x50] sm:$0xff]  ;;  %7624 = vmatmul.msk.f32.gmra.mxu2 %vm1176_vm2, %v1223_v57  ;;  %v829_v62 = vpop.f32.mrf.mxu0 }
  0xe4   : > { %v8922_v60 = vld [vmem:[#allocation2 + $0x49] sm:$0xff]  ;;  %7662 = vmatmul.msk.f32.gmra.mxu3 %vm1176_vm2, %v1742_v58  ;;  %v830_v0 = vadd.f32 %v8801_v22, %v829_v62  ;;  %v664_v58 = vld [vmem:[%s8585_s0 + $0xe0] sm:$0xff] }
  0xe5   : > { %v8924_v61 = vld [vmem:[#allocation2 + $0x4a] sm:$0xff] }
  0xe6   : > { %12669 = vst [vmem:[#allocation8_spill] sm:$0xff] %v8924_v61  ;;  %v913_v2 = vmax.f32 %v830_v0, 0.0  ;;  %7568 = vmatmul.msk.f32.gmra.mxu0 %vm678_vm1, %v661_v63  ;;  %v8937_v10 = vld [vmem:[#allocation2 + $0x50] sm:$0xff]  ;;  %v1035_v0 = vpop.permute.xlu0 %1034 }
  0xe7   : > { %3974 = vst [vmem:[#allocation2 + $0x4d] sm:$0x1] %v12651_v54 }
  0xe8   : > { %v1151_v6 = vmul.f32 %v1020_v3, %v913_v2 }
  0xe9   : > { %v8931_v7 = vld [vmem:[#allocation2 + $0x57] sm:$0xff] }
  0xea   : > { %v1224_v8 = vld [vmem:[#allocation2 + $0x56] sm:$0xff]  ;;  %1186 = vst.msk [vmem:[#allocation2 + $0x60] sm:$0xff] %vm1176_vm2, %v1151_v6  ;;  %7591 = vmatmul.msk.f32.gmra.mxu1 %vm1176_vm2, %v8931_v7 }
  0xeb   : > { %v1743_v9 = vld [vmem:[#allocation2 + $0x58] sm:$0xff]  ;;  %7625 = vmatmul.msk.f32.gmra.mxu2 %vm1176_vm2, %v1224_v8  ;;  %v832_v14 = vpop.f32.mrf.mxu0 }
  0xec   : > { %v8939_v11 = vld [vmem:[#allocation2 + $0x51] sm:$0xff]  ;;  %7663 = vmatmul.msk.f32.gmra.mxu3 %vm1176_vm2, %v1743_v9  ;;  %v833_v19 = vadd.f32 %v8801_v22, %v832_v14 }
  0xed   : > { %v8941_v13 = vld [vmem:[#allocation2 + $0x52] sm:$0xff] }
  0xee   : > { %12670 = vst [vmem:[#allocation9_spill] sm:$0xff] %v8941_v13  ;;  %v914_v20 = vmax.f32 %v833_v19, 0.0  ;;  %7569 = vmatmul.msk.f32.gmra.mxu0 %vm678_vm1, %v662_v18  ;;  %v8954_v31 = vld [vmem:[#allocation2 + $0x58] sm:$0xff] }
  0xef   : > { %3987 = vst [vmem:[#allocation2 + $0x56] sm:$0x1] %v12651_v54 }
  0xf0   : > { %v1152_v23 = vmul.f32 %v1025_v21, %v914_v20  ;;  %v665_v20 = vld [vmem:[%s8585_s0 + $0xe8] sm:$0xff] }
  0xf1   : > { %v8948_v24 = vld [vmem:[#allocation2 + $0x5f] sm:$0xff] }
  0xf2   : > { %v1225_v26 = vld [vmem:[#allocation2 + $0x5e] sm:$0xff]  ;;  %1187 = vst.msk [vmem:[#allocation2 + $0x68] sm:$0xff] %vm1176_vm2, %v1152_v23  ;;  %7592 = vmatmul.msk.f32.gmra.mxu1 %vm1176_vm2, %v8948_v24 }
  0xf3   : > { %v1744_v27 = vld [vmem:[#allocation2 + $0x60] sm:$0xff]  ;;  %7626 = vmatmul.msk.f32.gmra.mxu2 %vm1176_vm2, %v1225_v26  ;;  %v835_v34 = vpop.f32.mrf.mxu0  ;;  %v1040_v26 = vpop.permute.xlu1 %1039 }
  0xf4   : > { %v8956_v32 = vld [vmem:[#allocation2 + $0x59] sm:$0xff]  ;;  %7664 = vmatmul.msk.f32.gmra.mxu3 %vm1176_vm2, %v1744_v27  ;;  %v836_v37 = vadd.f32 %v8801_v22, %v835_v34 }
  0xf5   : > { %v8958_v33 = vld [vmem:[#allocation2 + $0x5a] sm:$0xff] }
  0xf6   : > { %12671 = vst [vmem:[#allocation10_spill] sm:$0xff] %v8958_v33  ;;  %v915_v39 = vmax.f32 %v836_v37, 0.0  ;;  %7570 = vmatmul.msk.f32.gmra.mxu0 %vm678_vm1, %v663_v36  ;;  %v8971_v51 = vld [vmem:[#allocation2 + $0x60] sm:$0xff] }
  0xf7   : > { %4000 = vst [vmem:[#allocation2 + $0x5f] sm:$0x1] %v12651_v54 }
  0xf8   : > { %v1153_v41 = vmul.f32 %v1030_v40, %v915_v39 }
  0xf9   : > { %v8965_v42 = vld [vmem:[#allocation2 + $0x67] sm:$0xff] }
  0xfa   : > { %v1226_v43 = vld [vmem:[#allocation2 + $0x66] sm:$0xff]  ;;  %1188 = vst.msk [vmem:[#allocation2 + $0x70] sm:$0xff] %vm1176_vm2, %v1153_v41  ;;  %7593 = vmatmul.msk.f32.gmra.mxu1 %vm1176_vm2, %v8965_v42 }
  0xfb   : > { %v1745_v50 = vld [vmem:[#allocation2 + $0x68] sm:$0xff]  ;;  %7627 = vmatmul.msk.f32.gmra.mxu2 %vm1176_vm2, %v1226_v43  ;;  %v838_v57 = vpop.f32.mrf.mxu0 }
  0xfc   : > { %v8973_v52 = vld [vmem:[#allocation2 + $0x61] sm:$0xff]  ;;  %7665 = vmatmul.msk.f32.gmra.mxu3 %vm1176_vm2, %v1745_v50  ;;  %v839_v62 = vadd.f32 %v8801_v22, %v838_v57  ;;  %v666_v50 = vld [vmem:[%s8585_s0 + $0xf0] sm:$0xff] }
  0xfd   : > { %v8975_v53 = vld [vmem:[#allocation2 + $0x62] sm:$0xff] }
  0xfe   : > { %12672 = vst [vmem:[#allocation11_spill] sm:$0xff] %v8975_v53  ;;  %v916_v63 = vmax.f32 %v839_v62, 0.0  ;;  %7571 = vmatmul.msk.f32.gmra.mxu0 %vm678_vm1, %v664_v58  ;;  %v8988_v9 = vld [vmem:[#allocation2 + $0x68] sm:$0xff]  ;;  %v1045_v62 = vpop.permute.xlu2 %1044 }
  0xff   : > { %4001 = vst [vmem:[#allocation2 + $0x60] sm:$0xff] %v12651_v54 }
 0x100   : > { %v1154_v2 = vmul.f32 %v1035_v0, %v916_v63  ;;  %v7690_v63 = vld [vmem:[%s12665_s21 + $0x78] sm:$0xff] }
 0x101   : > { %v8982_v3 = vld [vmem:[#allocation2 + $0x6f] sm:$0xff]  ;;  %2180 = vmatpush.msra.mxu0 %v7690_v63 }
 0x102   : > { %v1227_v6 = vld [vmem:[#allocation2 + $0x6e] sm:$0xff]  ;;  %1189 = vst.msk [vmem:[#allocation2 + $0x78] sm:$0xff] %vm1176_vm2, %v1154_v2  ;;  %7594 = vmatmul.msk.f32.gmra.mxu1 %vm1176_vm2, %v8982_v3 }
 0x103   : > { %v1746_v8 = vld [vmem:[#allocation2 + $0x70] sm:$0xff]  ;;  %7628 = vmatmul.msk.f32.gmra.mxu2 %vm1176_vm2, %v1227_v6  ;;  %v841_v19 = vpop.f32.mrf.mxu0  ;;  %v7726_v63 = vld [vmem:[%s12665_s21 + $0x88] sm:$0xff] }
 0x104   : > { %v8990_v14 = vld [vmem:[#allocation2 + $0x69] sm:$0xff]  ;;  %7666 = vmatmul.msk.f32.gmra.mxu3 %vm1176_vm2, %v1746_v8  ;;  %v842_v21 = vadd.f32 %v8801_v22, %v841_v19  ;;  %2476 = vmatpush.msrb.mxu1 %v7726_v63 }
 0x105   : > { %v8992_v18 = vld [vmem:[#allocation2 + $0x6a] sm:$0xff] }
 0x106   : > { %12673 = vst [vmem:[#allocation12_spill] sm:$0xff] %v8992_v18  ;;  %v917_v23 = vmax.f32 %v842_v21, 0.0  ;;  %7572 = vmatmul.msk.f32.gmra.mxu0 %vm678_vm1, %v665_v20  ;;  %v9005_v39 = vld [vmem:[#allocation2 + $0x70] sm:$0xff]  ;;  %v667_v21 = vld [vmem:[%s8585_s0 + $0xf8] sm:$0xff] }
 0x107   : > { %4002 = vst [vmem:[#allocation2 + $0x68] sm:$0xff] %v12651_v54  ;;  %v7689_v19 = vld [vmem:[%s12665_s21 + $0x70] sm:$0xff] }
 0x108   : > { %v1155_v27 = vmul.f32 %v1040_v26, %v917_v23  ;;  %v9030_v23 = vpop.f32.mrf.mxu1  ;;  %2181 = vmatpush.msra.mxu0 %v7689_v19  ;;  %v7688_v26 = vld [vmem:[%s12665_s21 + $0x68] sm:$0xff] }
 0x109   : > { %v8999_v34 = vld [vmem:[#allocation2 + $0x77] sm:$0xff] }
 0x10a   : > { %v1228_v36 = vld [vmem:[#allocation2 + $0x76] sm:$0xff]  ;;  %1190 = vst.msk [vmem:[#allocation2 + $0x80] sm:$0xff] %vm1176_vm2, %v1155_v27  ;;  %7595 = vmatmul.msk.f32.gmra.mxu1 %vm1176_vm2, %v8999_v34  ;;  %2182 = vmatpush.msra.mxu0 %v7688_v26  ;;  %v1055_v26 = vpop.permute.xlu1 %1054 }
 0x10b   : > { %v1747_v37 = vld [vmem:[#allocation2 + $0x78] sm:$0xff]  ;;  %7629 = vmatmul.msk.f32.gmra.mxu2 %vm1176_vm2, %v1228_v36  ;;  %v844_v43 = vpop.f32.mrf.mxu0  ;;  %v7687_v36 = vld [vmem:[%s12665_s21 + $0x60] sm:$0xff] }
 0x10c   : > { %v9007_v40 = vld [vmem:[#allocation2 + $0x71] sm:$0xff]  ;;  %7667 = vmatmul.msk.f32.gmra.mxu3 %vm1176_vm2, %v1747_v37  ;;  %v845_v57 = vadd.f32 %v8801_v22, %v844_v43  ;;  %v1050_v43 = vpop.permute.xlu0 %1049  ;;  %2183 = vmatpush.msra.mxu0 %v7687_v36 }
 0x10d   : > { %v9009_v41 = vld [vmem:[#allocation2 + $0x72] sm:$0xff] }
 0x10e   : > { %12674 = vst [vmem:[#allocation13_spill] sm:$0xff] %v9009_v41  ;;  %v918_v58 = vmax.f32 %v845_v57, 0.0  ;;  %7573 = vmatmul.msk.f32.gmra.mxu0 %vm678_vm1, %v666_v50 }
 0x10f   : > { %4003 = vst [vmem:[#allocation2 + $0x70] sm:$0xff] %v12651_v54 }
 0x110   : > { %v1156_v0 = vmul.f32 %v1045_v62, %v918_v58 }
 0x111   : > { %v9019_v2 = vld [vmem:[#allocation2 + $0x7f] sm:$0xff] }
 0x112   : > { %v1229_v6 = vld [vmem:[#allocation2 + $0x7e] sm:$0xff]  ;;  %1191 = vst.msk [vmem:[#allocation2 + $0x88] sm:$0xff] %vm1176_vm2, %v1156_v0  ;;  %7596 = vmatmul.msk.f32.gmra.mxu1 %vm1176_vm2, %v9019_v2  ;;  %v9049_v0 = vpop.f32.mrf.mxu2 }
 0x113   : > { %v1748_v8 = vld [vmem:[#allocation2 + $0x80] sm:$0xff]  ;;  %7630 = vmatmul.msk.f32.gmra.mxu2 %vm1176_vm2, %v1229_v6  ;;  %v847_v20 = vpop.f32.mrf.mxu0 }
 0x114   : > { %7668 = vmatmul.msk.f32.gmra.mxu3 %vm1176_vm2, %v1748_v8  ;;  %v848_v27 = vadd.f32 %v8801_v22, %v847_v20  ;;  %v668_v8 = vld [vmem:[%s8585_s0 + $0x100] sm:$0xff]  ;;  %v9054_v20 = vpop.f32.mrf.mxu1  ;;  %v1065_v18 = vpop.permute.xlu0 %1064 }
 0x116   : > { %v919_v37 = vmax.f32 %v848_v27, 0.0  ;;  %7574 = vmatmul.msk.f32.gmra.mxu0 %vm678_vm1, %v667_v21 }
 0x118   : > { %v1157_v50 = vmul.f32 %v1050_v43, %v919_v37 }
 0x119   : > { %v9040_v57 = vld [vmem:[#allocation2 + $0x87] sm:$0xff] }
 0x11a   : > { %v1230_v58 = vld [vmem:[#allocation2 + $0x86] sm:$0xff]  ;;  %1192 = vst.msk [vmem:[#allocation2 + $0x90] sm:$0xff] %vm1176_vm2, %v1157_v50  ;;  %7597 = vmatmul.msk.f32.gmra.mxu1 %vm1176_vm2, %v9040_v57  ;;  %v9066_v63 = vpop.f32.mrf.mxu2 }
 0x11b   : > { %v1749_v62 = vld [vmem:[#allocation2 + $0x88] sm:$0xff]  ;;  %7631 = vmatmul.msk.f32.gmra.mxu2 %vm1176_vm2, %v1230_v58  ;;  %v850_v6 = vpop.f32.mrf.mxu0 }
 0x11c   : > { %7669 = vmatmul.msk.f32.gmra.mxu3 %vm1176_vm2, %v1749_v62  ;;  %v851_v19 = vadd.f32 %v8801_v22, %v850_v6  ;;  %v669_v58 = vld [vmem:[%s8585_s0 + $0x108] sm:$0xff]  ;;  %v9068_v6 = vpop.f32.mrf.mxu3 }
 0x11e   : > { %v920_v21 = vmax.f32 %v851_v19, 0.0  ;;  %7575 = vmatmul.msk.f32.gmra.mxu0 %vm678_vm1, %v668_v8  ;;  %v1060_v19 = vpop.permute.xlu2 %1059 }
 0x120   : > { %v1158_v27 = vmul.f32 %v1055_v26, %v920_v21 }
 0x121   : > { %v9057_v36 = vld [vmem:[#allocation2 + $0x8f] sm:$0xff] }
 0x122   : > { %v1231_v37 = vld [vmem:[#allocation2 + $0x8e] sm:$0xff]  ;;  %1193 = vst.msk [vmem:[#allocation2 + $0x98] sm:$0xff] %vm1176_vm2, %v1158_v27  ;;  %7598 = vmatmul.msk.f32.gmra.mxu1 %vm1176_vm2, %v9057_v36 }
 0x123   : > { %v1750_v43 = vld [vmem:[#allocation2 + $0x90] sm:$0xff]  ;;  %7632 = vmatmul.msk.f32.gmra.mxu2 %vm1176_vm2, %v1231_v37  ;;  %v853_v50 = vpop.f32.mrf.mxu0 }
 0x124   : > { %7670 = vmatmul.msk.f32.gmra.mxu3 %vm1176_vm2, %v1750_v43  ;;  %v854_v62 = vadd.f32 %v8801_v22, %v853_v50 }
 0x126   : > { %v921_v8 = vmax.f32 %v854_v62, 0.0  ;;  %7576 = vmatmul.msk.f32.gmra.mxu0 %vm678_vm1, %v669_v58 }
 0x127   : > { %v1416_v21 = vpop.f32.mrf.mxu1 }
 0x128   : > { %v1159_v26 = vmul.f32 %v1060_v19, %v921_v8  ;;  %v12675_v19 = vmov 0.0  }
 0x129   : > { %v9071_v27 = vld [vmem:[#allocation2 + $0x97] sm:$0xff] }
 0x12a   : > { %v1232_v54 = vld [vmem:[#allocation2 + $0x96] sm:$0xff]  ;;  %1194 = vst.msk [vmem:[#allocation2 + $0xa0] sm:$0xff] %vm1176_vm2, %v1159_v26  ;;  %7599 = vmatmul.msk.f32.gmra.mxu1 %vm1176_vm2, %v9071_v27 }
 0x12b   : > { %v1751_v37 = vld [vmem:[#allocation2 + $0x98] sm:$0xff]  ;;  %7633 = vmatmul.msk.f32.gmra.mxu2 %vm1176_vm2, %v1232_v54  ;;  %v856_v43 = vpop.f32.mrf.mxu0 }
 0x12c   : > { %7671 = vmatmul.msk.f32.gmra.mxu3 %vm1176_vm2, %v1751_v37  ;;  %v857_v50 = vadd.f32 %v8801_v22, %v856_v43 }
 0x12e   : > { %v1637_v58 = vpop.f32.mrf.mxu2  ;;  %v922_v62 = vmax.f32 %v857_v50, 0.0  ;;  %7653 = vmatmul.msk.f32.vlgmr.msrb.gmra.mxu0 %vm1176_vm2, %v12675_v19 }
 0x12f   : > { %v1638_v41 = vadd.f32 %v1637_v58, %v1416_v21  ;;  %v1897_v8 = vpop.f32.mrf.mxu3  ;;  %v1419_v53 = vpop.f32.mrf.mxu1 }
 0x130   : > { %v1160_v26 = vmul.f32 %v1065_v18, %v922_v62  ;;  %v1070_v58 = vpop.permute.xlu1 %1069 }
 0x131   : > { %v9081_v33 = vadd.f32 %v1897_v8, %v1638_v41  ;;  %v9083_v13 = vld [vmem:[#allocation2 + $0x9f] sm:$0xff] }
 0x132   : > { %v1233_v54 = vld [vmem:[#allocation2 + $0x9e] sm:$0xff]  ;;  %1195 = vst.msk [vmem:[#allocation2 + $0xa8] sm:$0xff] %vm1176_vm2, %v1160_v26  ;;  %7600 = vmatmul.msk.f32.gmra.mxu1 %vm1176_vm2, %v9083_v13 }
 0x133   : > { %v1752_v61 = vld [vmem:[#allocation2 + $0xa0] sm:$0xff]  ;;  %7634 = vmatmul.msk.f32.gmra.mxu2 %vm1176_vm2, %v1233_v54  ;;  %v859_v21 = vpop.f32.mrf.mxu0 }
 0x134   : > { %7672 = vmatmul.msk.f32.gmra.mxu3 %vm1176_vm2, %v1752_v61  ;;  %v860_v37 = vadd.f32 %v8801_v22, %v859_v21 }
 0x136   : > { %v1640_v43 = vpop.f32.mrf.mxu2  ;;  %v923_v18 = vmax.f32 %v860_v37, 0.0  ;;  %7691 = vmatmul.msk.f32.vlgmr.msra.gmra.mxu0 %vm1176_vm2, %v8810_v35 }
 0x137   : > { %v1641_v41 = vadd.f32 %v1640_v43, %v1419_v53  ;;  %v1900_v50 = vpop.f32.mrf.mxu3  ;;  %v1422_v62 = vpop.f32.mrf.mxu1 }
 0x138   : > { %v1161_v8 = vmul.f32 %v1070_v58, %v923_v18  ;;  %v1075_v18 = vpop.permute.xlu2 %1074 }
 0x139   : > { %v9093_v19 = vadd.f32 %v1900_v50, %v1641_v41  ;;  %v9095_v26 = vld [vmem:[#allocation2 + $0xa7] sm:$0xff] }
 0x13a   : > { %v1234_v54 = vld [vmem:[#allocation2 + $0xa6] sm:$0xff]  ;;  %1196 = vst.msk [vmem:[#allocation2 + $0xb0] sm:$0xff] %vm1176_vm2, %v1161_v8  ;;  %7601 = vmatmul.msk.f32.gmra.mxu1 %vm1176_vm2, %v9095_v26 }
 0x13b   : > { %v1753_v49 = vld [vmem:[#allocation2 + $0xa8] sm:$0xff]  ;;  %7635 = vmatmul.msk.f32.gmra.mxu2 %vm1176_vm2, %v1234_v54  ;;  %v862_v61 = vpop.f32.mrf.mxu0 }
 0x13c   : > { %7673 = vmatmul.msk.f32.gmra.mxu3 %vm1176_vm2, %v1753_v49  ;;  %v863_v35 = vadd.f32 %v8801_v22, %v862_v61 }
 0x13e   : > { %v1643_v53 = vpop.f32.mrf.mxu2  ;;  %v924_v21 = vmax.f32 %v863_v35, 0.0  ;;  %7692 = vmatmul.msk.f32.gmra.mxu0 %vm1176_vm2, %v8820_v44 }
 0x13f   : > { %v1644_v37 = vadd.f32 %v1643_v53, %v1422_v62  ;;  %v1903_v43 = vpop.f32.mrf.mxu3  ;;  %v1425_v41 = vpop.f32.mrf.mxu1 }
 0x140   : > { %v1162_v50 = vmul.f32 %v1075_v18, %v924_v21  ;;  %v1080_v21 = vpop.permute.xlu0 %1079 }
 0x141   : > { %v9105_v58 = vadd.f32 %v1903_v43, %v1644_v37  ;;  %v9107_v8 = vld [vmem:[#allocation2 + $0xaf] sm:$0xff] }
 0x142   : > { %v1235_v54 = vld [vmem:[#allocation2 + $0xae] sm:$0xff]  ;;  %1197 = vst.msk [vmem:[#allocation2 + $0xb8] sm:$0xff] %vm1176_vm2, %v1162_v50  ;;  %7602 = vmatmul.msk.f32.gmra.mxu1 %vm1176_vm2, %v9107_v8 }
 0x143   : > { %v1754_v30 = vld [vmem:[#allocation2 + $0xb0] sm:$0xff]  ;;  %7636 = vmatmul.msk.f32.gmra.mxu2 %vm1176_vm2, %v1235_v54  ;;  %v865_v49 = vpop.f32.mrf.mxu0 }
 0x144   : > { %7674 = vmatmul.msk.f32.gmra.mxu3 %vm1176_vm2, %v1754_v30  ;;  %v866_v44 = vadd.f32 %v8801_v22, %v865_v49 }
 0x146   : > { %v1646_v62 = vpop.f32.mrf.mxu2  ;;  %v925_v61 = vmax.f32 %v866_v44, 0.0  ;;  %7693 = vmatmul.msk.f32.gmra.mxu0 %vm1176_vm2, %v8835_v56 }
 0x147   : > { %v1647_v35 = vadd.f32 %v1646_v62, %v1425_v41  ;;  %v1906_v53 = vpop.f32.mrf.mxu3  ;;  %v1428_v37 = vpop.f32.mrf.mxu1 }
 0x148   : > { %v1163_v43 = vmul.f32 %v1080_v21, %v925_v61  ;;  %v1085_v61 = vpop.permute.xlu1 %1084 }
 0x149   : > { %v9117_v18 = vadd.f32 %v1906_v53, %v1647_v35  ;;  %v9119_v50 = vld [vmem:[#allocation2 + $0xb7] sm:$0xff] }
 0x14a   : > { %v1236_v54 = vld [vmem:[#allocation2 + $0xb6] sm:$0xff]  ;;  %1198 = vst.msk [vmem:[#allocation2 + $0xc0] sm:$0xff] %vm1176_vm2, %v1163_v43  ;;  %7603 = vmatmul.msk.f32.gmra.mxu1 %vm1176_vm2, %v9119_v50 }
 0x14b   : > { %12676 = vst [vmem:[#allocation14_spill] sm:$0xff] %v9117_v18  ;;  %v1755_v17 = vld [vmem:[#allocation2 + $0xb8] sm:$0xff]  ;;  %7637 = vmatmul.msk.f32.gmra.mxu2 %vm1176_vm2, %v1236_v54  ;;  %v868_v30 = vpop.f32.mrf.mxu0 }
 0x14c   : > { %7675 = vmatmul.msk.f32.gmra.mxu3 %vm1176_vm2, %v1755_v17  ;;  %v869_v56 = vadd.f32 %v8801_v22, %v868_v30 }
 0x14e   : > { %v1649_v41 = vpop.f32.mrf.mxu2  ;;  %v926_v49 = vmax.f32 %v869_v56, 0.0  ;;  %7694 = vmatmul.msk.f32.gmra.mxu0 %vm1176_vm2, %v8845_v1 }
 0x14f   : > { %v1650_v44 = vadd.f32 %v1649_v41, %v1428_v37  ;;  %v1909_v62 = vpop.f32.mrf.mxu3  ;;  %v1431_v35 = vpop.f32.mrf.mxu1 }
 0x150   : > { %v1164_v53 = vmul.f32 %v1085_v61, %v926_v49  ;;  %v1090_v49 = vpop.permute.xlu2 %1089 }
 0x151   : > { %v9129_v21 = vadd.f32 %v1909_v62, %v1650_v44  ;;  %v9131_v43 = vld [vmem:[#allocation2 + $0xbf] sm:$0xff] }
 0x152   : > { %v1237_v54 = vld [vmem:[#allocation2 + $0xbe] sm:$0xff]  ;;  %1199 = vst.msk [vmem:[#allocation2 + $0xc8] sm:$0xff] %vm1176_vm2, %v1164_v53  ;;  %7604 = vmatmul.msk.f32.gmra.mxu1 %vm1176_vm2, %v9131_v43 }
 0x153   : > { %12677 = vst [vmem:[#allocation15_spill] sm:$0xff] %v9129_v21  ;;  %v1756_v18 = vld [vmem:[#allocation2 + $0xc0] sm:$0xff]  ;;  %7638 = vmatmul.msk.f32.gmra.mxu2 %vm1176_vm2, %v1237_v54  ;;  %v871_v17 = vpop.f32.mrf.mxu0 }
 0x154   : > { %7676 = vmatmul.msk.f32.gmra.mxu3 %vm1176_vm2, %v1756_v18  ;;  %v872_v1 = vadd.f32 %v8801_v22, %v871_v17 }
 0x156   : > { %v1652_v37 = vpop.f32.mrf.mxu2  ;;  %v927_v30 = vmax.f32 %v872_v1, 0.0  ;;  %7695 = vmatmul.msk.f32.gmra.mxu0 %vm1176_vm2, %v8860_v12 }
 0x157   : > { %v1653_v56 = vadd.f32 %v1652_v37, %v1431_v35  ;;  %v1912_v41 = vpop.f32.mrf.mxu3  ;;  %v1434_v44 = vpop.f32.mrf.mxu1 }
 0x158   : > { %v1165_v62 = vmul.f32 %v1090_v49, %v927_v30  ;;  %v1095_v30 = vpop.permute.xlu0 %1094 }
 0x159   : > { %v9141_v61 = vadd.f32 %v1912_v41, %v1653_v56  ;;  %v9143_v53 = vld [vmem:[#allocation2 + $0xc7] sm:$0xff] }
 0x15a   : > { %v1238_v54 = vld [vmem:[#allocation2 + $0xc6] sm:$0xff]  ;;  %1200 = vst.msk [vmem:[#allocation2 + $0xd0] sm:$0xff] %vm1176_vm2, %v1165_v62  ;;  %7605 = vmatmul.msk.f32.gmra.mxu1 %vm1176_vm2, %v9143_v53 }
 0x15b   : > { %12678 = vst [vmem:[#allocation16_spill] sm:$0xff] %v9141_v61  ;;  %v1757_v21 = vld [vmem:[#allocation2 + $0xc8] sm:$0xff]  ;;  %7639 = vmatmul.msk.f32.gmra.mxu2 %vm1176_vm2, %v1238_v54  ;;  %v874_v18 = vpop.f32.mrf.mxu0 }
 0x15c   : > { %7677 = vmatmul.msk.f32.gmra.mxu3 %vm1176_vm2, %v1757_v21  ;;  %v875_v12 = vadd.f32 %v8801_v22, %v874_v18 }
 0x15e   : > { %v1655_v35 = vpop.f32.mrf.mxu2  ;;  %v928_v17 = vmax.f32 %v875_v12, 0.0  ;;  %7696 = vmatmul.msk.f32.gmra.mxu0 %vm1176_vm2, %v8877_v25  ;;  %v7725_v25 = vld [vmem:[%s12665_s21 + $0x80] sm:$0xff] }
 0x15f   : > { %v1656_v1 = vadd.f32 %v1655_v35, %v1434_v44  ;;  %v1915_v37 = vpop.f32.mrf.mxu3  ;;  %v1437_v56 = vpop.f32.mrf.mxu1  ;;  %2477 = vmatpush.msrb.mxu1 %v7725_v25 }
 0x160   : > { %v1166_v41 = vmul.f32 %v1095_v30, %v928_v17 }
 0x161   : > { %v9153_v49 = vadd.f32 %v1915_v37, %v1656_v1  ;;  %v9155_v62 = vld [vmem:[#allocation2 + $0xcf] sm:$0xff]  ;;  %v1100_v1 = vpop.permute.xlu1 %1099 }
 0x162   : > { %v1239_v54 = vld [vmem:[#allocation2 + $0xce] sm:$0xff]  ;;  %1201 = vst.msk [vmem:[#allocation2 + $0xd8] sm:$0xff] %vm1176_vm2, %v1166_v41  ;;  %7606 = vmatmul.msk.f32.gmra.mxu1 %vm1176_vm2, %v9155_v62 }
 0x163   : > { %12679 = vst [vmem:[#allocation17_spill] sm:$0xff] %v9153_v49  ;;  %v1758_v61 = vld [vmem:[#allocation2 + $0xd0] sm:$0xff]  ;;  %7640 = vmatmul.msk.f32.gmra.mxu2 %vm1176_vm2, %v1239_v54  ;;  %v877_v21 = vpop.f32.mrf.mxu0 }
 0x164   : > { %7678 = vmatmul.msk.f32.gmra.mxu3 %vm1176_vm2, %v1758_v61  ;;  %v878_v44 = vadd.f32 %v8801_v22, %v877_v21 }
 0x166   : > { %v1658_v18 = vpop.f32.mrf.mxu2  ;;  %v929_v12 = vmax.f32 %v878_v44, 0.0  ;;  %7697 = vmatmul.msk.f32.gmra.mxu0 %vm1176_vm2, %v8894_v38 }
 0x167   : > { %v1659_v35 = vadd.f32 %v1658_v18, %v1437_v56  ;;  %v1918_v17 = vpop.f32.mrf.mxu3  ;;  %v1440_v37 = vpop.f32.mrf.mxu1 }
 0x168   : > { %v1167_v30 = vmul.f32 %v1100_v1, %v929_v12  ;;  %v1105_v12 = vpop.permute.xlu2 %1104 }
 0x169   : > { %v9168_v41 = vadd.f32 %v1918_v17, %v1659_v35  ;;  %v9170_v54 = vld [vmem:[#allocation2 + $0xd7] sm:$0xff] }
 0x16a   : > { %v1240_v49 = vld [vmem:[#allocation2 + $0xd6] sm:$0xff]  ;;  %1202 = vst.msk [vmem:[#allocation2 + $0xe0] sm:$0xff] %vm1176_vm2, %v1167_v30  ;;  %7607 = vmatmul.msk.f32.gmra.mxu1 %vm1176_vm2, %v9170_v54 }
 0x16b   : > { %12680 = vst [vmem:[#allocation18_spill] sm:$0xff] %v9168_v41  ;;  %v1759_v61 = vld [vmem:[#allocation2 + $0xd8] sm:$0xff]  ;;  %7641 = vmatmul.msk.f32.gmra.mxu2 %vm1176_vm2, %v1240_v49  ;;  %v880_v56 = vpop.f32.mrf.mxu0 }
 0x16c   : > { %7679 = vmatmul.msk.f32.gmra.mxu3 %vm1176_vm2, %v1759_v61  ;;  %v881_v38 = vadd.f32 %v8801_v22, %v880_v56 }
 0x16e   : > { %v1661_v25 = vpop.f32.mrf.mxu2  ;;  %v930_v21 = vmax.f32 %v881_v38, 0.0  ;;  %7698 = vmatmul.msk.f32.gmra.mxu0 %vm1176_vm2, %v8914_v55 }
 0x16f   : > { %v1662_v44 = vadd.f32 %v1661_v25, %v1440_v37  ;;  %v1921_v18 = vpop.f32.mrf.mxu3  ;;  %v1443_v35 = vpop.f32.mrf.mxu1 }
 0x170   : > { %v1168_v17 = vmul.f32 %v1105_v12, %v930_v21  ;;  %v1110_v21 = vpop.permute.xlu0 %1109 }
 0x171   : > { %v9180_v1 = vadd.f32 %v1921_v18, %v1662_v44  ;;  %v9182_v30 = vld [vmem:[#allocation2 + $0xdf] sm:$0xff] }
 0x172   : > { %v1241_v49 = vld [vmem:[#allocation2 + $0xde] sm:$0xff]  ;;  %1203 = vst.msk [vmem:[#allocation2 + $0xe8] sm:$0xff] %vm1176_vm2, %v1168_v17  ;;  %7608 = vmatmul.msk.f32.gmra.mxu1 %vm1176_vm2, %v9182_v30 }
 0x173   : > { %12681 = vst [vmem:[#allocation19_spill] sm:$0xff] %v9180_v1  ;;  %v1760_v41 = vld [vmem:[#allocation2 + $0xe0] sm:$0xff]  ;;  %7642 = vmatmul.msk.f32.gmra.mxu2 %vm1176_vm2, %v1241_v49  ;;  %v883_v37 = vpop.f32.mrf.mxu0 }
 0x174   : > { %7680 = vmatmul.msk.f32.gmra.mxu3 %vm1176_vm2, %v1760_v41  ;;  %v884_v55 = vadd.f32 %v8801_v22, %v883_v37 }
 0x176   : > { %v1664_v61 = vpop.f32.mrf.mxu2  ;;  %v931_v56 = vmax.f32 %v884_v55, 0.0  ;;  %7699 = vmatmul.msk.f32.gmra.mxu0 %vm1176_vm2, %v8931_v7 }
 0x177   : > { %v1665_v38 = vadd.f32 %v1664_v61, %v1443_v35  ;;  %v1924_v25 = vpop.f32.mrf.mxu3  ;;  %v1446_v44 = vpop.f32.mrf.mxu1 }
 0x178   : > { %v1169_v18 = vmul.f32 %v1110_v21, %v931_v56  ;;  %v1115_v56 = vpop.permute.xlu1 %1114 }
 0x179   : > { %v9192_v12 = vadd.f32 %v1924_v25, %v1665_v38  ;;  %v9194_v17 = vld [vmem:[#allocation2 + $0xe7] sm:$0xff] }
 0x17a   : > { %v1242_v49 = vld [vmem:[#allocation2 + $0xe6] sm:$0xff]  ;;  %1204 = vst.msk [vmem:[#allocation2 + $0xf0] sm:$0xff] %vm1176_vm2, %v1169_v18  ;;  %7609 = vmatmul.msk.f32.gmra.mxu1 %vm1176_vm2, %v9194_v17 }
 0x17b   : > { %12682 = vst [vmem:[#allocation20_spill] sm:$0xff] %v9192_v12  ;;  %v9196_v1 = vld [vmem:[#allocation2 + $0xe8] sm:$0xff]  ;;  %7643 = vmatmul.msk.f32.gmra.mxu2 %vm1176_vm2, %v1242_v49  ;;  %v886_v7 = vpop.f32.mrf.mxu0 }
 0x17c   : > { %12683 = vst [vmem:[#allocation21_spill] sm:$0xff] %v9196_v1  ;;  %7681 = vmatmul.msk.f32.gmra.mxu3 %vm1176_vm2, %v9196_v1  ;;  %v887_v41 = vadd.f32 %v8801_v22, %v886_v7  ;;  %v7804_v7 = vld [vmem:[%s12665_s21 + $0xd8] sm:$0xff] }
 0x17d   : > { %3062 = vmatpush.msrb.mxu3 %v7804_v7 }
 0x17e   : > { %v1667_v35 = vpop.f32.mrf.mxu2  ;;  %v932_v37 = vmax.f32 %v887_v41, 0.0  ;;  %7700 = vmatmul.msk.f32.gmra.mxu0 %vm1176_vm2, %v8948_v24 }
 0x17f   : > { %v1668_v55 = vadd.f32 %v1667_v35, %v1446_v44  ;;  %v1927_v61 = vpop.f32.mrf.mxu3  ;;  %v1449_v38 = vpop.f32.mrf.mxu1  ;;  %v7766_v44 = vld [vmem:[%s12665_s21 + $0xb8] sm:$0xff] }
 0x180   : > { %v1170_v25 = vmul.f32 %v1115_v56, %v932_v37  ;;  %2768 = vmatpush.msrb.mxu2 %v7766_v44  ;;  %v7765_v37 = vld [vmem:[%s12665_s21 + $0xb0] sm:$0xff]  ;;  %v7802_v44 = vld [vmem:[%s12665_s21 + $0xc8] sm:$0xff] }
 0x181   : > { %v9207_v21 = vadd.f32 %v1927_v61, %v1668_v55  ;;  %v9209_v18 = vld [vmem:[#allocation2 + $0xef] sm:$0xff] }
 0x182   : > { %v1243_v49 = vld [vmem:[#allocation2 + $0xee] sm:$0xff]  ;;  %1205 = vst.msk [vmem:[#allocation2 + $0xf8] sm:$0xff] %vm1176_vm2, %v1170_v25  ;;  %7610 = vmatmul.msk.f32.gmra.mxu1 %vm1176_vm2, %v9209_v18  ;;  %2769 = vmatpush.msrb.mxu2 %v7765_v37  ;;  %v7801_v37 = vld [vmem:[%s12665_s21 + $0xc0] sm:$0xff] }
 0x183   : > { %12684 = vst [vmem:[#allocation22_spill] sm:$0xff] %v9207_v21  ;;  %v9211_v12 = vld [vmem:[#allocation2 + $0xf0] sm:$0xff]  ;;  %7644 = vmatmul.msk.f32.gmra.mxu2 %vm1176_vm2, %v1243_v49  ;;  %v889_v24 = vpop.f32.mrf.mxu0  ;;  %v1120_v49 = vpop.permute.xlu2 %1119 }
 0x184   : > { %12685 = vst [vmem:[#allocation23_spill] sm:$0xff] %v9211_v12  ;;  %7682 = vmatmul.msk.f32.gmra.mxu3 %vm1176_vm2, %v9211_v12  ;;  %v890_v41 = vadd.f32 %v8801_v22, %v889_v24  ;;  %v7803_v55 = vld [vmem:[%s12665_s21 + $0xd0] sm:$0xff]  ;;  %v7764_v24 = vld [vmem:[%s12665_s21 + $0xa8] sm:$0xff] }
 0x185   : > { %3063 = vmatpush.msrb.mxu3 %v7803_v55  ;;  %2770 = vmatpush.msrb.mxu2 %v7764_v24 }
 0x186   : > { %v1670_v35 = vpop.f32.mrf.mxu2  ;;  %v933_v61 = vmax.f32 %v890_v41, 0.0  ;;  %7701 = vmatmul.msk.f32.gmra.mxu0 %vm1176_vm2, %v8965_v42 }
 0x187   : > { %v1671_v56 = vadd.f32 %v1670_v35, %v1449_v38  ;;  %v1930_v25 = vpop.f32.mrf.mxu3  ;;  %v1452_v22 = vpop.f32.mrf.mxu1  ;;  %3064 = vmatpush.msrb.mxu3 %v7802_v44  ;;  %v7763_v35 = vld [vmem:[%s12665_s21 + $0xa0] sm:$0xff] }
 0x188   : > { %v1171_v7 = vmul.f32 %v1120_v49, %v933_v61  ;;  %2771 = vmatpush.msrb.mxu2 %v7763_v35  ;;  %v8421_v61 = vld [vmem:[%s12633_s7] ss:$0 sm:$0xff] }
 0x189   : > { %v9240_v21 = vadd.f32 %v1930_v25, %v1671_v56  ;;  %v9242_v38 = vld [vmem:[#allocation2 + $0xf7] sm:$0xff]  ;;  %3065 = vmatpush.msrb.mxu3 %v7801_v37 }
 0x18a   : > { %v1244_v41 = vld [vmem:[#allocation2 + $0xf6] sm:$0xff]  ;;  %1206 = vst.msk [vmem:[#allocation2 + $0x100] sm:$0xff] %vm1176_vm2, %v1171_v7  ;;  %7611 = vmatmul.msk.f32.gmra.mxu1 %vm1176_vm2, %v9242_v38  ;;  %v1125_v7 = vpop.permute.xlu0 %1124 }
 0x18b   : > { %12686 = vst [vmem:[#allocation24_spill] sm:$0xff] %v9240_v21  ;;  %v9244_v42 = vld [vmem:[#allocation2 + $0xf8] sm:$0xff]  ;;  %7645 = vmatmul.msk.f32.gmra.mxu2 %vm1176_vm2, %v1244_v41  ;;  %v892_v55 = vpop.f32.mrf.mxu0 }
 0x18c   : > { %12687 = vst [vmem:[#allocation25_spill] sm:$0xff] %v9244_v42  ;;  %7683 = vmatmul.msk.f32.gmra.mxu3 %vm1176_vm2, %v9244_v42  ;;  %v893_v56 = vadd.f32 %v8421_v61, %v892_v55 }
 0x18e   : > { %v1673_v25 = vpop.f32.mrf.mxu2  ;;  %v934_v49 = vmax.f32 %v893_v56, 0.0  ;;  %7702 = vmatmul.msk.f32.gmra.mxu0 %vm1176_vm2, %v8982_v3 }
 0x18f   : > { %v1674_v24 = vadd.f32 %v1673_v25, %v1452_v22  ;;  %v1933_v44 = vpop.f32.mrf.mxu3  ;;  %v1455_v41 = vpop.f32.mrf.mxu1 }
 0x190   : > { %v1172_v21 = vmul.f32 %v1125_v7, %v934_v49  ;;  %v1130_v49 = vpop.permute.xlu1 %1129 }
 0x191   : > { %v9263_v12 = vadd.f32 %v1933_v44, %v1674_v24  ;;  %v9265_v42 = vld [vmem:[#allocation2 + $0xff] sm:$0xff] }
 0x192   : > { %v1245_v35 = vld [vmem:[#allocation2 + $0xfe] sm:$0xff]  ;;  %1207 = vst.msk [vmem:[#allocation2 + $0x108] sm:$0xff] %vm1176_vm2, %v1172_v21  ;;  %7612 = vmatmul.msk.f32.gmra.mxu1 %vm1176_vm2, %v9265_v42 }
 0x193   : > { %12688 = vst [vmem:[#allocation26_spill] sm:$0xff] %v9263_v12  ;;  %v9267_v1 = vld [vmem:[#allocation2 + $0x100] sm:$0xff]  ;;  %7646 = vmatmul.msk.f32.gmra.mxu2 %vm1176_vm2, %v1245_v35  ;;  %v895_v3 = vpop.f32.mrf.mxu0 }
 0x194   : > { %7684 = vmatmul.msk.f32.gmra.mxu3 %vm1176_vm2, %v9267_v1  ;;  %v896_v22 = vadd.f32 %v8421_v61, %v895_v3 }
 0x196   : > { %v1676_v37 = vpop.f32.mrf.mxu2  ;;  %v935_v55 = vmax.f32 %v896_v22, 0.0  ;;  %7703 = vmatmul.msk.f32.gmra.mxu0 %vm1176_vm2, %v8999_v34 }
 0x197   : > { %v1677_v56 = vadd.f32 %v1676_v37, %v1455_v41  ;;  %v1936_v25 = vpop.f32.mrf.mxu3  ;;  %v1458_v24 = vpop.f32.mrf.mxu1 }
 0x198   : > { %v1173_v21 = vmul.f32 %v1130_v49, %v935_v55 }
 0x199   : > { %v9277_v44 = vadd.f32 %v1936_v25, %v1677_v56  ;;  %v9279_v7 = vld [vmem:[#allocation2 + $0x107] sm:$0xff]  ;;  %v1135_v56 = vpop.permute.xlu2 %1134 }
 0x19a   : > { %v1246_v35 = vld [vmem:[#allocation2 + $0x106] sm:$0xff]  ;;  %1208 = vst.msk [vmem:[#allocation2 + $0x110] sm:$0xff] %vm1176_vm2, %v1173_v21  ;;  %7613 = vmatmul.msk.f32.gmra.mxu1 %vm1176_vm2, %v9279_v7 }
 0x19b   : > { %12689 = vst [vmem:[#allocation27_spill] sm:$0xff] %v9277_v44  ;;  %v9281_v12 = vld [vmem:[#allocation2 + $0x108] sm:$0xff]  ;;  %7647 = vmatmul.msk.f32.gmra.mxu2 %vm1176_vm2, %v1246_v35  ;;  %v898_v34 = vpop.f32.mrf.mxu0  ;;  %v7842_v35 = vld [vmem:[%s12665_s21 + $0xf8] sm:$0xff] }
 0x19c   : > { %12690 = vst [vmem:[#allocation28_spill] sm:$0xff] %v9281_v12  ;;  %7685 = vmatmul.msk.f32.gmra.mxu3 %vm1176_vm2, %v9281_v12  ;;  %v899_v41 = vadd.f32 %v8421_v61, %v898_v34  ;;  %v7880_v34 = vld [vmem:[%s12665_s21 + $0x118] sm:$0xff]  ;;  %3356 = vmatpush.msrb.mxu0 %v7842_v35  ;;  %v1140_v35 = vpop.permute.xlu0 %1139 }
 0x19d   : > { %3650 = vmatpush.msra.mxu1 %v7880_v34  ;;  %v2321_v12 = vld [vmem:[#allocation2 + $0x18] sm:$0xff] }
 0x19e   : > { %v1679_v3 = vpop.f32.mrf.mxu2  ;;  %v936_v22 = vmax.f32 %v899_v41, 0.0  ;;  %7704 = vmatmul.msk.f32.gmra.mxu0 %vm1176_vm2, %v9019_v2 }
 0x19f   : > { %v1680_v37 = vadd.f32 %v1679_v3, %v1458_v24  ;;  %v1939_v55 = vpop.f32.mrf.mxu3  ;;  %v1461_v25 = vpop.f32.mrf.mxu1 }
 0x1a0   : > { %v1174_v49 = vmul.f32 %v1135_v56, %v936_v22 }
 0x1a1   : > { %v9291_v21 = vadd.f32 %v1939_v55, %v1680_v37  ;;  %v9299_v44 = vld [vmem:[#allocation2 + $0x10f] sm:$0xff] }
 0x1a2   : > { %v1247_v24 = vld [vmem:[#allocation2 + $0x10e] sm:$0xff]  ;;  %1209 = vst.msk [vmem:[#allocation2 + $0x118] sm:$0xff] %vm1176_vm2, %v1174_v49  ;;  %7614 = vmatmul.msk.f32.gmra.mxu1 %vm1176_vm2, %v9299_v44 }
 0x1a3   : > { %12691 = vst [vmem:[#allocation29_spill] sm:$0xff] %v9291_v21  ;;  %v9301_v41 = vld [vmem:[#allocation2 + $0x110] sm:$0xff]  ;;  %7648 = vmatmul.msk.f32.gmra.mxu2 %vm1176_vm2, %v1247_v24  ;;  %v901_v2 = vpop.f32.mrf.mxu0 }
 0x1a4   : > { %7686 = vmatmul.msk.f32.gmra.mxu3 %vm1176_vm2, %v9301_v41  ;;  %v902_v3 = vadd.f32 %v8421_v61, %v901_v2 }
 0x1a6   : > { %v1682_v22 = vpop.f32.mrf.mxu2  ;;  %v937_v37 = vmax.f32 %v902_v3, 0.0  ;;  %7705 = vmatmul.msk.f32.gmra.mxu0 %vm1176_vm2, %v9040_v57 }
 0x1a7   : > { %v1683_v55 = vadd.f32 %v1682_v22, %v1461_v25  ;;  %v1942_v56 = vpop.f32.mrf.mxu3  ;;  %v1464_v34 = vpop.f32.mrf.mxu1  ;;  %v2616_v22 = vld [vmem:[#allocation2 + $0x21] sm:$0xff] }
 0x1a8   : > { %v1175_v49 = vmul.f32 %v1140_v35, %v937_v37 }
 0x1a9   : > { %v9311_v21 = vadd.f32 %v1942_v56, %v1683_v55 }
 0x1aa   : > { %1210 = vst.msk [vmem:[#allocation2 + $0x120] sm:$0xff] %vm1176_vm2, %v1175_v49  ;;  %7729 = vmatmul.msk.f32.vlgmr.msrb.gmra.mxu1 %vm1176_vm2, %v2321_v12 }
 0x1ab   : > { %7767 = vmatmul.msk.f32.vlgmr.msrb.gmra.mxu2 %vm1176_vm2, %v8826_v47  ;;  %v9319_v61 = vpop.f32.mrf.mxu0 }
 0x1ac   : > { %7805 = vmatmul.msk.f32.vlgmr.msrb.gmra.mxu3 %vm1176_vm2, %v8851_v4 }
 0x1ae   : > { %v1685_v25 = vpop.f32.mrf.mxu2  ;;  %7706 = vmatmul.msk.f32.gmra.mxu0 %vm1176_vm2, %v9057_v36 }
 0x1af   : > { %v1686_v57 = vadd.f32 %v1685_v25, %v1464_v34  ;;  %v1945_v24 = vpop.f32.mrf.mxu3  ;;  %v1467_v2 = vpop.f32.mrf.mxu1 }
 0x1b1   : > { %v9323_v3 = vadd.f32 %v1945_v24, %v1686_v57 }
 0x1b2   : > { %7730 = vmatmul.msk.f32.gmra.mxu1 %vm1176_vm2, %v8828_v48 }
 0x1b3   : > { %7768 = vmatmul.msk.f32.gmra.mxu2 %vm1176_vm2, %v2616_v22  ;;  %v9330_v47 = vpop.f32.mrf.mxu0 }
 0x1b4   : > { %7806 = vmatmul.msk.f32.gmra.mxu3 %vm1176_vm2, %v8866_v15 }
 0x1b6   : > { %v1688_v12 = vpop.f32.mrf.mxu2  ;;  %7707 = vmatmul.msk.f32.gmra.mxu0 %vm1176_vm2, %v9071_v27 }
 0x1b7   : > { %v1689_v37 = vadd.f32 %v1688_v12, %v1467_v2  ;;  %v1948_v55 = vpop.f32.mrf.mxu3  ;;  %v1470_v36 = vpop.f32.mrf.mxu1 }
 0x1b9   : > { %v9334_v56 = vadd.f32 %v1948_v55, %v1689_v37 }
 0x1ba   : > { %7731 = vmatmul.msk.f32.gmra.mxu1 %vm1176_vm2, %v8851_v4 }
 0x1bb   : > { %7769 = vmatmul.msk.f32.gmra.mxu2 %vm1176_vm2, %v8853_v5  ;;  %v9342_v48 = vpop.f32.mrf.mxu0 }
 0x1bc   : > { %7807 = vmatmul.msk.f32.gmra.mxu3 %vm1176_vm2, %v8883_v28 }
 0x1be   : > { %v1691_v35 = vpop.f32.mrf.mxu2  ;;  %7708 = vmatmul.msk.f32.gmra.mxu0 %vm1176_vm2, %v9083_v13 }
 0x1bf   : > { %v1692_v34 = vadd.f32 %v1691_v35, %v1470_v36  ;;  %v1951_v49 = vpop.f32.mrf.mxu3  ;;  %v1473_v27 = vpop.f32.mrf.mxu1 }
 0x1c1   : > { %v9346_v25 = vadd.f32 %v1951_v49, %v1692_v34 }
 0x1c2   : > { %7732 = vmatmul.msk.f32.gmra.mxu1 %vm1176_vm2, %v8866_v15 }
 0x1c3   : > { %7770 = vmatmul.msk.f32.gmra.mxu2 %vm1176_vm2, %v8868_v16  ;;  %v9354_v4 = vpop.f32.mrf.mxu0 }
 0x1c4   : > { %7808 = vmatmul.msk.f32.gmra.mxu3 %vm1176_vm2, %v8905_v45 }
 0x1c6   : > { %v1694_v57 = vpop.f32.mrf.mxu2  ;;  %7709 = vmatmul.msk.f32.gmra.mxu0 %vm1176_vm2, %v9095_v26 }
 0x1c7   : > { %v1695_v24 = vadd.f32 %v1694_v57, %v1473_v27  ;;  %v1954_v2 = vpop.f32.mrf.mxu3  ;;  %v1476_v13 = vpop.f32.mrf.mxu1 }
 0x1c9   : > { %v9358_v22 = vadd.f32 %v1954_v2, %v1695_v24 }
 0x1ca   : > { %7733 = vmatmul.msk.f32.gmra.mxu1 %vm1176_vm2, %v8883_v28 }
 0x1cb   : > { %7771 = vmatmul.msk.f32.gmra.mxu2 %vm1176_vm2, %v8885_v29  ;;  %v9366_v15 = vpop.f32.mrf.mxu0 }
 0x1cc   : > { %7809 = vmatmul.msk.f32.gmra.mxu3 %vm1176_vm2, %v8920_v59 }
 0x1ce   : > { %v1697_v12 = vpop.f32.mrf.mxu2  ;;  %7710 = vmatmul.msk.f32.gmra.mxu0 %vm1176_vm2, %v9107_v8 }
 0x1cf   : > { %v1698_v37 = vadd.f32 %v1697_v12, %v1476_v13  ;;  %v1957_v55 = vpop.f32.mrf.mxu3  ;;  %v1479_v26 = vpop.f32.mrf.mxu1  ;;  %v7841_v12 = vld [vmem:[%s12665_s21 + $0xf0] sm:$0xff] }
 0x1d0   : > { %3357 = vmatpush.msrb.mxu0 %v7841_v12 }
 0x1d1   : > { %v9370_v36 = vadd.f32 %v1957_v55, %v1698_v37 }
 0x1d2   : > { %7734 = vmatmul.msk.f32.gmra.mxu1 %vm1176_vm2, %v8905_v45 }
 0x1d3   : > { %7772 = vmatmul.msk.f32.gmra.mxu2 %vm1176_vm2, %v8907_v46  ;;  %v9378_v28 = vpop.f32.mrf.mxu0 }
 0x1d4   : > { %7810 = vmatmul.msk.f32.gmra.mxu3 %vm1176_vm2, %v8937_v10 }
 0x1d6   : > { %v1700_v35 = vpop.f32.mrf.mxu2  ;;  %7711 = vmatmul.msk.f32.gmra.mxu0 %vm1176_vm2, %v9119_v50 }
 0x1d7   : > { %v1701_v34 = vadd.f32 %v1700_v35, %v1479_v26  ;;  %v1960_v49 = vpop.f32.mrf.mxu3  ;;  %v1482_v8 = vpop.f32.mrf.mxu1  ;;  %v7879_v35 = vld [vmem:[%s12665_s21 + $0x110] sm:$0xff] }
 0x1d8   : > { %3651 = vmatpush.msra.mxu1 %v7879_v35 }
 0x1d9   : > { %v9382_v27 = vadd.f32 %v1960_v49, %v1701_v34 }
 0x1da   : > { %7735 = vmatmul.msk.f32.gmra.mxu1 %vm1176_vm2, %v8920_v59 }
 0x1db   : > { %12692 = vst [vmem:[#allocation30_spill] sm:$0xff] %v9382_v27  ;;  %7773 = vmatmul.msk.f32.gmra.mxu2 %vm1176_vm2, %v8922_v60  ;;  %v9390_v45 = vpop.f32.mrf.mxu0  ;;  %v3519_v27 = vld [vmem:[#allocation2 + $0xda] sm:$0xff] }
 0x1dc   : > { %7811 = vmatmul.msk.f32.gmra.mxu3 %vm1176_vm2, %v8954_v31 }
 0x1de   : > { %v1703_v57 = vpop.f32.mrf.mxu2  ;;  %7712 = vmatmul.msk.f32.gmra.mxu0 %vm1176_vm2, %v9131_v43 }
 0x1df   : > { %v1704_v24 = vadd.f32 %v1703_v57, %v1482_v8  ;;  %v1963_v2 = vpop.f32.mrf.mxu3  ;;  %v1485_v50 = vpop.f32.mrf.mxu1 }
 0x1e1   : > { %v9394_v13 = vadd.f32 %v1963_v2, %v1704_v24 }
 0x1e2   : > { %7736 = vmatmul.msk.f32.gmra.mxu1 %vm1176_vm2, %v8937_v10 }
 0x1e3   : > { %12693 = vst [vmem:[#allocation31_spill] sm:$0xff] %v9394_v13  ;;  %7774 = vmatmul.msk.f32.gmra.mxu2 %vm1176_vm2, %v8939_v11  ;;  %v9402_v59 = vpop.f32.mrf.mxu0  ;;  %v12719_v13 = vld [vmem:[#allocation5_spill] sm:$0xff] }
 0x1e4   : > { %7812 = vmatmul.msk.f32.gmra.mxu3 %vm1176_vm2, %v8971_v51 }
 0x1e6   : > { %v1706_v37 = vpop.f32.mrf.mxu2  ;;  %7713 = vmatmul.msk.f32.gmra.mxu0 %vm1176_vm2, %v9143_v53 }
 0x1e7   : > { %v1707_v43 = vadd.f32 %v1706_v37, %v1485_v50  ;;  %v1966_v55 = vpop.f32.mrf.mxu3  ;;  %v1488_v10 = vpop.f32.mrf.mxu1 }
 0x1e9   : > { %v9409_v26 = vadd.f32 %v1966_v55, %v1707_v43 }
 0x1ea   : > { %7737 = vmatmul.msk.f32.gmra.mxu1 %vm1176_vm2, %v8954_v31 }
 0x1eb   : > { %12694 = vst [vmem:[#allocation32_spill] sm:$0xff] %v9409_v26  ;;  %7775 = vmatmul.msk.f32.gmra.mxu2 %vm1176_vm2, %v8956_v32  ;;  %v9420_v34 = vpop.f32.mrf.mxu0  ;;  %v9749_v26 = vld [vmem:[#allocation2 + $0x121] sm:$0xff] }
 0x1ec   : > { %7813 = vmatmul.msk.f32.gmra.mxu3 %vm1176_vm2, %v8988_v9 }
 0x1ee   : > { %v1709_v53 = vpop.f32.mrf.mxu2  ;;  %7714 = vmatmul.msk.f32.gmra.mxu0 %vm1176_vm2, %v9155_v62 }
 0x1ef   : > { %v1710_v49 = vadd.f32 %v1709_v53, %v1488_v10  ;;  %v1969_v8 = vpop.f32.mrf.mxu3  ;;  %v1491_v57 = vpop.f32.mrf.mxu1 }
 0x1f1   : > { %v9424_v24 = vadd.f32 %v1969_v8, %v1710_v49 }
 0x1f2   : > { %7738 = vmatmul.msk.f32.gmra.mxu1 %vm1176_vm2, %v8971_v51  ;;  %v2919_v51 = vld [vmem:[#allocation2 + $0x78] sm:$0xff] }
 0x1f3   : > { %12695 = vst [vmem:[#allocation33_spill] sm:$0xff] %v9424_v24  ;;  %7776 = vmatmul.msk.f32.gmra.mxu2 %vm1176_vm2, %v8973_v52  ;;  %v9432_v31 = vpop.f32.mrf.mxu0  ;;  %v9520_v24 = vld [vmem:[#allocation2 + $0x99] sm:$0xff] }
 0x1f4   : > { %7814 = vmatmul.msk.f32.gmra.mxu3 %vm1176_vm2, %v9005_v39 }
 0x1f6   : > { %v1712_v2 = vpop.f32.mrf.mxu2  ;;  %7715 = vmatmul.msk.f32.gmra.mxu0 %vm1176_vm2, %v9170_v54 }
 0x1f7   : > { %v1713_v50 = vadd.f32 %v1712_v2, %v1491_v57  ;;  %v1972_v12 = vpop.f32.mrf.mxu3  ;;  %v1494_v62 = vpop.f32.mrf.mxu1 }
 0x1f9   : > { %v9436_v37 = vadd.f32 %v1972_v12, %v1713_v50  ;;  %v9460_v12 = vld [vmem:[#allocation2 + $0x79] sm:$0xff] }
 0x1fa   : > { %7739 = vmatmul.msk.f32.gmra.mxu1 %vm1176_vm2, %v8988_v9  ;;  %v2920_v9 = vld [vmem:[#allocation2 + $0x80] sm:$0xff] }
 0x1fb   : > { %12696 = vst [vmem:[#allocation34_spill] sm:$0xff] %v9436_v37  ;;  %7777 = vmatmul.msk.f32.gmra.mxu2 %vm1176_vm2, %v8990_v14  ;;  %v9443_v43 = vpop.f32.mrf.mxu0 }
 0x1fc   : > { %7815 = vmatmul.msk.f32.gmra.mxu3 %vm1176_vm2, %v2919_v51 }
 0x1fe   : > { %v1715_v55 = vpop.f32.mrf.mxu2  ;;  %7716 = vmatmul.msk.f32.gmra.mxu0 %vm1176_vm2, %v9182_v30 }
 0x1ff   : > { %v1716_v10 = vadd.f32 %v1715_v55, %v1494_v62  ;;  %v1975_v35 = vpop.f32.mrf.mxu3  ;;  %v1497_v54 = vpop.f32.mrf.mxu1 }
 0x201   : > { %v9447_v53 = vadd.f32 %v1975_v35, %v1716_v10 }
 0x202   : > { %7740 = vmatmul.msk.f32.gmra.mxu1 %vm1176_vm2, %v9005_v39  ;;  %v2921_v39 = vld [vmem:[#allocation2 + $0x88] sm:$0xff] }
 0x203   : > { %12697 = vst [vmem:[#allocation35_spill] sm:$0xff] %v9447_v53  ;;  %7778 = vmatmul.msk.f32.gmra.mxu2 %vm1176_vm2, %v9007_v40  ;;  %v9454_v49 = vpop.f32.mrf.mxu0 }
 0x204   : > { %7816 = vmatmul.msk.f32.gmra.mxu3 %vm1176_vm2, %v2920_v9 }
 0x206   : > { %v1718_v8 = vpop.f32.mrf.mxu2  ;;  %7717 = vmatmul.msk.f32.gmra.mxu0 %vm1176_vm2, %v9194_v17 }
 0x207   : > { %v1719_v57 = vadd.f32 %v1718_v8, %v1497_v54  ;;  %v1978_v2 = vpop.f32.mrf.mxu3  ;;  %v1500_v30 = vpop.f32.mrf.mxu1  ;;  %v9472_v8 = vld [vmem:[#allocation2 + $0x81] sm:$0xff] }
 0x209   : > { %v9458_v50 = vadd.f32 %v1978_v2, %v1719_v57 }
 0x20a   : > { %7741 = vmatmul.msk.f32.gmra.mxu1 %vm1176_vm2, %v2919_v51  ;;  %v2922_v51 = vld [vmem:[#allocation2 + $0x90] sm:$0xff] }
 0x20b   : > { %12698 = vst [vmem:[#allocation36_spill] sm:$0xff] %v9458_v50  ;;  %7779 = vmatmul.msk.f32.gmra.mxu2 %vm1176_vm2, %v9460_v12  ;;  %v9466_v62 = vpop.f32.mrf.mxu0 }
 0x20c   : > { %7817 = vmatmul.msk.f32.gmra.mxu3 %vm1176_vm2, %v2921_v39 }
 0x20e   : > { %v1721_v55 = vpop.f32.mrf.mxu2  ;;  %7718 = vmatmul.msk.f32.gmra.mxu0 %vm1176_vm2, %v9209_v18 }
 0x20f   : > { %v1722_v10 = vadd.f32 %v1721_v55, %v1500_v30  ;;  %v1981_v35 = vpop.f32.mrf.mxu3  ;;  %v1503_v17 = vpop.f32.mrf.mxu1 }
 0x211   : > { %v9470_v54 = vadd.f32 %v1981_v35, %v1722_v10  ;;  %v9484_v35 = vld [vmem:[#allocation2 + $0x89] sm:$0xff] }
 0x212   : > { %7742 = vmatmul.msk.f32.gmra.mxu1 %vm1176_vm2, %v2920_v9  ;;  %v2923_v9 = vld [vmem:[#allocation2 + $0x98] sm:$0xff] }
 0x213   : > { %12699 = vst [vmem:[#allocation37_spill] sm:$0xff] %v9470_v54  ;;  %7780 = vmatmul.msk.f32.gmra.mxu2 %vm1176_vm2, %v9472_v8  ;;  %v9478_v57 = vpop.f32.mrf.mxu0 }
 0x214   : > { %7818 = vmatmul.msk.f32.gmra.mxu3 %vm1176_vm2, %v2922_v51 }
 0x216   : > { %v1724_v2 = vpop.f32.mrf.mxu2  ;;  %7719 = vmatmul.msk.f32.gmra.mxu0 %vm1176_vm2, %v9242_v38 }
 0x217   : > { %v1725_v30 = vadd.f32 %v1724_v2, %v1503_v17  ;;  %v1984_v55 = vpop.f32.mrf.mxu3  ;;  %v1506_v18 = vpop.f32.mrf.mxu1 }
 0x219   : > { %v9482_v10 = vadd.f32 %v1984_v55, %v1725_v30  ;;  %v9496_v55 = vld [vmem:[#allocation2 + $0x91] sm:$0xff] }
 0x21a   : > { %7743 = vmatmul.msk.f32.gmra.mxu1 %vm1176_vm2, %v2921_v39  ;;  %v2924_v39 = vld [vmem:[#allocation2 + $0xa0] sm:$0xff] }
 0x21b   : > { %12700 = vst [vmem:[#allocation38_spill] sm:$0xff] %v9482_v10  ;;  %7781 = vmatmul.msk.f32.gmra.mxu2 %vm1176_vm2, %v9484_v35  ;;  %v9492_v38 = vpop.f32.mrf.mxu0 }
 0x21c   : > { %7819 = vmatmul.msk.f32.gmra.mxu3 %vm1176_vm2, %v2923_v9 }
 0x21e   : > { %v1727_v54 = vpop.f32.mrf.mxu2  ;;  %7720 = vmatmul.msk.f32.gmra.mxu0 %vm1176_vm2, %v9265_v42 }
 0x21f   : > { %v1728_v50 = vadd.f32 %v1727_v54, %v1506_v18  ;;  %v1987_v17 = vpop.f32.mrf.mxu3  ;;  %v1509_v2 = vpop.f32.mrf.mxu1  ;;  %v7840_v54 = vld [vmem:[%s12665_s21 + $0xe8] sm:$0xff]  ;;  %v1632_v18 = vadd.f32 %v9049_v0, %v9030_v23 }
 0x220   : > { %3358 = vmatpush.msrb.mxu0 %v7840_v54  ;;  %v7878_v54 = vld [vmem:[%s12665_s21 + $0x108] sm:$0xff] }
 0x221   : > { %v9494_v30 = vadd.f32 %v1987_v17, %v1728_v50  ;;  %v7839_v50 = vld [vmem:[%s12665_s21 + $0xe0] sm:$0xff]  ;;  %v1993_v10 = vadd.f32 %v9319_v61, %v1632_v18  ;;  %3652 = vmatpush.msra.mxu1 %v7878_v54  ;;  %v2925_v0 = vld [vmem:[#allocation2 + $0xa8] sm:$0xff] }
 0x222   : > { %7744 = vmatmul.msk.f32.gmra.mxu1 %vm1176_vm2, %v2922_v51  ;;  %3359 = vmatpush.msrb.mxu0 %v7839_v50 }
 0x223   : > { %12701 = vst [vmem:[#allocation39_spill] sm:$0xff] %v9494_v30  ;;  %7782 = vmatmul.msk.f32.gmra.mxu2 %vm1176_vm2, %v9496_v55  ;;  %v9518_v37 = vpop.f32.mrf.mxu0  ;;  %v2287_v23 = vadd.f32 %v9330_v47, %v1993_v10 }
 0x224   : > { %7820 = vmatmul.msk.f32.gmra.mxu3 %vm1176_vm2, %v2924_v39 }
 0x226   : > { %v1730_v42 = vpop.f32.mrf.mxu2  ;;  %7721 = vmatmul.msk.f32.gmra.mxu0 %vm1176_vm2, %v9279_v7  ;;  %v1635_v7 = vadd.f32 %v9066_v63, %v9054_v20  ;;  %v2926_v20 = vld [vmem:[#allocation2 + $0xb0] sm:$0xff] }
 0x227   : > { %v1731_v51 = vadd.f32 %v1730_v42, %v1509_v2  ;;  %v1990_v17 = vpop.f32.mrf.mxu3  ;;  %v2479_v30 = vpop.f32.mrf.mxu1 }
 0x228   : > { %v2581_v61 = vadd.f32 %v2479_v30, %v2287_v23  ;;  %v1994_v47 = vadd.f32 %v9068_v6, %v1635_v7 }
 0x229   : > { %v9513_v53 = vadd.f32 %v1990_v17, %v1731_v51  ;;  %v2059_v17 = vld [vmem:[#allocation2 + $0x117] sm:$0xff] }
 0x22a   : > { %7745 = vmatmul.msk.f32.gmra.mxu1 %vm1176_vm2, %v2923_v9  ;;  %v9534_v9 = vld [vmem:[#allocation2 + $0xa1] sm:$0xff]  ;;  %v2288_v51 = vadd.f32 %v9342_v48, %v1994_v47  ;;  %v9546_v48 = vld [vmem:[#allocation2 + $0xa9] sm:$0xff] }
 0x22b   : > { %12702 = vst [vmem:[#allocation40_spill] sm:$0xff] %v9513_v53  ;;  %7783 = vmatmul.msk.f32.gmra.mxu2 %vm1176_vm2, %v9520_v24  ;;  %v9540_v63 = vpop.f32.mrf.mxu0  ;;  %v9724_v53 = vld [vmem:[#allocation2 + $0x111] sm:$0xff] }
 0x22c   : > { %7821 = vmatmul.msk.f32.gmra.mxu3 %vm1176_vm2, %v2925_v0 }
 0x22e   : > { %v2773_v2 = vpop.f32.mrf.mxu2  ;;  %7722 = vmatmul.msk.f32.gmra.mxu0 %vm1176_vm2, %v9299_v44 }
 0x22f   : > { %v2875_v42 = vadd.f32 %v2773_v2, %v2581_v61  ;;  %v3067_v50 = vpop.f32.mrf.mxu3  ;;  %v2482_v18 = vpop.f32.mrf.mxu1  ;;  %v2927_v61 = vld [vmem:[#allocation2 + $0xb8] sm:$0xff] }
 0x230   : > { %v2582_v44 = vadd.f32 %v2482_v18, %v2288_v51  ;;  %v2060_v18 = vld [vmem:[#allocation2 + $0x11f] sm:$0xff] }
 0x231   : > { %v9532_v10 = vadd.f32 %v3067_v50, %v2875_v42 }
 0x232   : > { %7746 = vmatmul.msk.f32.gmra.mxu1 %vm1176_vm2, %v2924_v39  ;;  %v2289_v39 = vadd.f32 %v9354_v4, %v9081_v33  ;;  %v9559_v33 = vld [vmem:[#allocation2 + $0xb1] sm:$0xff]  ;;  %v2290_v4 = vadd.f32 %v9366_v15, %v9093_v19  ;;  %v9573_v19 = vld [vmem:[#allocation2 + $0xb9] sm:$0xff]  ;;  %v2291_v15 = vadd.f32 %v9378_v28, %v9105_v58  ;;  %v9587_v58 = vld [vmem:[#allocation2 + $0xc1] sm:$0xff] }
 0x233   : > { %7784 = vmatmul.msk.f32.gmra.mxu2 %vm1176_vm2, %v9534_v9  ;;  %v9554_v42 = vpop.f32.mrf.mxu0  ;;  %v12703_v28 = vld [vmem:[#allocation14_spill] sm:$0xff] }
 0x234   : > { %7822 = vmatmul.msk.f32.gmra.mxu3 %vm1176_vm2, %v2926_v20 }
 0x236   : > { %v2776_v30 = vpop.f32.mrf.mxu2  ;;  %7723 = vmatmul.msk.f32.gmra.mxu0 %vm1176_vm2, %v2059_v17 }
 0x237   : > { %v2876_v6 = vadd.f32 %v2776_v30, %v2582_v44  ;;  %v3070_v54 = vpop.f32.mrf.mxu3  ;;  %v2485_v23 = vpop.f32.mrf.mxu1 }
 0x238   : > { %v2583_v2 = vadd.f32 %v2485_v23, %v2289_v39 }
 0x239   : > { %v9544_v7 = vadd.f32 %v3070_v54, %v2876_v6 }
 0x23a   : > { %7747 = vmatmul.msk.f32.gmra.mxu1 %vm1176_vm2, %v2925_v0  ;;  %v2928_v0 = vld [vmem:[#allocation2 + $0xc0] sm:$0xff] }
 0x23b   : > { %7785 = vmatmul.msk.f32.gmra.mxu2 %vm1176_vm2, %v9546_v48  ;;  %v9569_v39 = vpop.f32.mrf.mxu0 }
 0x23c   : > { %7823 = vmatmul.msk.f32.gmra.mxu3 %vm1176_vm2, %v2927_v61 }
 0x23e   : > { %v2779_v50 = vpop.f32.mrf.mxu2  ;;  %7724 = vmatmul.msk.f32.gmra.mxu0 %vm1176_vm2, %v2060_v18 }
 0x23f   : > { %v2877_v47 = vadd.f32 %v2779_v50, %v2583_v2  ;;  %v3073_v51 = vpop.f32.mrf.mxu3  ;;  %v2488_v44 = vpop.f32.mrf.mxu1 }
 0x240   : > { %v2584_v17 = vadd.f32 %v2488_v44, %v2290_v4 }
 0x241   : > { %v9557_v30 = vadd.f32 %v3073_v51, %v2877_v47 }
 0x242   : > { %7748 = vmatmul.msk.f32.gmra.mxu1 %vm1176_vm2, %v2926_v20  ;;  %v2929_v20 = vld [vmem:[#allocation2 + $0xc8] sm:$0xff] }
 0x243   : > { %7786 = vmatmul.msk.f32.gmra.mxu2 %vm1176_vm2, %v9559_v33 }
 0x244   : > { %7824 = vmatmul.msk.f32.gmra.mxu3 %vm1176_vm2, %v2928_v0 }
 0x246   : > { %v2782_v6 = vpop.f32.mrf.mxu2  ;;  %7843 = vmatmul.msk.f32.vlgmr.msrb.gmra.mxu0 %vm1176_vm2, %v8853_v5 }
 0x247   : > { %v2878_v54 = vadd.f32 %v2782_v6, %v2584_v17  ;;  %v3076_v23 = vpop.f32.mrf.mxu3  ;;  %v2491_v2 = vpop.f32.mrf.mxu1  ;;  %v2930_v6 = vld [vmem:[#allocation2 + $0xd0] sm:$0xff] }
 0x248   : > { %v2585_v18 = vadd.f32 %v2491_v2, %v2291_v15  ;;  %v9585_v17 = vpop.f32.mrf.mxu0 }
 0x249   : > { %v9571_v50 = vadd.f32 %v3076_v23, %v2878_v54 }
 0x24a   : > { %7749 = vmatmul.msk.f32.gmra.mxu1 %vm1176_vm2, %v2927_v61  ;;  %v2292_v61 = vadd.f32 %v9390_v45, %v12703_v28  ;;  %v12704_v45 = vld [vmem:[#allocation15_spill] sm:$0xff] }
 0x24b   : > { %7787 = vmatmul.msk.f32.gmra.mxu2 %vm1176_vm2, %v9573_v19 }
 0x24c   : > { %7825 = vmatmul.msk.f32.gmra.mxu3 %vm1176_vm2, %v2929_v20 }
 0x24e   : > { %v2785_v5 = vpop.f32.mrf.mxu2  ;;  %7844 = vmatmul.msk.f32.gmra.mxu0 %vm1176_vm2, %v8868_v16 }
 0x24f   : > { %v2879_v47 = vadd.f32 %v2785_v5, %v2585_v18  ;;  %v3079_v51 = vpop.f32.mrf.mxu3  ;;  %v2494_v44 = vpop.f32.mrf.mxu1  ;;  %v9599_v5 = vld [vmem:[#allocation2 + $0xc9] sm:$0xff] }
 0x250   : > { %v2586_v54 = vadd.f32 %v2494_v44, %v2292_v61 }
 0x251   : > { %v9583_v4 = vadd.f32 %v3079_v51, %v2879_v47  ;;  %v2931_v47 = vld [vmem:[#allocation2 + $0xd8] sm:$0xff]  ;;  %v9606_v51 = vpop.f32.mrf.mxu0 }
 0x252   : > { %7750 = vmatmul.msk.f32.gmra.mxu1 %vm1176_vm2, %v2928_v0  ;;  %v2293_v0 = vadd.f32 %v9402_v59, %v12704_v45  ;;  %v9613_v59 = vld [vmem:[#allocation2 + $0xd1] sm:$0xff] }
 0x253   : > { %7788 = vmatmul.msk.f32.gmra.mxu2 %vm1176_vm2, %v9587_v58 }
 0x254   : > { %7826 = vmatmul.msk.f32.gmra.mxu3 %vm1176_vm2, %v2930_v6 }
 0x256   : > { %v2788_v16 = vpop.f32.mrf.mxu2  ;;  %7845 = vmatmul.msk.f32.gmra.mxu0 %vm1176_vm2, %v8885_v29 }
 0x257   : > { %v2880_v23 = vadd.f32 %v2788_v16, %v2586_v54  ;;  %v3082_v2 = vpop.f32.mrf.mxu3  ;;  %v2497_v15 = vpop.f32.mrf.mxu1 }
 0x258   : > { %v2587_v44 = vadd.f32 %v2497_v15, %v2293_v0 }
 0x259   : > { %v9597_v18 = vadd.f32 %v3082_v2, %v2880_v23  ;;  %v2932_v2 = vld [vmem:[#allocation2 + $0xe0] sm:$0xff]  ;;  %v9621_v45 = vpop.f32.mrf.mxu0 }
 0x25a   : > { %7751 = vmatmul.msk.f32.gmra.mxu1 %vm1176_vm2, %v2929_v20  ;;  %v12705_v20 = vld [vmem:[#allocation16_spill] sm:$0xff] }
 0x25b   : > { %7789 = vmatmul.msk.f32.gmra.mxu2 %vm1176_vm2, %v9599_v5  ;;  %v2294_v23 = vadd.f32 %v9420_v34, %v12705_v20  ;;  %v9627_v34 = vld [vmem:[#allocation2 + $0xd9] sm:$0xff] }
 0x25c   : > { %7827 = vmatmul.msk.f32.gmra.mxu3 %vm1176_vm2, %v2931_v47 }
 0x25e   : > { %v2791_v29 = vpop.f32.mrf.mxu2  ;;  %7846 = vmatmul.msk.f32.gmra.mxu0 %vm1176_vm2, %v8907_v46 }
 0x25f   : > { %v2881_v28 = vadd.f32 %v2791_v29, %v2587_v44  ;;  %v3085_v61 = vpop.f32.mrf.mxu3  ;;  %v2500_v54 = vpop.f32.mrf.mxu1 }
 0x260   : > { %v2588_v15 = vadd.f32 %v2500_v54, %v2294_v23  ;;  %v12707_v54 = vld [vmem:[#allocation21_spill] sm:$0xff] }
 0x261   : > { %v9611_v16 = vadd.f32 %v3085_v61, %v2881_v28 }
 0x262   : > { %7752 = vmatmul.msk.f32.gmra.mxu1 %vm1176_vm2, %v2930_v6  ;;  %v12706_v6 = vld [vmem:[#allocation17_spill] sm:$0xff] }
 0x263   : > { %7790 = vmatmul.msk.f32.gmra.mxu2 %vm1176_vm2, %v9613_v59  ;;  %v2295_v61 = vadd.f32 %v9432_v31, %v12706_v6  ;;  %v7877_v31 = vld [vmem:[%s12665_s21 + $0x100] sm:$0xff]  ;;  %v12708_v6 = vld [vmem:[#allocation18_spill] sm:$0xff] }
 0x264   : > { %7828 = vmatmul.msk.f32.gmra.mxu3 %vm1176_vm2, %v2932_v2  ;;  %3653 = vmatpush.msra.mxu1 %v7877_v31  ;;  %v9662_v31 = vld [vmem:[#allocation2 + $0xe9] sm:$0xff] }
 0x266   : > { %v2794_v46 = vpop.f32.mrf.mxu2  ;;  %7847 = vmatmul.msk.f32.gmra.mxu0 %vm1176_vm2, %v8922_v60 }
 0x267   : > { %v2882_v0 = vadd.f32 %v2794_v46, %v2588_v15  ;;  %v3088_v44 = vpop.f32.mrf.mxu3  ;;  %v2503_v29 = vpop.f32.mrf.mxu1 }
 0x268   : > { %v2589_v20 = vadd.f32 %v2503_v29, %v2295_v61  ;;  %v9638_v46 = vpop.f32.mrf.mxu0  ;;  %v2296_v29 = vadd.f32 %v9443_v43, %v12708_v6  ;;  %v2348_v6 = vld [vmem:[#allocation2 + $0xf0] sm:$0xff] }
 0x269   : > { %v9625_v28 = vadd.f32 %v3088_v44, %v2882_v0 }
 0x26a   : > { %7753 = vmatmul.msk.f32.gmra.mxu1 %vm1176_vm2, %v2931_v47  ;;  %v9645_v47 = vld [vmem:[#allocation2 + $0xe1] sm:$0xff] }
 0x26b   : > { %7791 = vmatmul.msk.f32.gmra.mxu2 %vm1176_vm2, %v9627_v34 }
 0x26c   : > { %7829 = vmatmul.msk.f32.gmra.mxu3 %vm1176_vm2, %v12707_v54 }
 0x26e   : > { %v2797_v23 = vpop.f32.mrf.mxu2  ;;  %7848 = vmatmul.msk.f32.gmra.mxu0 %vm1176_vm2, %v8939_v11  ;;  %v12709_v11 = vld [vmem:[#allocation23_spill] sm:$0xff] }
 0x26f   : > { %v2883_v15 = vadd.f32 %v2797_v23, %v2589_v20  ;;  %v3091_v60 = vpop.f32.mrf.mxu3  ;;  %v2506_v0 = vpop.f32.mrf.mxu1 }
 0x270   : > { %v2590_v61 = vadd.f32 %v2506_v0, %v2296_v29  ;;  %v9660_v43 = vpop.f32.mrf.mxu0  ;;  %v12710_v0 = vld [vmem:[#allocation25_spill] sm:$0xff]  ;;  %v9673_v29 = vld [vmem:[#allocation2 + $0xf1] sm:$0xff] }
 0x271   : > { %v9640_v44 = vadd.f32 %v3091_v60, %v2883_v15 }
 0x272   : > { %7754 = vmatmul.msk.f32.gmra.mxu1 %vm1176_vm2, %v2932_v2  ;;  %v2347_v2 = vld [vmem:[#allocation2 + $0xe8] sm:$0xff] }
 0x273   : > { %7792 = vmatmul.msk.f32.gmra.mxu2 %vm1176_vm2, %v9645_v47 }
 0x274   : > { %7830 = vmatmul.msk.f32.gmra.mxu3 %vm1176_vm2, %v12709_v11 }
 0x276   : > { %v2800_v54 = vpop.f32.mrf.mxu2  ;;  %7849 = vmatmul.msk.f32.gmra.mxu0 %vm1176_vm2, %v8956_v32 }
 0x277   : > { %v2884_v20 = vadd.f32 %v2800_v54, %v2590_v61  ;;  %v3094_v23 = vpop.f32.mrf.mxu3  ;;  %v9656_v15 = vpop.f32.mrf.mxu1  ;;  %v9686_v54 = vld [vmem:[#allocation2 + $0xf9] sm:$0xff] }
 0x278   : > { %v9678_v11 = vpop.f32.mrf.mxu0 }
 0x279   : > { %v9658_v60 = vadd.f32 %v3094_v23, %v2884_v20  ;;  %12711 = vst [vmem:[#allocation14_spill] sm:$0xff] %v9678_v11  ;;  %v12712_v20 = vld [vmem:[#allocation28_spill] sm:$0xff]  ;;  %v12721_v11 = vld [vmem:[#allocation6_spill] sm:$0xff] }
 0x27a   : > { %7755 = vmatmul.msk.f32.gmra.mxu1 %vm1176_vm2, %v2347_v2  ;;  %v9699_v2 = vld [vmem:[#allocation2 + $0x101] sm:$0xff] }
 0x27b   : > { %7793 = vmatmul.msk.f32.gmra.mxu2 %vm1176_vm2, %v9662_v31 }
 0x27c   : > { %7831 = vmatmul.msk.f32.gmra.mxu3 %vm1176_vm2, %v12710_v0 }
 0x27e   : > { %7850 = vmatmul.msk.f32.gmra.mxu0 %vm1176_vm2, %v8973_v52  ;;  %v2349_v52 = vld [vmem:[#allocation2 + $0xf8] sm:$0xff] }
 0x27f   : > { %v9671_v32 = vpop.f32.mrf.mxu1 }
 0x280   : > { %v9693_v23 = vpop.f32.mrf.mxu0 }
 0x281   : > { %12713 = vst [vmem:[#allocation15_spill] sm:$0xff] %v9693_v23 }
 0x282   : > { %7756 = vmatmul.msk.f32.gmra.mxu1 %vm1176_vm2, %v2348_v6 }
 0x283   : > { %7794 = vmatmul.msk.f32.gmra.mxu2 %vm1176_vm2, %v9673_v29 }
 0x284   : > { %7832 = vmatmul.msk.f32.gmra.mxu3 %vm1176_vm2, %v9267_v1 }
 0x286   : > { %7851 = vmatmul.msk.f32.gmra.mxu0 %vm1176_vm2, %v8990_v14  ;;  %v2350_v14 = vld [vmem:[#allocation2 + $0x100] sm:$0xff] }
 0x287   : > { %v9684_v61 = vpop.f32.mrf.mxu1 }
 0x288   : > { %v9708_v0 = vpop.f32.mrf.mxu0 }
 0x289   : > { %12714 = vst [vmem:[#allocation16_spill] sm:$0xff] %v9708_v0 }
 0x28a   : > { %7757 = vmatmul.msk.f32.gmra.mxu1 %vm1176_vm2, %v2349_v52  ;;  %v9712_v52 = vld [vmem:[#allocation2 + $0x109] sm:$0xff] }
 0x28b   : > { %7795 = vmatmul.msk.f32.gmra.mxu2 %vm1176_vm2, %v9686_v54 }
 0x28c   : > { %7833 = vmatmul.msk.f32.gmra.mxu3 %vm1176_vm2, %v12712_v20  ;;  %v2939_v20 = vld [vmem:[#allocation2 + $0x118] sm:$0xff] }
 0x28e   : > { %7852 = vmatmul.msk.f32.gmra.mxu0 %vm1176_vm2, %v9007_v40  ;;  %v2351_v40 = vld [vmem:[#allocation2 + $0x108] sm:$0xff] }
 0x28f   : > { %v9697_v1 = vpop.f32.mrf.mxu1 }
 0x292   : > { %7758 = vmatmul.msk.f32.gmra.mxu1 %vm1176_vm2, %v2350_v14  ;;  %v2352_v14 = vld [vmem:[#allocation2 + $0x110] sm:$0xff] }
 0x293   : > { %7796 = vmatmul.msk.f32.gmra.mxu2 %vm1176_vm2, %v9699_v2 }
 0x294   : > { %7834 = vmatmul.msk.f32.gmra.mxu3 %vm1176_vm2, %v9301_v41 }
 0x296   : > { %7853 = vmatmul.msk.f32.gmra.mxu0 %vm1176_vm2, %v9460_v12  ;;  %v9722_v12 = vpop.f32.mrf.mxu0 }
 0x297   : > { %v9710_v6 = vpop.f32.mrf.mxu1  ;;  %12715 = vst [vmem:[#allocation17_spill] sm:$0xff] %v9722_v12 }
 0x29a   : > { %7759 = vmatmul.msk.f32.gmra.mxu1 %vm1176_vm2, %v2351_v40  ;;  %v2940_v40 = vld [vmem:[#allocation2 + $0x120] sm:$0xff] }
 0x29b   : > { %7797 = vmatmul.msk.f32.gmra.mxu2 %vm1176_vm2, %v9712_v52 }
 0x29c   : > { %7835 = vmatmul.msk.f32.gmra.mxu3 %vm1176_vm2, %v2939_v20 }
 0x29e   : > { %7854 = vmatmul.msk.f32.gmra.mxu0 %vm1176_vm2, %v9472_v8  ;;  %v9734_v8 = vld [vmem:[#allocation2 + $0x119] sm:$0xff]  ;;  %v9739_v12 = vpop.f32.mrf.mxu0 }
 0x29f   : > { %v9720_v41 = vpop.f32.mrf.mxu1  ;;  %12716 = vst [vmem:[#allocation21_spill] sm:$0xff] %v9739_v12 }
 0x2a2   : > { %7760 = vmatmul.msk.f32.gmra.mxu1 %vm1176_vm2, %v2352_v14  ;;  %v9741_v14 = vld [vmem:[#allocation2] sm:$0xff] }
 0x2a3   : > { %7798 = vmatmul.msk.f32.gmra.mxu2 %vm1176_vm2, %v9724_v53 }
 0x2a4   : > { %7836 = vmatmul.msk.f32.gmra.mxu3 %vm1176_vm2, %v2940_v40 }
 0x2a6   : > { %7855 = vmatmul.msk.f32.gmra.mxu0 %vm1176_vm2, %v9484_v35 }
 0x2a7   : > { %v9732_v0 = vpop.f32.mrf.mxu1 }
 0x2aa   : > { %7761 = vmatmul.msk.f32.gmra.mxu1 %vm1176_vm2, %v2939_v20  ;;  %v9756_v20 = vpop.f32.mrf.mxu0 }
 0x2ab   : > { %7799 = vmatmul.msk.f32.gmra.mxu2 %vm1176_vm2, %v9734_v8  ;;  %12717 = vst [vmem:[#allocation18_spill] sm:$0xff] %v9756_v20 }
 0x2ac   : > { %7837 = vmatmul.msk.f32.gmra.mxu3 %vm1176_vm2, %v9741_v14 }
 0x2ae   : > { %7856 = vmatmul.msk.f32.gmra.mxu0 %vm1176_vm2, %v9496_v55  ;;  %v3497_v55 = vld [vmem:[#allocation2 + $0x2a] sm:$0xff] }
 0x2af   : > { %v9747_v35 = vpop.f32.mrf.mxu1 }
 0x2b2   : > { %7762 = vmatmul.msk.f32.gmra.mxu1 %vm1176_vm2, %v2940_v40  ;;  %v9765_v40 = vpop.f32.mrf.mxu0 }
 0x2b3   : > { %7800 = vmatmul.msk.f32.gmra.mxu2 %vm1176_vm2, %v9749_v26  ;;  %12718 = vst [vmem:[#allocation23_spill] sm:$0xff] %v9765_v40 }
 0x2b4   : > { %7838 = vmatmul.msk.f32.gmra.mxu3 %vm1176_vm2, %v9741_v14 }
 0x2b6   : > { %7857 = vmatmul.msk.f32.gmra.mxu0 %vm1176_vm2, %v9520_v24 }
 0x2b7   : > { %v9760_v12 = vpop.f32.mrf.mxu1 }
 0x2ba   : > { %7881 = vmatmul.msk.f32.vlgmr.msra.gmra.mxu1 %vm1176_vm2, %v3497_v55  ;;  %v9775_v24 = vpop.f32.mrf.mxu0  ;;  %v12722_v55 = vld [vmem:[#allocation7_spill] sm:$0xff] }
 0x2bb   : > { %12720 = vst [vmem:[#allocation25_spill] sm:$0xff] %v9775_v24 }
 0x2be   : > { %7858 = vmatmul.msk.f32.gmra.mxu0 %vm1176_vm2, %v9534_v9 }
 0x2bf   : > { %v9767_v23 = vpop.f32.mrf.mxu1 }
 0x2c2   : > { %7882 = vmatmul.msk.f32.gmra.mxu1 %vm1176_vm2, %v12719_v13  ;;  %v9785_v40 = vpop.f32.mrf.mxu0 }
 0x2c3   : > { %12723 = vst [vmem:[#allocation28_spill] sm:$0xff] %v9785_v40 }
 0x2c6   : > { %7859 = vmatmul.msk.f32.gmra.mxu0 %vm1176_vm2, %v9546_v48  ;;  %v12724_v48 = vld [vmem:[#allocation8_spill] sm:$0xff] }
 0x2c7   : > { %v9773_v20 = vpop.f32.mrf.mxu1 }
 0x2ca   : > { %7883 = vmatmul.msk.f32.gmra.mxu1 %vm1176_vm2, %v12721_v11  ;;  %v9793_v24 = vpop.f32.mrf.mxu0  ;;  %v12727_v11 = vld [vmem:[#allocation9_spill] sm:$0xff] }
 0x2cb   : > { %12725 = vst [vmem:[#allocation5_spill] sm:$0xff] %v9793_v24  ;;  %v12731_v24 = vld [vmem:[#allocation10_spill] sm:$0xff] }
 0x2ce   : > { %7860 = vmatmul.msk.f32.gmra.mxu0 %vm1176_vm2, %v9559_v33 }
 0x2cf   : > { %v9781_v9 = vpop.f32.mrf.mxu1 }
 0x2d2   : > { %7884 = vmatmul.msk.f32.gmra.mxu1 %vm1176_vm2, %v12722_v55  ;;  %v9803_v55 = vpop.f32.mrf.mxu0 }
 0x2d3   : > { %12728 = vst [vmem:[#allocation7_spill] sm:$0xff] %v9803_v55  ;;  %v12733_v55 = vld [vmem:[#allocation11_spill] sm:$0xff] }
 0x2d6   : > { %7861 = vmatmul.msk.f32.gmra.mxu0 %vm1176_vm2, %v9573_v19 }
 0x2d7   : > { %v9789_v13 = vpop.f32.mrf.mxu1 }
 0x2da   : > { %7885 = vmatmul.msk.f32.gmra.mxu1 %vm1176_vm2, %v12724_v48  ;;  %v7918_v48 = vld [vmem:[%s12730_s29 + $0x38] sm:$0xff] }
 0x2db   : > { %4070 = vmatpush.msra.mxu2 %v7918_v48 }
 0x2de   : > { %7862 = vmatmul.msk.f32.gmra.mxu0 %vm1176_vm2, %v9587_v58  ;;  %v4016_v58 = vld [vmem:[%s12730_s29 + $0x18] sm:$0xff] }
 0x2df   : > { %v9797_v33 = vpop.f32.mrf.mxu1  ;;  %4141 = vmatpush.msra.mxu3 %v4016_v58 }
 0x2e0   : > { %12726 = vst [vmem:[#allocation6_spill] sm:$0xff] %v9797_v33 }
 0x2e2   : > { %7886 = vmatmul.msk.f32.gmra.mxu1 %vm1176_vm2, %v12727_v11  ;;  %v3361_v11 = vpop.f32.mrf.mxu0 }
 0x2e6   : > { %7863 = vmatmul.msk.f32.gmra.mxu0 %vm1176_vm2, %v9599_v5 }
 0x2e7   : > { %v9805_v19 = vpop.f32.mrf.mxu1 }
 0x2e8   : > { %12729 = vst [vmem:[#allocation8_spill] sm:$0xff] %v9805_v19 }
 0x2ea   : > { %7887 = vmatmul.msk.f32.gmra.mxu1 %vm1176_vm2, %v12731_v24  ;;  %v12735_v24 = vld [vmem:[#allocation12_spill] sm:$0xff]  ;;  %v3364_v40 = vpop.f32.mrf.mxu0 }
 0x2ee   : > { %7864 = vmatmul.msk.f32.gmra.mxu0 %vm1176_vm2, %v9613_v59  ;;  %v12737_v59 = vld [vmem:[#allocation13_spill] sm:$0xff] }
 0x2ef   : > { %v9817_v5 = vpop.f32.mrf.mxu1 }
 0x2f0   : > { %12732 = vst [vmem:[#allocation9_spill] sm:$0xff] %v9817_v5 }
 0x2f2   : > { %7888 = vmatmul.msk.f32.gmra.mxu1 %vm1176_vm2, %v12733_v55  ;;  %v3367_v5 = vpop.f32.mrf.mxu0 }
 0x2f3   : > { %v3465_v19 = vadd.f32 %v3367_v5, %v9557_v30  ;;  %v7915_v30 = vld [vmem:[%s12730_s29 + $0x20] sm:$0xff] }
 0x2f6   : > { %7865 = vmatmul.msk.f32.gmra.mxu0 %vm1176_vm2, %v9627_v34  ;;  %v3507_v34 = vld [vmem:[#allocation2 + $0x7a] sm:$0xff] }
 0x2f7   : > { %v9823_v48 = vpop.f32.mrf.mxu1 }
 0x2f8   : > { %12734 = vst [vmem:[#allocation10_spill] sm:$0xff] %v9823_v48  ;;  %v3513_v48 = vld [vmem:[#allocation2 + $0xaa] sm:$0xff] }
 0x2fa   : > { %7889 = vmatmul.msk.f32.gmra.mxu1 %vm1176_vm2, %v12735_v24  ;;  %v9840_v24 = vpop.f32.mrf.mxu0 }
 0x2fe   : > { %7866 = vmatmul.msk.f32.gmra.mxu0 %vm1176_vm2, %v9645_v47 }
 0x2ff   : > { %v9829_v58 = vpop.f32.mrf.mxu1 }
 0x300   : > { %12736 = vst [vmem:[#allocation11_spill] sm:$0xff] %v9829_v58  ;;  %v3508_v58 = vld [vmem:[#allocation2 + $0x82] sm:$0xff] }
 0x302   : > { %7890 = vmatmul.msk.f32.gmra.mxu1 %vm1176_vm2, %v12737_v59 }
 0x306   : > { %7867 = vmatmul.msk.f32.gmra.mxu0 %vm1176_vm2, %v9662_v31  ;;  %v9849_v31 = vpop.f32.mrf.mxu0 }
 0x307   : > { %v9835_v55 = vpop.f32.mrf.mxu1 }
 0x308   : > { %12738 = vst [vmem:[#allocation12_spill] sm:$0xff] %v9835_v55  ;;  %v3509_v55 = vld [vmem:[#allocation2 + $0x8a] sm:$0xff] }
 0x30a   : > { %7891 = vmatmul.msk.f32.gmra.mxu1 %vm1176_vm2, %v3507_v34  ;;  %v3510_v34 = vld [vmem:[#allocation2 + $0x92] sm:$0xff] }
 0x30e   : > { %7868 = vmatmul.msk.f32.gmra.mxu0 %vm1176_vm2, %v9673_v29 }
 0x30f   : > { %v9842_v47 = vpop.f32.mrf.mxu1 }
 0x310   : > { %12739 = vst [vmem:[#allocation13_spill] sm:$0xff] %v9842_v47  ;;  %v9857_v47 = vpop.f32.mrf.mxu0 }
 0x312   : > { %7892 = vmatmul.msk.f32.gmra.mxu1 %vm1176_vm2, %v3508_v58  ;;  %v3511_v58 = vld [vmem:[#allocation2 + $0x9a] sm:$0xff] }
 0x316   : > { %7869 = vmatmul.msk.f32.gmra.mxu0 %vm1176_vm2, %v9686_v54 }
 0x317   : > { %v9847_v59 = vpop.f32.mrf.mxu1 }
 0x318   : > { %12740 = vst [vmem:[#allocation41_spill] sm:$0xff] %v9847_v59  ;;  %v9864_v59 = vpop.f32.mrf.mxu0 }
 0x31a   : > { %7893 = vmatmul.msk.f32.gmra.mxu1 %vm1176_vm2, %v3509_v55 }
 0x31e   : > { %7870 = vmatmul.msk.f32.gmra.mxu0 %vm1176_vm2, %v9699_v2  ;;  %v7917_v2 = vld [vmem:[%s12730_s29 + $0x30] sm:$0xff] }
 0x31f   : > { %v9854_v29 = vpop.f32.mrf.mxu1  ;;  %4071 = vmatpush.msra.mxu2 %v7917_v2 }
 0x320   : > { %12741 = vst [vmem:[#allocation42_spill] sm:$0xff] %v9854_v29 }
 0x322   : > { %7894 = vmatmul.msk.f32.gmra.mxu1 %vm1176_vm2, %v3510_v34  ;;  %v3512_v34 = vld [vmem:[#allocation2 + $0xa2] sm:$0xff] }
 0x326   : > { %7871 = vmatmul.msk.f32.gmra.mxu0 %vm1176_vm2, %v9712_v52  ;;  %v3463_v52 = vadd.f32 %v3361_v11, %v9532_v10  ;;  %v4015_v10 = vld [vmem:[%s12730_s29 + $0x10] sm:$0xff] }
 0x327   : > { %v9861_v54 = vpop.f32.mrf.mxu1  ;;  %4142 = vmatpush.msra.mxu3 %v4015_v10  ;;  %v3515_v10 = vld [vmem:[#allocation2 + $0xba] sm:$0xff] }
 0x328   : > { %12742 = vst [vmem:[#allocation43_spill] sm:$0xff] %v9861_v54 }
 0x32a   : > { %7895 = vmatmul.msk.f32.gmra.mxu1 %vm1176_vm2, %v3511_v58  ;;  %v9880_v58 = vld [vmem:[%s12634_s8] ss:$0 sm:$0xff] }
 0x32e   : > { %7872 = vmatmul.msk.f32.gmra.mxu0 %vm1176_vm2, %v9724_v53  ;;  %v9882_v53 = vpop.f32.mrf.mxu0 }
 0x32f   : > { %v9871_v55 = vpop.f32.mrf.mxu1 }
 0x330   : > { %12743 = vst [vmem:[#allocation44_spill] sm:$0xff] %v9871_v55 }
 0x332   : > { %7896 = vmatmul.msk.f32.gmra.mxu1 %vm1176_vm2, %v3512_v34 }
 0x336   : > { %7873 = vmatmul.msk.f32.gmra.mxu0 %vm1176_vm2, %v9734_v8  ;;  %v3464_v8 = vadd.f32 %v3364_v40, %v9544_v7  ;;  %v7916_v40 = vld [vmem:[%s12730_s29 + $0x28] sm:$0xff] }
 0x337   : > { %v3655_v54 = vpop.f32.mrf.mxu1  ;;  %4072 = vmatpush.msra.mxu2 %v7916_v40 }
 0x338   : > { %v3757_v29 = vadd.f32 %v3655_v54, %v3463_v52  ;;  %v9893_v52 = vpop.f32.mrf.mxu0 }
 0x339   : > { %4073 = vmatpush.msra.mxu2 %v7915_v30 }
 0x33a   : > { %v3795_v2 = vadd.f32 %v9880_v58, %v3757_v29  ;;  %7897 = vmatmul.msk.f32.gmra.mxu1 %vm1176_vm2, %v3513_v48  ;;  %v3514_v29 = vld [vmem:[#allocation2 + $0xb2] sm:$0xff] }
 0x33c   : > { %v3829_v34 = vmax.f32 %v3795_v2, 0.0  ;;  %v3235_v2 = vld [vmem:[#allocation2 + $0x129] sm:$0xff] }
 0x33e   : > { %3863 = vst.msk [vmem:[#allocation3 + $0x18] sm:$0xff] %vm1176_vm2, %v3829_v34  ;;  %7874 = vmatmul.msk.f32.gmra.mxu0 %vm1176_vm2, %v9749_v26  ;;  %v4014_v34 = vld [vmem:[%s12730_s29 + $0x8] sm:$0xff] }
 0x33f   : > { %v3658_v11 = vpop.f32.mrf.mxu1  ;;  %4143 = vmatpush.msra.mxu3 %v4014_v34  ;;  %v3516_v34 = vld [vmem:[#allocation2 + $0xc2] sm:$0xff] }
 0x340   : > { %v3758_v54 = vadd.f32 %v3658_v11, %v3464_v8  ;;  %v9914_v5 = vpop.f32.mrf.mxu0  ;;  %v4017_v11 = vld [vmem:[#allocation2 + $0xf] sm:$0xff] }
 0x342   : > { %v3796_v48 = vadd.f32 %v9880_v58, %v3758_v54  ;;  %7898 = vmatmul.msk.f32.gmra.mxu1 %vm1176_vm2, %v3514_v29  ;;  %v4004_v54 = vld [vmem:[#allocation2 + $0xe] sm:$0xff]  ;;  %v9916_v29 = vpop.f32.mrf.mxu2  ;;  %7919 = vmatmul.msk.f32.vlgmr.msra.gmra.mxu2 %vm1176_vm2, %v4017_v11 }
 0x344   : > { %v3830_v55 = vmax.f32 %v3796_v48, 0.0  ;;  %v9918_v48 = vpop.f32.mrf.mxu3 }
 0x346   : > { %3864 = vst.msk [vmem:[#allocation3 + $0x20] sm:$0xff] %vm1176_vm2, %v3830_v55  ;;  %7875 = vmatmul.msk.f32.gmra.mxu0 %vm1176_vm2, %v3235_v2  ;;  %v3236_v55 = vld [vmem:[#allocation2 + $0x131] sm:$0xff] }
 0x347   : > { %v3661_v7 = vpop.f32.mrf.mxu1 }
 0x348   : > { %v3759_v26 = vadd.f32 %v3661_v7, %v3465_v19  ;;  %v4013_v19 = vld [vmem:[%s12730_s29] sm:$0xff]  ;;  %v3466_v7 = vadd.f32 %v9840_v24, %v9571_v50 }
 0x349   : > { %4144 = vmatpush.msra.mxu3 %v4013_v19  ;;  %v3467_v19 = vadd.f32 %v9849_v31, %v9583_v4 }
 0x34a   : > { %v3797_v8 = vadd.f32 %v9880_v58, %v3759_v26  ;;  %7899 = vmatmul.msk.f32.gmra.mxu1 %vm1176_vm2, %v3515_v10  ;;  %7928 = vmatmul.msk.f32.vlgmr.msra.gmra.mxu3 %vm1176_vm2, %v4004_v54  ;;  %v9933_v11 = vpop.f32.mrf.mxu2 }
 0x34c   : > { %v3831_v2 = vmax.f32 %v3797_v8, 0.0  ;;  %v9928_v8 = vpop.f32.mrf.mxu0 }
 0x34e   : > { %3865 = vst.msk [vmem:[#allocation3 + $0x28] sm:$0xff] %vm1176_vm2, %v3831_v2  ;;  %7876 = vmatmul.msk.f32.gmra.mxu0 %vm1176_vm2, %v3236_v55  ;;  %v3517_v55 = vld [vmem:[#allocation2 + $0xca] sm:$0xff] }
 0x34f   : > { %v3664_v26 = vpop.f32.mrf.mxu1 }
 0x350   : > { %v3760_v40 = vadd.f32 %v3664_v26, %v3466_v7  ;;  %v9937_v7 = vpop.f32.mrf.mxu3  ;;  %v3468_v26 = vadd.f32 %v9857_v47, %v9597_v18  ;;  %v3469_v18 = vadd.f32 %v9864_v59, %v9611_v16  ;;  %v8018_v59 = vld [vmem:[%s12730_s29 + $0x118] sm:$0xff] }
 0x351   : > { %4790 = vmatpush.msra.mxu0 %v8018_v59 }
 0x352   : > { %v3798_v10 = vadd.f32 %v9880_v58, %v3760_v40  ;;  %7900 = vmatmul.msk.f32.gmra.mxu1 %vm1176_vm2, %v3516_v34  ;;  %v3518_v34 = vld [vmem:[#allocation2 + $0xd2] sm:$0xff] }
 0x354   : > { %v3832_v30 = vmax.f32 %v3798_v10, 0.0  ;;  %v9942_v4 = vpop.f32.mrf.mxu0 }
 0x356   : > { %3866 = vst.msk [vmem:[#allocation3 + $0x30] sm:$0xff] %vm1176_vm2, %v3832_v30  ;;  %v9946_v30 = vpop.f32.mrf.mxu2 }
 0x357   : > { %v3667_v50 = vpop.f32.mrf.mxu1 }
 0x358   : > { %v3761_v24 = vadd.f32 %v3667_v50, %v3467_v19  ;;  %v3898_v19 = vld [vmem:[#allocation3 + $0x18] ss:$2 sm:$0xff]  ;;  %v3900_v50 = vld [vmem:[#allocation3 + $0x19] ss:$2 sm:$0xff] }
 0x359   : > { %v3905_v47 = vmax.f32 %v3898_v19, %v3900_v50  ;;  %v3470_v50 = vadd.f32 %v9882_v53, %v9625_v28  ;;  %v8015_v53 = vld [vmem:[%s12730_s29 + $0x100] sm:$0xff] }
 0x35a   : > { %v3799_v54 = vadd.f32 %v9880_v58, %v3761_v24  ;;  %7901 = vmatmul.msk.f32.gmra.mxu1 %vm1176_vm2, %v3517_v55 }
 0x35c   : > { %v3833_v2 = vmax.f32 %v3799_v54, 0.0  ;;  %v9955_v33 = vpop.f32.mrf.mxu0 }
 0x35d   : > { %v3902_v55 = vld [vmem:[#allocation3 + $0x29] ss:$2 sm:$0xff] }
 0x35e   : > { %3867 = vst.msk [vmem:[#allocation3 + $0x38] sm:$0xff] %vm1176_vm2, %v3833_v2  ;;  %v9963_v19 = vpop.f32.mrf.mxu2 }
 0x35f   : > { %v3670_v31 = vpop.f32.mrf.mxu1 }
 0x360   : > { %v3762_v40 = vadd.f32 %v3670_v31, %v3468_v26  ;;  %v9951_v31 = vpop.f32.mrf.mxu3 }
 0x362   : > { %v3800_v10 = vadd.f32 %v9880_v58, %v3762_v40  ;;  %7902 = vmatmul.msk.f32.gmra.mxu1 %vm1176_vm2, %v3518_v34 }
 0x364   : > { %v3834_v24 = vmax.f32 %v3800_v10, 0.0 }
 0x365   : > { %v3904_v54 = vld [vmem:[#allocation3 + $0x2a] ss:$2 sm:$0xff] }
 0x366   : > { %v3906_v2 = vmax.f32 %v3902_v55, %v3904_v54  ;;  %3868 = vst.msk [vmem:[#allocation3 + $0x40] sm:$0xff] %vm1176_vm2, %v3834_v24  ;;  %v8017_v24 = vld [vmem:[%s12730_s29 + $0x110] sm:$0xff]  ;;  %v8016_v54 = vld [vmem:[%s12730_s29 + $0x108] sm:$0xff]  ;;  %v9991_v59 = vpop.f32.mrf.mxu2 }
 0x367   : > { %v3673_v26 = vpop.f32.mrf.mxu1  ;;  %4791 = vmatpush.msra.mxu0 %v8017_v24 }
 0x368   : > { %v9953_v40 = vmax.f32 %v3905_v47, %v3906_v2  ;;  %v3763_v34 = vadd.f32 %v3673_v26, %v3469_v18  ;;  %v3520_v18 = vld [vmem:[#allocation2 + $0xe2] sm:$0xff]  ;;  %v9976_v26 = vpop.f32.mrf.mxu3 }
 0x369   : > { %4792 = vmatpush.msra.mxu0 %v8016_v54  ;;  %v12746_v54 = vld [vmem:[#allocation19_spill] sm:$0xff] }
 0x36a   : > { %12744 = vst [vmem:[#allocation45_spill] sm:$0xff] %v9953_v40  ;;  %v3801_v10 = vadd.f32 %v9880_v58, %v3763_v34  ;;  %7903 = vmatmul.msk.f32.gmra.mxu1 %vm1176_vm2, %v3519_v27  ;;  %v9985_v34 = vpop.f32.mrf.mxu0 }
 0x36b   : > { %3908 = vst [vmem:[#allocation2 + $0x18] sm:$0xff] %v9953_v40  ;;  %4793 = vmatpush.msra.mxu0 %v8015_v53  ;;  %v12747_v40 = vld [vmem:[#allocation20_spill] sm:$0xff] }
 0x36c   : > { %v3835_v16 = vmax.f32 %v3801_v10, 0.0 }
 0x36e   : > { %3869 = vst.msk [vmem:[#allocation3 + $0x48] sm:$0xff] %vm1176_vm2, %v3835_v16  ;;  %v3471_v16 = vadd.f32 %v9893_v52, %v9640_v44  ;;  %v3472_v52 = vadd.f32 %v9914_v5, %v9658_v60 }
 0x36f   : > { %v3676_v55 = vpop.f32.mrf.mxu1 }
 0x370   : > { %v3764_v27 = vadd.f32 %v3676_v55, %v3470_v50  ;;  %v3521_v55 = vld [vmem:[#allocation2 + $0xea] sm:$0xff] }
 0x372   : > { %v9974_v47 = vld [vmem:[#allocation2 + $0x17] sm:$0xff]  ;;  %v3802_v28 = vadd.f32 %v9880_v58, %v3764_v27  ;;  %7904 = vmatmul.msk.f32.gmra.mxu1 %vm1176_vm2, %v3520_v18  ;;  %v2297_v18 = vadd.f32 %v9454_v49, %v12746_v54  ;;  %v9999_v53 = vpop.f32.mrf.mxu0 }
 0x373   : > { %12745 = vst [vmem:[#allocation46_spill] sm:$0xff] %v9974_v47  ;;  %v4005_v2 = vld [vmem:[#allocation2 + $0x16] sm:$0xff]  ;;  %7920 = vmatmul.msk.f32.gmra.mxu2 %vm1176_vm2, %v9974_v47 }
 0x374   : > { %7929 = vmatmul.msk.f32.gmra.mxu3 %vm1176_vm2, %v4005_v2  ;;  %v3836_v10 = vmax.f32 %v3802_v28, 0.0  ;;  %v9997_v2 = vpop.f32.mrf.mxu3  ;;  %v2591_v44 = vadd.f32 %v9656_v15, %v2297_v18  ;;  %v2298_v15 = vadd.f32 %v9466_v62, %v12747_v40 }
 0x375   : > { %v3913_v54 = vld [vmem:[#allocation3 + $0x3b] ss:$2 sm:$0xff] }
 0x376   : > { %3870 = vst.msk [vmem:[#allocation3 + $0x50] sm:$0xff] %vm1176_vm2, %v3836_v10 }
 0x377   : > { %v3679_v50 = vpop.f32.mrf.mxu1 }
 0x378   : > { %v3765_v24 = vadd.f32 %v3679_v50, %v3471_v16  ;;  %v2885_v16 = vadd.f32 %v9916_v29, %v2591_v44  ;;  %v2592_v29 = vadd.f32 %v9671_v32, %v2298_v15 }
 0x37a   : > { %v3803_v27 = vadd.f32 %v9880_v58, %v3765_v24  ;;  %7905 = vmatmul.msk.f32.gmra.mxu1 %vm1176_vm2, %v3521_v55  ;;  %v10006_v24 = vpop.f32.mrf.mxu2  ;;  %v3522_v55 = vld [vmem:[#allocation2 + $0xf2] sm:$0xff]  ;;  %v3179_v60 = vadd.f32 %v9918_v48, %v2885_v16  ;;  %v2886_v62 = vadd.f32 %v9933_v11, %v2592_v29  ;;  %v3523_v16 = vld [vmem:[#allocation2 + $0xfa] sm:$0xff]  ;;  %v3524_v29 = vld [vmem:[#allocation2 + $0x102] sm:$0xff] }
 0x37c   : > { %v3837_v28 = vmax.f32 %v3803_v27, 0.0  ;;  %v3911_v27 = vld [vmem:[#allocation3 + $0x3a] ss:$2 sm:$0xff]  ;;  %v10014_v44 = vpop.f32.mrf.mxu3 }
 0x37e   : > { %3871 = vst.msk [vmem:[#allocation3 + $0x58] sm:$0xff] %vm1176_vm2, %v3837_v28 }
 0x37f   : > { %v3682_v10 = vpop.f32.mrf.mxu1 }
 0x380   : > { %v3766_v50 = vadd.f32 %v3682_v10, %v3472_v52  ;;  %v3473_v52 = vadd.f32 %v9928_v8, %v3179_v60  ;;  %v3918_v10 = vmax.f32 %v3911_v27, %v3913_v54  ;;  %v3180_v54 = vadd.f32 %v9937_v7, %v2886_v62 }
 0x382   : > { %v3804_v49 = vadd.f32 %v9880_v58, %v3766_v50  ;;  %7906 = vmatmul.msk.f32.gmra.mxu1 %vm1176_vm2, %v3522_v55  ;;  %v10018_v55 = vpop.f32.mrf.mxu0  ;;  %v10026_v8 = vpop.f32.mrf.mxu2  ;;  %v3474_v60 = vadd.f32 %v9942_v4, %v3180_v54 }
 0x384   : > { %v3838_v5 = vmax.f32 %v3804_v49, 0.0  ;;  %v12748_v49 = vld [vmem:[#allocation22_spill] sm:$0xff] }
 0x385   : > { %v3915_v18 = vld [vmem:[#allocation3 + $0x4b] ss:$2 sm:$0xff]  ;;  %v3917_v28 = vld [vmem:[#allocation3 + $0x4c] ss:$2 sm:$0xff]  ;;  %v2299_v27 = vadd.f32 %v9478_v57, %v12748_v49 }
 0x386   : > { %v3919_v50 = vmax.f32 %v3915_v18, %v3917_v28  ;;  %3872 = vst.msk [vmem:[#allocation3 + $0x60] sm:$0xff] %vm1176_vm2, %v3838_v5  ;;  %v10035_v18 = vpop.f32.mrf.mxu3 }
 0x387   : > { %v3685_v47 = vpop.f32.mrf.mxu1  ;;  %v2593_v11 = vadd.f32 %v9684_v61, %v2299_v27  ;;  %v12749_v61 = vld [vmem:[#allocation24_spill] sm:$0xff] }
 0x388   : > { %v10021_v40 = vmax.f32 %v3918_v10, %v3919_v50  ;;  %v3767_v48 = vadd.f32 %v3685_v47, %v3473_v52  ;;  %v2300_v4 = vadd.f32 %v9492_v38, %v12749_v61  ;;  %v3525_v38 = vld [vmem:[#allocation2 + $0x10a] sm:$0xff] }
 0x389   : > { %v2887_v5 = vadd.f32 %v9946_v30, %v2593_v11 }
 0x38a   : > { %3921 = vst [vmem:[#allocation2 + $0x21] sm:$0xff] %v10021_v40  ;;  %v3805_v32 = vadd.f32 %v9880_v58, %v3767_v48  ;;  %7907 = vmatmul.msk.f32.gmra.mxu1 %vm1176_vm2, %v3523_v16  ;;  %v10037_v52 = vpop.f32.mrf.mxu0  ;;  %v10050_v48 = vpop.f32.mrf.mxu2  ;;  %v2594_v49 = vadd.f32 %v9697_v1, %v2300_v4  ;;  %v12750_v1 = vld [vmem:[#allocation26_spill] sm:$0xff]  ;;  %v3526_v4 = vld [vmem:[#allocation2 + $0x112] sm:$0xff] }
 0x38b   : > { %v3181_v30 = vadd.f32 %v9951_v31, %v2887_v5 }
 0x38c   : > { %v3839_v15 = vmax.f32 %v3805_v32, 0.0 }
 0x38d   : > { %v3475_v27 = vadd.f32 %v9955_v33, %v3181_v30  ;;  %v2301_v33 = vadd.f32 %v9518_v37, %v12750_v1  ;;  %v12751_v37 = vld [vmem:[#allocation27_spill] sm:$0xff] }
 0x38e   : > { %3873 = vst.msk [vmem:[#allocation3 + $0x68] sm:$0xff] %vm1176_vm2, %v3839_v15  ;;  %v2888_v15 = vadd.f32 %v9963_v19, %v2594_v49 }
 0x38f   : > { %v3688_v47 = vpop.f32.mrf.mxu1 }
 0x390   : > { %v3768_v28 = vadd.f32 %v3688_v47, %v3474_v60  ;;  %v10057_v60 = vpop.f32.mrf.mxu3  ;;  %v3182_v5 = vadd.f32 %v9976_v26, %v2888_v15  ;;  %v2302_v26 = vadd.f32 %v9540_v63, %v12751_v37 }
 0x391   : > { %v10039_v10 = vld [vmem:[#allocation2 + $0x1f] sm:$0xff] }
 0x392   : > { %v4006_v57 = vld [vmem:[#allocation2 + $0x1e] sm:$0xff]  ;;  %v3806_v50 = vadd.f32 %v9880_v58, %v3768_v28  ;;  %7908 = vmatmul.msk.f32.gmra.mxu1 %vm1176_vm2, %v3524_v29  ;;  %7921 = vmatmul.msk.f32.gmra.mxu2 %vm1176_vm2, %v10039_v10  ;;  %v10061_v47 = vpop.f32.mrf.mxu0  ;;  %v2595_v29 = vadd.f32 %v9710_v6, %v2301_v33  ;;  %v3476_v19 = vadd.f32 %v9985_v34, %v3182_v5 }
 0x393   : > { %v4737_v7 = vld [vmem:[#allocation2 + $0x22] sm:$0xff]  ;;  %7930 = vmatmul.msk.f32.gmra.mxu3 %vm1176_vm2, %v4006_v57  ;;  %v10069_v57 = vpop.f32.mrf.mxu2  ;;  %v3527_v5 = vld [vmem:[#allocation2 + $0x11a] sm:$0xff] }
 0x394   : > { %8019 = vmatmul.msk.f32.vlgmr.msra.gmra.mxu0 %vm1176_vm2, %v4737_v7  ;;  %v3840_v62 = vmax.f32 %v3806_v50, 0.0  ;;  %v2889_v50 = vadd.f32 %v9991_v59, %v2595_v29  ;;  %v2596_v59 = vadd.f32 %v9720_v41, %v2302_v26 }
 0x395   : > { %v3924_v16 = vld [vmem:[#allocation3 + $0x5c] ss:$2 sm:$0xff]  ;;  %v3926_v32 = vld [vmem:[#allocation3 + $0x5d] ss:$2 sm:$0xff] }
 0x396   : > { %4926 = vst [vmem:[#allocation3 + $0x60] sm:$0xff] %v9741_v14  ;;  %v3183_v6 = vadd.f32 %v9997_v2, %v2889_v50  ;;  %v2890_v2 = vadd.f32 %v10006_v24, %v2596_v59 }
 0x397   : > { %3874 = vst.msk [vmem:[#allocation3 + $0x70] sm:$0xff] %vm1176_vm2, %v3840_v62  ;;  %v3691_v54 = vpop.f32.mrf.mxu1 }
 0x398   : > { %v3769_v11 = vadd.f32 %v3691_v54, %v3475_v27  ;;  %v10077_v62 = vpop.f32.mrf.mxu3  ;;  %v3477_v15 = vadd.f32 %v9999_v53, %v3183_v6  ;;  %v12752_v53 = vld [vmem:[#allocation29_spill] sm:$0xff] }
 0x39a   : > { %v3807_v31 = vadd.f32 %v9880_v58, %v3769_v11  ;;  %7909 = vmatmul.msk.f32.gmra.mxu1 %vm1176_vm2, %v3525_v38  ;;  %v10079_v49 = vpop.f32.mrf.mxu0  ;;  %v3931_v11 = vmax.f32 %v3924_v16, %v3926_v32  ;;  %v3184_v16 = vadd.f32 %v10014_v44, %v2890_v2  ;;  %v3530_v2 = vld [vmem:[#allocation2 + $0x132] sm:$0xff] }
 0x39b   : > { %v10087_v33 = vpop.f32.mrf.mxu2 }
 0x39c   : > { %v3841_v28 = vmax.f32 %v3807_v31, 0.0  ;;  %v3478_v29 = vadd.f32 %v10018_v55, %v3184_v16  ;;  %v2304_v55 = vadd.f32 %v9569_v39, %v9311_v21  ;;  %v2305_v21 = vadd.f32 %v9585_v17, %v9323_v3 }
 0x39e   : > { %3875 = vst.msk [vmem:[#allocation3 + $0x78] sm:$0xff] %vm1176_vm2, %v3841_v28  ;;  %v2598_v26 = vadd.f32 %v9747_v35, %v2304_v55 }
 0x39f   : > { %v3694_v7 = vpop.f32.mrf.mxu1 }
 0x3a0   : > { %v3770_v61 = vadd.f32 %v3694_v7, %v3476_v19  ;;  %v10096_v28 = vpop.f32.mrf.mxu3 }
 0x3a2   : > { %v3808_v30 = vadd.f32 %v9880_v58, %v3770_v61  ;;  %7910 = vmatmul.msk.f32.gmra.mxu1 %vm1176_vm2, %v3526_v4  ;;  %v10100_v19 = vpop.f32.mrf.mxu0  ;;  %v3528_v4 = vld [vmem:[#allocation2 + $0x122] sm:$0xff] }
 0x3a4   : > { %v3842_v34 = vmax.f32 %v3808_v30, 0.0 }
 0x3a5   : > { %v3928_v27 = vld [vmem:[#allocation3 + $0x6d] ss:$2 sm:$0xff]  ;;  %v3930_v54 = vld [vmem:[#allocation3 + $0x6e] ss:$2 sm:$0xff] }
 0x3a6   : > { %v3932_v38 = vmax.f32 %v3928_v27, %v3930_v54  ;;  %4928 = vst [vmem:[#allocation3 + $0x70] sm:$0xff] %v9741_v14  ;;  %v3529_v27 = vld [vmem:[#allocation2 + $0x12a] sm:$0xff]  ;;  %v2892_v54 = vadd.f32 %v10050_v48, %v2598_v26 }
 0x3a7   : > { %4927 = vst [vmem:[#allocation3 + $0x68] sm:$0xff] %v9741_v14  ;;  %v3697_v63 = vpop.f32.mrf.mxu1  ;;  %v2303_v14 = vadd.f32 %v9554_v42, %v12752_v53 }
 0x3a8   : > { %v3933_v31 = vmax.f32 %v3931_v11, %v3932_v38  ;;  %3876 = vst.msk [vmem:[#allocation3 + $0x80] sm:$0xff] %vm1176_vm2, %v3842_v34  ;;  %v3771_v1 = vadd.f32 %v3697_v63, %v3477_v15  ;;  %v3127_v59 = vpop.f32.mrf.mxu3  ;;  %v3186_v39 = vadd.f32 %v10057_v60, %v2892_v54 }
 0x3a9   : > { %v2597_v32 = vadd.f32 %v9732_v0, %v2303_v14  ;;  %v2833_v0 = vpop.f32.mrf.mxu2 }
 0x3aa   : > { %3934 = vst [vmem:[#allocation2 + $0x2a] sm:$0xff] %v3933_v31  ;;  %v3809_v41 = vadd.f32 %v9880_v58, %v3771_v1  ;;  %7911 = vmatmul.msk.f32.gmra.mxu1 %vm1176_vm2, %v3527_v5  ;;  %8020 = vmatmul.msk.f32.gmra.mxu0 %vm1176_vm2, %v3933_v31  ;;  %v3421_v11 = vpop.f32.mrf.mxu0  ;;  %v3480_v63 = vadd.f32 %v10061_v47, %v3186_v39 }
 0x3ab   : > { %v2891_v50 = vadd.f32 %v10026_v8, %v2597_v32 }
 0x3ac   : > { %v3843_v24 = vmax.f32 %v3809_v41, 0.0 }
 0x3ad   : > { %v3185_v8 = vadd.f32 %v10035_v18, %v2891_v50 }
 0x3ae   : > { %3877 = vst.msk [vmem:[#allocation3 + $0x88] sm:$0xff] %vm1176_vm2, %v3843_v24 }
 0x3af   : > { %v3700_v7 = vpop.f32.mrf.mxu1  ;;  %v3479_v6 = vadd.f32 %v10037_v52, %v3185_v8  ;;  %v2599_v52 = vadd.f32 %v9760_v12, %v2305_v21  ;;  %v2306_v12 = vadd.f32 %v9606_v51, %v9334_v56  ;;  %v2307_v51 = vadd.f32 %v9621_v45, %v9346_v25 }
 0x3b0   : > { %v3772_v61 = vadd.f32 %v3700_v7, %v3478_v29  ;;  %v3130_v5 = vpop.f32.mrf.mxu3  ;;  %v2308_v45 = vadd.f32 %v9638_v46, %v9358_v22 }
 0x3b1   : > { %v10103_v30 = vld [vmem:[#allocation2 + $0x27] sm:$0xff]  ;;  %v2836_v18 = vpop.f32.mrf.mxu2  ;;  %v2893_v31 = vadd.f32 %v10069_v57, %v2599_v52  ;;  %v2600_v24 = vadd.f32 %v9767_v23, %v2306_v12  ;;  %v2601_v55 = vadd.f32 %v9773_v20, %v2307_v51 }
 0x3b2   : > { %v4007_v42 = vld [vmem:[#allocation2 + $0x26] sm:$0xff]  ;;  %v3810_v44 = vadd.f32 %v9880_v58, %v3772_v61  ;;  %7912 = vmatmul.msk.f32.gmra.mxu1 %vm1176_vm2, %v3528_v4  ;;  %7922 = vmatmul.msk.f32.gmra.mxu2 %vm1176_vm2, %v10103_v30  ;;  %v3424_v3 = vpop.f32.mrf.mxu0 }
 0x3b3   : > { %7931 = vmatmul.msk.f32.gmra.mxu3 %vm1176_vm2, %v4007_v42  ;;  %v3187_v47 = vadd.f32 %v10077_v62, %v2893_v31  ;;  %v2894_v61 = vadd.f32 %v10087_v33, %v2600_v24 }
 0x3b4   : > { %v3844_v37 = vmax.f32 %v3810_v44, 0.0 }
 0x3b5   : > { %v3937_v17 = vld [vmem:[#allocation3 + $0x7e] ss:$2 sm:$0xff]  ;;  %v3939_v60 = vld [vmem:[#allocation3 + $0x7f] ss:$2 sm:$0xff]  ;;  %v3481_v57 = vadd.f32 %v10079_v49, %v3187_v47  ;;  %v3188_v23 = vadd.f32 %v10096_v28, %v2894_v61  ;;  %v12757_v61 = vld [vmem:[#allocation15_spill] sm:$0xff] }
 0x3b6   : > { %3878 = vst.msk [vmem:[#allocation3 + $0x90] sm:$0xff] %vm1176_vm2, %v3844_v37  ;;  %v3944_v32 = vmax.f32 %v3937_v17, %v3939_v60  ;;  %v2895_v37 = vadd.f32 %v2833_v0, %v2601_v55  ;;  %v12753_v17 = vld [vmem:[#allocation30_spill] sm:$0xff] }
 0x3b7   : > { %v3703_v34 = vpop.f32.mrf.mxu1  ;;  %v3482_v8 = vadd.f32 %v10100_v19, %v3188_v23  ;;  %v2602_v19 = vadd.f32 %v9781_v9, %v2308_v45  ;;  %v12754_v60 = vld [vmem:[#allocation14_spill] sm:$0xff]  ;;  %v12760_v45 = vld [vmem:[#allocation16_spill] sm:$0xff] }
 0x3b8   : > { %v3773_v15 = vadd.f32 %v3703_v34, %v3479_v6  ;;  %v3133_v62 = vpop.f32.mrf.mxu3  ;;  %v3189_v20 = vadd.f32 %v3127_v59, %v2895_v37  ;;  %v2310_v12 = vadd.f32 %v12754_v60, %v12753_v17 }
 0x3b9   : > { %v2839_v7 = vpop.f32.mrf.mxu2  ;;  %v2896_v39 = vadd.f32 %v2836_v18, %v2602_v19 }
 0x3ba   : > { %v3811_v38 = vadd.f32 %v9880_v58, %v3773_v15  ;;  %7913 = vmatmul.msk.f32.gmra.mxu1 %vm1176_vm2, %v3529_v27  ;;  %v3427_v44 = vpop.f32.mrf.mxu0  ;;  %v3483_v15 = vadd.f32 %v3421_v11, %v3189_v20 }
 0x3bc   : > { %v3845_v35 = vmax.f32 %v3811_v38, 0.0 }
 0x3be   : > { %3879 = vst.msk [vmem:[#allocation3 + $0x98] sm:$0xff] %vm1176_vm2, %v3845_v35 }
 0x3bf   : > { %v3706_v48 = vpop.f32.mrf.mxu1 }
 0x3c0   : > { %v3774_v1 = vadd.f32 %v3706_v48, %v3480_v63  ;;  %v3136_v0 = vpop.f32.mrf.mxu3  ;;  %v2309_v48 = vadd.f32 %v9660_v43, %v9370_v36  ;;  %v12755_v43 = vld [vmem:[#allocation6_spill] sm:$0xff] }
 0x3c1   : > { %v2842_v6 = vpop.f32.mrf.mxu2 }
 0x3c2   : > { %v3812_v41 = vadd.f32 %v9880_v58, %v3774_v1  ;;  %7914 = vmatmul.msk.f32.gmra.mxu1 %vm1176_vm2, %v3530_v2  ;;  %v3430_v38 = vpop.f32.mrf.mxu0  ;;  %v3190_v2 = vadd.f32 %v3130_v5, %v2896_v39  ;;  %v2603_v46 = vadd.f32 %v9789_v13, %v2309_v48  ;;  %v2604_v5 = vadd.f32 %v12755_v43, %v2310_v12 }
 0x3c4   : > { %v3846_v53 = vmax.f32 %v3812_v41, 0.0  ;;  %v3484_v59 = vadd.f32 %v3424_v3, %v3190_v2  ;;  %v2897_v11 = vadd.f32 %v2839_v7, %v2603_v46  ;;  %v2898_v3 = vadd.f32 %v2842_v6, %v2604_v5 }
 0x3c5   : > { %v3941_v14 = vld [vmem:[#allocation3 + $0x8f] ss:$2 sm:$0xff]  ;;  %v3943_v16 = vld [vmem:[#allocation3 + $0x90] ss:$2 sm:$0xff] }
 0x3c6   : > { %v3945_v29 = vmax.f32 %v3941_v14, %v3943_v16  ;;  %3880 = vst.msk [vmem:[#allocation3 + $0xa0] sm:$0xff] %vm1176_vm2, %v3846_v53  ;;  %v3191_v47 = vadd.f32 %v3133_v62, %v2897_v11  ;;  %v12758_v62 = vld [vmem:[#allocation8_spill] sm:$0xff]  ;;  %v12763_v11 = vld [vmem:[#allocation17_spill] sm:$0xff] }
 0x3c7   : > { %v3709_v50 = vpop.f32.mrf.mxu1 }
 0x3c8   : > { %v3946_v4 = vmax.f32 %v3944_v32, %v3945_v29  ;;  %v3775_v42 = vadd.f32 %v3709_v50, %v3481_v57  ;;  %v3139_v31 = vpop.f32.mrf.mxu3  ;;  %v3485_v14 = vadd.f32 %v3427_v44, %v3191_v47  ;;  %v12756_v50 = vld [vmem:[#allocation31_spill] sm:$0xff] }
 0x3c9   : > { %v2845_v63 = vpop.f32.mrf.mxu2  ;;  %v7940_v47 = vld [vmem:[%s12730_s29 + $0x58] sm:$0xff] }
 0x3ca   : > { %3947 = vst [vmem:[#allocation2 + $0x33] sm:$0xff] %v3946_v4  ;;  %v3813_v56 = vadd.f32 %v9880_v58, %v3775_v42  ;;  %v3433_v41 = vpop.f32.mrf.mxu0  ;;  %v2311_v4 = vadd.f32 %v12757_v61, %v12756_v50  ;;  %v3192_v42 = vadd.f32 %v3136_v0, %v2898_v3  ;;  %4226 = vmatpush.msrb.mxu2 %v7940_v47  ;;  %v7951_v47 = vld [vmem:[%s12730_s29 + $0x68] sm:$0xff] }
 0x3cc   : > { %v3847_v49 = vmax.f32 %v3813_v56, 0.0  ;;  %v3486_v44 = vadd.f32 %v3430_v38, %v3192_v42  ;;  %v12761_v38 = vld [vmem:[#allocation9_spill] sm:$0xff] }
 0x3ce   : > { %3881 = vst.msk [vmem:[#allocation3 + $0xa8] sm:$0xff] %vm1176_vm2, %v3847_v49  ;;  %v2605_v49 = vadd.f32 %v12758_v62, %v2311_v4 }
 0x3cf   : > { %v3712_v33 = vpop.f32.mrf.mxu1 }
 0x3d0   : > { %v3776_v26 = vadd.f32 %v3712_v33, %v3482_v8  ;;  %v3142_v24 = vpop.f32.mrf.mxu3 }
 0x3d1   : > { %v10142_v34 = vld [vmem:[#allocation2 + $0x2f] sm:$0xff]  ;;  %v2848_v36 = vpop.f32.mrf.mxu2 }
 0x3d2   : > { %v4008_v27 = vld [vmem:[#allocation2 + $0x2e] sm:$0xff]  ;;  %v3814_v25 = vadd.f32 %v9880_v58, %v3776_v26  ;;  %7923 = vmatmul.msk.f32.gmra.mxu2 %vm1176_vm2, %v10142_v34  ;;  %v3436_v32 = vpop.f32.mrf.mxu0  ;;  %v2899_v26 = vadd.f32 %v2845_v63, %v2605_v49 }
 0x3d3   : > { %v4739_v54 = vld [vmem:[#allocation2 + $0x32] sm:$0xff]  ;;  %7932 = vmatmul.msk.f32.gmra.mxu3 %vm1176_vm2, %v4008_v27 }
 0x3d4   : > { %8021 = vmatmul.msk.f32.gmra.mxu0 %vm1176_vm2, %v4739_v54  ;;  %v3848_v28 = vmax.f32 %v3814_v25, 0.0  ;;  %v12759_v25 = vld [vmem:[#allocation32_spill] sm:$0xff] }
 0x3d5   : > { %v3950_v29 = vld [vmem:[#allocation3 + $0xa0] ss:$2 sm:$0xff]  ;;  %v3952_v7 = vld [vmem:[#allocation3 + $0xa1] ss:$2 sm:$0xff]  ;;  %v2312_v20 = vadd.f32 %v12760_v45, %v12759_v25 }
 0x3d6   : > { %3882 = vst.msk [vmem:[#allocation3 + $0xb0] sm:$0xff] %vm1176_vm2, %v3848_v28  ;;  %v3957_v55 = vmax.f32 %v3950_v29, %v3952_v7  ;;  %v3193_v28 = vadd.f32 %v3139_v31, %v2899_v26  ;;  %v12767_v7 = vld [vmem:[#allocation11_spill] sm:$0xff]  ;;  %v12770_v25 = vld [vmem:[#allocation12_spill] sm:$0xff] }
 0x3d7   : > { %v3715_v21 = vpop.f32.mrf.mxu1 }
 0x3d8   : > { %v3777_v35 = vadd.f32 %v3715_v21, %v3483_v15  ;;  %v3145_v19 = vpop.f32.mrf.mxu3  ;;  %v2606_v21 = vadd.f32 %v12761_v38, %v2312_v20  ;;  %v3487_v39 = vadd.f32 %v3433_v41, %v3193_v28 }
 0x3d9   : > { %v2851_v33 = vpop.f32.mrf.mxu2 }
 0x3da   : > { %v3815_v52 = vadd.f32 %v9880_v58, %v3777_v35  ;;  %v3439_v15 = vpop.f32.mrf.mxu0 }
 0x3dc   : > { %v3849_v22 = vmax.f32 %v3815_v52, 0.0  ;;  %v2900_v52 = vadd.f32 %v2848_v36, %v2606_v21 }
 0x3de   : > { %3883 = vst.msk [vmem:[#allocation3 + $0xb8] sm:$0xff] %vm1176_vm2, %v3849_v22 }
 0x3df   : > { %v3718_v9 = vpop.f32.mrf.mxu1 }
 0x3e0   : > { %v3778_v1 = vadd.f32 %v3718_v9, %v3484_v59  ;;  %v12762_v9 = vld [vmem:[#allocation33_spill] sm:$0xff]  ;;  %v3148_v60 = vpop.f32.mrf.mxu3 }
 0x3e1   : > { %v2854_v48 = vpop.f32.mrf.mxu2  ;;  %v2313_v31 = vadd.f32 %v12763_v11, %v12762_v9 }
 0x3e2   : > { %v3816_v18 = vadd.f32 %v9880_v58, %v3778_v1  ;;  %v3194_v1 = vadd.f32 %v3142_v24, %v2900_v52  ;;  %v3442_v36 = vpop.f32.mrf.mxu0  ;;  %v12766_v24 = vld [vmem:[#allocation21_spill] sm:$0xff]  ;;  %v7939_v52 = vld [vmem:[%s12730_s29 + $0x50] sm:$0xff] }
 0x3e3   : > { %4227 = vmatpush.msrb.mxu2 %v7939_v52 }
 0x3e4   : > { %v3850_v53 = vmax.f32 %v3816_v18, 0.0  ;;  %v12764_v18 = vld [vmem:[#allocation10_spill] sm:$0xff]  ;;  %v3488_v12 = vadd.f32 %v3436_v32, %v3194_v1 }
 0x3e5   : > { %v3954_v51 = vld [vmem:[#allocation3 + $0xb1] ss:$2 sm:$0xff]  ;;  %v2607_v17 = vadd.f32 %v12764_v18, %v2313_v31  ;;  %v12773_v31 = vld [vmem:[#allocation13_spill] sm:$0xff] }
 0x3e6   : > { %3884 = vst.msk [vmem:[#allocation3 + $0xc0] sm:$0xff] %vm1176_vm2, %v3850_v53  ;;  %v7953_v53 = vld [vmem:[%s12730_s29 + $0x78] sm:$0xff] }
 0x3e7   : > { %v3721_v13 = vpop.f32.mrf.mxu1  ;;  %4320 = vmatpush.msrb.mxu3 %v7953_v53  ;;  %v2901_v5 = vadd.f32 %v2851_v33, %v2607_v17 }
 0x3e8   : > { %v3779_v16 = vadd.f32 %v3721_v13, %v3485_v14 }
 0x3e9   : > { %v2857_v3 = vpop.f32.mrf.mxu2  ;;  %v3195_v32 = vadd.f32 %v3145_v19, %v2901_v5 }
 0x3ea   : > { %v3817_v57 = vadd.f32 %v9880_v58, %v3779_v16  ;;  %v12765_v16 = vld [vmem:[#allocation34_spill] sm:$0xff] }
 0x3eb   : > { %v3489_v61 = vadd.f32 %v3439_v15, %v3195_v32 }
 0x3ec   : > { %v3851_v56 = vmax.f32 %v3817_v57, 0.0  ;;  %v2314_v57 = vadd.f32 %v12766_v24, %v12765_v16 }
 0x3ed   : > { %v3956_v23 = vld [vmem:[#allocation3 + $0xb2] ss:$2 sm:$0xff] }
 0x3ee   : > { %v3958_v8 = vmax.f32 %v3954_v51, %v3956_v23  ;;  %3885 = vst.msk [vmem:[#allocation3 + $0xc8] sm:$0xff] %vm1176_vm2, %v3851_v56  ;;  %v2608_v50 = vadd.f32 %v12767_v7, %v2314_v57  ;;  %v3151_v56 = vpop.f32.mrf.mxu3  ;;  %v3445_v23 = vpop.f32.mrf.mxu0  ;;  %v12776_v7 = vld [vmem:[#allocation41_spill] sm:$0xff] }
 0x3ef   : > { %v3724_v37 = vpop.f32.mrf.mxu1 }
 0x3f0   : > { %v3959_v6 = vmax.f32 %v3957_v55, %v3958_v8  ;;  %v3780_v27 = vadd.f32 %v3724_v37, %v3486_v44  ;;  %v2902_v42 = vadd.f32 %v2854_v48, %v2608_v50  ;;  %v12768_v55 = vld [vmem:[#allocation35_spill] sm:$0xff]  ;;  %v12769_v8 = vld [vmem:[#allocation18_spill] sm:$0xff] }
 0x3f1   : > { %v2315_v33 = vadd.f32 %v12769_v8, %v12768_v55  ;;  %v12778_v55 = vld [vmem:[#allocation28_spill] sm:$0xff] }
 0x3f2   : > { %3960 = vst [vmem:[#allocation2 + $0x3c] sm:$0xff] %v3959_v6  ;;  %v3818_v54 = vadd.f32 %v9880_v58, %v3780_v27  ;;  %v3196_v37 = vadd.f32 %v3148_v60, %v2902_v42  ;;  %v2860_v6 = vpop.f32.mrf.mxu2 }
 0x3f3   : > { %v2609_v45 = vadd.f32 %v12770_v25, %v2315_v33 }
 0x3f4   : > { %v3852_v0 = vmax.f32 %v3818_v54, 0.0  ;;  %v3490_v20 = vadd.f32 %v3442_v36, %v3196_v37 }
 0x3f5   : > { %v2903_v15 = vadd.f32 %v2857_v3, %v2609_v45  ;;  %v12775_v3 = vld [vmem:[#allocation25_spill] sm:$0xff] }
 0x3f6   : > { %3886 = vst.msk [vmem:[#allocation3 + $0xd0] sm:$0xff] %vm1176_vm2, %v3852_v0  ;;  %v3448_v48 = vpop.f32.mrf.mxu0 }
 0x3f7   : > { %v3727_v35 = vpop.f32.mrf.mxu1  ;;  %v3197_v9 = vadd.f32 %v3151_v56, %v2903_v15 }
 0x3f8   : > { %v3781_v63 = vadd.f32 %v3727_v35, %v3487_v39  ;;  %v3154_v39 = vpop.f32.mrf.mxu3 }
 0x3f9   : > { %v10173_v2 = vld [vmem:[#allocation2 + $0x37] sm:$0xff] }
 0x3fa   : > { %v4009_v22 = vld [vmem:[#allocation2 + $0x36] sm:$0xff]  ;;  %v3819_v59 = vadd.f32 %v9880_v58, %v3781_v63  ;;  %7924 = vmatmul.msk.f32.gmra.mxu2 %vm1176_vm2, %v10173_v2  ;;  %v2863_v18 = vpop.f32.mrf.mxu2 }
 0x3fb   : > { %v4740_v46 = vld [vmem:[#allocation2 + $0x3a] sm:$0xff]  ;;  %7933 = vmatmul.msk.f32.gmra.mxu3 %vm1176_vm2, %v4009_v22  ;;  %v7952_v63 = vld [vmem:[%s12730_s29 + $0x70] sm:$0xff] }
 0x3fc   : > { %8022 = vmatmul.msk.f32.gmra.mxu0 %vm1176_vm2, %v4740_v46  ;;  %v3853_v41 = vmax.f32 %v3819_v59, 0.0  ;;  %4321 = vmatpush.msrb.mxu3 %v7952_v63  ;;  %v12771_v22 = vld [vmem:[#allocation36_spill] sm:$0xff]  ;;  %v12772_v46 = vld [vmem:[#allocation23_spill] sm:$0xff] }
 0x3fd   : > { %v3963_v49 = vld [vmem:[#allocation3 + $0xc2] ss:$2 sm:$0xff]  ;;  %v3965_v44 = vld [vmem:[#allocation3 + $0xc3] ss:$2 sm:$0xff]  ;;  %v2316_v59 = vadd.f32 %v12772_v46, %v12771_v22 }
 0x3fe   : > { %3887 = vst.msk [vmem:[#allocation3 + $0xd8] sm:$0xff] %vm1176_vm2, %v3853_v41  ;;  %v3970_v28 = vmax.f32 %v3963_v49, %v3965_v44  ;;  %v3491_v41 = vadd.f32 %v3445_v23, %v3197_v9  ;;  %4322 = vmatpush.msrb.mxu3 %v7951_v47  ;;  %v12777_v44 = vld [vmem:[#allocation38_spill] sm:$0xff]  ;;  %v8423_v47 = vld [vmem:[%s12634_s8] ss:$0 sm:$0xff] }
 0x3ff   : > { %v3730_v43 = vpop.f32.mrf.mxu1  ;;  %v2610_v1 = vadd.f32 %v12773_v31, %v2316_v59  ;;  %v2318_v8 = vadd.f32 %v12778_v55, %v12777_v44  ;;  %v12782_v59 = vld [vmem:[#allocation43_spill] sm:$0xff] }
 0x400   : > { %v3782_v14 = vadd.f32 %v3730_v43, %v3488_v12  ;;  %v3157_v57 = vpop.f32.mrf.mxu3 }
 0x401   : > { %v2904_v60 = vadd.f32 %v2860_v6, %v2610_v1 }
 0x402   : > { %v3820_v13 = vadd.f32 %v9880_v58, %v3782_v14  ;;  %v7950_v14 = vld [vmem:[%s12730_s29 + $0x60] sm:$0xff]  ;;  %v2866_v23 = vpop.f32.mrf.mxu2 }
 0x403   : > { %4323 = vmatpush.msrb.mxu3 %v7950_v14  ;;  %v3198_v24 = vadd.f32 %v3154_v39, %v2904_v60  ;;  %v12780_v39 = vld [vmem:[#allocation39_spill] sm:$0xff] }
 0x404   : > { %v3854_v29 = vmax.f32 %v3820_v13, 0.0  ;;  %v12774_v13 = vld [vmem:[#allocation37_spill] sm:$0xff] }
 0x405   : > { %v2317_v16 = vadd.f32 %v12775_v3, %v12774_v13 }
 0x406   : > { %3888 = vst.msk [vmem:[#allocation3 + $0xe0] sm:$0xff] %vm1176_vm2, %v3854_v29  ;;  %v3451_v29 = vpop.f32.mrf.mxu0 }
 0x407   : > { %v3733_v4 = vpop.f32.mrf.mxu1  ;;  %v2611_v50 = vadd.f32 %v12776_v7, %v2317_v16 }
 0x408   : > { %v3783_v51 = vadd.f32 %v3733_v4, %v3489_v61  ;;  %v3492_v61 = vadd.f32 %v3448_v48, %v3198_v24  ;;  %v7938_v4 = vld [vmem:[%s12730_s29 + $0x48] sm:$0xff]  ;;  %v12785_v24 = vld [vmem:[#allocation44_spill] sm:$0xff] }
 0x409   : > { %4228 = vmatpush.msrb.mxu2 %v7938_v4  ;;  %v2905_v56 = vadd.f32 %v2863_v18, %v2611_v50 }
 0x40a   : > { %v3821_v62 = vadd.f32 %v9880_v58, %v3783_v51  ;;  %v2869_v15 = vpop.f32.mrf.mxu2 }
 0x40b   : > { %v3199_v33 = vadd.f32 %v3157_v57, %v2905_v56 }
 0x40c   : > { %v3855_v26 = vmax.f32 %v3821_v62, 0.0 }
 0x40d   : > { %v3967_v27 = vld [vmem:[#allocation3 + $0xd3] ss:$2 sm:$0xff]  ;;  %v3969_v54 = vld [vmem:[#allocation3 + $0xd4] ss:$2 sm:$0xff] }
 0x40e   : > { %v3971_v19 = vmax.f32 %v3967_v27, %v3969_v54  ;;  %3889 = vst.msk [vmem:[#allocation3 + $0xe8] sm:$0xff] %vm1176_vm2, %v3855_v26  ;;  %v12779_v26 = vld [vmem:[#allocation42_spill] sm:$0xff]  ;;  %v3160_v27 = vpop.f32.mrf.mxu3  ;;  %v3493_v54 = vadd.f32 %v3451_v29, %v3199_v33  ;;  %v3454_v25 = vpop.f32.mrf.mxu0 }
 0x40f   : > { %v3736_v0 = vpop.f32.mrf.mxu1  ;;  %v2612_v6 = vadd.f32 %v12779_v26, %v2318_v8 }
 0x410   : > { %v3972_v38 = vmax.f32 %v3970_v28, %v3971_v19  ;;  %v3784_v21 = vadd.f32 %v3736_v0, %v3490_v20  ;;  %v7937_v0 = vld [vmem:[%s12730_s29 + $0x40] sm:$0xff] }
 0x411   : > { %v2906_v20 = vadd.f32 %v2866_v23, %v2612_v6  ;;  %4229 = vmatpush.msrb.mxu2 %v7937_v0  ;;  %v7979_v6 = vld [vmem:[%s12730_s29 + $0xb8] sm:$0xff] }
 0x412   : > { %3973 = vst [vmem:[#allocation2 + $0x45] sm:$0xff] %v3972_v38  ;;  %v3822_v35 = vadd.f32 %v9880_v58, %v3784_v21  ;;  %v2872_v16 = vpop.f32.mrf.mxu2  ;;  %4508 = vmatpush.msra.mxu3 %v7979_v6 }
 0x413   : > { %v3200_v63 = vadd.f32 %v3160_v27, %v2906_v20 }
 0x414   : > { %v3856_v11 = vmax.f32 %v3822_v35, 0.0  ;;  %v12781_v35 = vld [vmem:[#allocation5_spill] sm:$0xff] }
 0x415   : > { %v2319_v52 = vadd.f32 %v12781_v35, %v12780_v39  ;;  %v7978_v39 = vld [vmem:[%s12730_s29 + $0xb0] sm:$0xff] }
 0x416   : > { %3890 = vst.msk [vmem:[#allocation3 + $0xf0] sm:$0xff] %vm1176_vm2, %v3856_v11  ;;  %v3494_v11 = vadd.f32 %v3454_v25, %v3200_v63  ;;  %v3163_v1 = vpop.f32.mrf.mxu3  ;;  %v8035_v25 = vld [vmem:[%s12787_s25 + $0x78] sm:$0xff]  ;;  %4509 = vmatpush.msra.mxu3 %v7978_v39  ;;  %v10297_v63 = vld [vmem:[#allocation2 + $0x28] sm:$0xff] }
 0x417   : > { %v3739_v17 = vpop.f32.mrf.mxu1  ;;  %v2613_v9 = vadd.f32 %v12782_v59, %v2319_v52  ;;  %4999 = vmatpush.msrb.mxu1 %v8035_v25  ;;  %v7977_v52 = vld [vmem:[%s12730_s29 + $0xa8] sm:$0xff] }
 0x418   : > { %v3785_v12 = vadd.f32 %v3739_v17, %v3491_v41  ;;  %4510 = vmatpush.msra.mxu3 %v7977_v52 }
 0x419   : > { %v10214_v53 = vld [vmem:[#allocation2 + $0x3f] sm:$0xff]  ;;  %v2907_v18 = vadd.f32 %v2869_v15, %v2613_v9 }
 0x41a   : > { %v4010_v36 = vld [vmem:[#allocation2 + $0x3e] sm:$0xff]  ;;  %v3823_v5 = vadd.f32 %v9880_v58, %v3785_v12  ;;  %7925 = vmatmul.msk.f32.gmra.mxu2 %vm1176_vm2, %v10214_v53  ;;  %v4011_v62 = vld [vmem:[#allocation2 + $0x46] sm:$0xff]  ;;  %v3457_v12 = vpop.f32.mrf.mxu0 }
 0x41b   : > { %v4741_v43 = vld [vmem:[#allocation2 + $0x42] sm:$0xff]  ;;  %7934 = vmatmul.msk.f32.gmra.mxu3 %vm1176_vm2, %v4010_v36  ;;  %v3201_v13 = vadd.f32 %v3163_v1, %v2907_v18  ;;  %v10320_v9 = vld [vmem:[#allocation2 + $0x38] sm:$0xff] }
 0x41c   : > { %8023 = vmatmul.msk.f32.gmra.mxu0 %vm1176_vm2, %v4741_v43  ;;  %v3857_v32 = vmax.f32 %v3823_v5, 0.0  ;;  %v12783_v43 = vld [vmem:[#allocation40_spill] sm:$0xff]  ;;  %v12784_v5 = vld [vmem:[#allocation7_spill] sm:$0xff] }
 0x41d   : > { %v3976_v38 = vld [vmem:[#allocation3 + $0xe4] ss:$2 sm:$0xff]  ;;  %v3978_v21 = vld [vmem:[#allocation3 + $0xe5] ss:$2 sm:$0xff]  ;;  %v2320_v14 = vadd.f32 %v12784_v5, %v12783_v43  ;;  %v4455_v1 = vld [vmem:[#allocation2 + $0x19] sm:$0xff] }
 0x41e   : > { %3891 = vst.msk [vmem:[#allocation3 + $0xf8] sm:$0xff] %vm1176_vm2, %v3857_v32  ;;  %v3983_v31 = vmax.f32 %v3976_v38, %v3978_v21  ;;  %v3495_v32 = vadd.f32 %v3457_v12, %v3201_v13  ;;  %v12788_v38 = vld [vmem:[#allocation45_spill] sm:$0xff]  ;;  %v7965_v21 = vld [vmem:[%s12730_s29 + $0x90] sm:$0xff]  ;;  %v8005_v12 = vld [vmem:[%s12730_s29 + $0xf8] sm:$0xff] }
 0x41f   : > { %v3742_v42 = vpop.f32.mrf.mxu1  ;;  %v2614_v57 = vadd.f32 %v12785_v24, %v2320_v14  ;;  %v8425_v43 = vld [vmem:[#allocation2 + $0x18] sm:$0xff]  ;;  %v4457_v5 = vld [vmem:[#allocation2 + $0x29] sm:$0xff] }
 0x420   : > { %v3786_v51 = vadd.f32 %v3742_v42, %v3492_v61  ;;  %v3166_v61 = vpop.f32.mrf.mxu3  ;;  %v8033_v14 = vld [vmem:[%s12787_s25 + $0x68] sm:$0xff] }
 0x421   : > { %v2908_v7 = vadd.f32 %v2872_v16, %v2614_v57  ;;  %v7991_v16 = vld [vmem:[%s12730_s29 + $0xd0] sm:$0xff] }
 0x422   : > { %v3824_v49 = vadd.f32 %v9880_v58, %v3786_v51  ;;  %v7966_v51 = vld [vmem:[%s12730_s29 + $0x98] sm:$0xff]  ;;  %v3460_v23 = vpop.f32.mrf.mxu0 }
 0x423   : > { %7935 = vmatmul.msk.f32.gmra.mxu3 %vm1176_vm2, %v4011_v62  ;;  %v12786_v62 = vld [vmem:[#allocation46_spill] sm:$0xff]  ;;  %4414 = vmatpush.msra.mxu2 %v7966_v51 }
 0x424   : > { %v3858_v37 = vmax.f32 %v3824_v49, 0.0  ;;  %v3202_v49 = vadd.f32 %v3166_v61, %v2908_v7  ;;  %v8003_v61 = vld [vmem:[%s12730_s29 + $0xe8] sm:$0xff] }
 0x425   : > { %4415 = vmatpush.msra.mxu2 %v7965_v21 }
 0x426   : > { %3892 = vst.msk [vmem:[#allocation3 + $0x100] sm:$0xff] %vm1176_vm2, %v3858_v37  ;;  %v3496_v55 = vadd.f32 %v3460_v23, %v3202_v49  ;;  %v7990_v23 = vld [vmem:[%s12730_s29 + $0xc8] sm:$0xff] }
 0x427   : > { %v3745_v45 = vpop.f32.mrf.mxu1 }
 0x428   : > { %v3787_v28 = vadd.f32 %v3745_v45, %v3493_v54  ;;  %v10268_v54 = vld [vmem:[#allocation2] sm:$0xff]  ;;  %v10318_v59 = vpop.f32.mrf.mxu3 }
 0x42a   : > { %v3825_v19 = vadd.f32 %v9880_v58, %v3787_v28 }
 0x42c   : > { %v3859_v48 = vmax.f32 %v3825_v19, 0.0 }
 0x42d   : > { %v3980_v22 = vld [vmem:[#allocation3 + $0xf5] ss:$2 sm:$0xff]  ;;  %v3982_v46 = vld [vmem:[#allocation3 + $0xf6] ss:$2 sm:$0xff] }
 0x42e   : > { %v3984_v58 = vmax.f32 %v3980_v22, %v3982_v46  ;;  %3893 = vst.msk [vmem:[#allocation3 + $0x108] sm:$0xff] %vm1176_vm2, %v3859_v48  ;;  %v7964_v48 = vld [vmem:[%s12730_s29 + $0x88] sm:$0xff]  ;;  %v10310_v22 = vld [vmem:[#allocation2 + $0x30] sm:$0xff]  ;;  %v7963_v46 = vld [vmem:[%s12730_s29 + $0x80] sm:$0xff] }
 0x42f   : > { %v3748_v41 = vpop.f32.mrf.mxu1  ;;  %4416 = vmatpush.msra.mxu2 %v7964_v48  ;;  %v8031_v48 = vld [vmem:[%s12787_s25 + $0x58] sm:$0xff] }
 0x430   : > { %v3985_v17 = vmax.f32 %v3983_v31, %v3984_v58  ;;  %v3788_v60 = vadd.f32 %v3748_v41, %v3494_v11  ;;  %v10328_v11 = vld [vmem:[#allocation2 + $0x40] sm:$0xff]  ;;  %v10332_v31 = vpop.f32.mrf.mxu3  ;;  %v10339_v41 = vpop.f32.mrf.mxu2 }
 0x431   : > { %4417 = vmatpush.msra.mxu2 %v7963_v46 }
 0x432   : > { %3986 = vst [vmem:[#allocation2 + $0x4e] sm:$0xff] %v3985_v17  ;;  %v3826_v36 = vadd.f32 %v8423_v47, %v3788_v60  ;;  %7936 = vmatmul.msk.f32.gmra.mxu3 %vm1176_vm2, %v3985_v17  ;;  %v7992_v17 = vld [vmem:[%s12730_s29 + $0xd8] sm:$0xff] }
 0x434   : > { %v3860_v3 = vmax.f32 %v3826_v36, 0.0 }
 0x436   : > { %3894 = vst.msk [vmem:[#allocation3 + $0x110] sm:$0xff] %vm1176_vm2, %v3860_v3 }
 0x437   : > { %v3751_v29 = vpop.f32.mrf.mxu1 }
 0x438   : > { %v3789_v50 = vadd.f32 %v3751_v29, %v3495_v32  ;;  %v10341_v18 = vpop.f32.mrf.mxu3  ;;  %v10358_v36 = vpop.f32.mrf.mxu2  ;;  %v8004_v32 = vld [vmem:[%s12730_s29 + $0xf0] sm:$0xff]  ;;  %v4459_v29 = vld [vmem:[#allocation2 + $0x39] sm:$0xff] }
 0x439   : > { %v4024_v4 = vld [vmem:[#allocation2 + $0x47] sm:$0xff]  ;;  %v4025_v37 = vld [vmem:[#allocation2 + $0x4f] sm:$0xff]  ;;  %v4150_v39 = vadd.f32 %v10332_v31, %v10358_v36 }
 0x43a   : > { %v4742_v42 = vld [vmem:[#allocation2 + $0x4a] sm:$0xff]  ;;  %v3827_v56 = vadd.f32 %v8423_v47, %v3789_v50  ;;  %7926 = vmatmul.msk.f32.gmra.mxu2 %vm1176_vm2, %v4024_v4  ;;  %7954 = vmatmul.msk.f32.vlgmr.msrb.gmra.mxu3 %vm1176_vm2, %v12786_v62 }
 0x43b   : > { %8024 = vmatmul.msk.f32.gmra.mxu0 %vm1176_vm2, %v4742_v42  ;;  %v10335_v58 = vld [vmem:[#allocation2 + $0x48] sm:$0xff]  ;;  %v8002_v42 = vld [vmem:[%s12730_s29 + $0xe0] sm:$0xff] }
 0x43c   : > { %v3861_v44 = vmax.f32 %v3827_v56, 0.0  ;;  %v4461_v62 = vld [vmem:[#allocation2 + $0x49] sm:$0xff] }
 0x43d   : > { %v3989_v45 = vld [vmem:[#allocation3 + $0x106] ss:$2 sm:$0xff]  ;;  %v3991_v20 = vld [vmem:[#allocation3 + $0x107] ss:$2 sm:$0xff] }
 0x43e   : > { %3895 = vst.msk [vmem:[#allocation3 + $0x118] sm:$0xff] %vm1176_vm2, %v3861_v44  ;;  %v3996_v19 = vmax.f32 %v3989_v45, %v3991_v20 }
 0x43f   : > { %v3754_v8 = vpop.f32.mrf.mxu1 }
 0x440   : > { %v3790_v33 = vadd.f32 %v3754_v8, %v3496_v55  ;;  %v10367_v3 = vpop.f32.mrf.mxu2  ;;  %v8032_v55 = vld [vmem:[%s12787_s25 + $0x60] sm:$0xff] }
 0x441   : > { %v7989_v8 = vld [vmem:[%s12730_s29 + $0xc0] sm:$0xff]  ;;  %v4153_v46 = vadd.f32 %v10341_v18, %v10367_v3 }
 0x442   : > { %v3828_v26 = vadd.f32 %v8423_v47, %v3790_v33  ;;  %7927 = vmatmul.msk.f32.gmra.mxu2 %vm1176_vm2, %v4025_v37  ;;  %7955 = vmatmul.msk.f32.gmra.mxu3 %vm1176_vm2, %v10039_v10  ;;  %v10354_v47 = vpop.f32.mrf.mxu3 }
 0x444   : > { %v3862_v27 = vmax.f32 %v3828_v26, 0.0 }
 0x446   : > { %3896 = vst.msk [vmem:[#allocation3 + $0x120] sm:$0xff] %vm1176_vm2, %v3862_v27 }
 0x448   : > { %v10380_v57 = vpop.f32.mrf.mxu2 }
 0x44a   : > { %7941 = vmatmul.msk.f32.vlgmr.msrb.gmra.mxu2 %vm1176_vm2, %v10268_v54  ;;  %7956 = vmatmul.msk.f32.gmra.mxu3 %vm1176_vm2, %v10103_v30  ;;  %v10287_v30 = vld [vmem:[#allocation2 + $0x20] sm:$0xff] }
 0x44b   : > { %4602 = vmatpush.msrb.mxu2 %v7992_v17 }
 0x44d   : > { %v3993_v10 = vld [vmem:[#allocation3 + $0x117] ss:$2 sm:$0xff]  ;;  %v3995_v28 = vld [vmem:[#allocation3 + $0x118] ss:$2 sm:$0xff]  ;;  %4603 = vmatpush.msrb.mxu2 %v7991_v16 }
 0x44e   : > { %v3997_v0 = vmax.f32 %v3993_v10, %v3995_v28  ;;  %v8426_v10 = vld [vmem:[#allocation2 + $0x21] sm:$0xff]  ;;  %v4147_v28 = vadd.f32 %v10318_v59, %v10339_v41 }
 0x44f   : > { %4604 = vmatpush.msrb.mxu2 %v7990_v23 }
 0x450   : > { %v3998_v15 = vmax.f32 %v3996_v19, %v3997_v0 }
 0x451   : > { %4605 = vmatpush.msrb.mxu2 %v7989_v8  ;;  %v8061_v8 = vld [vmem:[%s12787_s25 + $0xb8] sm:$0xff] }
 0x452   : > { %3999 = vst [vmem:[#allocation2 + $0x57] sm:$0xff] %v3998_v15  ;;  %7942 = vmatmul.msk.f32.gmra.mxu2 %vm1176_vm2, %v12788_v38  ;;  %7957 = vmatmul.msk.f32.gmra.mxu3 %vm1176_vm2, %v10142_v34 }
 0x455   : > { %v10390_v50 = vpop.f32.mrf.mxu2 }
 0x456   : > { %v10364_v13 = vpop.f32.mrf.mxu3 }
 0x459   : > { %v4743_v35 = vld [vmem:[#allocation2 + $0x52] sm:$0xff]  ;;  %v4744_v34 = vld [vmem:[#allocation2 + $0x5a] sm:$0xff] }
 0x45a   : > { %7943 = vmatmul.msk.f32.gmra.mxu2 %vm1176_vm2, %v10287_v30  ;;  %8025 = vmatmul.msk.f32.gmra.mxu0 %vm1176_vm2, %v4743_v35  ;;  %v10347_v60 = vld [vmem:[#allocation2 + $0x50] sm:$0xff]  ;;  %v4463_v27 = vld [vmem:[#allocation2 + $0x59] sm:$0xff] }
 0x45b   : > { %7958 = vmatmul.msk.f32.gmra.mxu3 %vm1176_vm2, %v10173_v2  ;;  %v7976_v2 = vld [vmem:[%s12730_s29 + $0xa0] sm:$0xff]  ;;  %v4462_v33 = vld [vmem:[#allocation2 + $0x51] sm:$0xff] }
 0x45c   : > { %4511 = vmatpush.msra.mxu3 %v7976_v2  ;;  %v4369_v21 = vld [vmem:[#allocation2 + $0x58] sm:$0xff] }
 0x45e   : > { %4696 = vmatpush.msrb.mxu3 %v8005_v12 }
 0x460   : > { %4697 = vmatpush.msrb.mxu3 %v8004_v32 }
 0x462   : > { %7944 = vmatmul.msk.f32.gmra.mxu2 %vm1176_vm2, %v10297_v63  ;;  %8026 = vmatmul.msk.f32.gmra.mxu0 %vm1176_vm2, %v4744_v34 }
 0x463   : > { %7959 = vmatmul.msk.f32.gmra.mxu3 %vm1176_vm2, %v10214_v53  ;;  %v8034_v53 = vld [vmem:[%s12787_s25 + $0x70] sm:$0xff] }
 0x464   : > { %5000 = vmatpush.msrb.mxu1 %v8034_v53  ;;  %4698 = vmatpush.msrb.mxu3 %v8003_v61 }
 0x466   : > { %5001 = vmatpush.msrb.mxu1 %v8033_v14  ;;  %4699 = vmatpush.msrb.mxu3 %v8002_v42  ;;  %v4651_v14 = vld [vmem:[#allocation2 + $0x61] sm:$0xff] }
 0x468   : > { %5002 = vmatpush.msrb.mxu1 %v8032_v55  ;;  %v4944_v55 = vld [vmem:[%s12787_s25 + $0x30] sm:$0xff] }
 0x46a   : > { %7945 = vmatmul.msk.f32.gmra.mxu2 %vm1176_vm2, %v10310_v22  ;;  %5003 = vmatpush.msrb.mxu1 %v8031_v48 }
 0x46b   : > { %7960 = vmatmul.msk.f32.gmra.mxu3 %vm1176_vm2, %v4024_v4  ;;  %v4460_v4 = vld [vmem:[#allocation2 + $0x41] sm:$0xff] }
 0x472   : > { %7946 = vmatmul.msk.f32.gmra.mxu2 %vm1176_vm2, %v10320_v9 }
 0x473   : > { %7961 = vmatmul.msk.f32.gmra.mxu3 %vm1176_vm2, %v4025_v37 }
 0x47a   : > { %7947 = vmatmul.msk.f32.gmra.mxu2 %vm1176_vm2, %v10328_v11 }
 0x47b   : > { %7962 = vmatmul.msk.f32.gmra.mxu3 %vm1176_vm2, %v3998_v15 }
 0x47d   : > { %v10401_v56 = vpop.f32.mrf.mxu2 }
 0x47e   : > { %v10376_v24 = vpop.f32.mrf.mxu3 }
 0x482   : > { %7948 = vmatmul.msk.f32.gmra.mxu2 %vm1176_vm2, %v10335_v58 }
 0x483   : > { %7980 = vmatmul.msk.f32.vlgmr.msra.gmra.mxu3 %vm1176_vm2, %v4455_v1 }
 0x484   : > { %5159 = vmatpush.msra.mxu3 %v8061_v8 }
 0x48a   : > { %7949 = vmatmul.msk.f32.gmra.mxu2 %vm1176_vm2, %v10347_v60 }
 0x48b   : > { %7981 = vmatmul.msk.f32.gmra.mxu3 %vm1176_vm2, %v10021_v40  ;;  %v10371_v40 = vld [vmem:[#allocation2 + $0x31] sm:$0xff] }
 0x492   : > { %7967 = vmatmul.msk.f32.vlgmr.msra.gmra.mxu2 %vm1176_vm2, %v8425_v43 }
 0x493   : > { %7982 = vmatmul.msk.f32.gmra.mxu3 %vm1176_vm2, %v4457_v5 }
 0x49a   : > { %7968 = vmatmul.msk.f32.gmra.mxu2 %vm1176_vm2, %v10287_v30 }
 0x49b   : > { %7983 = vmatmul.msk.f32.gmra.mxu3 %vm1176_vm2, %v10371_v40 }
 0x49d   : > { %v10409_v49 = vpop.f32.mrf.mxu2 }
 0x49e   : > { %v10387_v7 = vpop.f32.mrf.mxu3 }
 0x4a2   : > { %7969 = vmatmul.msk.f32.gmra.mxu2 %vm1176_vm2, %v10297_v63 }
 0x4a3   : > { %7984 = vmatmul.msk.f32.gmra.mxu3 %vm1176_vm2, %v4459_v29 }
 0x4a6   : > { %v4167_v51 = vpop.f32.mrf.mxu3 }
 0x4aa   : > { %7970 = vmatmul.msk.f32.gmra.mxu2 %vm1176_vm2, %v10310_v22 }
 0x4ab   : > { %7985 = vmatmul.msk.f32.gmra.mxu3 %vm1176_vm2, %v4460_v4 }
 0x4b2   : > { %7971 = vmatmul.msk.f32.gmra.mxu2 %vm1176_vm2, %v10320_v9 }
 0x4b3   : > { %7986 = vmatmul.msk.f32.gmra.mxu3 %vm1176_vm2, %v4461_v62 }
 0x4b5   : > { %v4170_v44 = vpop.f32.mrf.mxu3 }
 0x4ba   : > { %7972 = vmatmul.msk.f32.gmra.mxu2 %vm1176_vm2, %v10328_v11 }
 0x4bb   : > { %7987 = vmatmul.msk.f32.gmra.mxu3 %vm1176_vm2, %v4462_v33 }
 0x4bd   : > { %v4096_v37 = vpop.f32.mrf.mxu2  ;;  %v4325_v6 = vpop.f32.mrf.mxu3 }
 0x4be   : > { %v10420_v26 = vadd.f32 %v4167_v51, %v4096_v37  ;;  %v4943_v37 = vld [vmem:[%s12787_s25 + $0x28] sm:$0xff] }
 0x4c2   : > { %7973 = vmatmul.msk.f32.gmra.mxu2 %vm1176_vm2, %v10335_v58 }
 0x4c3   : > { %7988 = vmatmul.msk.f32.gmra.mxu3 %vm1176_vm2, %v4463_v27 }
 0x4c5   : > { %v4099_v25 = vpop.f32.mrf.mxu2  ;;  %v4328_v20 = vpop.f32.mrf.mxu3 }
 0x4c6   : > { %v10425_v45 = vadd.f32 %v4170_v44, %v4099_v25  ;;  %v4945_v44 = vld [vmem:[%s12787_s25 + $0x38] sm:$0xff] }
 0x4c7   : > { %5070 = vmatpush.msra.mxu2 %v4945_v44  ;;  %v4946_v44 = vld [vmem:[#allocation3 + $0xf] sm:$0xff] }
 0x4c9   : > { %5071 = vmatpush.msra.mxu2 %v4944_v55  ;;  %v8074_v55 = vld [vmem:[%s12787_s25 + $0xd8] sm:$0xff] }
 0x4ca   : > { %7974 = vmatmul.msk.f32.gmra.mxu2 %vm1176_vm2, %v10347_v60 }
 0x4cb   : > { %8006 = vmatmul.msk.f32.vlgmr.msrb.gmra.mxu3 %vm1176_vm2, %v8426_v10  ;;  %5072 = vmatpush.msra.mxu2 %v4943_v37  ;;  %v4941_v10 = vld [vmem:[%s12787_s25 + $0x18] sm:$0xff] }
 0x4cd   : > { %v4231_v19 = vpop.f32.mrf.mxu2  ;;  %v4331_v15 = vpop.f32.mrf.mxu3 }
 0x4ce   : > { %v4258_v0 = vadd.f32 %v4231_v19, %v4147_v28  ;;  %v8058_v28 = vld [vmem:[%s12787_s25 + $0xa0] sm:$0xff]  ;;  %v4940_v19 = vld [vmem:[%s12787_s25 + $0x10] sm:$0xff] }
 0x4d0   : > { %v10432_v38 = vadd.f32 %v4325_v6, %v4258_v0  ;;  %v8059_v6 = vld [vmem:[%s12787_s25 + $0xa8] sm:$0xff]  ;;  %v8057_v0 = vld [vmem:[%s12787_s25 + $0x98] sm:$0xff] }
 0x4d2   : > { %7975 = vmatmul.msk.f32.gmra.mxu2 %vm1176_vm2, %v4369_v21 }
 0x4d3   : > { %8007 = vmatmul.msk.f32.gmra.mxu3 %vm1176_vm2, %v4457_v5 }
 0x4d5   : > { %v4234_v35 = vpop.f32.mrf.mxu2  ;;  %v10438_v34 = vpop.f32.mrf.mxu3 }
 0x4d6   : > { %v4259_v52 = vadd.f32 %v4234_v35, %v4150_v39  ;;  %v4938_v39 = vld [vmem:[%s12787_s25] sm:$0xff]  ;;  %v8055_v35 = vld [vmem:[%s12787_s25 + $0x88] sm:$0xff] }
 0x4d8   : > { %v10443_v2 = vadd.f32 %v4328_v20, %v4259_v52  ;;  %v8078_v52 = vld [vmem:[%s12787_s25 + $0xf8] sm:$0xff] }
 0x4d9   : > { %5257 = vmatpush.msrb.mxu0 %v8078_v52 }
 0x4da   : > { %7993 = vmatmul.msk.f32.vlgmr.msrb.gmra.mxu2 %vm1176_vm2, %v10287_v30 }
 0x4db   : > { %8008 = vmatmul.msk.f32.gmra.mxu3 %vm1176_vm2, %v10371_v40 }
 0x4dd   : > { %v4237_v59 = vpop.f32.mrf.mxu2 }
 0x4de   : > { %v4260_v53 = vadd.f32 %v4237_v59, %v4153_v46  ;;  %v10451_v31 = vpop.f32.mrf.mxu3  ;;  %v4929_v46 = vld [vmem:[#allocation3 + $0xe] sm:$0xff] }
 0x4e0   : > { %v10453_v1 = vadd.f32 %v4331_v15, %v4260_v53  ;;  %v4939_v15 = vld [vmem:[%s12787_s25 + $0x8] sm:$0xff]  ;;  %v8054_v53 = vld [vmem:[%s12787_s25 + $0x80] sm:$0xff] }
 0x4e2   : > { %7994 = vmatmul.msk.f32.gmra.mxu2 %vm1176_vm2, %v10297_v63 }
 0x4e3   : > { %8009 = vmatmul.msk.f32.gmra.mxu3 %vm1176_vm2, %v4459_v29 }
 0x4e5   : > { %v10458_v41 = vpop.f32.mrf.mxu2 }
 0x4e6   : > { %v10460_v30 = vpop.f32.mrf.mxu3 }
 0x4ea   : > { %7995 = vmatmul.msk.f32.gmra.mxu2 %vm1176_vm2, %v10310_v22  ;;  %v8030_v22 = vld [vmem:[%s12787_s25 + $0x50] sm:$0xff] }
 0x4eb   : > { %8010 = vmatmul.msk.f32.gmra.mxu3 %vm1176_vm2, %v4460_v4  ;;  %5004 = vmatpush.msrb.mxu1 %v8030_v22  ;;  %v8077_v22 = vld [vmem:[%s12787_s25 + $0xf0] sm:$0xff] }
 0x4ec   : > { %5258 = vmatpush.msrb.mxu0 %v8077_v22 }
 0x4ed   : > { %v10465_v18 = vpop.f32.mrf.mxu2 }
 0x4ee   : > { %v10467_v17 = vpop.f32.mrf.mxu3 }
 0x4f2   : > { %7996 = vmatmul.msk.f32.gmra.mxu2 %vm1176_vm2, %v10320_v9  ;;  %v4745_v9 = vld [vmem:[#allocation2 + $0x62] sm:$0xff] }
 0x4f3   : > { %8011 = vmatmul.msk.f32.gmra.mxu3 %vm1176_vm2, %v4461_v62  ;;  %8027 = vmatmul.msk.f32.gmra.mxu0 %vm1176_vm2, %v4745_v9  ;;  %v8076_v9 = vld [vmem:[%s12787_s25 + $0xe8] sm:$0xff] }
 0x4f4   : > { %5259 = vmatpush.msrb.mxu0 %v8076_v9 }
 0x4f5   : > { %v10472_v63 = vpop.f32.mrf.mxu2 }
 0x4f6   : > { %v10474_v12 = vpop.f32.mrf.mxu3 }
 0x4fa   : > { %7997 = vmatmul.msk.f32.gmra.mxu2 %vm1176_vm2, %v10328_v11 }
 0x4fb   : > { %8012 = vmatmul.msk.f32.gmra.mxu3 %vm1176_vm2, %v4462_v33  ;;  %v8060_v33 = vld [vmem:[%s12787_s25 + $0xb0] sm:$0xff] }
 0x4fc   : > { %5160 = vmatpush.msra.mxu3 %v8060_v33  ;;  %v8073_v33 = vld [vmem:[%s12787_s25 + $0xd0] sm:$0xff] }
 0x4fd   : > { %v10482_v36 = vpop.f32.mrf.mxu2 }
 0x4fe   : > { %v10484_v43 = vpop.f32.mrf.mxu3  ;;  %5161 = vmatpush.msra.mxu3 %v8059_v6  ;;  %v8072_v6 = vld [vmem:[%s12787_s25 + $0xc8] sm:$0xff] }
 0x500   : > { %5162 = vmatpush.msra.mxu3 %v8058_v28 }
 0x502   : > { %7998 = vmatmul.msk.f32.gmra.mxu2 %vm1176_vm2, %v10335_v58  ;;  %5163 = vmatpush.msra.mxu3 %v8057_v0  ;;  %v4795_v0 = vpop.f32.mrf.mxu0 }
 0x503   : > { %8013 = vmatmul.msk.f32.gmra.mxu3 %vm1176_vm2, %v4463_v27  ;;  %v4942_v27 = vld [vmem:[%s12787_s25 + $0x20] sm:$0xff] }
 0x504   : > { %5073 = vmatpush.msra.mxu2 %v4942_v27  ;;  %v8071_v27 = vld [vmem:[%s12787_s25 + $0xc0] sm:$0xff] }
 0x505   : > { %v10490_v11 = vpop.f32.mrf.mxu2 }
 0x506   : > { %v10492_v5 = vpop.f32.mrf.mxu3  ;;  %5074 = vmatpush.msra.mxu2 %v4941_v10 }
 0x508   : > { %5075 = vmatpush.msra.mxu2 %v4940_v19 }
 0x50a   : > { %7999 = vmatmul.msk.f32.gmra.mxu2 %vm1176_vm2, %v10347_v60  ;;  %v8029_v60 = vld [vmem:[%s12787_s25 + $0x48] sm:$0xff]  ;;  %v4798_v9 = vpop.f32.mrf.mxu0 }
 0x50b   : > { %8014 = vmatmul.msk.f32.gmra.mxu3 %vm1176_vm2, %v4651_v14  ;;  %5005 = vmatpush.msrb.mxu1 %v8029_v60  ;;  %v8028_v14 = vld [vmem:[%s12787_s25 + $0x40] sm:$0xff] }
 0x50c   : > { %5076 = vmatpush.msra.mxu2 %v4939_v15  ;;  %v8075_v60 = vld [vmem:[%s12787_s25 + $0xe0] sm:$0xff] }
 0x50d   : > { %v10497_v3 = vpop.f32.mrf.mxu2  ;;  %5006 = vmatpush.msrb.mxu1 %v8028_v14  ;;  %5260 = vmatpush.msrb.mxu0 %v8075_v60 }
 0x50e   : > { %v10499_v40 = vpop.f32.mrf.mxu3  ;;  %5077 = vmatpush.msra.mxu2 %v4938_v39  ;;  %8036 = vmatmul.msk.f32.vlgmr.msrb.gmra.mxu1 %vm4916_vm3, %v4946_v44  ;;  %v4865_v44 = vpop.permute.xlu1 %4864 }
 0x50f   : > { %5261 = vmatpush.msrb.mxu0 %v8074_v55 }
 0x511   : > { %5262 = vmatpush.msrb.mxu0 %v8073_v33 }
 0x512   : > { %8000 = vmatmul.msk.f32.gmra.mxu2 %vm1176_vm2, %v4369_v21  ;;  %v8056_v21 = vld [vmem:[%s12787_s25 + $0x90] sm:$0xff] }
 0x513   : > { %5164 = vmatpush.msra.mxu3 %v8056_v21  ;;  %5263 = vmatpush.msrb.mxu0 %v8072_v6 }
 0x515   : > { %v10502_v16 = vpop.f32.mrf.mxu2  ;;  %5165 = vmatpush.msra.mxu3 %v8055_v35  ;;  %5264 = vmatpush.msrb.mxu0 %v8071_v27  ;;  %v4801_v27 = vpop.f32.mrf.mxu0 }
 0x516   : > { %v10504_v58 = vpop.f32.mrf.mxu3  ;;  %v4446_v28 = vadd.f32 %v10502_v16, %v10432_v38 }
 0x517   : > { %5166 = vmatpush.msra.mxu3 %v8054_v53 }
 0x518   : > { %8062 = vmatmul.msk.f32.vlgmr.msra.gmra.mxu3 %vm4916_vm3, %v10268_v54  ;;  %v4540_v15 = vadd.f32 %v10492_v5, %v4446_v28 }
 0x51a   : > { %8001 = vmatmul.msk.f32.gmra.mxu2 %vm1176_vm2, %v10268_v54 }
 0x51d   : > { %v10508_v32 = vpop.f32.mrf.mxu2 }
 0x51e   : > { %v10510_v29 = vpop.f32.mrf.mxu3  ;;  %v4447_v35 = vadd.f32 %v10508_v32, %v10443_v2  ;;  %v4156_v2 = vadd.f32 %v10354_v47, %v10380_v57 }
 0x520   : > { %v4541_v16 = vadd.f32 %v10499_v40, %v4447_v35  ;;  %v8095_v40 = vld [vmem:[%s12787_s25 + $0x138] sm:$0xff] }
 0x521   : > { %5355 = vmatpush.msra.mxu1 %v8095_v40 }
 0x522   : > { %8045 = vmatmul.msk.f32.vlgmr.msra.gmra.mxu2 %vm4916_vm3, %v4929_v46  ;;  %v10626_v46 = vld [vmem:[%s12635_s9] ss:$0 sm:$0xff] }
 0x525   : > { %v10515_v61 = vpop.f32.mrf.mxu2 }
 0x526   : > { %v10517_v4 = vpop.f32.mrf.mxu3  ;;  %v4448_v32 = vadd.f32 %v10515_v61, %v10453_v1 }
 0x528   : > { %v4542_v47 = vadd.f32 %v10504_v58, %v4448_v32 }
 0x52d   : > { %v10519_v42 = vpop.f32.mrf.mxu2 }
 0x52e   : > { %v10521_v51 = vpop.f32.mrf.mxu3 }
 0x535   : > { %v10523_v23 = vpop.f32.mrf.mxu2 }
 0x536   : > { %v10525_v62 = vpop.f32.mrf.mxu3 }
 0x53d   : > { %v10548_v25 = vpop.f32.mrf.mxu2 }
 0x53e   : > { %v10550_v20 = vpop.f32.mrf.mxu3 }
 0x545   : > { %v10579_v48 = vpop.f32.mrf.mxu2 }
 0x546   : > { %v10581_v59 = vpop.f32.mrf.mxu3 }
 0x54d   : > { %v10605_v8 = vpop.f32.mrf.mxu2 }
 0x54e   : > { %v4701_v37 = vpop.f32.mrf.mxu3 }
 0x555   : > { %v10616_v10 = vpop.f32.mrf.mxu2 }
 0x556   : > { %v4704_v19 = vpop.f32.mrf.mxu3 }
 0x55d   : > { %v4607_v21 = vpop.f32.mrf.mxu2 }
 0x55e   : > { %v4634_v39 = vadd.f32 %v4607_v21, %v4540_v15  ;;  %v4707_v22 = vpop.f32.mrf.mxu3  ;;  %v4159_v15 = vadd.f32 %v10364_v13, %v10390_v50  ;;  %v8094_v13 = vld [vmem:[%s12787_s25 + $0x130] sm:$0xff] }
 0x55f   : > { %5356 = vmatpush.msra.mxu1 %v8094_v13 }
 0x560   : > { %v4728_v52 = vadd.f32 %v4701_v37, %v4634_v39  ;;  %v4261_v37 = vadd.f32 %v10458_v41, %v4156_v2  ;;  %v4870_v41 = vpop.permute.xlu2 %4869  ;;  %v4262_v58 = vadd.f32 %v10465_v18, %v4159_v15  ;;  %v4804_v18 = vpop.f32.mrf.mxu0 }
 0x562   : > { %v4822_v53 = vadd.f32 %v4795_v0, %v4728_v52  ;;  %v4355_v1 = vadd.f32 %v10438_v34, %v4261_v37 }
 0x564   : > { %v4835_v38 = vadd.f32 %v10626_v46, %v4822_v53  ;;  %v4449_v21 = vadd.f32 %v10519_v42, %v4355_v1  ;;  %v4165_v1 = vadd.f32 %v10387_v7, %v10409_v49  ;;  %v8092_v7 = vld [vmem:[%s12787_s25 + $0x120] sm:$0xff] }
 0x565   : > { %v4610_v14 = vpop.f32.mrf.mxu2 }
 0x566   : > { %v4844_v5 = vmax.f32 %v4835_v38, 0.0  ;;  %v4635_v60 = vadd.f32 %v4610_v14, %v4541_v16  ;;  %v4710_v0 = vpop.f32.mrf.mxu3  ;;  %v4543_v34 = vadd.f32 %v10510_v29, %v4449_v21 }
 0x568   : > { %v4907_v55 = vmul.f32 %v4865_v44, %v4844_v5  ;;  %v4729_v33 = vadd.f32 %v4704_v19, %v4635_v60  ;;  %v4875_v5 = vpop.permute.xlu0 %4874  ;;  %v4162_v44 = vadd.f32 %v10376_v24, %v10401_v56  ;;  %v8093_v24 = vld [vmem:[%s12787_s25 + $0x128] sm:$0xff]  ;;  %v4807_v40 = vpop.f32.mrf.mxu0 }
 0x569   : > { %5357 = vmatpush.msra.mxu1 %v8093_v24 }
 0x56a   : > { %4917 = vst.msk [vmem:[#allocation3 + $0x18] sm:$0xff] %vm4916_vm3, %v4907_v55  ;;  %v4823_v6 = vadd.f32 %v4798_v9, %v4729_v33  ;;  %v4263_v29 = vadd.f32 %v10472_v63, %v4162_v44 }
 0x56b   : > { %5358 = vmatpush.msra.mxu1 %v8092_v7  ;;  %v8088_v7 = vld [vmem:[%s12787_s25 + $0x100] sm:$0xff] }
 0x56c   : > { %v4836_v28 = vadd.f32 %v10626_v46, %v4823_v6 }
 0x56d   : > { %v4613_v57 = vpop.f32.mrf.mxu2 }
 0x56e   : > { %v4845_v61 = vmax.f32 %v4836_v28, 0.0  ;;  %v4636_v19 = vadd.f32 %v4613_v57, %v4542_v47  ;;  %v4713_v60 = vpop.f32.mrf.mxu3  ;;  %v4357_v28 = vadd.f32 %v10460_v30, %v4263_v29  ;;  %v8126_v29 = vld [vmem:[%s12787_s25 + $0x1a0] sm:$0xff] }
 0x570   : > { %v4908_v39 = vmul.f32 %v4870_v41, %v4845_v61  ;;  %v4730_v35 = vadd.f32 %v4707_v22, %v4636_v19  ;;  %v4356_v22 = vadd.f32 %v10451_v31, %v4262_v58  ;;  %v4451_v61 = vadd.f32 %v10548_v25, %v4357_v28  ;;  %v8129_v58 = vld [vmem:[%s12787_s25 + $0x1b8] sm:$0xff] }
 0x571   : > { %v4947_v52 = vld [vmem:[#allocation3 + $0x17] sm:$0xff]  ;;  %5551 = vmatpush.msrb.mxu3 %v8129_v58 }
 0x572   : > { %v4930_v53 = vld [vmem:[#allocation3 + $0x16] sm:$0xff]  ;;  %4918 = vst.msk [vmem:[#allocation3 + $0x20] sm:$0xff] %vm4916_vm3, %v4908_v39  ;;  %v4824_v38 = vadd.f32 %v4801_v27, %v4730_v35  ;;  %8037 = vmatmul.msk.f32.gmra.mxu1 %vm4916_vm3, %v4947_v52  ;;  %8079 = vmatmul.msk.f32.vlgmr.msrb.gmra.mxu0 %vm4916_vm3, %v4947_v52  ;;  %v4450_v2 = vadd.f32 %v10523_v23, %v4356_v22  ;;  %v4885_v22 = vpop.permute.xlu2 %4884 }
 0x573   : > { %v10645_v9 = vld [vmem:[#allocation3 + $0x18] sm:$0xff]  ;;  %8046 = vmatmul.msk.f32.gmra.mxu2 %vm4916_vm3, %v4930_v53  ;;  %v4545_v52 = vadd.f32 %v10521_v51, %v4451_v61  ;;  %v8111_v51 = vld [vmem:[%s12787_s25 + $0x170] sm:$0xff] }
 0x574   : > { %8063 = vmatmul.msk.f32.gmra.mxu3 %vm4916_vm3, %v10645_v9  ;;  %v4837_v50 = vadd.f32 %v10626_v46, %v4824_v38  ;;  %v4544_v23 = vadd.f32 %v10517_v4, %v4450_v2  ;;  %v4264_v4 = vadd.f32 %v10482_v36, %v4165_v1  ;;  %v8112_v53 = vld [vmem:[%s12787_s25 + $0x178] sm:$0xff]  ;;  %v4810_v38 = vpop.f32.mrf.mxu0 }
 0x575   : > { %v4616_v42 = vpop.f32.mrf.mxu2  ;;  %5453 = vmatpush.msrb.mxu2 %v8112_v53 }
 0x576   : > { %v4846_v16 = vmax.f32 %v4837_v50, 0.0  ;;  %v4637_v14 = vadd.f32 %v4616_v42, %v4543_v34  ;;  %v4716_v15 = vpop.f32.mrf.mxu3  ;;  %v4358_v50 = vadd.f32 %v10467_v17, %v4264_v4  ;;  %v8128_v42 = vld [vmem:[%s12787_s25 + $0x1b0] sm:$0xff]  ;;  %v8110_v17 = vld [vmem:[%s12787_s25 + $0x168] sm:$0xff] }
 0x577   : > { %5454 = vmatpush.msrb.mxu2 %v8111_v51  ;;  %5552 = vmatpush.msrb.mxu3 %v8128_v42 }
 0x578   : > { %v4909_v32 = vmul.f32 %v4875_v5, %v4846_v16  ;;  %v4731_v55 = vadd.f32 %v4710_v0, %v4637_v14  ;;  %v4880_v0 = vpop.permute.xlu1 %4879  ;;  %v4452_v16 = vadd.f32 %v10579_v48, %v4358_v50  ;;  %v8143_v50 = vld [vmem:[%s12787_s25 + $0x1e0] sm:$0xff] }
 0x579   : > { %v4948_v33 = vld [vmem:[#allocation3 + $0x1f] sm:$0xff]  ;;  %5455 = vmatpush.msrb.mxu2 %v8110_v17 }
 0x57a   : > { %v4931_v37 = vld [vmem:[#allocation3 + $0x1e] sm:$0xff]  ;;  %4919 = vst.msk [vmem:[#allocation3 + $0x28] sm:$0xff] %vm4916_vm3, %v4909_v32  ;;  %v4825_v31 = vadd.f32 %v4804_v18, %v4731_v55  ;;  %8038 = vmatmul.msk.f32.gmra.mxu1 %vm4916_vm3, %v4948_v33  ;;  %8080 = vmatmul.msk.f32.gmra.mxu0 %vm4916_vm3, %v4948_v33  ;;  %v4265_v55 = vadd.f32 %v10490_v11, %v10420_v26 }
 0x57b   : > { %v10663_v6 = vld [vmem:[#allocation3 + $0x20] sm:$0xff]  ;;  %8047 = vmatmul.msk.f32.gmra.mxu2 %vm4916_vm3, %v4931_v37  ;;  %v8091_v33 = vld [vmem:[%s12787_s25 + $0x118] sm:$0xff] }
 0x57c   : > { %v10672_v56 = vld [vmem:[#allocation3 + $0x19] sm:$0xff]  ;;  %8064 = vmatmul.msk.f32.gmra.mxu3 %vm4916_vm3, %v10663_v6  ;;  %v4838_v63 = vadd.f32 %v10626_v46, %v4825_v31  ;;  %5359 = vmatpush.msra.mxu1 %v8091_v33 }
 0x57d   : > { %5835 = vst [vmem:[#allocation3 + $0x1c] sm:$0x1] %v10268_v54  ;;  %v4619_v27 = vpop.f32.mrf.mxu2  ;;  %v8109_v37 = vld [vmem:[%s12787_s25 + $0x160] sm:$0xff]  ;;  %v8108_v11 = vld [vmem:[%s12787_s25 + $0x158] sm:$0xff] }
 0x57e   : > { %v4847_v47 = vmax.f32 %v4838_v63, 0.0  ;;  %v4638_v57 = vadd.f32 %v4619_v27, %v4544_v23  ;;  %v4719_v26 = vpop.f32.mrf.mxu3  ;;  %v8146_v31 = vld [vmem:[%s12787_s25 + $0x1f8] sm:$0xff]  ;;  %v4546_v63 = vadd.f32 %v10525_v62, %v4452_v16  ;;  %5456 = vmatpush.msrb.mxu2 %v8109_v37  ;;  %v4813_v27 = vpop.f32.mrf.mxu0  ;;  %v8145_v62 = vld [vmem:[%s12787_s25 + $0x1f0] sm:$0xff]  ;;  %v8140_v37 = vld [vmem:[%s12787_s25 + $0x1c8] sm:$0xff] }
 0x57f   : > { %v8125_v23 = vld [vmem:[%s12787_s25 + $0x198] sm:$0xff]  ;;  %5649 = vmatpush.msra.mxu0 %v8146_v31 }
 0x580   : > { %v4910_v19 = vmul.f32 %v4880_v0, %v4847_v47  ;;  %v4732_v41 = vadd.f32 %v4713_v60, %v4638_v57  ;;  %v8127_v60 = vld [vmem:[%s12787_s25 + $0x1a8] sm:$0xff]  ;;  %v8107_v47 = vld [vmem:[%s12787_s25 + $0x150] sm:$0xff]  ;;  %v4359_v0 = vadd.f32 %v10474_v12, %v4265_v55  ;;  %5457 = vmatpush.msrb.mxu2 %v8108_v11 }
 0x581   : > { %v4949_v21 = vld [vmem:[#allocation3 + $0x27] sm:$0xff]  ;;  %5553 = vmatpush.msrb.mxu3 %v8127_v60  ;;  %5650 = vmatpush.msra.mxu0 %v8145_v62  ;;  %v4900_v62 = vpop.permute.xlu2 %4899 }
 0x582   : > { %v4932_v39 = vld [vmem:[#allocation3 + $0x26] sm:$0xff]  ;;  %4920 = vst.msk [vmem:[#allocation3 + $0x30] sm:$0xff] %vm4916_vm3, %v4910_v19  ;;  %v4826_v30 = vadd.f32 %v4807_v40, %v4732_v41  ;;  %8039 = vmatmul.msk.f32.gmra.mxu1 %vm4916_vm3, %v4949_v21  ;;  %8081 = vmatmul.msk.f32.gmra.mxu0 %vm4916_vm3, %v4949_v21  ;;  %v8090_v40 = vld [vmem:[%s12787_s25 + $0x110] sm:$0xff] }
 0x583   : > { %v10684_v35 = vld [vmem:[#allocation3 + $0x28] sm:$0xff]  ;;  %8048 = vmatmul.msk.f32.gmra.mxu2 %vm4916_vm3, %v4932_v39  ;;  %5554 = vmatpush.msrb.mxu3 %v8126_v29  ;;  %v8124_v19 = vld [vmem:[%s12787_s25 + $0x190] sm:$0xff]  ;;  %v4453_v39 = vadd.f32 %v10605_v8, %v4359_v0  ;;  %v4266_v8 = vadd.f32 %v10497_v3, %v10425_v45  ;;  %v8105_v45 = vld [vmem:[%s12787_s25 + $0x140] sm:$0xff] }
 0x584   : > { %v10693_v49 = vld [vmem:[#allocation3 + $0x21] sm:$0xff]  ;;  %8065 = vmatmul.msk.f32.gmra.mxu3 %vm4916_vm3, %v10684_v35  ;;  %v4839_v25 = vadd.f32 %v10626_v46, %v4826_v30  ;;  %5360 = vmatpush.msra.mxu1 %v8090_v40 }
 0x585   : > { %5848 = vst [vmem:[#allocation3 + $0x21] sm:$0x1] %v10268_v54  ;;  %v10699_v36 = vld [vmem:[#allocation3 + $0x22] sm:$0xff]  ;;  %v4622_v13 = vpop.f32.mrf.mxu2  ;;  %5555 = vmatpush.msrb.mxu3 %v8125_v23  ;;  %5458 = vmatpush.msrb.mxu2 %v8107_v47  ;;  %v4547_v42 = vadd.f32 %v10550_v20, %v4453_v39  ;;  %v8141_v20 = vld [vmem:[%s12787_s25 + $0x1d0] sm:$0xff] }
 0x586   : > { %5861 = vst [vmem:[#allocation3 + $0x26] sm:$0x1] %v10268_v54  ;;  %v4848_v34 = vmax.f32 %v4839_v25, 0.0  ;;  %v4639_v18 = vadd.f32 %v4622_v13, %v4545_v52  ;;  %v8089_v57 = vld [vmem:[%s12787_s25 + $0x108] sm:$0xff]  ;;  %v8122_v3 = vld [vmem:[%s12787_s25 + $0x180] sm:$0xff]  ;;  %v4722_v16 = vpop.f32.mrf.mxu3 }
 0x587   : > { %v8144_v41 = vld [vmem:[%s12787_s25 + $0x1e8] sm:$0xff]  ;;  %5361 = vmatpush.msra.mxu1 %v8089_v57  ;;  %5556 = vmatpush.msrb.mxu3 %v8124_v19 }
 0x588   : > { %v4911_v14 = vmul.f32 %v4885_v22, %v4848_v34  ;;  %v4733_v5 = vadd.f32 %v4716_v15, %v4639_v18  ;;  %v4890_v15 = vpop.permute.xlu0 %4889  ;;  %v8106_v21 = vld [vmem:[%s12787_s25 + $0x148] sm:$0xff]  ;;  %5651 = vmatpush.msra.mxu0 %v8144_v41  ;;  %v8142_v22 = vld [vmem:[%s12787_s25 + $0x1d8] sm:$0xff] }
 0x589   : > { %v4950_v44 = vld [vmem:[#allocation3 + $0x2f] sm:$0xff]  ;;  %5459 = vmatpush.msrb.mxu2 %v8106_v21  ;;  %5362 = vmatpush.msra.mxu1 %v8088_v7 }
 0x58a   : > { %v4933_v2 = vld [vmem:[#allocation3 + $0x2e] sm:$0xff]  ;;  %4921 = vst.msk [vmem:[#allocation3 + $0x38] sm:$0xff] %vm4916_vm3, %v4911_v14  ;;  %v4827_v48 = vadd.f32 %v4810_v38, %v4733_v5  ;;  %8040 = vmatmul.msk.f32.gmra.mxu1 %vm4916_vm3, %v4950_v44  ;;  %8082 = vmatmul.msk.f32.gmra.mxu0 %vm4916_vm3, %v4950_v44  ;;  %v4360_v5 = vadd.f32 %v10484_v43, %v4266_v8  ;;  %v4895_v44 = vpop.permute.xlu1 %4894 }
 0x58b   : > { %v10724_v32 = vld [vmem:[#allocation3 + $0x30] sm:$0xff]  ;;  %8049 = vmatmul.msk.f32.gmra.mxu2 %vm4916_vm3, %v4933_v2  ;;  %v8123_v12 = vld [vmem:[%s12787_s25 + $0x188] sm:$0xff]  ;;  %5652 = vmatpush.msra.mxu0 %v8143_v50  ;;  %v4816_v2 = vpop.f32.mrf.mxu0 }
 0x58c   : > { %8066 = vmatmul.msk.f32.gmra.mxu3 %vm4916_vm3, %v10724_v32  ;;  %v4840_v24 = vadd.f32 %v10626_v46, %v4827_v48  ;;  %v10783_v25 = vld [vmem:[#allocation3 + $0x29] sm:$0xff]  ;;  %5460 = vmatpush.msrb.mxu2 %v8105_v45  ;;  %v4454_v55 = vadd.f32 %v10616_v10, %v4360_v5 }
 0x58d   : > { %v4625_v28 = vpop.f32.mrf.mxu2  ;;  %v10785_v52 = vld [vmem:[#allocation3 + $0x2a] sm:$0xff]  ;;  %5557 = vmatpush.msrb.mxu3 %v8123_v12  ;;  %5653 = vmatpush.msra.mxu0 %v8142_v22  ;;  %v8163_v12 = vld [vmem:[%s12787_s25 + $0x238] sm:$0xff] }
 0x58e   : > { %v4849_v1 = vmax.f32 %v4840_v24, 0.0  ;;  %v4640_v61 = vadd.f32 %v4625_v28, %v4546_v63  ;;  %5874 = vst [vmem:[#allocation3 + $0x2b] sm:$0x1] %v10268_v54  ;;  %v8139_v24 = vld [vmem:[%s12787_s25 + $0x1c0] sm:$0xff]  ;;  %v4548_v23 = vadd.f32 %v10581_v59, %v4454_v55  ;;  %5747 = vmatpush.msrb.mxu1 %v8163_v12 }
 0x58f   : > { %5558 = vmatpush.msrb.mxu3 %v8122_v3  ;;  %5654 = vmatpush.msra.mxu0 %v8141_v20  ;;  %v10945_v3 = vld [vmem:[#allocation2] sm:$0xff] }
 0x590   : > { %v4912_v4 = vmul.f32 %v4890_v15, %v4849_v1  ;;  %v4734_v30 = vadd.f32 %v4719_v26, %v4640_v61 }
 0x591   : > { %v4951_v53 = vld [vmem:[#allocation3 + $0x37] sm:$0xff]  ;;  %5655 = vmatpush.msra.mxu0 %v8140_v37 }
 0x592   : > { %v4934_v58 = vld [vmem:[#allocation3 + $0x36] sm:$0xff]  ;;  %4922 = vst.msk [vmem:[#allocation3 + $0x40] sm:$0xff] %vm4916_vm3, %v4912_v4  ;;  %v4828_v13 = vadd.f32 %v4813_v27, %v4734_v30  ;;  %8041 = vmatmul.msk.f32.gmra.mxu1 %vm4916_vm3, %v4951_v53  ;;  %8083 = vmatmul.msk.f32.gmra.mxu0 %vm4916_vm3, %v4951_v53  ;;  %v4725_v27 = vpop.f32.mrf.mxu3  ;;  %v4905_v30 = vpop.permute.xlu0 %4904 }
 0x593   : > { %v10787_v38 = vld [vmem:[#allocation3 + $0x38] sm:$0xff]  ;;  %8050 = vmatmul.msk.f32.gmra.mxu2 %vm4916_vm3, %v4934_v58  ;;  %5656 = vmatpush.msra.mxu0 %v8139_v24  ;;  %v4819_v57 = vpop.f32.mrf.mxu0 }
 0x594   : > { %v10798_v34 = vld [vmem:[#allocation3 + $0x31] sm:$0xff]  ;;  %8067 = vmatmul.msk.f32.gmra.mxu3 %vm4916_vm3, %v10787_v38  ;;  %v4841_v51 = vadd.f32 %v10626_v46, %v4828_v13 }
 0x595   : > { %v10800_v18 = vld [vmem:[#allocation3 + $0x32] sm:$0xff]  ;;  %v4628_v14 = vpop.f32.mrf.mxu2 }
 0x596   : > { %5875 = vst [vmem:[#allocation3 + $0x2c] sm:$0xff] %v10268_v54  ;;  %v4850_v17 = vmax.f32 %v4841_v51, 0.0  ;;  %v4641_v60 = vadd.f32 %v4628_v14, %v4547_v42  ;;  %v5604_v42 = vld [vmem:[#allocation3 + $0x61] sm:$0xff] }
 0x598   : > { %v4913_v48 = vmul.f32 %v4895_v44, %v4850_v17  ;;  %v4735_v33 = vadd.f32 %v4722_v16, %v4641_v60 }
 0x599   : > { %v4952_v43 = vld [vmem:[#allocation3 + $0x3f] sm:$0xff] }
 0x59a   : > { %v4935_v29 = vld [vmem:[#allocation3 + $0x3e] sm:$0xff]  ;;  %4923 = vst.msk [vmem:[#allocation3 + $0x48] sm:$0xff] %vm4916_vm3, %v4913_v48  ;;  %v4829_v11 = vadd.f32 %v4816_v2, %v4735_v33  ;;  %8042 = vmatmul.msk.f32.gmra.mxu1 %vm4916_vm3, %v4952_v43  ;;  %8084 = vmatmul.msk.f32.gmra.mxu0 %vm4916_vm3, %v4952_v43 }
 0x59b   : > { %v10825_v26 = vld [vmem:[#allocation3 + $0x40] sm:$0xff]  ;;  %8051 = vmatmul.msk.f32.gmra.mxu2 %vm4916_vm3, %v4935_v29  ;;  %v5168_v5 = vpop.f32.mrf.mxu3 }
 0x59c   : > { %v10830_v31 = vld [vmem:[#allocation3 + $0x39] sm:$0xff]  ;;  %8068 = vmatmul.msk.f32.gmra.mxu3 %vm4916_vm3, %v10825_v26  ;;  %v4842_v63 = vadd.f32 %v10626_v46, %v4829_v11 }
 0x59d   : > { %v10832_v10 = vld [vmem:[#allocation3 + $0x3a] sm:$0xff]  ;;  %v4631_v40 = vpop.f32.mrf.mxu2 }
 0x59e   : > { %5876 = vst [vmem:[#allocation3 + $0x34] sm:$0xff] %v10268_v54  ;;  %v4851_v28 = vmax.f32 %v4842_v63, 0.0  ;;  %v4642_v47 = vadd.f32 %v4631_v40, %v4548_v23 }
 0x5a0   : > { %v4914_v0 = vmul.f32 %v4900_v62, %v4851_v28  ;;  %v4736_v1 = vadd.f32 %v4725_v27, %v4642_v47  ;;  %v5702_v28 = vld [vmem:[#allocation3 + $0x62] sm:$0xff] }
 0x5a1   : > { %v4953_v61 = vld [vmem:[#allocation3 + $0x47] sm:$0xff] }
 0x5a2   : > { %v4936_v19 = vld [vmem:[#allocation3 + $0x46] sm:$0xff]  ;;  %4924 = vst.msk [vmem:[#allocation3 + $0x50] sm:$0xff] %vm4916_vm3, %v4914_v0  ;;  %v4830_v15 = vadd.f32 %v4819_v57, %v4736_v1  ;;  %8043 = vmatmul.msk.f32.gmra.mxu1 %vm4916_vm3, %v4953_v61  ;;  %8085 = vmatmul.msk.f32.gmra.mxu0 %vm4916_vm3, %v4953_v61 }
 0x5a3   : > { %v10843_v41 = vld [vmem:[#allocation3 + $0x48] sm:$0xff]  ;;  %8052 = vmatmul.msk.f32.gmra.mxu2 %vm4916_vm3, %v4936_v19 }
 0x5a4   : > { %v5405_v59 = vld [vmem:[#allocation3 + $0x41] sm:$0xff]  ;;  %8069 = vmatmul.msk.f32.gmra.mxu3 %vm4916_vm3, %v10843_v41  ;;  %v4843_v39 = vadd.f32 %v10626_v46, %v4830_v15  ;;  %v8162_v46 = vld [vmem:[%s12787_s25 + $0x230] sm:$0xff] }
 0x5a5   : > { %v10848_v21 = vld [vmem:[#allocation3 + $0x42] sm:$0xff]  ;;  %5748 = vmatpush.msrb.mxu1 %v8162_v46  ;;  %v5079_v16 = vpop.f32.mrf.mxu2 }
 0x5a6   : > { %5877 = vst [vmem:[#allocation3 + $0x3c] sm:$0xff] %v10268_v54  ;;  %v4852_v4 = vmax.f32 %v4843_v39, 0.0 }
 0x5a8   : > { %v4915_v7 = vmul.f32 %v4905_v30, %v4852_v4 }
 0x5a9   : > { %v4954_v53 = vld [vmem:[#allocation3 + $0x4f] sm:$0xff] }
 0x5aa   : > { %v4937_v58 = vld [vmem:[#allocation3 + $0x4e] sm:$0xff]  ;;  %4925 = vst.msk [vmem:[#allocation3 + $0x58] sm:$0xff] %vm4916_vm3, %v4915_v7  ;;  %8044 = vmatmul.msk.f32.gmra.mxu1 %vm4916_vm3, %v4954_v53  ;;  %8086 = vmatmul.msk.f32.gmra.mxu0 %vm4916_vm3, %v4954_v53 }
 0x5ab   : > { %v5114_v8 = vld [vmem:[#allocation3 + $0x50] sm:$0xff]  ;;  %8053 = vmatmul.msk.f32.gmra.mxu2 %vm4916_vm3, %v4937_v58 }
 0x5ac   : > { %8070 = vmatmul.msk.f32.gmra.mxu3 %vm4916_vm3, %v5114_v8  ;;  %v5699_v37 = vld [vmem:[#allocation3 + $0x4a] sm:$0xff] }
 0x5b1   : > { %v5212_v54 = vld [vmem:[#allocation3 + $0x57] sm:$0xff] }
 0x5b2   : > { %8096 = vmatmul.msk.f32.vlgmr.msra.gmra.mxu1 %vm4916_vm3, %v10645_v9  ;;  %8087 = vmatmul.msk.f32.gmra.mxu0 %vm4916_vm3, %v5212_v54  ;;  %v8161_v9 = vld [vmem:[%s12787_s25 + $0x228] sm:$0xff]  ;;  %v5407_v13 = vld [vmem:[#allocation3 + $0x51] sm:$0xff]  ;;  %v5408_v45 = vld [vmem:[#allocation3 + $0x59] sm:$0xff] }
 0x5b3   : > { %8113 = vmatmul.msk.f32.vlgmr.msrb.gmra.mxu2 %vm4916_vm3, %v10672_v56  ;;  %5749 = vmatpush.msrb.mxu1 %v8161_v9  ;;  %v8159_v56 = vld [vmem:[%s12787_s25 + $0x218] sm:$0xff] }
 0x5b4   : > { %8130 = vmatmul.msk.f32.vlgmr.msrb.gmra.mxu3 %vm4916_vm3, %v10663_v6  ;;  %v5505_v50 = vld [vmem:[#allocation3 + $0x58] sm:$0xff] }
 0x5b5   : > { %v5701_v63 = vld [vmem:[#allocation3 + $0x5a] sm:$0xff] }
 0x5ba   : > { %8097 = vmatmul.msk.f32.gmra.mxu1 %vm4916_vm3, %v10663_v6  ;;  %8147 = vmatmul.msk.f32.vlgmr.msra.gmra.mxu0 %vm4916_vm3, %v10693_v49  ;;  %v8160_v6 = vld [vmem:[%s12787_s25 + $0x220] sm:$0xff] }
 0x5bb   : > { %8114 = vmatmul.msk.f32.gmra.mxu2 %vm4916_vm3, %v10693_v49  ;;  %5750 = vmatpush.msrb.mxu1 %v8160_v6  ;;  %v8157_v49 = vld [vmem:[%s12787_s25 + $0x208] sm:$0xff] }
 0x5bc   : > { %8131 = vmatmul.msk.f32.gmra.mxu3 %vm4916_vm3, %v10684_v35 }
 0x5bd   : > { %5751 = vmatpush.msrb.mxu1 %v8159_v56 }
 0x5c2   : > { %8098 = vmatmul.msk.f32.gmra.mxu1 %vm4916_vm3, %v10684_v35  ;;  %8148 = vmatmul.msk.f32.gmra.mxu0 %vm4916_vm3, %v10783_v25  ;;  %v8158_v35 = vld [vmem:[%s12787_s25 + $0x210] sm:$0xff] }
 0x5c3   : > { %8115 = vmatmul.msk.f32.gmra.mxu2 %vm4916_vm3, %v10783_v25  ;;  %5752 = vmatpush.msrb.mxu1 %v8158_v35  ;;  %v5406_v25 = vld [vmem:[#allocation3 + $0x49] sm:$0xff] }
 0x5c4   : > { %8132 = vmatmul.msk.f32.gmra.mxu3 %vm4916_vm3, %v10724_v32 }
 0x5c5   : > { %5753 = vmatpush.msrb.mxu1 %v8157_v49 }
 0x5ca   : > { %8099 = vmatmul.msk.f32.gmra.mxu1 %vm4916_vm3, %v10724_v32  ;;  %8149 = vmatmul.msk.f32.gmra.mxu0 %vm4916_vm3, %v10798_v34  ;;  %v8156_v32 = vld [vmem:[%s12787_s25 + $0x200] sm:$0xff] }
 0x5cb   : > { %8116 = vmatmul.msk.f32.gmra.mxu2 %vm4916_vm3, %v10798_v34  ;;  %5754 = vmatpush.msrb.mxu1 %v8156_v32 }
 0x5cc   : > { %8133 = vmatmul.msk.f32.gmra.mxu3 %vm4916_vm3, %v10787_v38 }
 0x5d2   : > { %8100 = vmatmul.msk.f32.gmra.mxu1 %vm4916_vm3, %v10787_v38  ;;  %8150 = vmatmul.msk.f32.gmra.mxu0 %vm4916_vm3, %v10830_v31  ;;  %v10934_v38 = vpop.f32.mrf.mxu1 }
 0x5d3   : > { %8117 = vmatmul.msk.f32.gmra.mxu2 %vm4916_vm3, %v10830_v31  ;;  %v5700_v31 = vld [vmem:[#allocation3 + $0x52] sm:$0xff]  ;;  %v5080_v46 = vadd.f32 %v5079_v16, %v10934_v38 }
 0x5d4   : > { %8134 = vmatmul.msk.f32.gmra.mxu3 %vm4916_vm3, %v10825_v26  ;;  %v8180_v38 = vld [vmem:[%s12631_s5 + $0x78] sm:$0xff] }
 0x5d5   : > { %v5195_v32 = vadd.f32 %v5168_v5, %v5080_v46  ;;  %5918 = vmatpush.msra.mxu2 %v8180_v38 }
 0x5da   : > { %8101 = vmatmul.msk.f32.gmra.mxu1 %vm4916_vm3, %v10825_v26  ;;  %8151 = vmatmul.msk.f32.gmra.mxu0 %vm4916_vm3, %v5405_v59 }
 0x5db   : > { %8118 = vmatmul.msk.f32.gmra.mxu2 %vm4916_vm3, %v5405_v59 }
 0x5dc   : > { %8135 = vmatmul.msk.f32.gmra.mxu3 %vm4916_vm3, %v10843_v41 }
 0x5e2   : > { %8102 = vmatmul.msk.f32.gmra.mxu1 %vm4916_vm3, %v10843_v41  ;;  %8152 = vmatmul.msk.f32.gmra.mxu0 %vm4916_vm3, %v5406_v25 }
 0x5e3   : > { %8119 = vmatmul.msk.f32.gmra.mxu2 %vm4916_vm3, %v5406_v25 }
 0x5e4   : > { %8136 = vmatmul.msk.f32.gmra.mxu3 %vm4916_vm3, %v5114_v8 }
 0x5ea   : > { %8103 = vmatmul.msk.f32.gmra.mxu1 %vm4916_vm3, %v5114_v8  ;;  %8153 = vmatmul.msk.f32.gmra.mxu0 %vm4916_vm3, %v5407_v13 }
 0x5eb   : > { %8120 = vmatmul.msk.f32.gmra.mxu2 %vm4916_vm3, %v5407_v13 }
 0x5ec   : > { %8137 = vmatmul.msk.f32.gmra.mxu3 %vm4916_vm3, %v5505_v50 }
 0x5ef   : > { %v10940_v34 = vpop.f32.mrf.mxu1  ;;  %v5266_v17 = vpop.f32.mrf.mxu0 }
 0x5f0   : > { %v5293_v13 = vadd.f32 %v5266_v17, %v5195_v32  ;;  %v8176_v32 = vld [vmem:[%s12631_s5 + $0x58] sm:$0xff] }
 0x5f2   : > { %8104 = vmatmul.msk.f32.gmra.mxu1 %vm4916_vm3, %v5505_v50  ;;  %8154 = vmatmul.msk.f32.gmra.mxu0 %vm4916_vm3, %v5408_v45 }
 0x5f3   : > { %8121 = vmatmul.msk.f32.gmra.mxu2 %vm4916_vm3, %v5408_v45 }
 0x5f4   : > { %8138 = vmatmul.msk.f32.gmra.mxu3 %vm4916_vm3, %v10945_v3 }
 0x5f6   : > { %v5082_v60 = vpop.f32.mrf.mxu2 }
 0x5f7   : > { %v10949_v51 = vpop.f32.mrf.mxu1  ;;  %v5171_v44 = vpop.f32.mrf.mxu3  ;;  %v5083_v50 = vadd.f32 %v5082_v60, %v10940_v34 }
 0x5fa   : > { %8164 = vmatmul.msk.f32.vlgmr.msrb.gmra.mxu1 %vm4916_vm3, %v10699_v36  ;;  %8155 = vmatmul.msk.f32.gmra.mxu0 %vm4916_vm3, %v5604_v42  ;;  %v10966_v36 = vpop.f32.mrf.mxu0 }
 0x5fe   : > { %v10968_v2 = vpop.f32.mrf.mxu2 }
 0x5ff   : > { %v10954_v22 = vpop.f32.mrf.mxu1  ;;  %v10974_v55 = vpop.f32.mrf.mxu3  ;;  %v5086_v34 = vadd.f32 %v10968_v2, %v10949_v51  ;;  %v5888_v51 = vld [vmem:[%s12631_s5 + $0x38] sm:$0xff] }
 0x600   : > { %5953 = vmatpush.msra.mxu3 %v5888_v51 }
 0x602   : > { %8165 = vmatmul.msk.f32.gmra.mxu1 %vm4916_vm3, %v10785_v52  ;;  %v10976_v48 = vpop.f32.mrf.mxu0 }
 0x607   : > { %v10958_v14 = vpop.f32.mrf.mxu1  ;;  %v10981_v43 = vpop.f32.mrf.mxu3 }
 0x60a   : > { %8166 = vmatmul.msk.f32.gmra.mxu1 %vm4916_vm3, %v10800_v18  ;;  %v10978_v18 = vpop.f32.mrf.mxu2  ;;  %v10983_v26 = vpop.f32.mrf.mxu0 }
 0x60f   : > { %v10962_v20 = vpop.f32.mrf.mxu1 }
 0x612   : > { %8167 = vmatmul.msk.f32.gmra.mxu1 %vm4916_vm3, %v10832_v10  ;;  %v10985_v11 = vpop.f32.mrf.mxu2  ;;  %v10988_v10 = vpop.f32.mrf.mxu3 }
 0x613   : > { %v10990_v23 = vpop.f32.mrf.mxu0 }
 0x617   : > { %v10970_v52 = vpop.f32.mrf.mxu1 }
 0x61a   : > { %8168 = vmatmul.msk.f32.gmra.mxu1 %vm4916_vm3, %v10848_v21  ;;  %v10993_v40 = vpop.f32.mrf.mxu2  ;;  %v10995_v47 = vpop.f32.mrf.mxu3 }
 0x61b   : > { %v10998_v62 = vpop.f32.mrf.mxu0 }
 0x61f   : > { %v5029_v33 = vpop.f32.mrf.mxu1 }
 0x622   : > { %8169 = vmatmul.msk.f32.gmra.mxu1 %vm4916_vm3, %v5699_v37  ;;  %v11000_v57 = vpop.f32.mrf.mxu2  ;;  %v11002_v1 = vpop.f32.mrf.mxu3  ;;  %v5196_v37 = vadd.f32 %v5171_v44, %v5083_v50 }
 0x623   : > { %v11004_v61 = vpop.f32.mrf.mxu0 }
 0x624   : > { %v5294_v17 = vadd.f32 %v10966_v36, %v5196_v37  ;;  %v5887_v36 = vld [vmem:[%s12631_s5 + $0x30] sm:$0xff]  ;;  %v5092_v37 = vadd.f32 %v10985_v11, %v10958_v14  ;;  %v5882_v14 = vld [vmem:[%s12631_s5 + $0x8] sm:$0xff] }
 0x625   : > { %5954 = vmatpush.msra.mxu3 %v5887_v36 }
 0x626   : > { %v5199_v11 = vadd.f32 %v10988_v10, %v5092_v37 }
 0x627   : > { %v5032_v29 = vpop.f32.mrf.mxu1 }
 0x628   : > { %v5297_v10 = vadd.f32 %v10990_v23, %v5199_v11  ;;  %v5098_v23 = vadd.f32 %v11000_v57, %v10970_v52  ;;  %v8238_v57 = vld [vmem:[%s12631_s5 + $0x1b8] sm:$0xff] }
 0x629   : > { %6200 = vmatpush.msrb.mxu0 %v8238_v57 }
 0x62a   : > { %8170 = vmatmul.msk.f32.gmra.mxu1 %vm4916_vm3, %v5700_v31  ;;  %v5100_v19 = vpop.f32.mrf.mxu2  ;;  %v5189_v15 = vpop.f32.mrf.mxu3 }
 0x62b   : > { %v5287_v21 = vpop.f32.mrf.mxu0  ;;  %v5101_v53 = vadd.f32 %v5100_v19, %v5029_v33  ;;  %v11029_v19 = vld [vmem:[%s12636_s10] ss:$0 sm:$0xff] }
 0x62d   : > { %v5202_v54 = vadd.f32 %v5189_v15, %v5101_v53  ;;  %v5197_v15 = vadd.f32 %v10974_v55, %v5086_v34  ;;  %v5089_v55 = vadd.f32 %v10978_v18, %v10954_v22 }
 0x62f   : > { %v5364_v24 = vpop.f32.mrf.mxu1  ;;  %v5300_v56 = vadd.f32 %v5287_v21, %v5202_v54  ;;  %v5295_v53 = vadd.f32 %v10976_v48, %v5197_v15  ;;  %v8177_v48 = vld [vmem:[%s12631_s5 + $0x60] sm:$0xff] }
 0x630   : > { %v5391_v33 = vadd.f32 %v5364_v24, %v5293_v13  ;;  %v5884_v13 = vld [vmem:[%s12631_s5 + $0x18] sm:$0xff] }
 0x632   : > { %8171 = vmatmul.msk.f32.gmra.mxu1 %vm4916_vm3, %v5701_v63  ;;  %v5103_v12 = vpop.f32.mrf.mxu2  ;;  %v5192_v39 = vpop.f32.mrf.mxu3 }
 0x633   : > { %v5290_v30 = vpop.f32.mrf.mxu0  ;;  %v5104_v35 = vadd.f32 %v5103_v12, %v5032_v29 }
 0x635   : > { %v5203_v45 = vadd.f32 %v5192_v39, %v5104_v35  ;;  %v8179_v39 = vld [vmem:[%s12631_s5 + $0x70] sm:$0xff]  ;;  %v5886_v35 = vld [vmem:[%s12631_s5 + $0x28] sm:$0xff] }
 0x636   : > { %5919 = vmatpush.msra.mxu2 %v8179_v39  ;;  %5955 = vmatpush.msra.mxu3 %v5886_v35 }
 0x637   : > { %v5367_v27 = vpop.f32.mrf.mxu1  ;;  %v5301_v31 = vadd.f32 %v5290_v30, %v5203_v45 }
 0x638   : > { %v5392_v24 = vadd.f32 %v5367_v27, %v5294_v17 }
 0x63a   : > { %8172 = vmatmul.msk.f32.gmra.mxu1 %vm4916_vm3, %v5702_v28  ;;  %v5462_v7 = vpop.f32.mrf.mxu2  ;;  %v5560_v8 = vpop.f32.mrf.mxu3 }
 0x63b   : > { %v5658_v9 = vpop.f32.mrf.mxu0  ;;  %v5489_v63 = vadd.f32 %v5462_v7, %v5391_v33  ;;  %v5883_v33 = vld [vmem:[%s12631_s5 + $0x10] sm:$0xff] }
 0x63d   : > { %v5587_v60 = vadd.f32 %v5560_v8, %v5489_v63 }
 0x63f   : > { %v5370_v0 = vpop.f32.mrf.mxu1  ;;  %v5685_v21 = vadd.f32 %v5658_v9, %v5587_v60  ;;  %v5881_v60 = vld [vmem:[%s12631_s5] sm:$0xff] }
 0x640   : > { %v5393_v46 = vadd.f32 %v5370_v0, %v5295_v53 }
 0x642   : > { %v5465_v6 = vpop.f32.mrf.mxu2  ;;  %v5563_v42 = vpop.f32.mrf.mxu3 }
 0x643   : > { %v5661_v28 = vpop.f32.mrf.mxu0  ;;  %v5490_v12 = vadd.f32 %v5465_v6, %v5392_v24  ;;  %v5198_v6 = vadd.f32 %v10981_v43, %v5089_v55  ;;  %v5885_v43 = vld [vmem:[%s12631_s5 + $0x20] sm:$0xff] }
 0x644   : > { %5956 = vmatpush.msra.mxu3 %v5885_v43 }
 0x645   : > { %v5588_v8 = vadd.f32 %v5563_v42, %v5490_v12  ;;  %v5296_v45 = vadd.f32 %v10983_v26, %v5198_v6  ;;  %v8175_v42 = vld [vmem:[%s12631_s5 + $0x50] sm:$0xff] }
 0x646   : > { %5957 = vmatpush.msra.mxu3 %v5884_v13 }
 0x647   : > { %v11006_v41 = vpop.f32.mrf.mxu1  ;;  %v5686_v22 = vadd.f32 %v5661_v28, %v5588_v8 }
 0x648   : > { %v5394_v26 = vadd.f32 %v11006_v41, %v5296_v45  ;;  %5958 = vmatpush.msra.mxu3 %v5883_v33  ;;  %v8173_v41 = vld [vmem:[%s12631_s5 + $0x40] sm:$0xff] }
 0x64a   : > { %v5468_v16 = vpop.f32.mrf.mxu2  ;;  %v5566_v44 = vpop.f32.mrf.mxu3  ;;  %5959 = vmatpush.msra.mxu3 %v5882_v14  ;;  %v8205_v14 = vld [vmem:[%s12631_s5 + $0xf8] sm:$0xff] }
 0x64b   : > { %v5664_v27 = vpop.f32.mrf.mxu0  ;;  %v5491_v18 = vadd.f32 %v5468_v16, %v5393_v46 }
 0x64c   : > { %5960 = vmatpush.msra.mxu3 %v5881_v60 }
 0x64e   : > { %6050 = vmatpush.msrb.mxu3 %v8205_v14  ;;  %v8225_v14 = vld [vmem:[%s12631_s5 + $0x168] sm:$0xff] }
 0x64f   : > { %v11008_v59 = vpop.f32.mrf.mxu1 }
 0x650   : > { %v5395_v51 = vadd.f32 %v11008_v59, %v5297_v10 }
 0x652   : > { %v5471_v7 = vpop.f32.mrf.mxu2  ;;  %v5569_v0 = vpop.f32.mrf.mxu3 }
 0x653   : > { %v5667_v63 = vpop.f32.mrf.mxu0  ;;  %v5492_v34 = vadd.f32 %v5471_v7, %v5394_v26  ;;  %v8236_v26 = vld [vmem:[%s12631_s5 + $0x1a8] sm:$0xff] }
 0x655   : > { %v5590_v12 = vadd.f32 %v5569_v0, %v5492_v34  ;;  %v8245_v34 = vld [vmem:[%s12631_s5 + $0x1d8] sm:$0xff] }
 0x657   : > { %v11010_v4 = vpop.f32.mrf.mxu1  ;;  %v5688_v55 = vadd.f32 %v5667_v63, %v5590_v12 }
 0x65a   : > { %v5474_v38 = vpop.f32.mrf.mxu2  ;;  %v5572_v15 = vpop.f32.mrf.mxu3 }
 0x65b   : > { %v5670_v36 = vpop.f32.mrf.mxu0  ;;  %v5493_v7 = vadd.f32 %v5474_v38, %v5395_v51  ;;  %v8233_v51 = vld [vmem:[%s12631_s5 + $0x190] sm:$0xff] }
 0x65f   : > { %v11012_v58 = vpop.f32.mrf.mxu1 }
 0x662   : > { %v5575_v59 = vpop.f32.mrf.mxu3 }
 0x663   : > { %v5673_v43 = vpop.f32.mrf.mxu0 }
 0x667   : > { %v5385_v49 = vpop.f32.mrf.mxu1 }
 0x668   : > { %v11015_v25 = vadd.f32 %v5385_v49, %v5300_v56  ;;  %v8178_v56 = vld [vmem:[%s12631_s5 + $0x68] sm:$0xff] }
 0x669   : > { %5920 = vmatpush.msra.mxu2 %v8178_v56  ;;  %v5201_v56 = vadd.f32 %v11002_v1, %v5098_v23  ;;  %v8237_v1 = vld [vmem:[%s12631_s5 + $0x1b0] sm:$0xff] }
 0x66a   : > { %6201 = vmatpush.msrb.mxu0 %v8237_v1  ;;  %v8199_v1 = vld [vmem:[%s12631_s5 + $0xc8] sm:$0xff] }
 0x66b   : > { %5921 = vmatpush.msra.mxu2 %v8177_v48  ;;  %v5299_v45 = vadd.f32 %v11004_v61, %v5201_v56  ;;  %v8247_v61 = vld [vmem:[%s12631_s5 + $0x1e8] sm:$0xff]  ;;  %v5676_v60 = vpop.f32.mrf.mxu0 }
 0x66c   : > { %6202 = vmatpush.msrb.mxu0 %v8236_v26 }
 0x66d   : > { %5922 = vmatpush.msra.mxu2 %v8176_v32  ;;  %v8248_v32 = vld [vmem:[%s12631_s5 + $0x1f0] sm:$0xff]  ;;  %v5397_v37 = vadd.f32 %v11012_v58, %v5299_v45  ;;  %v8246_v58 = vld [vmem:[%s12631_s5 + $0x1e0] sm:$0xff] }
 0x66f   : > { %v5388_v29 = vpop.f32.mrf.mxu1  ;;  %5923 = vmatpush.msra.mxu2 %v8175_v42 }
 0x670   : > { %v11021_v5 = vadd.f32 %v5388_v29, %v5301_v31  ;;  %v5589_v31 = vadd.f32 %v5566_v44, %v5491_v18  ;;  %v8174_v29 = vld [vmem:[%s12631_s5 + $0x48] sm:$0xff] }
 0x671   : > { %5924 = vmatpush.msra.mxu2 %v8174_v29 }
 0x672   : > { %v5687_v17 = vadd.f32 %v5664_v27, %v5589_v31  ;;  %v5477_v27 = vpop.f32.mrf.mxu2 }
 0x673   : > { %5925 = vmatpush.msra.mxu2 %v8173_v41  ;;  %v5679_v57 = vpop.f32.mrf.mxu0 }
 0x677   : > { %v5756_v2 = vpop.f32.mrf.mxu1 }
 0x678   : > { %v5783_v30 = vadd.f32 %v5756_v2, %v5685_v21  ;;  %v5095_v21 = vadd.f32 %v10993_v40, %v10962_v20  ;;  %v5591_v40 = vadd.f32 %v5572_v15, %v5493_v7  ;;  %v8202_v7 = vld [vmem:[%s12631_s5 + $0xe0] sm:$0xff] }
 0x67a   : > { %v5796_v54 = vadd.f32 %v11029_v19, %v5783_v30  ;;  %v5200_v30 = vadd.f32 %v10995_v47, %v5095_v21  ;;  %v5689_v18 = vadd.f32 %v5670_v36, %v5591_v40  ;;  %v5480_v0 = vpop.f32.mrf.mxu2  ;;  %v8204_v21 = vld [vmem:[%s12631_s5 + $0xf0] sm:$0xff] }
 0x67b   : > { %v5495_v63 = vadd.f32 %v5480_v0, %v5397_v37  ;;  %v8244_v36 = vld [vmem:[%s12631_s5 + $0x1d0] sm:$0xff]  ;;  %6051 = vmatpush.msrb.mxu3 %v8204_v21  ;;  %v8190_v0 = vld [vmem:[%s12631_s5 + $0x98] sm:$0xff] }
 0x67c   : > { %v5805_v9 = vmax.f32 %v5796_v54, 0.0  ;;  %v5298_v20 = vadd.f32 %v10998_v62, %v5200_v30  ;;  %v8243_v30 = vld [vmem:[%s12631_s5 + $0x1c8] sm:$0xff] }
 0x67e   : > { %5814 = vst.msk [vmem:[#allocation2 + $0x18] sm:$0xff] %vm4916_vm3, %v5805_v9  ;;  %v5396_v6 = vadd.f32 %v11010_v4, %v5298_v20  ;;  %v8249_v4 = vld [vmem:[%s12631_s5 + $0x1f8] sm:$0xff] }
 0x67f   : > { %v5759_v49 = vpop.f32.mrf.mxu1  ;;  %6250 = vmatpush.msra.mxu1 %v8249_v4 }
 0x680   : > { %v5784_v50 = vadd.f32 %v5759_v49, %v5686_v22  ;;  %v5494_v48 = vadd.f32 %v5477_v27, %v5396_v6  ;;  %v8232_v27 = vld [vmem:[%s12631_s5 + $0x188] sm:$0xff]  ;;  %v8242_v6 = vld [vmem:[%s12631_s5 + $0x1c0] sm:$0xff] }
 0x681   : > { %6251 = vmatpush.msra.mxu1 %v8248_v32 }
 0x682   : > { %v5797_v28 = vadd.f32 %v11029_v19, %v5784_v50  ;;  %v5592_v42 = vadd.f32 %v5575_v59, %v5494_v48  ;;  %v8200_v48 = vld [vmem:[%s12631_s5 + $0xd0] sm:$0xff] }
 0x683   : > { %6252 = vmatpush.msra.mxu1 %v8247_v61 }
 0x684   : > { %v5806_v16 = vmax.f32 %v5797_v28, 0.0  ;;  %v5578_v28 = vpop.f32.mrf.mxu3  ;;  %v5690_v38 = vadd.f32 %v5673_v43, %v5592_v42  ;;  %v8191_v43 = vld [vmem:[%s12631_s5 + $0xa0] sm:$0xff] }
 0x685   : > { %v5824_v46 = vld [vmem:[#allocation2 + $0x18] ss:$2 sm:$0xf]  ;;  %v5826_v9 = vld [vmem:[#allocation2 + $0x19] ss:$2 sm:$0xf]  ;;  %v5593_v41 = vadd.f32 %v5578_v28, %v5495_v63  ;;  %6253 = vmatpush.msra.mxu1 %v8246_v58 }
 0x686   : > { %5815 = vst.msk [vmem:[#allocation2 + $0x20] sm:$0xff] %vm4916_vm3, %v5806_v16  ;;  %v5831_v52 = vmax.f32 %v5824_v46, %v5826_v9  ;;  %v8235_v16 = vld [vmem:[%s12631_s5 + $0x1a0] sm:$0xff]  ;;  %v8188_v63 = vld [vmem:[%s12631_s5 + $0x88] sm:$0xff] }
 0x687   : > { %v5762_v24 = vpop.f32.mrf.mxu1  ;;  %6203 = vmatpush.msrb.mxu0 %v8235_v16  ;;  %6254 = vmatpush.msra.mxu1 %v8245_v34  ;;  %v5691_v23 = vadd.f32 %v5676_v60, %v5593_v41  ;;  %v8231_v9 = vld [vmem:[%s12631_s5 + $0x180] sm:$0xff]  ;;  %v5682_v16 = vpop.f32.mrf.mxu0 }
 0x688   : > { %v5785_v44 = vadd.f32 %v5762_v24, %v5687_v17  ;;  %v8234_v17 = vld [vmem:[%s12631_s5 + $0x198] sm:$0xff]  ;;  %v5483_v24 = vpop.f32.mrf.mxu2 }
 0x689   : > { %6204 = vmatpush.msrb.mxu0 %v8234_v17  ;;  %6255 = vmatpush.msra.mxu1 %v8244_v36  ;;  %v8222_v36 = vld [vmem:[%s12631_s5 + $0x150] sm:$0xff] }
 0x68a   : > { %v5798_v39 = vadd.f32 %v11029_v19, %v5785_v44 }
 0x68b   : > { %6205 = vmatpush.msrb.mxu0 %v8233_v51  ;;  %6256 = vmatpush.msra.mxu1 %v8243_v30  ;;  %v8215_v51 = vld [vmem:[%s12631_s5 + $0x130] sm:$0xff]  ;;  %v8213_v30 = vld [vmem:[%s12631_s5 + $0x120] sm:$0xff] }
 0x68c   : > { %v5807_v2 = vmax.f32 %v5798_v39, 0.0 }
 0x68d   : > { %v5828_v35 = vld [vmem:[#allocation2 + $0x21] ss:$2 sm:$0xf]  ;;  %6206 = vmatpush.msrb.mxu0 %v8232_v27  ;;  %6257 = vmatpush.msra.mxu1 %v8242_v6  ;;  %v8221_v27 = vld [vmem:[%s12631_s5 + $0x148] sm:$0xff] }
 0x68e   : > { %5816 = vst.msk [vmem:[#allocation2 + $0x28] sm:$0xff] %vm4916_vm3, %v5807_v2  ;;  %v8203_v2 = vld [vmem:[%s12631_s5 + $0xe8] sm:$0xff] }
 0x68f   : > { %v5765_v53 = vpop.f32.mrf.mxu1  ;;  %6052 = vmatpush.msrb.mxu3 %v8203_v2  ;;  %6207 = vmatpush.msrb.mxu0 %v8231_v9  ;;  %v8214_v2 = vld [vmem:[%s12631_s5 + $0x128] sm:$0xff] }
 0x690   : > { %v5786_v8 = vadd.f32 %v5765_v53, %v5688_v55  ;;  %v8194_v53 = vld [vmem:[%s12631_s5 + $0xb8] sm:$0xff]  ;;  %v5486_v4 = vpop.f32.mrf.mxu2 }
 0x691   : > { %6000 = vmatpush.msrb.mxu2 %v8194_v53  ;;  %6053 = vmatpush.msrb.mxu3 %v8202_v7  ;;  %v5497_v42 = vadd.f32 %v5486_v4, %v11021_v5  ;;  %v8187_v5 = vld [vmem:[%s12631_s5 + $0x80] sm:$0xff]  ;;  %v8259_v4 = vld [vmem:[%s12631_s5 + $0x230] sm:$0xff] }
 0x692   : > { %v5799_v54 = vadd.f32 %v11029_v19, %v5786_v8  ;;  %v8193_v8 = vld [vmem:[%s12631_s5 + $0xb0] sm:$0xff] }
 0x693   : > { %6001 = vmatpush.msrb.mxu2 %v8193_v8 }
 0x694   : > { %v5808_v47 = vmax.f32 %v5799_v54, 0.0  ;;  %v5496_v54 = vadd.f32 %v5483_v24, %v11015_v25  ;;  %v8201_v25 = vld [vmem:[%s12631_s5 + $0xd8] sm:$0xff] }
 0x695   : > { %v5830_v22 = vld [vmem:[#allocation2 + $0x22] ss:$2 sm:$0xf]  ;;  %6054 = vmatpush.msrb.mxu3 %v8201_v25 }
 0x696   : > { %5817 = vst.msk [vmem:[#allocation2 + $0x30] sm:$0xff] %vm4916_vm3, %v5808_v47  ;;  %v5832_v62 = vmax.f32 %v5828_v35, %v5830_v22  ;;  %v5581_v47 = vpop.f32.mrf.mxu3  ;;  %v8192_v35 = vld [vmem:[%s12631_s5 + $0xa8] sm:$0xff] }
 0x697   : > { %v5768_v49 = vpop.f32.mrf.mxu1  ;;  %6002 = vmatpush.msrb.mxu2 %v8192_v35  ;;  %6055 = vmatpush.msrb.mxu3 %v8200_v48  ;;  %v8209_v35 = vld [vmem:[%s12631_s5 + $0x100] sm:$0xff] }
 0x698   : > { %v5787_v13 = vadd.f32 %v5768_v49, %v5689_v18  ;;  %v5833_v50 = vmax.f32 %v5831_v52, %v5832_v62  ;;  %v5594_v52 = vadd.f32 %v5581_v47, %v5496_v54  ;;  %v8212_v54 = vld [vmem:[%s12631_s5 + $0x118] sm:$0xff] }
 0x699   : > { %6003 = vmatpush.msrb.mxu2 %v8191_v43  ;;  %6056 = vmatpush.msrb.mxu3 %v8199_v1  ;;  %v8258_v1 = vld [vmem:[%s12631_s5 + $0x228] sm:$0xff] }
 0x69a   : > { %v5800_v33 = vadd.f32 %v11029_v19, %v5787_v13  ;;  %5834 = vst [vmem:[#allocation3 + $0x18] sm:$0xf] %v5833_v50  ;;  %v8198_v13 = vld [vmem:[%s12631_s5 + $0xc0] sm:$0xff]  ;;  %v8189_v50 = vld [vmem:[%s12631_s5 + $0x90] sm:$0xff]  ;;  %v5692_v45 = vadd.f32 %v5679_v57, %v5594_v52  ;;  %v8260_v57 = vld [vmem:[%s12631_s5 + $0x238] sm:$0xff] }
 0x69b   : > { %6004 = vmatpush.msrb.mxu2 %v8190_v0  ;;  %6057 = vmatpush.msrb.mxu3 %v8198_v13  ;;  %v8257_v0 = vld [vmem:[%s12631_s5 + $0x220] sm:$0xff]  ;;  %v8255_v13 = vld [vmem:[%s12631_s5 + $0x210] sm:$0xff] }
 0x69c   : > { %v5809_v31 = vmax.f32 %v5800_v33, 0.0 }
 0x69d   : > { %v5837_v10 = vld [vmem:[#allocation2 + $0x2a] ss:$2 sm:$0xf]  ;;  %v5839_v39 = vld [vmem:[#allocation2 + $0x2b] ss:$2 sm:$0xf]  ;;  %6005 = vmatpush.msrb.mxu2 %v8189_v50 }
 0x69e   : > { %5818 = vst.msk [vmem:[#allocation2 + $0x38] sm:$0xff] %vm4916_vm3, %v5809_v31  ;;  %v5844_v59 = vmax.f32 %v5837_v10, %v5839_v39  ;;  %v5584_v37 = vpop.f32.mrf.mxu3  ;;  %v8223_v39 = vld [vmem:[%s12631_s5 + $0x158] sm:$0xff]  ;;  %v8254_v50 = vld [vmem:[%s12631_s5 + $0x208] sm:$0xff] }
 0x69f   : > { %v5771_v29 = vpop.f32.mrf.mxu1  ;;  %v5595_v26 = vadd.f32 %v5584_v37, %v5497_v42  ;;  %6006 = vmatpush.msrb.mxu2 %v8188_v63  ;;  %v6173_v37 = vld [vmem:[#allocation3 + $0x2c] sm:$0xf] }
 0x6a0   : > { %v5788_v11 = vadd.f32 %v5771_v29, %v5690_v38  ;;  %v8226_v29 = vld [vmem:[%s12631_s5 + $0x170] sm:$0xff] }
 0x6a1   : > { %v5889_v44 = vld [vmem:[#allocation3 + $0x13] sm:$0xff]  ;;  %6007 = vmatpush.msrb.mxu2 %v8187_v5  ;;  %v5693_v34 = vadd.f32 %v5682_v16, %v5595_v26 }
 0x6a2   : > { %v5878_v15 = vld [vmem:[#allocation3 + $0x12] sm:$0xff]  ;;  %v5801_v12 = vadd.f32 %v11029_v19, %v5788_v11  ;;  %8181 = vmatmul.msk.f32.vlgmr.msra.gmra.mxu2 %vm4916_vm3, %v5889_v44  ;;  %v8224_v44 = vld [vmem:[%s12631_s5 + $0x160] sm:$0xff] }
 0x6a3   : > { %8184 = vmatmul.msk.f32.vlgmr.msra.gmra.mxu3 %vm4916_vm3, %v5878_v15  ;;  %v5971_v48 = vld [vmem:[#allocation3 + $0x14] sm:$0xff] }
 0x6a4   : > { %v5810_v55 = vmax.f32 %v5801_v12, 0.0  ;;  %v8216_v12 = vld [vmem:[%s12631_s5 + $0x138] sm:$0xff] }
 0x6a5   : > { %v5841_v20 = vld [vmem:[#allocation2 + $0x33] ss:$2 sm:$0xf]  ;;  %v5843_v40 = vld [vmem:[#allocation2 + $0x34] ss:$2 sm:$0xf]  ;;  %6100 = vmatpush.msra.mxu2 %v8216_v12 }
 0x6a6   : > { %5819 = vst.msk [vmem:[#allocation2 + $0x40] sm:$0xff] %vm4916_vm3, %v5810_v55  ;;  %v5845_v46 = vmax.f32 %v5841_v20, %v5843_v40  ;;  %v8220_v55 = vld [vmem:[%s12631_s5 + $0x140] sm:$0xff]  ;;  %v8275_v12 = vld [vmem:[%s12632_s6 + $0xd8] sm:$0xff] }
 0x6a7   : > { %v5774_v56 = vpop.f32.mrf.mxu1  ;;  %6356 = vst [vmem:[#allocation2 + $0x34] sm:$0xff] %v10945_v3  ;;  %6101 = vmatpush.msra.mxu2 %v8215_v51  ;;  %v8294_v51 = vld [vmem:[%s12632_s6 + $0x170] sm:$0xff] }
 0x6a8   : > { %v5789_v22 = vadd.f32 %v5774_v56, %v5691_v23  ;;  %v5846_v18 = vmax.f32 %v5844_v59, %v5845_v46  ;;  %6355 = vst [vmem:[#allocation2 + $0x2c] sm:$0xff] %v10945_v3  ;;  %v8211_v59 = vld [vmem:[%s12631_s5 + $0x110] sm:$0xff]  ;;  %v8210_v46 = vld [vmem:[%s12631_s5 + $0x108] sm:$0xff] }
 0x6a9   : > { %6102 = vmatpush.msra.mxu2 %v8214_v2  ;;  %v8293_v2 = vld [vmem:[%s12632_s6 + $0x168] sm:$0xff] }
 0x6aa   : > { %v5802_v62 = vadd.f32 %v11029_v19, %v5789_v22  ;;  %5847 = vst [vmem:[#allocation3 + $0x1d] sm:$0xf] %v5846_v18 }
 0x6ab   : > { %6103 = vmatpush.msra.mxu2 %v8213_v30  ;;  %v8309_v30 = vld [vmem:[%s12632_s6 + $0x1e8] sm:$0xff] }
 0x6ac   : > { %v5811_v49 = vmax.f32 %v5802_v62, 0.0 }
 0x6ad   : > { %v5850_v32 = vld [vmem:[#allocation2 + $0x3c] ss:$2 sm:$0xf]  ;;  %v5852_v33 = vld [vmem:[#allocation2 + $0x3d] ss:$2 sm:$0xf]  ;;  %6104 = vmatpush.msra.mxu2 %v8212_v54 }
 0x6ae   : > { %5820 = vst.msk [vmem:[#allocation2 + $0x48] sm:$0xff] %vm4916_vm3, %v5811_v49  ;;  %v5857_v41 = vmax.f32 %v5850_v32, %v5852_v33  ;;  %v8256_v32 = vld [vmem:[%s12631_s5 + $0x218] sm:$0xff] }
 0x6af   : > { %v5777_v31 = vpop.f32.mrf.mxu1  ;;  %6357 = vst [vmem:[#allocation2 + $0x3c] sm:$0xff] %v10945_v3  ;;  %v8227_v3 = vld [vmem:[%s12631_s5 + $0x178] sm:$0xff]  ;;  %6105 = vmatpush.msra.mxu2 %v8211_v59 }
 0x6b0   : > { %v5790_v28 = vadd.f32 %v5777_v31, %v5692_v45  ;;  %6150 = vmatpush.msra.mxu3 %v8227_v3  ;;  %v8253_v45 = vld [vmem:[%s12631_s5 + $0x200] sm:$0xff]  ;;  %v6223_v31 = vld [vmem:[#allocation3 + $0x2d] sm:$0xf]  ;;  %v6372_v54 = vld [vmem:[%s12632_s6 + $0x58] sm:$0xff] }
 0x6b1   : > { %v5879_v38 = vld [vmem:[#allocation3 + $0x1a] sm:$0xff]  ;;  %6106 = vmatpush.msra.mxu2 %v8210_v46  ;;  %v6273_v3 = vld [vmem:[#allocation3 + $0x2e] sm:$0xf] }
 0x6b2   : > { %v5803_v61 = vadd.f32 %v11029_v19, %v5790_v28  ;;  %8185 = vmatmul.msk.f32.gmra.mxu3 %vm4916_vm3, %v5879_v38  ;;  %v6021_v18 = vld [vmem:[#allocation3 + $0x17] sm:$0xff] }
 0x6b3   : > { %6151 = vmatpush.msra.mxu3 %v8226_v29  ;;  %6107 = vmatpush.msra.mxu2 %v8209_v35  ;;  %v6121_v33 = vld [vmem:[#allocation3 + $0x19] sm:$0xff]  ;;  %v6370_v35 = vld [vmem:[%s12632_s6 + $0x48] sm:$0xff] }
 0x6b4   : > { %v5812_v58 = vmax.f32 %v5803_v61, 0.0  ;;  %v6071_v63 = vld [vmem:[#allocation3 + $0x18] sm:$0xff] }
 0x6b5   : > { %v5854_v11 = vld [vmem:[#allocation2 + $0x45] ss:$2 sm:$0xf]  ;;  %v5856_v17 = vld [vmem:[#allocation2 + $0x46] ss:$2 sm:$0xf]  ;;  %6152 = vmatpush.msra.mxu3 %v8225_v14 }
 0x6b6   : > { %5821 = vst.msk [vmem:[#allocation2 + $0x50] sm:$0xff] %vm4916_vm3, %v5812_v58  ;;  %v5858_v60 = vmax.f32 %v5854_v11, %v5856_v17  ;;  %v8279_v11 = vld [vmem:[%s12632_s6 + $0xf8] sm:$0xff]  ;;  %v8278_v17 = vld [vmem:[%s12632_s6 + $0xf0] sm:$0xff] }
 0x6b7   : > { %v5780_v24 = vpop.f32.mrf.mxu1  ;;  %6153 = vmatpush.msra.mxu3 %v8224_v44  ;;  %v8276_v44 = vld [vmem:[%s12632_s6 + $0xe0] sm:$0xff]  ;;  %v8291_v59 = vld [vmem:[%s12632_s6 + $0x158] sm:$0xff] }
 0x6b8   : > { %v5791_v15 = vadd.f32 %v5780_v24, %v5693_v34  ;;  %v5859_v10 = vmax.f32 %v5857_v41, %v5858_v60  ;;  %v8277_v24 = vld [vmem:[%s12632_s6 + $0xe8] sm:$0xff]  ;;  %v8307_v46 = vld [vmem:[%s12632_s6 + $0x1d8] sm:$0xff] }
 0x6b9   : > { %6154 = vmatpush.msra.mxu3 %v8223_v39  ;;  %v6375_v39 = vld [vmem:[%s12632_s6 + $0x70] sm:$0xff] }
 0x6ba   : > { %v5804_v21 = vadd.f32 %v11029_v19, %v5791_v15  ;;  %5860 = vst [vmem:[#allocation3 + $0x22] sm:$0xf] %v5859_v10  ;;  %v6376_v15 = vld [vmem:[%s12632_s6 + $0x78] sm:$0xff] }
 0x6bb   : > { %6155 = vmatpush.msra.mxu3 %v8222_v36  ;;  %6423 = vmatpush.msra.mxu0 %v6376_v15  ;;  %v8295_v10 = vld [vmem:[%s12632_s6 + $0x178] sm:$0xff]  ;;  %v8310_v36 = vld [vmem:[%s12632_s6 + $0x1f0] sm:$0xff] }
 0x6bc   : > { %v5813_v19 = vmax.f32 %v5804_v21, 0.0  ;;  %v8311_v21 = vld [vmem:[%s12632_s6 + $0x1f8] sm:$0xff]  ;;  %6469 = vmatpush.msrb.mxu1 %v8295_v10  ;;  %v6363_v10 = vld [vmem:[%s12632_s6 + $0x10] sm:$0xff] }
 0x6bd   : > { %6156 = vmatpush.msra.mxu3 %v8221_v27  ;;  %v5863_v20 = vld [vmem:[#allocation2 + $0x4e] ss:$2 sm:$0xf]  ;;  %v5865_v40 = vld [vmem:[#allocation2 + $0x4f] ss:$2 sm:$0xf]  ;;  %6424 = vmatpush.msra.mxu0 %v6375_v39 }
 0x6be   : > { %5822 = vst.msk [vmem:[#allocation2 + $0x58] sm:$0xff] %vm4916_vm3, %v5813_v19  ;;  %v5870_v47 = vmax.f32 %v5863_v20, %v5865_v40  ;;  %v6374_v19 = vld [vmem:[%s12632_s6 + $0x68] sm:$0xff]  ;;  %6470 = vmatpush.msrb.mxu1 %v8294_v51  ;;  %v8274_v27 = vld [vmem:[%s12632_s6 + $0xd0] sm:$0xff]  ;;  %v8308_v20 = vld [vmem:[%s12632_s6 + $0x1e0] sm:$0xff] }
 0x6bf   : > { %6157 = vmatpush.msra.mxu3 %v8220_v55  ;;  %6425 = vmatpush.msra.mxu0 %v6374_v19  ;;  %v8272_v40 = vld [vmem:[%s12632_s6 + $0xc0] sm:$0xff]  ;;  %v8327_v15 = vld [vmem:[%s12632_s6 + $0x278] sm:$0xff]  ;;  %v8298_v39 = vld [vmem:[%s12632_s6 + $0x190] sm:$0xff] }
 0x6c0   : > { %6471 = vmatpush.msrb.mxu1 %v8293_v2  ;;  %v8326_v51 = vld [vmem:[%s12632_s6 + $0x270] sm:$0xff]  ;;  %v8325_v19 = vld [vmem:[%s12632_s6 + $0x268] sm:$0xff] }
 0x6c1   : > { %v5890_v7 = vld [vmem:[#allocation3 + $0x1b] sm:$0xff]  ;;  %v5891_v22 = vld [vmem:[#allocation3 + $0x23] sm:$0xf] }
 0x6c2   : > { %v5880_v53 = vld [vmem:[#allocation3 + $0x22] sm:$0xf]  ;;  %8182 = vmatmul.msk.f32.gmra.mxu2 %vm4916_vm3, %v5890_v7  ;;  %v8273_v7 = vld [vmem:[%s12632_s6 + $0xc8] sm:$0xff] }
 0x6c3   : > { %v6171_v8 = vld [vmem:[#allocation3 + $0x1c] sm:$0xff]  ;;  %8186 = vmatmul.msk.f32.gmra.mxu3 %vm4916_vm3, %v5880_v53 }
 0x6c4   : > { %v6221_v23 = vld [vmem:[#allocation3 + $0x1d] sm:$0xff]  ;;  %8239 = vmatmul.msk.f32.vlgmr.msrb.gmra.mxu0 %vm4916_vm3, %v6171_v8 }
 0x6c5   : > { %8250 = vmatmul.msk.f32.vlgmr.msra.gmra.mxu1 %vm4916_vm3, %v6221_v23  ;;  %v5867_v9 = vld [vmem:[#allocation2 + $0x57] ss:$2 sm:$0xf]  ;;  %v5869_v6 = vld [vmem:[#allocation2 + $0x58] ss:$2 sm:$0xf] }
 0x6c6   : > { %v5871_v56 = vmax.f32 %v5867_v9, %v5869_v6  ;;  %v6022_v43 = vld [vmem:[#allocation3 + $0x1f] sm:$0xff]  ;;  %v6371_v6 = vld [vmem:[%s12632_s6 + $0x50] sm:$0xff] }
 0x6c7   : > { %v6271_v61 = vld [vmem:[#allocation3 + $0x1e] sm:$0xff] }
 0x6c8   : > { %v5872_v25 = vmax.f32 %v5870_v47, %v5871_v56  ;;  %v6373_v53 = vld [vmem:[%s12632_s6 + $0x60] sm:$0xff]  ;;  %v8271_v9 = vld [vmem:[%s12632_s6 + $0xb8] sm:$0xff]  ;;  %v8290_v47 = vld [vmem:[%s12632_s6 + $0x150] sm:$0xff] }
 0x6c9   : > { %6426 = vmatpush.msra.mxu0 %v6373_v53  ;;  %v8306_v56 = vld [vmem:[%s12632_s6 + $0x1d0] sm:$0xff] }
 0x6ca   : > { %8183 = vmatmul.msk.f32.gmra.mxu2 %vm4916_vm3, %v5891_v22  ;;  %5873 = vst [vmem:[#allocation3 + $0x27] sm:$0xf] %v5872_v25  ;;  %v8270_v25 = vld [vmem:[%s12632_s6 + $0xb0] sm:$0xff] }
 0x6cb   : > { %8206 = vmatmul.msk.f32.vlgmr.msrb.gmra.mxu3 %vm4916_vm3, %v6021_v18  ;;  %6427 = vmatpush.msra.mxu0 %v6372_v54  ;;  %v8289_v18 = vld [vmem:[%s12632_s6 + $0x148] sm:$0xff]  ;;  %v8375_v54 = vld [vmem:[%s12632_s6 + $0x3f8] sm:$0xff] }
 0x6cc   : > { %6397 = vmatpush.msrb.mxu3 %v8279_v11  ;;  %v8264_v11 = vld [vmem:[%s12632_s6 + $0x80] sm:$0xff] }
 0x6cd   : > { %6428 = vmatpush.msra.mxu0 %v6371_v6  ;;  %v8374_v6 = vld [vmem:[%s12632_s6 + $0x3f0] sm:$0xff] }
 0x6ce   : > { %6398 = vmatpush.msrb.mxu3 %v8278_v17  ;;  %v6364_v17 = vld [vmem:[%s12632_s6 + $0x18] sm:$0xff] }
 0x6cf   : > { %6429 = vmatpush.msra.mxu0 %v6370_v35  ;;  %v8341_v35 = vld [vmem:[%s12632_s6 + $0x2e8] sm:$0xff] }
 0x6d0   : > { %6399 = vmatpush.msrb.mxu3 %v8277_v24  ;;  %v8283_v24 = vld [vmem:[%s12632_s6 + $0x118] sm:$0xff] }
 0x6d1   : > { %v6172_v52 = vld [vmem:[#allocation3 + $0x24] sm:$0xff] }
 0x6d2   : > { %v6222_v62 = vld [vmem:[#allocation3 + $0x25] sm:$0xff]  ;;  %8195 = vmatmul.msk.f32.vlgmr.msrb.gmra.mxu2 %vm4916_vm3, %v5971_v48  ;;  %8240 = vmatmul.msk.f32.gmra.mxu0 %vm4916_vm3, %v6172_v52 }
 0x6d3   : > { %8207 = vmatmul.msk.f32.gmra.mxu3 %vm4916_vm3, %v6022_v43  ;;  %8251 = vmatmul.msk.f32.gmra.mxu1 %vm4916_vm3, %v6222_v62  ;;  %v6023_v49 = vld [vmem:[#allocation3 + $0x27] sm:$0xf] }
 0x6d4   : > { %6300 = vmatpush.msrb.mxu2 %v8260_v57  ;;  %v5973_v42 = vld [vmem:[#allocation3 + $0x24] sm:$0xf]  ;;  %v6123_v5 = vld [vmem:[#allocation3 + $0x29] sm:$0xf]  ;;  %6400 = vmatpush.msrb.mxu3 %v8276_v44  ;;  %v8299_v44 = vld [vmem:[%s12632_s6 + $0x198] sm:$0xff] }
 0x6d5   : > { %v6122_v28 = vld [vmem:[#allocation3 + $0x21] sm:$0xff] }
 0x6d6   : > { %6301 = vmatpush.msrb.mxu2 %v8259_v4  ;;  %v6072_v38 = vld [vmem:[#allocation3 + $0x20] sm:$0xff]  ;;  %v6073_v26 = vld [vmem:[#allocation3 + $0x28] sm:$0xf]  ;;  %6401 = vmatpush.msrb.mxu3 %v8275_v12 }
 0x6d7   : > { %v6272_v16 = vld [vmem:[#allocation3 + $0x26] sm:$0xff] }
 0x6d8   : > { %6302 = vmatpush.msrb.mxu2 %v8258_v1  ;;  %6402 = vmatpush.msrb.mxu3 %v8274_v27  ;;  %v8305_v48 = vld [vmem:[%s12632_s6 + $0x1c8] sm:$0xff]  ;;  %v6369_v52 = vld [vmem:[%s12632_s6 + $0x40] sm:$0xff]  ;;  %v6368_v1 = vld [vmem:[%s12632_s6 + $0x38] sm:$0xff] }
 0x6d9   : > { %v8269_v43 = vld [vmem:[%s12632_s6 + $0xa8] sm:$0xff]  ;;  %v8288_v62 = vld [vmem:[%s12632_s6 + $0x140] sm:$0xff]  ;;  %6430 = vmatpush.msra.mxu0 %v6369_v52 }
 0x6da   : > { %8196 = vmatmul.msk.f32.gmra.mxu2 %vm4916_vm3, %v6171_v8  ;;  %8241 = vmatmul.msk.f32.gmra.mxu0 %vm4916_vm3, %v6173_v37  ;;  %v8292_v8 = vld [vmem:[%s12632_s6 + $0x160] sm:$0xff]  ;;  %v6366_v37 = vld [vmem:[%s12632_s6 + $0x28] sm:$0xff] }
 0x6db   : > { %8208 = vmatmul.msk.f32.gmra.mxu3 %vm4916_vm3, %v6023_v49  ;;  %6303 = vmatpush.msrb.mxu2 %v8257_v0  ;;  %v8304_v57 = vld [vmem:[%s12632_s6 + $0x1c0] sm:$0xff]  ;;  %v8287_v0 = vld [vmem:[%s12632_s6 + $0x138] sm:$0xff] }
 0x6dc   : > { %8252 = vmatmul.msk.f32.gmra.mxu1 %vm4916_vm3, %v6223_v31  ;;  %6403 = vmatpush.msrb.mxu3 %v8273_v7  ;;  %v8268_v4 = vld [vmem:[%s12632_s6 + $0xa0] sm:$0xff]  ;;  %v8303_v49 = vld [vmem:[%s12632_s6 + $0x1b8] sm:$0xff] }
 0x6dd   : > { %6304 = vmatpush.msrb.mxu2 %v8256_v32  ;;  %6472 = vmatpush.msrb.mxu1 %v8292_v8  ;;  %v8267_v32 = vld [vmem:[%s12632_s6 + $0x98] sm:$0xff]  ;;  %v6361_v27 = vld [vmem:[%s12632_s6] sm:$0xff] }
 0x6de   : > { %6404 = vmatpush.msrb.mxu3 %v8272_v40  ;;  %6431 = vmatpush.msra.mxu0 %v6368_v1  ;;  %v8296_v7 = vld [vmem:[%s12632_s6 + $0x180] sm:$0xff]  ;;  %v8343_v8 = vld [vmem:[%s12632_s6 + $0x2f8] sm:$0xff] }
 0x6df   : > { %6305 = vmatpush.msrb.mxu2 %v8255_v13  ;;  %6473 = vmatpush.msrb.mxu1 %v8291_v59  ;;  %v6367_v13 = vld [vmem:[%s12632_s6 + $0x30] sm:$0xff]  ;;  %v8323_v59 = vld [vmem:[%s12632_s6 + $0x258] sm:$0xff]  ;;  %v8356_v52 = vld [vmem:[%s12632_s6 + $0x360] sm:$0xff] }
 0x6e0   : > { %6405 = vmatpush.msrb.mxu3 %v8271_v9  ;;  %6432 = vmatpush.msra.mxu0 %v6367_v13 }
 0x6e1   : > { %6306 = vmatpush.msrb.mxu2 %v8254_v50  ;;  %6474 = vmatpush.msrb.mxu1 %v8290_v47  ;;  %v8322_v47 = vld [vmem:[%s12632_s6 + $0x250] sm:$0xff] }
 0x6e2   : > { %8197 = vmatmul.msk.f32.gmra.mxu2 %vm4916_vm3, %v5973_v42  ;;  %6406 = vmatpush.msrb.mxu3 %v8270_v25  ;;  %v8302_v42 = vld [vmem:[%s12632_s6 + $0x1b0] sm:$0xff] }
 0x6e3   : > { %8228 = vmatmul.msk.f32.vlgmr.msra.gmra.mxu3 %vm4916_vm3, %v6121_v33  ;;  %6307 = vmatpush.msrb.mxu2 %v8253_v45  ;;  %v8286_v45 = vld [vmem:[%s12632_s6 + $0x130] sm:$0xff] }
 0x6e4   : > { %6475 = vmatpush.msrb.mxu1 %v8289_v18  ;;  %6407 = vmatpush.msrb.mxu3 %v8269_v43  ;;  %v8266_v33 = vld [vmem:[%s12632_s6 + $0x90] sm:$0xff]  ;;  %v8357_v18 = vld [vmem:[%s12632_s6 + $0x368] sm:$0xff]  ;;  %v8340_v43 = vld [vmem:[%s12632_s6 + $0x2e0] sm:$0xff] }
 0x6e5   : > { %6433 = vmatpush.msra.mxu0 %v6366_v37  ;;  %v8318_v37 = vld [vmem:[%s12632_s6 + $0x230] sm:$0xff] }
 0x6e6   : > { %6476 = vmatpush.msrb.mxu1 %v8288_v62  ;;  %6408 = vmatpush.msrb.mxu3 %v8268_v4  ;;  %v8372_v62 = vld [vmem:[%s12632_s6 + $0x3e0] sm:$0xff] }
 0x6e8   : > { %6477 = vmatpush.msrb.mxu1 %v8287_v0  ;;  %6409 = vmatpush.msrb.mxu3 %v8267_v32  ;;  %v8339_v0 = vld [vmem:[%s12632_s6 + $0x2d8] sm:$0xff] }
 0x6e9   : > { %v8371_v32 = vld [vmem:[%s12632_s6 + $0x3d8] sm:$0xff] }
 0x6ea   : > { %8217 = vmatmul.msk.f32.vlgmr.msra.gmra.mxu2 %vm4916_vm3, %v6071_v63  ;;  %v8285_v63 = vld [vmem:[%s12632_s6 + $0x128] sm:$0xff]  ;;  %6478 = vmatpush.msrb.mxu1 %v8286_v45  ;;  %v8319_v45 = vld [vmem:[%s12632_s6 + $0x238] sm:$0xff] }
 0x6eb   : > { %8229 = vmatmul.msk.f32.gmra.mxu3 %vm4916_vm3, %v6122_v28  ;;  %6518 = vmatpush.msra.mxu2 %v8311_v21  ;;  %v8301_v28 = vld [vmem:[%s12632_s6 + $0x1a8] sm:$0xff]  ;;  %v8282_v21 = vld [vmem:[%s12632_s6 + $0x110] sm:$0xff] }
 0x6ec   : > { %6410 = vmatpush.msrb.mxu3 %v8266_v33  ;;  %6479 = vmatpush.msrb.mxu1 %v8285_v63  ;;  %v8354_v33 = vld [vmem:[%s12632_s6 + $0x350] sm:$0xff] }
 0x6ed   : > { %6519 = vmatpush.msra.mxu2 %v8310_v36  ;;  %v6362_v36 = vld [vmem:[%s12632_s6 + $0x8] sm:$0xff] }
 0x6ef   : > { %6520 = vmatpush.msra.mxu2 %v8309_v30  ;;  %v8280_v30 = vld [vmem:[%s12632_s6 + $0x100] sm:$0xff] }
 0x6f1   : > { %6521 = vmatpush.msra.mxu2 %v8308_v20  ;;  %v8359_v20 = vld [vmem:[%s12632_s6 + $0x378] sm:$0xff] }
 0x6f2   : > { %8218 = vmatmul.msk.f32.gmra.mxu2 %vm4916_vm3, %v6072_v38  ;;  %v8265_v38 = vld [vmem:[%s12632_s6 + $0x88] sm:$0xff] }
 0x6f3   : > { %8230 = vmatmul.msk.f32.gmra.mxu3 %vm4916_vm3, %v6123_v5  ;;  %6522 = vmatpush.msra.mxu2 %v8307_v46  ;;  %v6365_v5 = vld [vmem:[%s12632_s6 + $0x20] sm:$0xff]  ;;  %v8342_v46 = vld [vmem:[%s12632_s6 + $0x2f0] sm:$0xff] }
 0x6f4   : > { %6411 = vmatpush.msrb.mxu3 %v8265_v38  ;;  %6434 = vmatpush.msra.mxu0 %v6365_v5  ;;  %v8337_v5 = vld [vmem:[%s12632_s6 + $0x2c8] sm:$0xff] }
 0x6f5   : > { %6523 = vmatpush.msra.mxu2 %v8306_v56 }
 0x6f6   : > { %6412 = vmatpush.msrb.mxu3 %v8264_v11  ;;  %6435 = vmatpush.msra.mxu0 %v6364_v17  ;;  %v8336_v17 = vld [vmem:[%s12632_s6 + $0x2c0] sm:$0xff] }
 0x6f7   : > { %6524 = vmatpush.msra.mxu2 %v8305_v48  ;;  %v8373_v48 = vld [vmem:[%s12632_s6 + $0x3e8] sm:$0xff] }
 0x6f8   : > { %6567 = vmatpush.msra.mxu3 %v8327_v15  ;;  %6436 = vmatpush.msra.mxu0 %v6363_v10 }
 0x6f9   : > { %6525 = vmatpush.msra.mxu2 %v8304_v57 }
 0x6fa   : > { %8219 = vmatmul.msk.f32.gmra.mxu2 %vm4916_vm3, %v6073_v26  ;;  %v8284_v26 = vld [vmem:[%s12632_s6 + $0x120] sm:$0xff]  ;;  %6568 = vmatpush.msra.mxu3 %v8326_v51 }
 0x6fb   : > { %6526 = vmatpush.msra.mxu2 %v8303_v49  ;;  %6480 = vmatpush.msrb.mxu1 %v8284_v26  ;;  %v8355_v49 = vld [vmem:[%s12632_s6 + $0x358] sm:$0xff]  ;;  %v8353_v26 = vld [vmem:[%s12632_s6 + $0x348] sm:$0xff] }
 0x6fc   : > { %6437 = vmatpush.msra.mxu0 %v6362_v36  ;;  %6569 = vmatpush.msra.mxu3 %v8325_v19 }
 0x6fd   : > { %6527 = vmatpush.msra.mxu2 %v8302_v42  ;;  %6481 = vmatpush.msrb.mxu1 %v8283_v24  ;;  %v8338_v42 = vld [vmem:[%s12632_s6 + $0x2d0] sm:$0xff]  ;;  %v8352_v24 = vld [vmem:[%s12632_s6 + $0x340] sm:$0xff] }
 0x6fe   : > { %6438 = vmatpush.msra.mxu0 %v6361_v27  ;;  %v8334_v27 = vld [vmem:[%s12632_s6 + $0x2b0] sm:$0xff] }
 0x6ff   : > { %6528 = vmatpush.msra.mxu2 %v8301_v28  ;;  %6482 = vmatpush.msrb.mxu1 %v8282_v21  ;;  %v11654_v21 = vld [vmem:[%s12637_s11] ss:$0 sm:$0xff] }
 0x700   : > { %6616 = vmatpush.msrb.mxu0 %v8343_v8 }
 0x702   : > { %8261 = vmatmul.msk.f32.vlgmr.msrb.gmra.mxu2 %vm4916_vm3, %v6271_v61  ;;  %v8300_v61 = vld [vmem:[%s12632_s6 + $0x1a0] sm:$0xff]  ;;  %6617 = vmatpush.msrb.mxu0 %v8342_v46  ;;  %v8313_v46 = vld [vmem:[%s12632_s6 + $0x208] sm:$0xff] }
 0x703   : > { %6529 = vmatpush.msra.mxu2 %v8300_v61 }
 0x704   : > { %6618 = vmatpush.msrb.mxu0 %v8341_v35  ;;  %v8312_v35 = vld [vmem:[%s12632_s6 + $0x200] sm:$0xff] }
 0x705   : > { %6530 = vmatpush.msra.mxu2 %v8299_v44  ;;  %v8368_v44 = vld [vmem:[%s12632_s6 + $0x3c0] sm:$0xff] }
 0x706   : > { %6619 = vmatpush.msrb.mxu0 %v8340_v43  ;;  %v8347_v43 = vld [vmem:[%s12632_s6 + $0x318] sm:$0xff] }
 0x707   : > { %6531 = vmatpush.msra.mxu2 %v8298_v39  ;;  %v8351_v39 = vld [vmem:[%s12632_s6 + $0x338] sm:$0xff] }
 0x708   : > { %6620 = vmatpush.msrb.mxu0 %v8339_v0  ;;  %v8362_v0 = vld [vmem:[%s12632_s6 + $0x390] sm:$0xff] }
 0x70a   : > { %8262 = vmatmul.msk.f32.gmra.mxu2 %vm4916_vm3, %v6272_v16  ;;  %6621 = vmatpush.msrb.mxu0 %v8338_v42 }
 0x70c   : > { %6622 = vmatpush.msrb.mxu0 %v8337_v5 }
 0x70e   : > { %6623 = vmatpush.msrb.mxu0 %v8336_v17 }
 0x712   : > { %8263 = vmatmul.msk.f32.gmra.mxu2 %vm4916_vm3, %v6273_v3 }
 0x725   : > { %v11316_v29 = vpop.f32.mrf.mxu2 }
 0x726   : > { %v11318_v58 = vpop.f32.mrf.mxu3 }
 0x727   : > { %v5963_v12 = vadd.f32 %v11318_v58, %v11316_v29  ;;  %v8281_v29 = vld [vmem:[%s12632_s6 + $0x108] sm:$0xff] }
 0x728   : > { %v8297_v58 = vld [vmem:[%s12632_s6 + $0x188] sm:$0xff]  ;;  %6483 = vmatpush.msrb.mxu1 %v8281_v29  ;;  %v8367_v29 = vld [vmem:[%s12632_s6 + $0x3b8] sm:$0xff] }
 0x729   : > { %6532 = vmatpush.msra.mxu2 %v8297_v58  ;;  %v8315_v58 = vld [vmem:[%s12632_s6 + $0x218] sm:$0xff] }
 0x72a   : > { %6484 = vmatpush.msrb.mxu1 %v8280_v30  ;;  %v8350_v30 = vld [vmem:[%s12632_s6 + $0x330] sm:$0xff] }
 0x72b   : > { %6533 = vmatpush.msra.mxu2 %v8296_v7  ;;  %v8366_v7 = vld [vmem:[%s12632_s6 + $0x3b0] sm:$0xff] }
 0x72c   : > { %6665 = vmatpush.msra.mxu1 %v8359_v20  ;;  %v8333_v20 = vld [vmem:[%s12632_s6 + $0x2a8] sm:$0xff] }
 0x72d   : > { %6714 = vmatpush.msrb.mxu2 %v8375_v54 }
 0x72f   : > { %6715 = vmatpush.msrb.mxu2 %v8374_v6  ;;  %v8348_v6 = vld [vmem:[%s12632_s6 + $0x320] sm:$0xff] }
 0x731   : > { %6716 = vmatpush.msrb.mxu2 %v8373_v48 }
 0x733   : > { %6717 = vmatpush.msrb.mxu2 %v8372_v62 }
 0x735   : > { %v11328_v34 = vpop.f32.mrf.mxu3  ;;  %6718 = vmatpush.msrb.mxu2 %v8371_v32 }
 0x741   : > { %v6209_v4 = vpop.f32.mrf.mxu0 }
 0x742   : > { %v6259_v61 = vpop.f32.mrf.mxu1 }
 0x745   : > { %v11320_v14 = vpop.f32.mrf.mxu2 }
 0x746   : > { %v11332_v60 = vpop.f32.mrf.mxu3  ;;  %v5966_v56 = vadd.f32 %v11328_v34, %v11320_v14  ;;  %v8321_v14 = vld [vmem:[%s12632_s6 + $0x248] sm:$0xff] }
 0x74d   : > { %v11330_v41 = vpop.f32.mrf.mxu2 }
 0x74e   : > { %v11384_v23 = vpop.f32.mrf.mxu3  ;;  %v5969_v63 = vadd.f32 %v11332_v60, %v11330_v41  ;;  %v8369_v41 = vld [vmem:[%s12632_s6 + $0x3c8] sm:$0xff] }
 0x74f   : > { %v8317_v60 = vld [vmem:[%s12632_s6 + $0x228] sm:$0xff]  ;;  %v6212_v51 = vpop.f32.mrf.mxu0 }
 0x750   : > { %v6262_v54 = vpop.f32.mrf.mxu1 }
 0x755   : > { %v11373_v55 = vpop.f32.mrf.mxu2 }
 0x756   : > { %v11457_v50 = vpop.f32.mrf.mxu3  ;;  %v6018_v2 = vadd.f32 %v11373_v55, %v5963_v12  ;;  %v8324_v55 = vld [vmem:[%s12632_s6 + $0x260] sm:$0xff]  ;;  %v8335_v12 = vld [vmem:[%s12632_s6 + $0x2b8] sm:$0xff] }
 0x757   : > { %6570 = vmatpush.msra.mxu3 %v8324_v55  ;;  %6624 = vmatpush.msrb.mxu0 %v8335_v12  ;;  %v6347_v12 = vpop.permute.xlu0 %6346 }
 0x758   : > { %v6068_v40 = vadd.f32 %v11384_v23, %v6018_v2  ;;  %v8358_v23 = vld [vmem:[%s12632_s6 + $0x370] sm:$0xff] }
 0x759   : > { %6571 = vmatpush.msra.mxu3 %v8323_v59  ;;  %6666 = vmatpush.msra.mxu1 %v8358_v23  ;;  %v8365_v59 = vld [vmem:[%s12632_s6 + $0x3a8] sm:$0xff]  ;;  %v8332_v23 = vld [vmem:[%s12632_s6 + $0x2a0] sm:$0xff]  ;;  %v6265_v42 = vpop.f32.mrf.mxu1 }
 0x75a   : > { %6625 = vmatpush.msrb.mxu0 %v8334_v27  ;;  %v8387_v27 = vld [vmem:[%s12632_s6 + $0x458] sm:$0xff] }
 0x75b   : > { %6572 = vmatpush.msra.mxu3 %v8322_v47  ;;  %6667 = vmatpush.msra.mxu1 %v8357_v18  ;;  %v6337_v47 = vpop.permute.xlu1 %6336 }
 0x75c   : > { %6626 = vmatpush.msrb.mxu0 %v8333_v20 }
 0x75d   : > { %v11419_v22 = vpop.f32.mrf.mxu2  ;;  %6573 = vmatpush.msra.mxu3 %v8321_v14  ;;  %6668 = vmatpush.msra.mxu1 %v8356_v52  ;;  %v6215_v52 = vpop.f32.mrf.mxu0 }
 0x75e   : > { %v11491_v16 = vpop.f32.mrf.mxu3  ;;  %v6019_v34 = vadd.f32 %v11419_v22, %v5966_v56  ;;  %v8320_v22 = vld [vmem:[%s12632_s6 + $0x240] sm:$0xff]  ;;  %6627 = vmatpush.msrb.mxu0 %v8332_v23 }
 0x75f   : > { %6574 = vmatpush.msra.mxu3 %v8320_v22  ;;  %6669 = vmatpush.msra.mxu1 %v8355_v49 }
 0x760   : > { %v6069_v13 = vadd.f32 %v11457_v50, %v6019_v34  ;;  %v8370_v50 = vld [vmem:[%s12632_s6 + $0x3d0] sm:$0xff]  ;;  %v8331_v34 = vld [vmem:[%s12632_s6 + $0x298] sm:$0xff] }
 0x761   : > { %6575 = vmatpush.msra.mxu3 %v8319_v45  ;;  %6670 = vmatpush.msra.mxu1 %v8354_v33  ;;  %v8345_v45 = vld [vmem:[%s12632_s6 + $0x308] sm:$0xff] }
 0x762   : > { %6719 = vmatpush.msrb.mxu2 %v8370_v50  ;;  %6628 = vmatpush.msrb.mxu0 %v8331_v34  ;;  %v8361_v33 = vld [vmem:[%s12632_s6 + $0x388] sm:$0xff] }
 0x763   : > { %6576 = vmatpush.msra.mxu3 %v8318_v37  ;;  %6671 = vmatpush.msra.mxu1 %v8353_v26  ;;  %v8328_v37 = vld [vmem:[%s12632_s6 + $0x280] sm:$0xff]  ;;  %v8391_v26 = vld [vmem:[%s12632_s6 + $0x478] sm:$0xff]  ;;  %v8381_v34 = vld [vmem:[%s12632_s6 + $0x428] sm:$0xff] }
 0x764   : > { %6720 = vmatpush.msrb.mxu2 %v8369_v41 }
 0x765   : > { %v11471_v31 = vpop.f32.mrf.mxu2  ;;  %6577 = vmatpush.msra.mxu3 %v8317_v60  ;;  %6672 = vmatpush.msra.mxu1 %v8352_v24 }
 0x766   : > { %v6159_v9 = vpop.f32.mrf.mxu3  ;;  %v6020_v11 = vadd.f32 %v11471_v31, %v5969_v63  ;;  %v8316_v31 = vld [vmem:[%s12632_s6 + $0x220] sm:$0xff]  ;;  %6721 = vmatpush.msrb.mxu2 %v8368_v44  ;;  %v8390_v44 = vld [vmem:[%s12632_s6 + $0x470] sm:$0xff] }
 0x767   : > { %6578 = vmatpush.msra.mxu3 %v8316_v31  ;;  %6673 = vmatpush.msra.mxu1 %v8351_v39  ;;  %v8344_v63 = vld [vmem:[%s12632_s6 + $0x300] sm:$0xff] }
 0x768   : > { %v6070_v19 = vadd.f32 %v11491_v16, %v6020_v11  ;;  %v8314_v16 = vld [vmem:[%s12632_s6 + $0x210] sm:$0xff]  ;;  %6722 = vmatpush.msrb.mxu2 %v8367_v29 }
 0x769   : > { %6579 = vmatpush.msra.mxu3 %v8315_v58  ;;  %6674 = vmatpush.msra.mxu1 %v8350_v30 }
 0x76a   : > { %6723 = vmatpush.msrb.mxu2 %v8366_v7  ;;  %v8386_v7 = vld [vmem:[%s12632_s6 + $0x450] sm:$0xff] }
 0x76b   : > { %6580 = vmatpush.msra.mxu3 %v8314_v16  ;;  %v8385_v16 = vld [vmem:[%s12632_s6 + $0x448] sm:$0xff] }
 0x76c   : > { %6724 = vmatpush.msrb.mxu2 %v8365_v59  ;;  %v6696_v59 = vld [vmem:[#allocation2 + $0x2d] sm:$0xf] }
 0x76d   : > { %v6109_v3 = vpop.f32.mrf.mxu2  ;;  %6581 = vmatpush.msra.mxu3 %v8313_v46 }
 0x76e   : > { %v6118_v25 = vadd.f32 %v6109_v3, %v6068_v40  ;;  %v6162_v3 = vpop.f32.mrf.mxu3  ;;  %v8349_v40 = vld [vmem:[%s12632_s6 + $0x328] sm:$0xff] }
 0x76f   : > { %6675 = vmatpush.msra.mxu1 %v8349_v40  ;;  %6582 = vmatpush.msra.mxu3 %v8312_v35  ;;  %v8384_v40 = vld [vmem:[%s12632_s6 + $0x440] sm:$0xff]  ;;  %v8383_v35 = vld [vmem:[%s12632_s6 + $0x438] sm:$0xff] }
 0x770   : > { %v6168_v57 = vadd.f32 %v6159_v9, %v6118_v25  ;;  %v8364_v25 = vld [vmem:[%s12632_s6 + $0x3a0] sm:$0xff] }
 0x771   : > { %6676 = vmatpush.msra.mxu1 %v8348_v6  ;;  %6725 = vmatpush.msrb.mxu2 %v8364_v25 }
 0x772   : > { %v6218_v38 = vadd.f32 %v6209_v4, %v6168_v57  ;;  %v8363_v57 = vld [vmem:[%s12632_s6 + $0x398] sm:$0xff]  ;;  %v8330_v4 = vld [vmem:[%s12632_s6 + $0x290] sm:$0xff] }
 0x773   : > { %6677 = vmatpush.msra.mxu1 %v8347_v43  ;;  %6726 = vmatpush.msrb.mxu2 %v8363_v57  ;;  %v8380_v43 = vld [vmem:[%s12632_s6 + $0x420] sm:$0xff] }
 0x774   : > { %v6268_v10 = vadd.f32 %v6259_v61, %v6218_v38  ;;  %6629 = vmatpush.msrb.mxu0 %v8330_v4  ;;  %v8360_v61 = vld [vmem:[%s12632_s6 + $0x380] sm:$0xff]  ;;  %v6959_v4 = vld [vmem:[%s12642_s16 + $0x3e8] sm:$0xff] }
 0x775   : > { %v6112_v53 = vpop.f32.mrf.mxu2  ;;  %6727 = vmatpush.msrb.mxu2 %v8362_v0  ;;  %v8376_v57 = vld [vmem:[%s12632_s6 + $0x400] sm:$0xff]  ;;  %v6961_v0 = vld [vmem:[%s12642_s16 + $0x3f8] sm:$0xff] }
 0x776   : > { %v6119_v28 = vadd.f32 %v6112_v53, %v6069_v13  ;;  %v6165_v56 = vpop.f32.mrf.mxu3  ;;  %v8329_v13 = vld [vmem:[%s12632_s6 + $0x288] sm:$0xff] }
 0x777   : > { %6630 = vmatpush.msrb.mxu0 %v8329_v13  ;;  %6728 = vmatpush.msrb.mxu2 %v8361_v33  ;;  %v6956_v13 = vld [vmem:[%s12642_s16 + $0x3d0] sm:$0xff]  ;;  %v6951_v33 = vld [vmem:[%s12642_s16 + $0x3a8] sm:$0xff] }
 0x778   : > { %v6169_v15 = vadd.f32 %v6162_v3, %v6119_v28  ;;  %v6342_v28 = vpop.permute.xlu2 %6341 }
 0x779   : > { %6631 = vmatpush.msrb.mxu0 %v8328_v37  ;;  %6729 = vmatpush.msrb.mxu2 %v8360_v61  ;;  %v6942_v61 = vld [vmem:[%s12642_s16 + $0x360] sm:$0xff] }
 0x77a   : > { %v6219_v8 = vadd.f32 %v6212_v51, %v6169_v15  ;;  %v8389_v15 = vld [vmem:[%s12632_s6 + $0x468] sm:$0xff]  ;;  %v8388_v51 = vld [vmem:[%s12632_s6 + $0x460] sm:$0xff] }
 0x77c   : > { %v6269_v14 = vadd.f32 %v6262_v54, %v6219_v8 }
 0x77d   : > { %v6115_v1 = vpop.f32.mrf.mxu2 }
 0x77e   : > { %v6120_v53 = vadd.f32 %v6115_v1, %v6070_v19  ;;  %v8346_v1 = vld [vmem:[%s12632_s6 + $0x310] sm:$0xff] }
 0x77f   : > { %6678 = vmatpush.msra.mxu1 %v8346_v1  ;;  %v6960_v1 = vld [vmem:[%s12642_s16 + $0x3f0] sm:$0xff] }
 0x780   : > { %v6170_v18 = vadd.f32 %v6165_v56, %v6120_v53  ;;  %v6647_v56 = vld [vmem:[#allocation2 + $0x2c] sm:$0xf] }
 0x781   : > { %6679 = vmatpush.msra.mxu1 %v8345_v45  ;;  %v6957_v45 = vld [vmem:[%s12642_s16 + $0x3d8] sm:$0xff] }
 0x782   : > { %v6220_v49 = vadd.f32 %v6215_v52, %v6170_v18  ;;  %v8382_v18 = vld [vmem:[%s12632_s6 + $0x430] sm:$0xff] }
 0x783   : > { %6680 = vmatpush.msra.mxu1 %v8344_v63  ;;  %v8378_v52 = vld [vmem:[%s12632_s6 + $0x410] sm:$0xff]  ;;  %v6953_v63 = vld [vmem:[%s12642_s16 + $0x3b8] sm:$0xff] }
 0x784   : > { %v6270_v38 = vadd.f32 %v6265_v42, %v6220_v49  ;;  %v6954_v49 = vld [vmem:[%s12642_s16 + $0x3c0] sm:$0xff] }
 0x785   : > { %v6309_v36 = vpop.f32.mrf.mxu2  ;;  %v6950_v42 = vld [vmem:[%s12642_s16 + $0x3a0] sm:$0xff] }
 0x786   : > { %v6318_v2 = vadd.f32 %v6309_v36, %v6268_v10 }
 0x788   : > { %v6325_v55 = vadd.f32 %v11654_v21, %v6318_v2  ;;  %v8428_v2 = vld [vmem:[#allocation2] sm:$0xff] }
 0x78a   : > { %v6328_v9 = vmax.f32 %v6325_v55, 0.0 }
 0x78c   : > { %v11706_v48 = vmul.f32 %v6337_v47, %v6328_v9 }
 0x78d   : > { %v6312_v62 = vpop.f32.mrf.mxu2 }
 0x78e   : > { %6352 = vst [vmem:[#allocation2 + $0x18] sm:$0xff] %v11706_v48  ;;  %v6319_v22 = vadd.f32 %v6312_v62, %v6269_v14  ;;  %v6745_v14 = vld [vmem:[#allocation2 + $0x2e] sm:$0xf] }
 0x78f   : > { %6831 = vst [vmem:[#allocation2 + $0x2e] sm:$0xff] %v8428_v2  ;;  %v8377_v62 = vld [vmem:[%s12632_s6 + $0x408] sm:$0xff] }
 0x790   : > { %v6326_v32 = vadd.f32 %v11654_v21, %v6319_v22  ;;  %v6958_v22 = vld [vmem:[%s12642_s16 + $0x3e0] sm:$0xff] }
 0x792   : > { %v6329_v50 = vmax.f32 %v6326_v32, 0.0  ;;  %v6955_v32 = vld [vmem:[%s12642_s16 + $0x3c8] sm:$0xff] }
 0x794   : > { %v11743_v5 = vmul.f32 %v6342_v28, %v6329_v50  ;;  %v6952_v50 = vld [vmem:[%s12642_s16 + $0x3b0] sm:$0xff]  ;;  %v6946_v28 = vld [vmem:[%s12642_s16 + $0x380] sm:$0xff] }
 0x795   : > { %v6315_v3 = vpop.f32.mrf.mxu2  ;;  %v6377_v41 = vld [vmem:[#allocation2 + $0x13] sm:$0xff] }
 0x796   : > { %v6358_v60 = vld [vmem:[#allocation2 + $0x12] sm:$0xff]  ;;  %6353 = vst [vmem:[#allocation2 + $0x20] sm:$0xff] %v11743_v5  ;;  %v6320_v17 = vadd.f32 %v6315_v3, %v6270_v38  ;;  %6413 = vmatmul.f32.vlgmr.msrb.gmra.mxu3 %v6377_v41  ;;  %v6947_v38 = vld [vmem:[%s12642_s16 + $0x388] sm:$0xff] }
 0x797   : > { %v6449_v11 = vld [vmem:[#allocation2 + $0x14] sm:$0xff]  ;;  %6439 = vmatmul.f32.vlgmr.msra.gmra.mxu0 %v6358_v60  ;;  %6763 = vmatpush.msrb.mxu3 %v8391_v26  ;;  %v6943_v3 = vld [vmem:[%s12642_s16 + $0x368] sm:$0xff] }
 0x798   : > { %v6498_v24 = vld [vmem:[#allocation2 + $0x17] sm:$0xff]  ;;  %6485 = vmatmul.f32.vlgmr.msrb.gmra.mxu1 %v6449_v11  ;;  %v6327_v31 = vadd.f32 %v11654_v21, %v6320_v17  ;;  %6962 = vmatpush.msra.mxu0 %v6958_v22  ;;  %v6938_v11 = vld [vmem:[%s12642_s16 + $0x340] sm:$0xff]  ;;  %v6939_v17 = vld [vmem:[%s12642_s16 + $0x348] sm:$0xff] }
 0x799   : > { %6534 = vmatmul.f32.vlgmr.msra.gmra.mxu2 %v6498_v24  ;;  %6764 = vmatpush.msrb.mxu3 %v8390_v44  ;;  %v6949_v26 = vld [vmem:[%s12642_s16 + $0x398] sm:$0xff]  ;;  %v6944_v41 = vld [vmem:[%s12642_s16 + $0x370] sm:$0xff] }
 0x79a   : > { %v6330_v10 = vmax.f32 %v6327_v31, 0.0  ;;  %6982 = vmatpush.msrb.mxu1 %v6959_v4  ;;  %7002 = vmatpush.msra.mxu2 %v6960_v1  ;;  %v6945_v60 = vld [vmem:[%s12642_s16 + $0x378] sm:$0xff]  ;;  %v6940_v44 = vld [vmem:[%s12642_s16 + $0x350] sm:$0xff]  ;;  %v6902_v4 = vld [vmem:[%s12642_s16 + $0x220] sm:$0xff] }
 0x79b   : > { %6765 = vmatpush.msrb.mxu3 %v8389_v15  ;;  %6963 = vmatpush.msra.mxu0 %v6954_v49  ;;  %v6941_v31 = vld [vmem:[%s12642_s16 + $0x358] sm:$0xff]  ;;  %v6934_v15 = vld [vmem:[%s12642_s16 + $0x320] sm:$0xff]  ;;  %v6903_v1 = vld [vmem:[%s12642_s16 + $0x228] sm:$0xff] }
 0x79c   : > { %v6351_v39 = vmul.f32 %v6347_v12, %v6330_v10  ;;  %6983 = vmatpush.msrb.mxu1 %v6955_v32  ;;  %7003 = vmatpush.msra.mxu2 %v6956_v13  ;;  %v6935_v10 = vld [vmem:[%s12642_s16 + $0x328] sm:$0xff]  ;;  %v6936_v12 = vld [vmem:[%s12642_s16 + $0x330] sm:$0xff]  ;;  %v6905_v13 = vld [vmem:[%s12642_s16 + $0x238] sm:$0xff] }
 0x79d   : > { %v6378_v36 = vld [vmem:[#allocation2 + $0x1b] sm:$0xff]  ;;  %6766 = vmatpush.msrb.mxu3 %v8388_v51  ;;  %v6379_v53 = vld [vmem:[#allocation2 + $0x23] sm:$0xf]  ;;  %6964 = vmatpush.msra.mxu0 %v6950_v42  ;;  %v6899_v42 = vld [vmem:[%s12642_s16 + $0x208] sm:$0xff] }
 0x79e   : > { %v6359_v29 = vld [vmem:[#allocation2 + $0x1a] sm:$0xff]  ;;  %6354 = vst [vmem:[#allocation2 + $0x28] sm:$0xf] %v6351_v39  ;;  %6416 = vmatmul.f32.gmra.mxu3 %v6378_v36  ;;  %v6360_v55 = vld [vmem:[#allocation2 + $0x22] sm:$0xf]  ;;  %6984 = vmatpush.msrb.mxu1 %v6951_v33 }
 0x79f   : > { %v6450_v58 = vld [vmem:[#allocation2 + $0x1c] sm:$0xff]  ;;  %6442 = vmatmul.f32.gmra.mxu0 %v6359_v29  ;;  %6767 = vmatpush.msrb.mxu3 %v8387_v27  ;;  %v6451_v8 = vld [vmem:[#allocation2 + $0x24] sm:$0xf]  ;;  %v6927_v27 = vld [vmem:[%s12642_s16 + $0x2e8] sm:$0xff] }
 0x7a0   : > { %v6499_v21 = vld [vmem:[#allocation2 + $0x1f] sm:$0xff]  ;;  %6488 = vmatmul.f32.gmra.mxu1 %v6450_v58  ;;  %7004 = vmatpush.msra.mxu2 %v6952_v50  ;;  %v6900_v50 = vld [vmem:[%s12642_s16 + $0x210] sm:$0xff] }
 0x7a1   : > { %v6596_v19 = vld [vmem:[#allocation2 + $0x19] sm:$0xff]  ;;  %6537 = vmatmul.f32.gmra.mxu2 %v6499_v21  ;;  %6768 = vmatpush.msrb.mxu3 %v8386_v7  ;;  %v6932_v21 = vld [vmem:[%s12642_s16 + $0x310] sm:$0xff] }
 0x7a2   : > { %6815 = vst [vmem:[#allocation2 + $0x1a] sm:$0x1] %v8428_v2  ;;  %v6694_v30 = vld [vmem:[#allocation2 + $0x1d] sm:$0xff]  ;;  %6965 = vmatpush.msra.mxu0 %v6946_v28  ;;  %6985 = vmatpush.msrb.mxu1 %v6947_v38  ;;  %v6895_v38 = vld [vmem:[%s12642_s16 + $0x1f0] sm:$0xff] }
 0x7a3   : > { %6828 = vst [vmem:[#allocation2 + $0x1d] sm:$0x1] %v8428_v2  ;;  %v6743_v46 = vld [vmem:[#allocation2 + $0x1e] sm:$0xff]  ;;  %6769 = vmatpush.msrb.mxu3 %v8385_v16 }
 0x7a4   : > { %6966 = vmatpush.msra.mxu0 %v6942_v61  ;;  %6986 = vmatpush.msrb.mxu1 %v6943_v3  ;;  %v6937_v36 = vld [vmem:[%s12642_s16 + $0x338] sm:$0xff]  ;;  %v6930_v29 = vld [vmem:[%s12642_s16 + $0x300] sm:$0xff]  ;;  %v6890_v61 = vld [vmem:[%s12642_s16 + $0x1c8] sm:$0xff] }
 0x7a5   : > { %v6500_v20 = vld [vmem:[#allocation2 + $0x27] sm:$0xf]  ;;  %6770 = vmatpush.msrb.mxu3 %v8384_v40  ;;  %v6929_v7 = vld [vmem:[%s12642_s16 + $0x2f8] sm:$0xff] }
 0x7a6   : > { %v6597_v54 = vld [vmem:[#allocation2 + $0x21] sm:$0xff]  ;;  %6419 = vmatmul.f32.gmra.mxu3 %v6379_v53  ;;  %v6598_v47 = vld [vmem:[#allocation2 + $0x29] sm:$0xf]  ;;  %6967 = vmatpush.msra.mxu0 %v6938_v11 }
 0x7a7   : > { %6445 = vmatmul.f32.gmra.mxu0 %v6360_v55  ;;  %v6646_v9 = vld [vmem:[#allocation2 + $0x24] sm:$0xff]  ;;  %6771 = vmatpush.msrb.mxu3 %v8383_v35 }
 0x7a8   : > { %v6695_v23 = vld [vmem:[#allocation2 + $0x25] sm:$0xff]  ;;  %6491 = vmatmul.f32.gmra.mxu1 %v6451_v8  ;;  %6968 = vmatpush.msra.mxu0 %v6934_v15  ;;  %v6924_v8 = vld [vmem:[%s12642_s16 + $0x2d0] sm:$0xff] }
 0x7a9   : > { %v6549_v6 = vld [vmem:[#allocation2 + $0x28] sm:$0xf]  ;;  %6540 = vmatmul.f32.gmra.mxu2 %v6500_v20  ;;  %6829 = vst [vmem:[#allocation2 + $0x1e] sm:$0xff] %v8428_v2  ;;  %6772 = vmatpush.msrb.mxu3 %v8382_v18  ;;  %v6922_v16 = vld [vmem:[%s12642_s16 + $0x2c0] sm:$0xff]  ;;  %v6925_v20 = vld [vmem:[%s12642_s16 + $0x2d8] sm:$0xff] }
 0x7aa   : > { %v6744_v25 = vld [vmem:[#allocation2 + $0x26] sm:$0xff]  ;;  %6987 = vmatpush.msrb.mxu1 %v6939_v17  ;;  %6969 = vmatpush.msra.mxu0 %v6930_v29  ;;  %v6884_v29 = vld [vmem:[%s12642_s16 + $0x198] sm:$0xff] }
 0x7ab   : > { %6830 = vst [vmem:[#allocation2 + $0x26] sm:$0xff] %v8428_v2  ;;  %6773 = vmatpush.msrb.mxu3 %v8381_v34  ;;  %v6926_v2 = vld [vmem:[%s12642_s16 + $0x2e0] sm:$0xff]  ;;  %v6923_v53 = vld [vmem:[%s12642_s16 + $0x2c8] sm:$0xff]  ;;  %v6912_v34 = vld [vmem:[%s12642_s16 + $0x270] sm:$0xff] }
 0x7ac   : > { %6988 = vmatpush.msrb.mxu1 %v6935_v10  ;;  %6970 = vmatpush.msra.mxu0 %v6926_v2  ;;  %v6918_v40 = vld [vmem:[%s12642_s16 + $0x2a0] sm:$0xff]  ;;  %v6911_v18 = vld [vmem:[%s12642_s16 + $0x268] sm:$0xff] }
 0x7ad   : > { %6774 = vmatpush.msrb.mxu3 %v8380_v43  ;;  %v6910_v35 = vld [vmem:[%s12642_s16 + $0x260] sm:$0xff]  ;;  %v6913_v43 = vld [vmem:[%s12642_s16 + $0x278] sm:$0xff]  ;;  %v6882_v10 = vld [vmem:[%s12642_s16 + $0x188] sm:$0xff] }
 0x7ae   : > { %6583 = vmatmul.f32.vlgmr.msra.gmra.mxu3 %v11706_v48  ;;  %v8379_v48 = vld [vmem:[%s12632_s6 + $0x418] sm:$0xff]  ;;  %6971 = vmatpush.msra.mxu0 %v6922_v16  ;;  %v6893_v28 = vld [vmem:[%s12642_s16 + $0x1e0] sm:$0xff]  ;;  %v6878_v2 = vld [vmem:[%s12642_s16 + $0x168] sm:$0xff] }
 0x7af   : > { %6632 = vmatmul.f32.vlgmr.msrb.gmra.mxu0 %v6596_v19  ;;  %6775 = vmatpush.msrb.mxu3 %v8379_v48  ;;  %v6933_v19 = vld [vmem:[%s12642_s16 + $0x318] sm:$0xff]  ;;  %v6906_v48 = vld [vmem:[%s12642_s16 + $0x240] sm:$0xff] }
 0x7b0   : > { %6681 = vmatmul.f32.vlgmr.msra.gmra.mxu1 %v6450_v58  ;;  %v6931_v58 = vld [vmem:[%s12642_s16 + $0x308] sm:$0xff]  ;;  %6972 = vmatpush.msra.mxu0 %v6918_v40  ;;  %v6885_v17 = vld [vmem:[%s12642_s16 + $0x1a0] sm:$0xff] }
 0x7b1   : > { %6730 = vmatmul.f32.vlgmr.msrb.gmra.mxu2 %v6694_v30  ;;  %6776 = vmatpush.msrb.mxu3 %v8378_v52  ;;  %v6928_v30 = vld [vmem:[%s12642_s16 + $0x2f0] sm:$0xff]  ;;  %v6907_v52 = vld [vmem:[%s12642_s16 + $0x248] sm:$0xff]  ;;  %v6881_v15 = vld [vmem:[%s12642_s16 + $0x180] sm:$0xff] }
 0x7b2   : > { %6989 = vmatpush.msrb.mxu1 %v6931_v58  ;;  %v6873_v16 = vld [vmem:[%s12642_s16 + $0x140] sm:$0xff] }
 0x7b3   : > { %6777 = vmatpush.msrb.mxu3 %v8377_v62  ;;  %v6908_v62 = vld [vmem:[%s12642_s16 + $0x250] sm:$0xff] }
 0x7b4   : > { %6990 = vmatpush.msrb.mxu1 %v6927_v27 }
 0x7b5   : > { %6778 = vmatpush.msrb.mxu3 %v8376_v57  ;;  %v6909_v57 = vld [vmem:[%s12642_s16 + $0x258] sm:$0xff] }
 0x7b6   : > { %6586 = vmatmul.f32.gmra.mxu3 %v11743_v5  ;;  %v6948_v5 = vld [vmem:[%s12642_s16 + $0x390] sm:$0xff]  ;;  %6991 = vmatpush.msrb.mxu1 %v6923_v53  ;;  %v6874_v53 = vld [vmem:[%s12642_s16 + $0x148] sm:$0xff] }
 0x7b7   : > { %6635 = vmatmul.f32.gmra.mxu0 %v6597_v54  ;;  %7022 = vmatpush.msra.mxu3 %v6961_v0  ;;  %v6919_v54 = vld [vmem:[%s12642_s16 + $0x2a8] sm:$0xff]  ;;  %v6904_v0 = vld [vmem:[%s12642_s16 + $0x230] sm:$0xff] }
 0x7b8   : > { %6684 = vmatmul.f32.gmra.mxu1 %v6646_v9  ;;  %7005 = vmatpush.msra.mxu2 %v6948_v5  ;;  %v6921_v9 = vld [vmem:[%s12642_s16 + $0x2b8] sm:$0xff] }
 0x7b9   : > { %6733 = vmatmul.f32.gmra.mxu2 %v6695_v23  ;;  %7023 = vmatpush.msra.mxu3 %v6957_v45  ;;  %v6914_v23 = vld [vmem:[%s12642_s16 + $0x280] sm:$0xff]  ;;  %v6896_v5 = vld [vmem:[%s12642_s16 + $0x1f8] sm:$0xff] }
 0x7ba   : > { %7006 = vmatpush.msra.mxu2 %v6944_v41  ;;  %6992 = vmatpush.msrb.mxu1 %v6919_v54  ;;  %v6898_v45 = vld [vmem:[%s12642_s16 + $0x200] sm:$0xff]  ;;  %v6891_v41 = vld [vmem:[%s12642_s16 + $0x1d0] sm:$0xff] }
 0x7bb   : > { %7024 = vmatpush.msra.mxu3 %v6953_v63  ;;  %6973 = vmatpush.msra.mxu0 %v6914_v23  ;;  %v6901_v63 = vld [vmem:[%s12642_s16 + $0x218] sm:$0xff]  ;;  %v6869_v54 = vld [vmem:[%s12642_s16 + $0x120] sm:$0xff] }
 0x7bc   : > { %7007 = vmatpush.msra.mxu2 %v6940_v44  ;;  %v6887_v44 = vld [vmem:[%s12642_s16 + $0x1b0] sm:$0xff]  ;;  %v6872_v23 = vld [vmem:[%s12642_s16 + $0x138] sm:$0xff] }
 0x7bd   : > { %7025 = vmatpush.msra.mxu3 %v6949_v26  ;;  %6974 = vmatpush.msra.mxu0 %v6910_v35  ;;  %v6889_v26 = vld [vmem:[%s12642_s16 + $0x1c0] sm:$0xff]  ;;  %v6867_v35 = vld [vmem:[%s12642_s16 + $0x110] sm:$0xff] }
 0x7be   : > { %6589 = vmatmul.f32.gmra.mxu3 %v6549_v6  ;;  %7008 = vmatpush.msra.mxu2 %v6936_v12  ;;  %v6915_v6 = vld [vmem:[%s12642_s16 + $0x288] sm:$0xff] }
 0x7bf   : > { %6638 = vmatmul.f32.gmra.mxu0 %v6598_v47  ;;  %7026 = vmatpush.msra.mxu3 %v6945_v60  ;;  %v6892_v60 = vld [vmem:[%s12642_s16 + $0x1d8] sm:$0xff] }
 0x7c0   : > { %6687 = vmatmul.f32.gmra.mxu1 %v6647_v56  ;;  %7009 = vmatpush.msra.mxu2 %v6932_v21  ;;  %v6916_v56 = vld [vmem:[%s12642_s16 + $0x290] sm:$0xff] }
 0x7c1   : > { %6736 = vmatmul.f32.gmra.mxu2 %v6696_v59  ;;  %7027 = vmatpush.msra.mxu3 %v6941_v31  ;;  %v6888_v31 = vld [vmem:[%s12642_s16 + $0x1b8] sm:$0xff] }
 0x7c2   : > { %7010 = vmatpush.msra.mxu2 %v6928_v30  ;;  %6993 = vmatpush.msrb.mxu1 %v6915_v6  ;;  %v6879_v30 = vld [vmem:[%s12642_s16 + $0x170] sm:$0xff]  ;;  %v6865_v6 = vld [vmem:[%s12642_s16 + $0x100] sm:$0xff] }
 0x7c3   : > { %7028 = vmatpush.msra.mxu3 %v6937_v36  ;;  %6975 = vmatpush.msra.mxu0 %v6906_v48  ;;  %v6883_v36 = vld [vmem:[%s12642_s16 + $0x190] sm:$0xff]  ;;  %v6862_v48 = vld [vmem:[%s12642_s16 + $0xe8] sm:$0xff] }
 0x7c4   : > { %7011 = vmatpush.msra.mxu2 %v6924_v8  ;;  %6994 = vmatpush.msrb.mxu1 %v6911_v18  ;;  %v6876_v8 = vld [vmem:[%s12642_s16 + $0x158] sm:$0xff] }
 0x7c5   : > { %7029 = vmatpush.msra.mxu3 %v6933_v19  ;;  %6976 = vmatpush.msra.mxu0 %v6902_v4  ;;  %v6877_v19 = vld [vmem:[%s12642_s16 + $0x160] sm:$0xff]  ;;  %v6868_v18 = vld [vmem:[%s12642_s16 + $0x118] sm:$0xff] }
 0x7c6   : > { %6779 = vmatmul.f32.vlgmr.msrb.gmra.mxu3 %v6743_v46  ;;  %v6920_v46 = vld [vmem:[%s12642_s16 + $0x2b0] sm:$0xff]  ;;  %6995 = vmatpush.msrb.mxu1 %v6907_v52  ;;  %v6857_v4 = vld [vmem:[%s12642_s16 + $0xc0] sm:$0xff] }
 0x7c7   : > { %7030 = vmatpush.msra.mxu3 %v6929_v7  ;;  %7012 = vmatpush.msra.mxu2 %v6920_v46  ;;  %v6871_v46 = vld [vmem:[%s12642_s16 + $0x130] sm:$0xff] }
 0x7c8   : > { %6996 = vmatpush.msrb.mxu1 %v6903_v1  ;;  %6977 = vmatpush.msra.mxu0 %v6898_v45  ;;  %v6858_v1 = vld [vmem:[%s12642_s16 + $0xc8] sm:$0xff]  ;;  %v6853_v45 = vld [vmem:[%s12642_s16 + $0xa0] sm:$0xff] }
 0x7c9   : > { %7031 = vmatpush.msra.mxu3 %v6925_v20  ;;  %7013 = vmatpush.msra.mxu2 %v6916_v56  ;;  %v6866_v56 = vld [vmem:[%s12642_s16 + $0x108] sm:$0xff] }
 0x7ca   : > { %6997 = vmatpush.msrb.mxu1 %v6899_v42  ;;  %7042 = vmatpush.msrb.mxu0 %v6893_v28  ;;  %v6854_v42 = vld [vmem:[%s12642_s16 + $0xa8] sm:$0xff] }
 0x7cb   : > { %7032 = vmatpush.msra.mxu3 %v6921_v9  ;;  %7014 = vmatpush.msra.mxu2 %v6912_v34 }
 0x7cc   : > { %7043 = vmatpush.msrb.mxu0 %v6889_v26 }
 0x7cd   : > { %7015 = vmatpush.msra.mxu2 %v6908_v62  ;;  %v6863_v62 = vld [vmem:[%s12642_s16 + $0xf0] sm:$0xff] }
 0x7ce   : > { %6782 = vmatmul.f32.gmra.mxu3 %v6744_v25  ;;  %v6917_v25 = vld [vmem:[%s12642_s16 + $0x298] sm:$0xff]  ;;  %7044 = vmatpush.msrb.mxu0 %v6885_v17  ;;  %v6845_v17 = vld [vmem:[%s12642_s16 + $0x60] sm:$0xff] }
 0x7cf   : > { %7033 = vmatpush.msra.mxu3 %v6917_v25  ;;  %7016 = vmatpush.msra.mxu2 %v6904_v0 }
 0x7d0   : > { %7045 = vmatpush.msrb.mxu0 %v6881_v15 }
 0x7d1   : > { %7034 = vmatpush.msra.mxu3 %v6913_v43  ;;  %7017 = vmatpush.msra.mxu2 %v6900_v50  ;;  %v6861_v43 = vld [vmem:[%s12642_s16 + $0xe0] sm:$0xff]  ;;  %v6856_v50 = vld [vmem:[%s12642_s16 + $0xb8] sm:$0xff] }
 0x7d2   : > { %7046 = vmatpush.msrb.mxu0 %v6877_v19 }
 0x7d3   : > { %7035 = vmatpush.msra.mxu3 %v6909_v57  ;;  %7082 = vmatpush.msrb.mxu2 %v6895_v38  ;;  %v6849_v38 = vld [vmem:[%s12642_s16 + $0x80] sm:$0xff] }
 0x7d4   : > { %7047 = vmatpush.msrb.mxu0 %v6873_v16 }
 0x7d5   : > { %7036 = vmatpush.msra.mxu3 %v6905_v13  ;;  %7083 = vmatpush.msrb.mxu2 %v6891_v41  ;;  %v6852_v41 = vld [vmem:[%s12642_s16 + $0x98] sm:$0xff] }
 0x7d6   : > { %6785 = vmatmul.f32.gmra.mxu3 %v6745_v14  ;;  %7048 = vmatpush.msrb.mxu0 %v6869_v54  ;;  %v6835_v54 = vld [vmem:[%s12642_s16 + $0x10] sm:$0xff] }
 0x7d7   : > { %7037 = vmatpush.msra.mxu3 %v6901_v63  ;;  %7084 = vmatpush.msrb.mxu2 %v6887_v44  ;;  %v6847_v44 = vld [vmem:[%s12642_s16 + $0x70] sm:$0xff] }
 0x7d8   : > { %7049 = vmatpush.msrb.mxu0 %v6865_v6 }
 0x7d9   : > { %7102 = vmatpush.msrb.mxu3 %v6896_v5  ;;  %7085 = vmatpush.msrb.mxu2 %v6883_v36  ;;  %v6850_v5 = vld [vmem:[%s12642_s16 + $0x88] sm:$0xff] }
 0x7da   : > { %7050 = vmatpush.msrb.mxu0 %v6861_v43  ;;  %v6842_v36 = vld [vmem:[%s12642_s16 + $0x48] sm:$0xff] }
 0x7db   : > { %7103 = vmatpush.msrb.mxu3 %v6892_v60  ;;  %7086 = vmatpush.msrb.mxu2 %v6879_v30 }
 0x7dc   : > { %7051 = vmatpush.msrb.mxu0 %v6857_v4 }
 0x7dd   : > { %7104 = vmatpush.msrb.mxu3 %v6888_v31  ;;  %v6848_v31 = vld [vmem:[%s12642_s16 + $0x78] sm:$0xff] }
 0x7de   : > { %7052 = vmatpush.msrb.mxu0 %v6853_v45 }
 0x7df   : > { %7105 = vmatpush.msrb.mxu3 %v6884_v29 }
 0x7e0   : > { %7053 = vmatpush.msrb.mxu0 %v6849_v38  ;;  %v7180_v38 = vld [vmem:[%s12642_s16 + $0x5c8] sm:$0xff] }
 0x7e2   : > { %7054 = vmatpush.msrb.mxu0 %v6845_v17  ;;  %v7172_v17 = vld [vmem:[%s12642_s16 + $0x588] sm:$0xff] }
 0x814   : > { %v11868_v24 = vpop.f32.mrf.mxu0 }
 0x815   : > { %v11885_v39 = vpop.f32.mrf.mxu1 }
 0x819   : > { %v11833_v37 = vpop.f32.mrf.mxu3 }
 0x81a   : > { %v6441_v33 = vadd.f32 %v11868_v24, %v11833_v37  ;;  %v6894_v37 = vld [vmem:[%s12642_s16 + $0x1e8] sm:$0xff] }
 0x81b   : > { %7062 = vmatpush.msra.mxu1 %v6894_v37  ;;  %v6886_v24 = vld [vmem:[%s12642_s16 + $0x1a8] sm:$0xff]  ;;  %v12162_v37 = vld [vmem:[%s12638_s12] ss:$0 sm:$0xff] }
 0x81c   : > { %v11922_v55 = vpop.f32.mrf.mxu2  ;;  %v11936_v59 = vpop.f32.mrf.mxu0  ;;  %v6495_v11 = vadd.f32 %v11885_v39, %v6441_v33  ;;  %v6855_v33 = vld [vmem:[%s12642_s16 + $0xb0] sm:$0xff] }
 0x81d   : > { %v11964_v14 = vpop.f32.mrf.mxu1  ;;  %7063 = vmatpush.msra.mxu1 %v6890_v61 }
 0x81e   : > { %v6544_v58 = vadd.f32 %v11922_v55, %v6495_v11  ;;  %v6875_v55 = vld [vmem:[%s12642_s16 + $0x150] sm:$0xff] }
 0x81f   : > { %7064 = vmatpush.msra.mxu1 %v6886_v24  ;;  %7087 = vmatpush.msrb.mxu2 %v6875_v55  ;;  %v6846_v24 = vld [vmem:[%s12642_s16 + $0x68] sm:$0xff]  ;;  %v6833_v55 = vld [vmem:[%s12642_s16] sm:$0xff] }
 0x821   : > { %v11887_v51 = vpop.f32.mrf.mxu3  ;;  %7065 = vmatpush.msra.mxu1 %v6882_v10  ;;  %7088 = vmatpush.msrb.mxu2 %v6871_v46 }
 0x822   : > { %v6444_v21 = vadd.f32 %v11936_v59, %v11887_v51  ;;  %v6880_v51 = vld [vmem:[%s12642_s16 + $0x178] sm:$0xff]  ;;  %v6870_v59 = vld [vmem:[%s12642_s16 + $0x128] sm:$0xff] }
 0x823   : > { %7066 = vmatpush.msra.mxu1 %v6878_v2  ;;  %7106 = vmatpush.msrb.mxu3 %v6880_v51  ;;  %v6837_v2 = vld [vmem:[%s12642_s16 + $0x20] sm:$0xff]  ;;  %v6839_v51 = vld [vmem:[%s12642_s16 + $0x30] sm:$0xff] }
 0x824   : > { %v11984_v22 = vpop.f32.mrf.mxu2  ;;  %v11995_v49 = vpop.f32.mrf.mxu0  ;;  %v6496_v20 = vadd.f32 %v11964_v14, %v6444_v21  ;;  %7089 = vmatpush.msrb.mxu2 %v6867_v35  ;;  %v6844_v21 = vld [vmem:[%s12642_s16 + $0x58] sm:$0xff] }
 0x825   : > { %v12032_v3 = vpop.f32.mrf.mxu1  ;;  %7067 = vmatpush.msra.mxu1 %v6874_v53  ;;  %7107 = vmatpush.msrb.mxu3 %v6876_v8  ;;  %v6834_v8 = vld [vmem:[%s12642_s16 + $0x8] sm:$0xff] }
 0x826   : > { %v6545_v14 = vadd.f32 %v11984_v22, %v6496_v20  ;;  %7090 = vmatpush.msrb.mxu2 %v6863_v62 }
 0x827   : > { %7068 = vmatpush.msra.mxu1 %v6870_v59  ;;  %7108 = vmatpush.msrb.mxu3 %v6872_v23  ;;  %v6836_v59 = vld [vmem:[%s12642_s16 + $0x18] sm:$0xff] }
 0x829   : > { %v11950_v47 = vpop.f32.mrf.mxu3  ;;  %7069 = vmatpush.msra.mxu1 %v6866_v56  ;;  %7109 = vmatpush.msrb.mxu3 %v6868_v18 }
 0x82a   : > { %v6447_v34 = vadd.f32 %v11995_v49, %v11950_v47  ;;  %v6864_v47 = vld [vmem:[%s12642_s16 + $0xf8] sm:$0xff]  ;;  %v6859_v49 = vld [vmem:[%s12642_s16 + $0xd0] sm:$0xff] }
 0x82b   : > { %7070 = vmatpush.msra.mxu1 %v6862_v48  ;;  %7110 = vmatpush.msrb.mxu3 %v6864_v47 }
 0x82c   : > { %v12059_v12 = vpop.f32.mrf.mxu2  ;;  %v6633_v27 = vpop.f32.mrf.mxu0  ;;  %v6497_v13 = vadd.f32 %v12032_v3, %v6447_v34  ;;  %7091 = vmatpush.msrb.mxu2 %v6859_v49  ;;  %v6851_v3 = vld [vmem:[%s12642_s16 + $0x90] sm:$0xff] }
 0x82d   : > { %v6682_v40 = vpop.f32.mrf.mxu1  ;;  %7071 = vmatpush.msra.mxu1 %v6858_v1 }
 0x82e   : > { %v6546_v60 = vadd.f32 %v12059_v12, %v6497_v13  ;;  %7092 = vmatpush.msrb.mxu2 %v6855_v33  ;;  %v7184_v33 = vld [vmem:[%s12642_s16 + $0x5e8] sm:$0xff] }
 0x82f   : > { %7072 = vmatpush.msra.mxu1 %v6854_v42  ;;  %v7183_v42 = vld [vmem:[%s12642_s16 + $0x5e0] sm:$0xff] }
 0x830   : > { %7093 = vmatpush.msrb.mxu2 %v6851_v3  ;;  %v7176_v3 = vld [vmem:[%s12642_s16 + $0x5a8] sm:$0xff] }
 0x831   : > { %v6584_v32 = vpop.f32.mrf.mxu3  ;;  %7073 = vmatpush.msra.mxu1 %v6850_v5  ;;  %v7181_v5 = vld [vmem:[%s12642_s16 + $0x5d0] sm:$0xff] }
 0x832   : > { %v6593_v7 = vadd.f32 %v6584_v32, %v6544_v58  ;;  %v6860_v32 = vld [vmem:[%s12642_s16 + $0xd8] sm:$0xff]  ;;  %v6843_v58 = vld [vmem:[%s12642_s16 + $0x50] sm:$0xff]  ;;  %7094 = vmatpush.msrb.mxu2 %v6847_v44 }
 0x833   : > { %7111 = vmatpush.msrb.mxu3 %v6860_v32  ;;  %7074 = vmatpush.msra.mxu1 %v6846_v24  ;;  %v7173_v24 = vld [vmem:[%s12642_s16 + $0x590] sm:$0xff]  ;;  %v7174_v44 = vld [vmem:[%s12642_s16 + $0x598] sm:$0xff] }
 0x834   : > { %v6642_v9 = vadd.f32 %v6633_v27, %v6593_v7  ;;  %v6731_v52 = vpop.f32.mrf.mxu2  ;;  %v6636_v0 = vpop.f32.mrf.mxu0  ;;  %v6838_v27 = vld [vmem:[%s12642_s16 + $0x28] sm:$0xff]  ;;  %v6840_v7 = vld [vmem:[%s12642_s16 + $0x38] sm:$0xff]  ;;  %7095 = vmatpush.msrb.mxu2 %v6843_v58  ;;  %v7165_v58 = vld [vmem:[%s12642_s16 + $0x550] sm:$0xff] }
 0x835   : > { %v6685_v26 = vpop.f32.mrf.mxu1  ;;  %7112 = vmatpush.msrb.mxu3 %v6856_v50  ;;  %7075 = vmatpush.msra.mxu1 %v6842_v36  ;;  %v7163_v36 = vld [vmem:[%s12642_s16 + $0x540] sm:$0xff] }
 0x836   : > { %v6691_v57 = vadd.f32 %v6682_v40, %v6642_v9  ;;  %7096 = vmatpush.msrb.mxu2 %v6839_v51  ;;  %v7155_v51 = vld [vmem:[%s12642_s16 + $0x500] sm:$0xff] }
 0x837   : > { %7113 = vmatpush.msrb.mxu3 %v6852_v41  ;;  %7076 = vmatpush.msra.mxu1 %v6838_v27  ;;  %v7177_v41 = vld [vmem:[%s12642_s16 + $0x5b0] sm:$0xff] }
 0x838   : > { %v6740_v63 = vadd.f32 %v6731_v52, %v6691_v57  ;;  %7097 = vmatpush.msrb.mxu2 %v6835_v54  ;;  %v7161_v27 = vld [vmem:[%s12642_s16 + $0x530] sm:$0xff]  ;;  %v7147_v54 = vld [vmem:[%s12642_s16 + $0x4c0] sm:$0xff] }
 0x839   : > { %v6587_v39 = vpop.f32.mrf.mxu3  ;;  %7114 = vmatpush.msrb.mxu3 %v6848_v31  ;;  %7077 = vmatpush.msra.mxu1 %v6834_v8  ;;  %v7152_v8 = vld [vmem:[%s12642_s16 + $0x4e8] sm:$0xff] }
 0x83a   : > { %v6594_v22 = vadd.f32 %v6587_v39, %v6545_v14  ;;  %v6841_v39 = vld [vmem:[%s12642_s16 + $0x40] sm:$0xff] }
 0x83b   : > { %7055 = vmatpush.msrb.mxu0 %v6841_v39  ;;  %7115 = vmatpush.msrb.mxu3 %v6844_v21  ;;  %v7170_v39 = vld [vmem:[%s12642_s16 + $0x578] sm:$0xff] }
 0x83c   : > { %v6643_v28 = vadd.f32 %v6636_v0, %v6594_v22  ;;  %v6734_v29 = vpop.f32.mrf.mxu2  ;;  %v6639_v30 = vpop.f32.mrf.mxu0  ;;  %v7166_v21 = vld [vmem:[%s12642_s16 + $0x558] sm:$0xff] }
 0x83d   : > { %v6688_v20 = vpop.f32.mrf.mxu1  ;;  %7056 = vmatpush.msrb.mxu0 %v6837_v2  ;;  %7116 = vmatpush.msrb.mxu3 %v6840_v7  ;;  %v7160_v2 = vld [vmem:[%s12642_s16 + $0x528] sm:$0xff] }
 0x83e   : > { %v6692_v15 = vadd.f32 %v6685_v26, %v6643_v28  ;;  %v7186_v28 = vld [vmem:[%s12642_s16 + $0x5f8] sm:$0xff]  ;;  %v7156_v7 = vld [vmem:[%s12642_s16 + $0x508] sm:$0xff] }
 0x83f   : > { %7057 = vmatpush.msrb.mxu0 %v6833_v55  ;;  %7117 = vmatpush.msrb.mxu3 %v6836_v59  ;;  %v7182_v26 = vld [vmem:[%s12642_s16 + $0x5d8] sm:$0xff]  ;;  %v7151_v55 = vld [vmem:[%s12642_s16 + $0x4e0] sm:$0xff]  ;;  %v7148_v59 = vld [vmem:[%s12642_s16 + $0x4c8] sm:$0xff] }
 0x840   : > { %v6741_v16 = vadd.f32 %v6734_v29, %v6692_v15  ;;  %v7167_v15 = vld [vmem:[%s12642_s16 + $0x560] sm:$0xff]  ;;  %v7164_v29 = vld [vmem:[%s12642_s16 + $0x548] sm:$0xff] }
 0x841   : > { %v6590_v25 = vpop.f32.mrf.mxu3 }
 0x842   : > { %v6595_v10 = vadd.f32 %v6590_v25, %v6546_v60  ;;  %v7178_v60 = vld [vmem:[%s12642_s16 + $0x5b8] sm:$0xff] }
 0x844   : > { %v6644_v53 = vadd.f32 %v6639_v30, %v6595_v10  ;;  %v6737_v6 = vpop.f32.mrf.mxu2  ;;  %v7168_v10 = vld [vmem:[%s12642_s16 + $0x568] sm:$0xff]  ;;  %v7162_v30 = vld [vmem:[%s12642_s16 + $0x538] sm:$0xff] }
 0x846   : > { %v6693_v9 = vadd.f32 %v6688_v20, %v6644_v53  ;;  %v7158_v53 = vld [vmem:[%s12642_s16 + $0x518] sm:$0xff]  ;;  %v7153_v20 = vld [vmem:[%s12642_s16 + $0x4f0] sm:$0xff] }
 0x848   : > { %v6742_v25 = vadd.f32 %v6737_v6, %v6693_v9  ;;  %v7150_v9 = vld [vmem:[%s12642_s16 + $0x4d8] sm:$0xff]  ;;  %v7144_v6 = vld [vmem:[%s12642_s16 + $0x4a8] sm:$0xff] }
 0x849   : > { %v6780_v61 = vpop.f32.mrf.mxu3 }
 0x84a   : > { %v6789_v11 = vadd.f32 %v6780_v61, %v6740_v63  ;;  %v7185_v63 = vld [vmem:[%s12642_s16 + $0x5f0] sm:$0xff]  ;;  %v7175_v61 = vld [vmem:[%s12642_s16 + $0x5a0] sm:$0xff] }
 0x84c   : > { %v6796_v12 = vadd.f32 %v12162_v37, %v6789_v11  ;;  %v7171_v11 = vld [vmem:[%s12642_s16 + $0x580] sm:$0xff] }
 0x84e   : > { %v6799_v19 = vmax.f32 %v6796_v12, 0.0  ;;  %v7169_v12 = vld [vmem:[%s12642_s16 + $0x570] sm:$0xff] }
 0x850   : > { %6802 = vst [vmem:[#allocation3 + $0x18] sm:$0xff] %v6799_v19  ;;  %v7159_v19 = vld [vmem:[%s12642_s16 + $0x520] sm:$0xff] }
 0x851   : > { %v6783_v40 = vpop.f32.mrf.mxu3 }
 0x852   : > { %v6790_v46 = vadd.f32 %v6783_v40, %v6741_v16  ;;  %v7157_v16 = vld [vmem:[%s12642_s16 + $0x510] sm:$0xff]  ;;  %v7154_v40 = vld [vmem:[%s12642_s16 + $0x4f8] sm:$0xff] }
 0x854   : > { %v6797_v23 = vadd.f32 %v12162_v37, %v6790_v46  ;;  %v7149_v46 = vld [vmem:[%s12642_s16 + $0x4d0] sm:$0xff] }
 0x856   : > { %v6800_v56 = vmax.f32 %v6797_v23, 0.0  ;;  %v7143_v23 = vld [vmem:[%s12642_s16 + $0x4a0] sm:$0xff] }
 0x857   : > { %v6805_v34 = vld [vmem:[#allocation3 + $0x18] ss:$2 sm:$0x3]  ;;  %v6806_v43 = vld [vmem:[#allocation3 + $0x19] ss:$2 sm:$0x3] }
 0x858   : > { %6803 = vst [vmem:[#allocation3 + $0x20] sm:$0xff] %v6800_v56  ;;  %v6808_v52 = vld [vmem:[#allocation3 + $0x1d] ss:$2 sm:$0x3]  ;;  %v6811_v47 = vmax.f32 %v6805_v34, %v6806_v43  ;;  %v7145_v56 = vld [vmem:[%s12642_s16 + $0x4b0] sm:$0xff]  ;;  %v7135_v43 = vld [vmem:[%s12642_s16 + $0x460] sm:$0xff] }
 0x859   : > { %v6786_v35 = vpop.f32.mrf.mxu3  ;;  %v7142_v34 = vld [vmem:[%s12642_s16 + $0x498] sm:$0xff] }
 0x85a   : > { %v6791_v18 = vadd.f32 %v6786_v35, %v6742_v25  ;;  %v7146_v25 = vld [vmem:[%s12642_s16 + $0x4b8] sm:$0xff]  ;;  %v7139_v35 = vld [vmem:[%s12642_s16 + $0x480] sm:$0xff] }
 0x85c   : > { %v6798_v14 = vadd.f32 %v12162_v37, %v6791_v18  ;;  %v7179_v37 = vld [vmem:[%s12642_s16 + $0x5c0] sm:$0xff]  ;;  %v7140_v18 = vld [vmem:[%s12642_s16 + $0x488] sm:$0xff] }
 0x85e   : > { %v6801_v48 = vmax.f32 %v6798_v14, 0.0  ;;  %v7141_v14 = vld [vmem:[%s12642_s16 + $0x490] sm:$0xff] }
 0x85f   : > { %v6810_v62 = vld [vmem:[#allocation3 + $0x1e] ss:$2 sm:$0x3]  ;;  %v6817_v4 = vld [vmem:[#allocation3 + $0x22] ss:$2 sm:$0x3] }
 0x860   : > { %6804 = vst [vmem:[#allocation3 + $0x28] sm:$0xf] %v6801_v48  ;;  %v6812_v57 = vmax.f32 %v6808_v52, %v6810_v62  ;;  %v6819_v1 = vld [vmem:[#allocation3 + $0x23] ss:$2 sm:$0x3]  ;;  %v7136_v48 = vld [vmem:[%s12642_s16 + $0x468] sm:$0xff] }
 0x861   : > { %v6824_v32 = vmax.f32 %v6817_v4, %v6819_v1  ;;  %v7137_v52 = vld [vmem:[%s12642_s16 + $0x470] sm:$0xff]  ;;  %v7138_v62 = vld [vmem:[%s12642_s16 + $0x478] sm:$0xff]  ;;  %v7127_v1 = vld [vmem:[%s12642_s16 + $0x420] sm:$0xff] }
 0x862   : > { %v6813_v22 = vmax.f32 %v6811_v47, %v6812_v57  ;;  %v7131_v47 = vld [vmem:[%s12642_s16 + $0x440] sm:$0xff]  ;;  %v7132_v57 = vld [vmem:[%s12642_s16 + $0x448] sm:$0xff]  ;;  %v7134_v4 = vld [vmem:[%s12642_s16 + $0x458] sm:$0xff] }
 0x864   : > { %6814 = vst [vmem:[#allocation2 + $0x18] sm:$0x3] %v6813_v22  ;;  %v7133_v22 = vld [vmem:[%s12642_s16 + $0x450] sm:$0xff] }
 0x867   : > { %v6821_v0 = vld [vmem:[#allocation3 + $0x27] ss:$2 sm:$0x3]  ;;  %v6823_v49 = vld [vmem:[#allocation3 + $0x28] ss:$2 sm:$0x3] }
 0x868   : > { %v6825_v13 = vmax.f32 %v6821_v0, %v6823_v49  ;;  %v7128_v0 = vld [vmem:[%s12642_s16 + $0x428] sm:$0xff]  ;;  %v7129_v49 = vld [vmem:[%s12642_s16 + $0x430] sm:$0xff] }
 0x86a   : > { %v6826_v50 = vmax.f32 %v6824_v32, %v6825_v13  ;;  %v7130_v32 = vld [vmem:[%s12642_s16 + $0x438] sm:$0xff]  ;;  %v7123_v13 = vld [vmem:[%s12642_s16 + $0x400] sm:$0xff] }
 0x86b   : > { %v6897_v45 = vld [vmem:[#allocation2 + $0x19] sm:$0x1]  ;;  %v6832_v31 = vld [vmem:[#allocation2 + $0x18] sm:$0x1] }
 0x86c   : > { %6978 = vmatmul.f32.vlgmr.msra.gmra.mxu0 %v6897_v45  ;;  %6998 = vmatmul.f32.vlgmr.msrb.gmra.mxu1 %v6897_v45  ;;  %6827 = vst [vmem:[#allocation2 + $0x1b] sm:$0x3] %v6826_v50 }
 0x86d   : > { %7018 = vmatmul.f32.vlgmr.msra.gmra.mxu2 %v6897_v45  ;;  %7038 = vmatmul.f32.vlgmr.msra.gmra.mxu3 %v6897_v45  ;;  %v7124_v45 = vld [vmem:[%s12642_s16 + $0x408] sm:$0xff] }
 0x86e   : > { %7187 = vmatpush.msra.mxu0 %v7183_v42  ;;  %7207 = vmatpush.msrb.mxu1 %v7184_v33  ;;  %v7125_v42 = vld [vmem:[%s12642_s16 + $0x410] sm:$0xff]  ;;  %v7126_v33 = vld [vmem:[%s12642_s16 + $0x418] sm:$0xff] }
 0x86f   : > { %7227 = vmatpush.msra.mxu2 %v7185_v63  ;;  %7247 = vmatpush.msra.mxu3 %v7186_v28  ;;  %v7332_v63 = vld [vmem:[%s12642_s16 + $0x7e0] sm:$0xff]  ;;  %v7333_v28 = vld [vmem:[%s12642_s16 + $0x7e8] sm:$0xff] }
 0x870   : > { %7188 = vmatpush.msra.mxu0 %v7179_v37  ;;  %7208 = vmatpush.msrb.mxu1 %v7180_v38  ;;  %v7334_v37 = vld [vmem:[%s12642_s16 + $0x7f0] sm:$0xff]  ;;  %v7335_v38 = vld [vmem:[%s12642_s16 + $0x7f8] sm:$0xff] }
 0x871   : > { %7228 = vmatpush.msra.mxu2 %v7181_v5  ;;  %7248 = vmatpush.msra.mxu3 %v7182_v26  ;;  %v7328_v5 = vld [vmem:[%s12642_s16 + $0x7c0] sm:$0xff]  ;;  %v7329_v26 = vld [vmem:[%s12642_s16 + $0x7c8] sm:$0xff] }
 0x872   : > { %7189 = vmatpush.msra.mxu0 %v7175_v61  ;;  %7209 = vmatpush.msrb.mxu1 %v7176_v3  ;;  %v7330_v61 = vld [vmem:[%s12642_s16 + $0x7d0] sm:$0xff]  ;;  %v7331_v3 = vld [vmem:[%s12642_s16 + $0x7d8] sm:$0xff] }
 0x873   : > { %7229 = vmatpush.msra.mxu2 %v7177_v41  ;;  %7249 = vmatpush.msra.mxu3 %v7178_v60  ;;  %v7122_v50 = vld [vmem:[#allocation2 + $0x1b] sm:$0x1]  ;;  %v7324_v41 = vld [vmem:[%s12642_s16 + $0x7a0] sm:$0xff]  ;;  %v7325_v60 = vld [vmem:[%s12642_s16 + $0x7a8] sm:$0xff] }
 0x874   : > { %7190 = vmatpush.msra.mxu0 %v7171_v11  ;;  %7210 = vmatpush.msrb.mxu1 %v7172_v17  ;;  %v7326_v11 = vld [vmem:[%s12642_s16 + $0x7b0] sm:$0xff]  ;;  %v7327_v17 = vld [vmem:[%s12642_s16 + $0x7b8] sm:$0xff] }
 0x875   : > { %7230 = vmatpush.msra.mxu2 %v7173_v24  ;;  %7250 = vmatpush.msra.mxu3 %v7174_v44  ;;  %v7320_v24 = vld [vmem:[%s12642_s16 + $0x780] sm:$0xff]  ;;  %v7321_v44 = vld [vmem:[%s12642_s16 + $0x788] sm:$0xff] }
 0x876   : > { %7058 = vmatmul.f32.vlgmr.msrb.gmra.mxu0 %v6832_v31  ;;  %7078 = vmatmul.f32.vlgmr.msra.gmra.mxu1 %v6832_v31 }
 0x877   : > { %7098 = vmatmul.f32.vlgmr.msrb.gmra.mxu2 %v6832_v31  ;;  %7118 = vmatmul.f32.vlgmr.msrb.gmra.mxu3 %v6832_v31  ;;  %v7322_v31 = vld [vmem:[%s12642_s16 + $0x790] sm:$0xff] }
 0x878   : > { %7191 = vmatpush.msra.mxu0 %v7167_v15  ;;  %7211 = vmatpush.msrb.mxu1 %v7168_v10  ;;  %v7323_v15 = vld [vmem:[%s12642_s16 + $0x798] sm:$0xff]  ;;  %v7316_v10 = vld [vmem:[%s12642_s16 + $0x760] sm:$0xff] }
 0x879   : > { %7231 = vmatpush.msra.mxu2 %v7169_v12  ;;  %7251 = vmatpush.msra.mxu3 %v7170_v39  ;;  %v7317_v12 = vld [vmem:[%s12642_s16 + $0x768] sm:$0xff]  ;;  %v7318_v39 = vld [vmem:[%s12642_s16 + $0x770] sm:$0xff] }
 0x87a   : > { %7192 = vmatpush.msra.mxu0 %v7163_v36  ;;  %7212 = vmatpush.msrb.mxu1 %v7164_v29  ;;  %v7319_v36 = vld [vmem:[%s12642_s16 + $0x778] sm:$0xff]  ;;  %v7312_v29 = vld [vmem:[%s12642_s16 + $0x740] sm:$0xff] }
 0x87b   : > { %7232 = vmatpush.msra.mxu2 %v7165_v58  ;;  %7252 = vmatpush.msra.mxu3 %v7166_v21  ;;  %v7313_v58 = vld [vmem:[%s12642_s16 + $0x748] sm:$0xff]  ;;  %v7314_v21 = vld [vmem:[%s12642_s16 + $0x750] sm:$0xff] }
 0x87c   : > { %7193 = vmatpush.msra.mxu0 %v7159_v19  ;;  %7213 = vmatpush.msrb.mxu1 %v7160_v2  ;;  %v7315_v19 = vld [vmem:[%s12642_s16 + $0x758] sm:$0xff]  ;;  %v7308_v2 = vld [vmem:[%s12642_s16 + $0x720] sm:$0xff] }
 0x87d   : > { %7233 = vmatpush.msra.mxu2 %v7161_v27  ;;  %7253 = vmatpush.msra.mxu3 %v7162_v30  ;;  %v7309_v27 = vld [vmem:[%s12642_s16 + $0x728] sm:$0xff]  ;;  %v7310_v30 = vld [vmem:[%s12642_s16 + $0x730] sm:$0xff] }
 0x87e   : > { %7194 = vmatpush.msra.mxu0 %v7155_v51  ;;  %7214 = vmatpush.msrb.mxu1 %v7156_v7  ;;  %v7311_v51 = vld [vmem:[%s12642_s16 + $0x738] sm:$0xff]  ;;  %v7304_v7 = vld [vmem:[%s12642_s16 + $0x700] sm:$0xff] }
 0x87f   : > { %7234 = vmatpush.msra.mxu2 %v7157_v16  ;;  %7254 = vmatpush.msra.mxu3 %v7158_v53  ;;  %v7305_v16 = vld [vmem:[%s12642_s16 + $0x708] sm:$0xff]  ;;  %v7306_v53 = vld [vmem:[%s12642_s16 + $0x710] sm:$0xff] }
 0x880   : > { %7195 = vmatpush.msra.mxu0 %v7151_v55  ;;  %7215 = vmatpush.msrb.mxu1 %v7152_v8  ;;  %v7307_v55 = vld [vmem:[%s12642_s16 + $0x718] sm:$0xff]  ;;  %v7300_v8 = vld [vmem:[%s12642_s16 + $0x6e0] sm:$0xff] }
 0x881   : > { %7235 = vmatpush.msra.mxu2 %v7153_v20  ;;  %7255 = vmatpush.msra.mxu3 %v7154_v40  ;;  %v7301_v20 = vld [vmem:[%s12642_s16 + $0x6e8] sm:$0xff]  ;;  %v7302_v40 = vld [vmem:[%s12642_s16 + $0x6f0] sm:$0xff] }
 0x882   : > { %7196 = vmatpush.msra.mxu0 %v7147_v54  ;;  %7216 = vmatpush.msrb.mxu1 %v7148_v59  ;;  %v7303_v54 = vld [vmem:[%s12642_s16 + $0x6f8] sm:$0xff]  ;;  %v7296_v59 = vld [vmem:[%s12642_s16 + $0x6c0] sm:$0xff] }
 0x883   : > { %7236 = vmatpush.msra.mxu2 %v7149_v46  ;;  %7256 = vmatpush.msra.mxu3 %v7150_v9  ;;  %v7297_v46 = vld [vmem:[%s12642_s16 + $0x6c8] sm:$0xff]  ;;  %v7298_v9 = vld [vmem:[%s12642_s16 + $0x6d0] sm:$0xff] }
 0x884   : > { %7197 = vmatpush.msra.mxu0 %v7143_v23  ;;  %7217 = vmatpush.msrb.mxu1 %v7144_v6  ;;  %v7299_v23 = vld [vmem:[%s12642_s16 + $0x6d8] sm:$0xff]  ;;  %v7292_v6 = vld [vmem:[%s12642_s16 + $0x6a0] sm:$0xff] }
 0x885   : > { %7237 = vmatpush.msra.mxu2 %v7145_v56  ;;  %7257 = vmatpush.msra.mxu3 %v7146_v25  ;;  %v7293_v56 = vld [vmem:[%s12642_s16 + $0x6a8] sm:$0xff]  ;;  %v7294_v25 = vld [vmem:[%s12642_s16 + $0x6b0] sm:$0xff] }
 0x886   : > { %7198 = vmatpush.msra.mxu0 %v7139_v35  ;;  %7218 = vmatpush.msrb.mxu1 %v7140_v18  ;;  %v7295_v35 = vld [vmem:[%s12642_s16 + $0x6b8] sm:$0xff]  ;;  %v7288_v18 = vld [vmem:[%s12642_s16 + $0x680] sm:$0xff] }
 0x887   : > { %7238 = vmatpush.msra.mxu2 %v7141_v14  ;;  %7258 = vmatpush.msra.mxu3 %v7142_v34  ;;  %v7289_v14 = vld [vmem:[%s12642_s16 + $0x688] sm:$0xff]  ;;  %v7290_v34 = vld [vmem:[%s12642_s16 + $0x690] sm:$0xff] }
 0x888   : > { %7199 = vmatpush.msra.mxu0 %v7135_v43  ;;  %7219 = vmatpush.msrb.mxu1 %v7136_v48  ;;  %v7291_v43 = vld [vmem:[%s12642_s16 + $0x698] sm:$0xff]  ;;  %v7284_v48 = vld [vmem:[%s12642_s16 + $0x660] sm:$0xff] }
 0x889   : > { %7239 = vmatpush.msra.mxu2 %v7137_v52  ;;  %7259 = vmatpush.msra.mxu3 %v7138_v62  ;;  %v7285_v52 = vld [vmem:[%s12642_s16 + $0x668] sm:$0xff]  ;;  %v7286_v62 = vld [vmem:[%s12642_s16 + $0x670] sm:$0xff] }
 0x88a   : > { %7200 = vmatpush.msra.mxu0 %v7131_v47  ;;  %7220 = vmatpush.msrb.mxu1 %v7132_v57  ;;  %v7287_v47 = vld [vmem:[%s12642_s16 + $0x678] sm:$0xff]  ;;  %v7280_v57 = vld [vmem:[%s12642_s16 + $0x640] sm:$0xff] }
 0x88b   : > { %7240 = vmatpush.msra.mxu2 %v7133_v22  ;;  %7260 = vmatpush.msra.mxu3 %v7134_v4  ;;  %v7281_v22 = vld [vmem:[%s12642_s16 + $0x648] sm:$0xff]  ;;  %v7282_v4 = vld [vmem:[%s12642_s16 + $0x650] sm:$0xff] }
 0x88c   : > { %7201 = vmatpush.msra.mxu0 %v7127_v1  ;;  %7221 = vmatpush.msrb.mxu1 %v7128_v0  ;;  %v7283_v1 = vld [vmem:[%s12642_s16 + $0x658] sm:$0xff]  ;;  %v7276_v0 = vld [vmem:[%s12642_s16 + $0x620] sm:$0xff] }
 0x88d   : > { %7241 = vmatpush.msra.mxu2 %v7129_v49  ;;  %7261 = vmatpush.msra.mxu3 %v7130_v32  ;;  %v7277_v49 = vld [vmem:[%s12642_s16 + $0x628] sm:$0xff]  ;;  %v7278_v32 = vld [vmem:[%s12642_s16 + $0x630] sm:$0xff] }
 0x88e   : > { %7202 = vmatpush.msra.mxu0 %v7123_v13  ;;  %7222 = vmatpush.msrb.mxu1 %v7124_v45  ;;  %v7279_v13 = vld [vmem:[%s12642_s16 + $0x638] sm:$0xff]  ;;  %v7272_v45 = vld [vmem:[%s12642_s16 + $0x600] sm:$0xff] }
 0x88f   : > { %7242 = vmatpush.msra.mxu2 %v7125_v42  ;;  %7262 = vmatpush.msra.mxu3 %v7126_v33  ;;  %v7273_v42 = vld [vmem:[%s12642_s16 + $0x608] sm:$0xff]  ;;  %v7274_v33 = vld [vmem:[%s12642_s16 + $0x610] sm:$0xff] }
 0x890   : > { %7203 = vmatmul.f32.vlgmr.msra.gmra.mxu0 %v7122_v50  ;;  %7223 = vmatmul.f32.vlgmr.msrb.gmra.mxu1 %v7122_v50 }
 0x891   : > { %7243 = vmatmul.f32.vlgmr.msra.gmra.mxu2 %v7122_v50  ;;  %7263 = vmatmul.f32.vlgmr.msra.gmra.mxu3 %v7122_v50  ;;  %v7275_v50 = vld [vmem:[%s12642_s16 + $0x618] sm:$0xff] }
 0x892   : > { %7336 = vmatpush.msrb.mxu0 %v7332_v63  ;;  %7356 = vmatpush.msra.mxu1 %v7333_v28  ;;  %v7271_v63 = vld [vmem:[#allocation2 + $0x1c] sm:$0x1] }
 0x893   : > { %7376 = vmatpush.msrb.mxu2 %v7334_v37  ;;  %7396 = vmatpush.msrb.mxu3 %v7335_v38 }
 0x894   : > { %7337 = vmatpush.msrb.mxu0 %v7328_v5  ;;  %7357 = vmatpush.msra.mxu1 %v7329_v26 }
 0x895   : > { %7377 = vmatpush.msrb.mxu2 %v7330_v61  ;;  %7397 = vmatpush.msrb.mxu3 %v7331_v3 }
 0x896   : > { %7338 = vmatpush.msrb.mxu0 %v7324_v41  ;;  %7358 = vmatpush.msra.mxu1 %v7325_v60 }
 0x897   : > { %7378 = vmatpush.msrb.mxu2 %v7326_v11  ;;  %7398 = vmatpush.msrb.mxu3 %v7327_v17  ;;  %v7420_v17 = vld [vmem:[%s12643_s17] sm:$0xf] }
 0x898   : > { %7339 = vmatpush.msrb.mxu0 %v7320_v24  ;;  %7359 = vmatpush.msra.mxu1 %v7321_v44 }
 0x899   : > { %7379 = vmatpush.msrb.mxu2 %v7322_v31  ;;  %7399 = vmatpush.msrb.mxu3 %v7323_v15 }
 0x89a   : > { %7340 = vmatpush.msrb.mxu0 %v7316_v10  ;;  %7360 = vmatpush.msra.mxu1 %v7317_v12 }
 0x89b   : > { %7380 = vmatpush.msrb.mxu2 %v7318_v39  ;;  %7400 = vmatpush.msrb.mxu3 %v7319_v36  ;;  %v7422_v39 = vperm.slane %v7420_v17, 0  ;;  %v7423_v36 = vperm.slane %v7420_v17, 1 }
 0x89c   : > { %7341 = vmatpush.msrb.mxu0 %v7312_v29  ;;  %7361 = vmatpush.msra.mxu1 %v7313_v58 }
 0x89d   : > { %7381 = vmatpush.msrb.mxu2 %v7314_v21  ;;  %7401 = vmatpush.msrb.mxu3 %v7315_v19  ;;  %v7438_v19 = vld [vmem:[%s12644_s18] sm:$0xf] }
 0x89e   : > { %7342 = vmatpush.msrb.mxu0 %v7308_v2  ;;  %7362 = vmatpush.msra.mxu1 %v7309_v27 }
 0x89f   : > { %7382 = vmatpush.msrb.mxu2 %v7310_v30  ;;  %7402 = vmatpush.msrb.mxu3 %v7311_v51 }
 0x8a0   : > { %7343 = vmatpush.msrb.mxu0 %v7304_v7  ;;  %7363 = vmatpush.msra.mxu1 %v7305_v16  ;;  %v7440_v16 = vperm.slane %v7438_v19, 0 }
 0x8a1   : > { %7383 = vmatpush.msrb.mxu2 %v7306_v53  ;;  %7403 = vmatpush.msrb.mxu3 %v7307_v55  ;;  %v7441_v53 = vperm.slane %v7438_v19, 1 }
 0x8a2   : > { %7344 = vmatpush.msrb.mxu0 %v7300_v8  ;;  %7364 = vmatpush.msra.mxu1 %v7301_v20 }
 0x8a3   : > { %7384 = vmatpush.msrb.mxu2 %v7302_v40  ;;  %7404 = vmatpush.msrb.mxu3 %v7303_v54  ;;  %v7424_v54 = vperm.slane %v7420_v17, 2 }
 0x8a4   : > { %7345 = vmatpush.msrb.mxu0 %v7296_v59  ;;  %7365 = vmatpush.msra.mxu1 %v7297_v46  ;;  %v7425_v59 = vperm.slane %v7420_v17, 3 }
 0x8a5   : > { %7385 = vmatpush.msrb.mxu2 %v7298_v9  ;;  %7405 = vmatpush.msrb.mxu3 %v7299_v23 }
 0x8a6   : > { %7346 = vmatpush.msrb.mxu0 %v7292_v6  ;;  %7366 = vmatpush.msra.mxu1 %v7293_v56 }
 0x8a7   : > { %7386 = vmatpush.msrb.mxu2 %v7294_v25  ;;  %7406 = vmatpush.msrb.mxu3 %v7295_v35 }
 0x8a8   : > { %7347 = vmatpush.msrb.mxu0 %v7288_v18  ;;  %7367 = vmatpush.msra.mxu1 %v7289_v14  ;;  %v7442_v18 = vperm.slane %v7438_v19, 2 }
 0x8a9   : > { %7387 = vmatpush.msrb.mxu2 %v7290_v34  ;;  %7407 = vmatpush.msrb.mxu3 %v7291_v43  ;;  %v7443_v34 = vperm.slane %v7438_v19, 3 }
 0x8aa   : > { %7348 = vmatpush.msrb.mxu0 %v7284_v48  ;;  %7368 = vmatpush.msra.mxu1 %v7285_v52 }
 0x8ab   : > { %7388 = vmatpush.msrb.mxu2 %v7286_v62  ;;  %7408 = vmatpush.msrb.mxu3 %v7287_v47 }
 0x8ac   : > { %7349 = vmatpush.msrb.mxu0 %v7280_v57  ;;  %7369 = vmatpush.msra.mxu1 %v7281_v22 }
 0x8ad   : > { %7389 = vmatpush.msrb.mxu2 %v7282_v4  ;;  %7409 = vmatpush.msrb.mxu3 %v7283_v1 }
 0x8ae   : > { %7350 = vmatpush.msrb.mxu0 %v7276_v0  ;;  %7370 = vmatpush.msra.mxu1 %v7277_v49 }
 0x8af   : > { %7390 = vmatpush.msrb.mxu2 %v7278_v32  ;;  %7410 = vmatpush.msrb.mxu3 %v7279_v13  ;;  %v7462_v32 = vld [vmem:[#allocation4] sm:$0x1] }
 0x8b0   : > { %7351 = vmatpush.msrb.mxu0 %v7272_v45  ;;  %7371 = vmatpush.msra.mxu1 %v7273_v42 }
 0x8b1   : > { %7391 = vmatpush.msrb.mxu2 %v7274_v33  ;;  %7411 = vmatpush.msrb.mxu3 %v7275_v50 }
 0x8b2   : > { %7352 = vmatmul.f32.vlgmr.msrb.gmra.mxu0 %v7271_v63  ;;  %7372 = vmatmul.f32.vlgmr.msra.gmra.mxu1 %v7271_v63 }
 0x8b3   : > { %7392 = vmatmul.f32.vlgmr.msrb.gmra.mxu2 %v7271_v63  ;;  %7412 = vmatmul.f32.vlgmr.msrb.gmra.mxu3 %v7271_v63 }
 0x8e9   : > { %v6979_v28 = vpop.f32.mrf.mxu0  ;;  %v6999_v37 = vpop.f32.mrf.mxu1 }
 0x8f0   : > { %v7019_v38 = vpop.f32.mrf.mxu2  ;;  %v7039_v5 = vpop.f32.mrf.mxu3 }
 0x8f3   : > { %v7059_v26 = vpop.f32.mrf.mxu0  ;;  %v7079_v61 = vpop.f32.mrf.mxu1 }
 0x8f4   : > { %v7060_v24 = vadd.f32 %v7059_v26, %v6979_v28  ;;  %v7080_v44 = vadd.f32 %v7079_v61, %v6999_v37 }
 0x8fa   : > { %v7099_v3 = vpop.f32.mrf.mxu2  ;;  %v7119_v41 = vpop.f32.mrf.mxu3 }
 0x8fb   : > { %v7100_v51 = vadd.f32 %v7099_v3, %v7019_v38  ;;  %v7120_v7 = vadd.f32 %v7119_v41, %v7039_v5 }
 0x90d   : > { %v7204_v60 = vpop.f32.mrf.mxu0  ;;  %v7224_v11 = vpop.f32.mrf.mxu1 }
 0x90e   : > { %v7267_v31 = vadd.f32 %v7204_v60, %v7060_v24  ;;  %v7268_v15 = vadd.f32 %v7224_v11, %v7080_v44 }
 0x914   : > { %v7244_v10 = vpop.f32.mrf.mxu2  ;;  %v7264_v12 = vpop.f32.mrf.mxu3 }
 0x915   : > { %v7269_v20 = vadd.f32 %v7244_v10, %v7100_v51  ;;  %v7270_v40 = vadd.f32 %v7264_v12, %v7120_v7 }
 0x92f   : > { %v7353_v29 = vpop.f32.mrf.mxu0  ;;  %v7373_v58 = vpop.f32.mrf.mxu1 }
 0x930   : > { %v7416_v21 = vadd.f32 %v7353_v29, %v7267_v31  ;;  %v7417_v2 = vadd.f32 %v7373_v58, %v7268_v15 }
 0x932   : > { %v7430_v27 = vadd.f32 %v7422_v39, %v7416_v21  ;;  %v7431_v30 = vadd.f32 %v7423_v36, %v7417_v2 }
 0x934   : > { %v7434_v55 = vmax.f32 %v7430_v27, 0.0  ;;  %v7435_v8 = vmax.f32 %v7431_v30, 0.0 }
 0x936   : > { %v7393_v46 = vpop.f32.mrf.mxu2  ;;  %v7413_v9 = vpop.f32.mrf.mxu3  ;;  %v7448_v23 = vmul.f32 %v7440_v16, %v7434_v55  ;;  %v7449_v6 = vmul.f32 %v7441_v53, %v7435_v8 }
 0x937   : > { %v7418_v56 = vadd.f32 %v7393_v46, %v7269_v20  ;;  %v7419_v25 = vadd.f32 %v7413_v9, %v7270_v40 }
 0x938   : > { %v7453_v52 = vsel %vm7452_vm4, %v7448_v23, 0.0  ;;  %v7454_v62 = vsel %vm7452_vm4, %v7449_v6, 0.0 }
 0x939   : > { %v7432_v35 = vadd.f32 %v7424_v54, %v7418_v56  ;;  %v7433_v14 = vadd.f32 %v7425_v59, %v7419_v25  ;;  %v7455_v22 = vadd.f32 %v7454_v62, %v7453_v52 }
 0x93b   : > { %v7436_v43 = vmax.f32 %v7432_v35, 0.0  ;;  %v7437_v48 = vmax.f32 %v7433_v14, 0.0 }
 0x93d   : > { %v7450_v47 = vmul.f32 %v7442_v18, %v7436_v43  ;;  %v7451_v57 = vmul.f32 %v7443_v34, %v7437_v48 }
 0x93f   : > { %v7456_v4 = vsel %vm7452_vm4, %v7450_v47, 0.0  ;;  %v7458_v0 = vsel %vm7452_vm4, %v7451_v57, 0.0 }
 0x940   : > { %v7457_v1 = vadd.f32 %v7456_v4, %v7455_v22 }
 0x942   : > { %v7459_v49 = vadd.f32 %v7458_v0, %v7457_v1 }
 0x944   : > { %7460 = vadd.xlane.f32.xlu1 %v7459_v49 }
 0x9b7   : > { %v7461_v13 = vpop.xlane.xlu1 %7460 }
 0x9b8   : > { %v7463_v45 = vadd.f32 %v7462_v32, %v7461_v13 }
 0x9ba   : > { %v7464_v42 = vsub.f32 0.0, %v7463_v45 }
 0x9bc   : > { %v7465_v33 = vmul.f32 1.442695, %v7464_v42 }
 0x9be   : > { %8417 = vpow2.f32 %v7465_v33 }
 0x9c4   : > { %v8418_v50 = vpop.eup %8417 }
 0x9c5   : > { %v7467_v63 = vadd.f32 1.0, %v8418_v50 }
 0x9c7   : > { %8419 = vrcp.f32 %v7467_v63  ;;  %v7479_v5 = vand.u32 2147483648, %v7467_v63  ;;  %v7477_v61 = vand.u32 2147483647, %v7467_v63  ;;  %vm7473_vm6 = vweird.f32 %v7467_v63 }
 0x9c9   : > { %v7480_v41 = vor.u32 1.1754944e-38, %v7479_v5  ;;  %vm7478_vm8 = vcmp.eq.f32.partialorder %v7477_v61, 8.507059e+37 }
 0x9cd   : > { %v8420_v28 = vpop.eup %8419 }
 0x9ce   : > { %v7469_v37 = vmul.f32 %v8420_v28, %v7467_v63  ;;  %vm7474_vm5 = vweird.f32 %v8420_v28 }
 0x9cf   : > { %vm7475_vm7 = vmor %vm7473_vm6, %vm7474_vm5 }
 0x9d0   : > { %v7470_v38 = vsub.f32 1.0, %v7469_v37 }
 0x9d2   : > { %v7471_v26 = vmul.f32 %v8420_v28, %v7470_v38 }
 0x9d4   : > { %v7472_v3 = vadd.f32 %v8420_v28, %v7471_v26 }
 0x9d6   : > { %v7476_v60 = vsel %vm7475_vm7, %v8420_v28, %v7472_v3 }
 0x9d7   : > { %v7481_v11 = vsel %vm7478_vm8, %v7480_v41, %v7476_v60 }
 0x9d8   : > { %7485 = vperm.xlu2 %8410, %v7481_v11  }
 0xa32   : > { %v7486_v17 = vpop.permute.xlu2 %7485 }
 0xa33   : > { %7488 = vst [vmem:[%s629_s28] sm:$0x1] %v7486_v17 }
 0xa34 PF: > { %s32_s23 = sadd.s32 1, %s8435_s23  }
 0xa35   : > { %p29_p5 = scmp.ge.s32.totalorder %s32_s23, 4  }
 0xa37   :  { %31 = sbr.rel (!%p29_p5) target bundleno = 6 (0x6), region = 224 }

</bundles_post_ra>
